<compile_context>
chip_gen: v5e
topology: v5e:2x2
jax: 0.10.0
libtpu: 0.0.40
codegen_flags: <defaults>
</compile_context>

<pallas_src>
import functools

import jax
import jax.numpy as jnp
from jax.experimental import pallas as pl
from jax.experimental.pallas import tpu as pltpu


KS = (7, 5, 3, 7, 5, 3)        # kernel sizes of the 6 depthwise conv layers
ST = (2, 1, 2, 2, 1, 2)        # H strides (W stride is always 1, padding=1)
_BN_EPS = 1e-5
_PCONV_IN, _PCONV_OUT = 218, 32


# ---------------------------------------------------------------------------
# Static geometry (shared by fold_params and the forward wrapper)
# ---------------------------------------------------------------------------
def _geometry(h, w):
  """Per-layer static shapes: (ks, stride_h, h_in, w_in, ho, wo)."""
  layers = []
  hh, ww = h, w
  for i, (ks, s) in enumerate(zip(KS, ST)):
    ho = (hh + 2 - ks) // s + 1
    wo = ww + 2 - ks + 1
    layers.append((ks, s, hh, ww, ho, wo))
    hh, ww = ho, wo
    if i == 2:                      # pointwise Conv1d remaps the W axis to 32
      ww = _PCONV_OUT
  return layers, hh, ww


# ---------------------------------------------------------------------------
# In-kernel helper: depthwise conv + eval BN + ReLU as banded MXU matmuls
# ---------------------------------------------------------------------------
def _conv_bn_relu(get_slab, a_ref, shift, *, ks, ho, wo):
  """ks x ks depthwise conv (H stride/pad/BN-scale folded into a_ref) + ReLU.

  get_slab(c0, n): (h_in, n) slab of this layer's (unpadded) input, columns
    c0 .. c0+n-1, already in the matmul operand dtype.
  a_ref: (ks, ho, h_in) fold-time band matrices, a_ref[dj][i, r] = scaled tap
    w[r + 1 - stride*i, dj] (zero outside the kernel support).
  W padding is handled here: interior tap columns are plain slabs; the two
  boundary columns only see the zero pad in their first / last output column,
  which is re-inserted with a lane concat of a zero column.
  """
  acc = None
  for dj in range(1, ks - 1):                       # interior tap columns
    t = jnp.dot(a_ref[dj], get_slab(dj - 1, wo),
                preferred_element_type=jnp.float32)
    acc = t if acc is None else acc + t

  zcol = jnp.zeros((ho, 1), jnp.float32)
  # dj = 0 : output column 0 only sees the (zero) left pad.
  p = jnp.dot(a_ref[0], get_slab(0, wo - 1), preferred_element_type=jnp.float32)
  acc = acc + jnp.concatenate([zcol, p], axis=1)
  # dj = ks-1 : output column wo-1 only sees the (zero) right pad.
  q = jnp.dot(a_ref[ks - 1], get_slab(ks - 2, wo - 1),
              preferred_element_type=jnp.float32)
  acc = acc + jnp.concatenate([q, zcol], axis=1)

  return jnp.maximum(acc + shift, 0.0)              # fused eval-BN shift + ReLU


# ---------------------------------------------------------------------------
# Fused SepConv forward for one grid step (block_b batch elements)
# ---------------------------------------------------------------------------
def _sepconv_kernel(x_ref, shift_ref, a0, a1, a2, a3, a4, a5,
                    pw_ref, pb_ref, fw_ref, fb_ref,
                    o_ref, buf1, buf2, flat_ref, *, geom, block_b, cdt):
  a_refs = (a0, a1, a2, a3, a4, a5)

  for e in range(block_b):                          # static unroll
    # --- dconv1 layer 0 (7x7, stride 2): slabs straight from the input ----
    ks, _, _, _, ho, wo = geom[0]
    y = _conv_bn_relu(
        lambda c0, n, e=e: x_ref[e, :, c0:c0 + n].astype(cdt),
        a_refs[0], shift_ref[0], ks=ks, ho=ho, wo=wo)
    buf1[...] = y.astype(cdt)                       # aligned, full-coverage store

    # --- layer 1 (5x5, stride 1) ------------------------------------------
    ks, _, _, _, ho, wo = geom[1]
    y = _conv_bn_relu(lambda c0, n: buf1[:, c0:c0 + n],
                      a_refs[1], shift_ref[1], ks=ks, ho=ho, wo=wo)
    buf2[...] = y.astype(cdt)

    # --- layer 2 (3x3, stride 2) ------------------------------------------
    ks, _, _, _, ho, wo = geom[2]
    y = _conv_bn_relu(lambda c0, n: buf2[:, c0:c0 + n],
                      a_refs[2], shift_ref[2], ks=ks, ho=ho, wo=wo)

    # --- pointwise Conv1d(218 -> 32) == per-row matmul on the MXU ----------
    z = (jnp.dot(y, pw_ref[...], preferred_element_type=jnp.float32)
         + pb_ref[...])

    # --- dconv2 (layers 3..5): maps are tiny, keep them in registers -------
    cur = z.astype(cdt)
    for li in range(3, 6):
      ks, _, _, _, ho, wo = geom[li]
      y = _conv_bn_relu(lambda c0, n, s=cur: s[:, c0:c0 + n],
                        a_refs[li], shift_ref[li], ks=ks, ho=ho, wo=wo)
      cur = y.astype(cdt) if li < 5 else y          # keep the last map in f32

    # --- Flatten (row-major, == nn.Flatten) + final Linear on the MXU ------
    _, _, _, _, fho, fwo = geom[5]
    for i in range(fho):
      flat_ref[:, i * fwo:(i + 1) * fwo] = cur[i:i + 1, :]
    o_ref[e] = (jnp.dot(flat_ref[...], fw_ref[...],
                        preferred_element_type=jnp.float32) + fb_ref[...])


# ---------------------------------------------------------------------------
# One-time parameter folding (hoisted out of the forward path)
# ---------------------------------------------------------------------------
def _band_matrices(w_eff, h_in, ho, stride):
  """(ks, ho, h_in) band matrices folding taps, H stride and H padding."""
  ks = w_eff.shape[0]
  di = (jnp.arange(h_in)[None, :] + 1) - stride * jnp.arange(ho)[:, None]
  valid = (di >= 0) & (di < ks)
  taps = w_eff[jnp.clip(di, 0, ks - 1), :]            # (ho, h_in, ks)
  a = jnp.where(valid[:, :, None], taps, 0.0)
  return jnp.transpose(a, (2, 0, 1))                  # (ks, ho, h_in)


def fold_params(params, input_hw=(224, 224), conv_dtype=jnp.bfloat16):
  """Fold BN, channel-sum and conv geometry into MXU-ready band matrices."""
  h, w = input_hw
  geom, fh, fw_sp = _geometry(h, w)
  assert geom[2][5] == _PCONV_IN, "input W incompatible with pconv(218, ...)"
  assert fh * fw_sp == params["fc_w"].shape[0], "input H incompatible with fc"

  convs = list(params["d1_w"]) + list(params["d2_w"])
  bns = list(params["d1_bn"]) + list(params["d2_bn"])
  a_mats, shifts = [], []
  for (ks, s, h_in, _, ho, _), cw, bn in zip(geom, convs, bns):
    gamma = jnp.reshape(jnp.asarray(bn["gamma"], jnp.float32), ())
    beta = jnp.reshape(jnp.asarray(bn["beta"], jnp.float32), ())
    mean = jnp.reshape(jnp.asarray(bn["mean"], jnp.float32), ())
    var = jnp.reshape(jnp.asarray(bn["var"], jnp.float32), ())
    scale = gamma / jnp.sqrt(var + _BN_EPS)
    shifts.append(beta - mean * scale)
    # channel-sum (exact: linear conv, bias=False, scalar BN after the sum)
    w_eff = jnp.sum(cw.astype(jnp.float32), axis=0) * scale        # (ks, ks)
    a_mats.append(_band_matrices(w_eff, h_in, ho, s).astype(conv_dtype))

  return {
      "a_mats": a_mats,                                            # 6 x (ks,ho,h_in)
      "shifts": jnp.stack(shifts).astype(jnp.float32),             # (6,) SMEM
      "pconv_w": params["pconv_w"].astype(jnp.float32),            # (218, 32)
      "pconv_b": params["pconv_b"].reshape(1, -1).astype(jnp.float32),
      "fc_w": params["fc_w"].astype(jnp.float32),                  # (312, 9)
      "fc_b": params["fc_b"].reshape(1, -1).astype(jnp.float32),
  }


# ---------------------------------------------------------------------------
# Forward: one fused pallas_call over the batch
# ---------------------------------------------------------------------------
def sepconv_forward(kp, x, *, block_b=1):
  """x: (B, 1, H, W) float32 -> (B, num_classes). kp: folded params."""
  b, c, h, w = x.shape
  assert c == 1, "SepConv takes a single input channel"
  assert b % block_b == 0, "batch must be divisible by block_b"
  xs = x[:, 0].astype(jnp.float32)                       # (B, H, W)

  geom, fh, fw_sp = _geometry(h, w)
  assert geom[2][5] == kp["pconv_w"].shape[0]
  flat_dim = fh * fw_sp
  assert flat_dim == kp["fc_w"].shape[0]
  n_cls = kp["fc_w"].shape[1]
  cdt = kp["a_mats"][0].dtype

  conv_flops = sum(2 * ks * ho * hi * wo for (ks, _, hi, _, ho, wo) in geom)
  mm_flops = (2 * geom[2][4] * kp["pconv_w"].shape[0] * kp["pconv_w"].shape[1]
              + 2 * flat_dim * n_cls)
  bytes_acc = (4 * xs.size + 4 * b * n_cls
               + sum(a.size * a.dtype.itemsize for a in kp["a_mats"])
               + 4 * (kp["shifts"].size + kp["pconv_w"].size
                      + kp["pconv_b"].size + kp["fc_w"].size + kp["fc_b"].size))

  kernel = functools.partial(_sepconv_kernel, geom=tuple(geom),
                             block_b=block_b, cdt=cdt)

  out = pl.pallas_call(
      kernel,
      out_shape=jax.ShapeDtypeStruct((b, 1, n_cls), jnp.float32),
      grid=(b // block_b,),
      in_specs=[
          pl.BlockSpec((block_b, h, w), lambda i: (i, 0, 0)),
          pl.BlockSpec(memory_space=pltpu.MemorySpace.SMEM),        # shifts (6,)
      ] + [pl.BlockSpec(a.shape, lambda i: (0, 0, 0)) for a in kp["a_mats"]]
        + [
          pl.BlockSpec(kp["pconv_w"].shape, lambda i: (0, 0)),
          pl.BlockSpec(kp["pconv_b"].shape, lambda i: (0, 0)),
          pl.BlockSpec(kp["fc_w"].shape, lambda i: (0, 0)),
          pl.BlockSpec(kp["fc_b"].shape, lambda i: (0, 0)),
      ],
      out_specs=pl.BlockSpec((block_b, 1, n_cls), lambda i: (i, 0, 0)),
      scratch_shapes=[
          pltpu.VMEM((geom[1][2], geom[1][3]), cdt),    # layer-1 input (110,220)
          pltpu.VMEM((geom[2][2], geom[2][3]), cdt),    # layer-2 input (108,218)
          pltpu.VMEM((1, flat_dim), jnp.float32),       # flatten scratch
      ],
      compiler_params=pltpu.CompilerParams(
          dimension_semantics=("parallel",)),
      cost_estimate=pl.CostEstimate(
          flops=int(b * (conv_flops + mm_flops)),
          transcendentals=0,
          bytes_accessed=int(bytes_acc)),
  )(xs, kp["shifts"], *kp["a_mats"], kp["pconv_w"], kp["pconv_b"],
    kp["fc_w"], kp["fc_b"])
  return out.reshape(b, n_cls)


# ---------------------------------------------------------------------------
# Deterministic parameter init (shapes from SepConv.__init__, k=1, classes=9)
# ---------------------------------------------------------------------------
def init_params(key, num_classes=9, k=1):
  keys = jax.random.split(key, 10)

  def conv_w(kk, ks):
    bound = 1.0 / jnp.sqrt(1.0 * ks * ks)
    return jax.random.uniform(kk, (k, ks, ks), jnp.float32, -bound, bound)

  def bn_identity():
    return dict(gamma=jnp.float32(1.0), beta=jnp.float32(0.0),
                mean=jnp.float32(0.0), var=jnp.float32(1.0))

  fc_in = 312
  pb = 1.0 / jnp.sqrt(float(_PCONV_IN))
  fb = 1.0 / jnp.sqrt(float(fc_in))

  return {
      "d1_w": [conv_w(keys[0], 7), conv_w(keys[1], 5), conv_w(keys[2], 3)],
      "d1_bn": [bn_identity() for _ in range(3)],
      # Conv1d(218, 32, 1) weight (32, 218, 1) stored transposed as (218, 32)
      "pconv_w": jax.random.uniform(keys[3], (_PCONV_IN, _PCONV_OUT),
                                    jnp.float32, -pb, pb),
      "pconv_b": jax.random.uniform(keys[4], (_PCONV_OUT,), jnp.float32,
                                    -pb, pb),
      "d2_w": [conv_w(keys[5], 7), conv_w(keys[6], 5), conv_w(keys[7], 3)],
      "d2_bn": [bn_identity() for _ in range(3)],
      # Linear(312, 9) weight (9, 312) stored transposed as (312, 9)
      "fc_w": jax.random.uniform(keys[8], (fc_in, num_classes),
                                 jnp.float32, -fb, fb),
      "fc_b": jax.random.uniform(keys[9], (num_classes,), jnp.float32,
                                 -fb, fb),
  }


if __name__ == "__main__":
  key = jax.random.PRNGKey(0)
  pkey, xkey = jax.random.split(key)
  params = init_params(pkey)
  kparams = fold_params(params)        # one-time fold, hoisted out of forward

  # The architecture hard-wires the input size: pconv expects 218 input
  # channels (=> W = 224) and fc expects 312 features (=> H = 224).  Batch is
  # kept small and even (one element per TensorCore on v7x megacore).
  x = jax.random.normal(xkey, (2, 1, 224, 224), jnp.float32)

  fwd = jax.jit(functools.partial(sepconv_forward, block_b=1))
  out = fwd(kparams, x)
  jax.block_until_ready(out)
  assert out.shape == (2, 9), out.shape
  assert bool(jnp.all(jnp.isfinite(out)))
  print("KERNEL_OK")
</pallas_src>

<mosaic_0001>
module attributes {stable_mosaic.version = 11 : i64} {
  func.func @_sepconv_kernel(%arg0: i32, %arg1: memref<1x224x224xf32, #tpu.memory_space<vmem>>, %arg2: memref<6xf32, #tpu.memory_space<smem>>, %arg3: memref<7x110x224xbf16, #tpu.memory_space<vmem>>, %arg4: memref<5x108x110xbf16, #tpu.memory_space<vmem>>, %arg5: memref<3x54x108xbf16, #tpu.memory_space<vmem>>, %arg6: memref<7x25x54xbf16, #tpu.memory_space<vmem>>, %arg7: memref<5x23x25xbf16, #tpu.memory_space<vmem>>, %arg8: memref<3x12x23xbf16, #tpu.memory_space<vmem>>, %arg9: memref<218x32xf32, #tpu.memory_space<vmem>>, %arg10: memref<1x32xf32, #tpu.memory_space<vmem>>, %arg11: memref<312x9xf32, #tpu.memory_space<vmem>>, %arg12: memref<1x9xf32, #tpu.memory_space<vmem>>, %arg13: memref<1x1x9xf32, #tpu.memory_space<vmem>>, %arg14: memref<110x220xbf16, #tpu.memory_space<vmem>>, %arg15: memref<108x218xbf16, #tpu.memory_space<vmem>>, %arg16: memref<1x312xf32, #tpu.memory_space<vmem>>) attributes {dimension_semantics = [#tpu.dimension_semantics<parallel>], iteration_bounds = array<i64: 2>, scalar_prefetch = 0 : i64, scratch_operands = 3 : i64, tpu.core_type = #tpu.core_type<tc>, window_params = [{transform_indices = @transform_0, window_bounds = array<i64: 1, 224, 224>}, {transform_indices = @transform_1, window_bounds = array<i64: 6>}, {pipeline_mode = #tpu.pipeline_mode<synchronous>, transform_indices = @transform_2, window_bounds = array<i64: 7, 110, 224>}, {pipeline_mode = #tpu.pipeline_mode<synchronous>, transform_indices = @transform_3, window_bounds = array<i64: 5, 108, 110>}, {pipeline_mode = #tpu.pipeline_mode<synchronous>, transform_indices = @transform_4, window_bounds = array<i64: 3, 54, 108>}, {pipeline_mode = #tpu.pipeline_mode<synchronous>, transform_indices = @transform_5, window_bounds = array<i64: 7, 25, 54>}, {pipeline_mode = #tpu.pipeline_mode<synchronous>, transform_indices = @transform_6, window_bounds = array<i64: 5, 23, 25>}, {pipeline_mode = #tpu.pipeline_mode<synchronous>, transform_indices = @transform_7, window_bounds = array<i64: 3, 12, 23>}, {pipeline_mode = #tpu.pipeline_mode<synchronous>, transform_indices = @transform_8, window_bounds = array<i64: 218, 32>}, {pipeline_mode = #tpu.pipeline_mode<synchronous>, transform_indices = @transform_9, window_bounds = array<i64: 1, 32>}, {pipeline_mode = #tpu.pipeline_mode<synchronous>, transform_indices = @transform_10, window_bounds = array<i64: 312, 9>}, {pipeline_mode = #tpu.pipeline_mode<synchronous>, transform_indices = @transform_11, window_bounds = array<i64: 1, 9>}, {transform_indices = @transform_12, window_bounds = array<i64: 1, 1, 9>}]} {
    %c0 = arith.constant 0 : index
    %0 = memref.load %arg2[%c0] : memref<6xf32, #tpu.memory_space<smem>>
    %c1 = arith.constant 1 : index
    %c0_0 = arith.constant 0 : index
    %c0_1 = arith.constant 0 : index
    %1 = vector.load %arg3[%c1, %c0_0, %c0_1] : memref<7x110x224xbf16, #tpu.memory_space<vmem>>, vector<1x110x224xbf16>
    %2 = vector.shape_cast %1 : vector<1x110x224xbf16> to vector<110x224xbf16>
    %c0_2 = arith.constant 0 : index
    %c0_3 = arith.constant 0 : index
    %c0_4 = arith.constant 0 : index
    %3 = vector.load %arg1[%c0_2, %c0_3, %c0_4] : memref<1x224x224xf32, #tpu.memory_space<vmem>>, vector<1x224x220xf32>
    %4 = vector.shape_cast %3 : vector<1x224x220xf32> to vector<224x220xf32>
    %5 = arith.truncf %4 : vector<224x220xf32> to vector<224x220xbf16>
    %cst = arith.constant dense<0.000000e+00> : vector<110x220xf32>
    %6 = tpu.matmul %2, %5, %cst {dimension_numbers = #tpu.dot_dimension_numbers<[1], [0], [0], [1], [0, 0, 1, 1], [], []>} : vector<110x224xbf16>, vector<224x220xbf16>, vector<110x220xf32> -> vector<110x220xf32>
    %c2 = arith.constant 2 : index
    %c0_5 = arith.constant 0 : index
    %c0_6 = arith.constant 0 : index
    %7 = vector.load %arg3[%c2, %c0_5, %c0_6] : memref<7x110x224xbf16, #tpu.memory_space<vmem>>, vector<1x110x224xbf16>
    %8 = vector.shape_cast %7 : vector<1x110x224xbf16> to vector<110x224xbf16>
    %c0_7 = arith.constant 0 : index
    %c0_8 = arith.constant 0 : index
    %c1_9 = arith.constant 1 : index
    %9 = vector.load %arg1[%c0_7, %c0_8, %c1_9] : memref<1x224x224xf32, #tpu.memory_space<vmem>>, vector<1x224x220xf32>
    %10 = vector.shape_cast %9 : vector<1x224x220xf32> to vector<224x220xf32>
    %11 = arith.truncf %10 : vector<224x220xf32> to vector<224x220xbf16>
    %cst_10 = arith.constant dense<0.000000e+00> : vector<110x220xf32>
    %12 = tpu.matmul %8, %11, %cst_10 {dimension_numbers = #tpu.dot_dimension_numbers<[1], [0], [0], [1], [0, 0, 1, 1], [], []>} : vector<110x224xbf16>, vector<224x220xbf16>, vector<110x220xf32> -> vector<110x220xf32>
    %13 = arith.addf %6, %12 : vector<110x220xf32>
    %c3 = arith.constant 3 : index
    %c0_11 = arith.constant 0 : index
    %c0_12 = arith.constant 0 : index
    %14 = vector.load %arg3[%c3, %c0_11, %c0_12] : memref<7x110x224xbf16, #tpu.memory_space<vmem>>, vector<1x110x224xbf16>
    %15 = vector.shape_cast %14 : vector<1x110x224xbf16> to vector<110x224xbf16>
    %c0_13 = arith.constant 0 : index
    %c0_14 = arith.constant 0 : index
    %c2_15 = arith.constant 2 : index
    %16 = vector.load %arg1[%c0_13, %c0_14, %c2_15] : memref<1x224x224xf32, #tpu.memory_space<vmem>>, vector<1x224x220xf32>
    %17 = vector.shape_cast %16 : vector<1x224x220xf32> to vector<224x220xf32>
    %18 = arith.truncf %17 : vector<224x220xf32> to vector<224x220xbf16>
    %cst_16 = arith.constant dense<0.000000e+00> : vector<110x220xf32>
    %19 = tpu.matmul %15, %18, %cst_16 {dimension_numbers = #tpu.dot_dimension_numbers<[1], [0], [0], [1], [0, 0, 1, 1], [], []>} : vector<110x224xbf16>, vector<224x220xbf16>, vector<110x220xf32> -> vector<110x220xf32>
    %20 = arith.addf %13, %19 : vector<110x220xf32>
    %c4 = arith.constant 4 : index
    %c0_17 = arith.constant 0 : index
    %c0_18 = arith.constant 0 : index
    %21 = vector.load %arg3[%c4, %c0_17, %c0_18] : memref<7x110x224xbf16, #tpu.memory_space<vmem>>, vector<1x110x224xbf16>
    %22 = vector.shape_cast %21 : vector<1x110x224xbf16> to vector<110x224xbf16>
    %c0_19 = arith.constant 0 : index
    %c0_20 = arith.constant 0 : index
    %c3_21 = arith.constant 3 : index
    %23 = vector.load %arg1[%c0_19, %c0_20, %c3_21] : memref<1x224x224xf32, #tpu.memory_space<vmem>>, vector<1x224x220xf32>
    %24 = vector.shape_cast %23 : vector<1x224x220xf32> to vector<224x220xf32>
    %25 = arith.truncf %24 : vector<224x220xf32> to vector<224x220xbf16>
    %cst_22 = arith.constant dense<0.000000e+00> : vector<110x220xf32>
    %26 = tpu.matmul %22, %25, %cst_22 {dimension_numbers = #tpu.dot_dimension_numbers<[1], [0], [0], [1], [0, 0, 1, 1], [], []>} : vector<110x224xbf16>, vector<224x220xbf16>, vector<110x220xf32> -> vector<110x220xf32>
    %27 = arith.addf %20, %26 : vector<110x220xf32>
    %c5 = arith.constant 5 : index
    %c0_23 = arith.constant 0 : index
    %c0_24 = arith.constant 0 : index
    %28 = vector.load %arg3[%c5, %c0_23, %c0_24] : memref<7x110x224xbf16, #tpu.memory_space<vmem>>, vector<1x110x224xbf16>
    %29 = vector.shape_cast %28 : vector<1x110x224xbf16> to vector<110x224xbf16>
    %c0_25 = arith.constant 0 : index
    %c0_26 = arith.constant 0 : index
    %c4_27 = arith.constant 4 : index
    %30 = vector.load %arg1[%c0_25, %c0_26, %c4_27] : memref<1x224x224xf32, #tpu.memory_space<vmem>>, vector<1x224x220xf32>
    %31 = vector.shape_cast %30 : vector<1x224x220xf32> to vector<224x220xf32>
    %32 = arith.truncf %31 : vector<224x220xf32> to vector<224x220xbf16>
    %cst_28 = arith.constant dense<0.000000e+00> : vector<110x220xf32>
    %33 = tpu.matmul %29, %32, %cst_28 {dimension_numbers = #tpu.dot_dimension_numbers<[1], [0], [0], [1], [0, 0, 1, 1], [], []>} : vector<110x224xbf16>, vector<224x220xbf16>, vector<110x220xf32> -> vector<110x220xf32>
    %34 = arith.addf %27, %33 : vector<110x220xf32>
    %cst_29 = arith.constant 0.000000e+00 : f32
    %35 = vector.broadcast %cst_29 : f32 to vector<110x1xf32>
    %c0_30 = arith.constant 0 : index
    %c0_31 = arith.constant 0 : index
    %c0_32 = arith.constant 0 : index
    %36 = vector.load %arg3[%c0_30, %c0_31, %c0_32] : memref<7x110x224xbf16, #tpu.memory_space<vmem>>, vector<1x110x224xbf16>
    %37 = vector.shape_cast %36 : vector<1x110x224xbf16> to vector<110x224xbf16>
    %c0_33 = arith.constant 0 : index
    %c0_34 = arith.constant 0 : index
    %c0_35 = arith.constant 0 : index
    %38 = vector.load %arg1[%c0_33, %c0_34, %c0_35] : memref<1x224x224xf32, #tpu.memory_space<vmem>>, vector<1x224x219xf32>
    %39 = vector.shape_cast %38 : vector<1x224x219xf32> to vector<224x219xf32>
    %40 = arith.truncf %39 : vector<224x219xf32> to vector<224x219xbf16>
    %cst_36 = arith.constant dense<0.000000e+00> : vector<110x219xf32>
    %41 = tpu.matmul %37, %40, %cst_36 {dimension_numbers = #tpu.dot_dimension_numbers<[1], [0], [0], [1], [0, 0, 1, 1], [], []>} : vector<110x224xbf16>, vector<224x219xbf16>, vector<110x219xf32> -> vector<110x219xf32>
    %42 = tpu.concatenate %35, %41 in 1 : vector<110x1xf32>, vector<110x219xf32> -> vector<110x220xf32>
    %43 = arith.addf %34, %42 : vector<110x220xf32>
    %c6 = arith.constant 6 : index
    %c0_37 = arith.constant 0 : index
    %c0_38 = arith.constant 0 : index
    %44 = vector.load %arg3[%c6, %c0_37, %c0_38] : memref<7x110x224xbf16, #tpu.memory_space<vmem>>, vector<1x110x224xbf16>
    %45 = vector.shape_cast %44 : vector<1x110x224xbf16> to vector<110x224xbf16>
    %c0_39 = arith.constant 0 : index
    %c0_40 = arith.constant 0 : index
    %c5_41 = arith.constant 5 : index
    %46 = vector.load %arg1[%c0_39, %c0_40, %c5_41] : memref<1x224x224xf32, #tpu.memory_space<vmem>>, vector<1x224x219xf32>
    %47 = vector.shape_cast %46 : vector<1x224x219xf32> to vector<224x219xf32>
    %48 = arith.truncf %47 : vector<224x219xf32> to vector<224x219xbf16>
    %cst_42 = arith.constant dense<0.000000e+00> : vector<110x219xf32>
    %49 = tpu.matmul %45, %48, %cst_42 {dimension_numbers = #tpu.dot_dimension_numbers<[1], [0], [0], [1], [0, 0, 1, 1], [], []>} : vector<110x224xbf16>, vector<224x219xbf16>, vector<110x219xf32> -> vector<110x219xf32>
    %50 = tpu.concatenate %49, %35 in 1 : vector<110x219xf32>, vector<110x1xf32> -> vector<110x220xf32>
    %51 = arith.addf %43, %50 : vector<110x220xf32>
    %52 = vector.broadcast %0 : f32 to vector<110x220xf32>
    %53 = arith.addf %51, %52 : vector<110x220xf32>
    %cst_43 = arith.constant 0.000000e+00 : f32
    %54 = vector.broadcast %cst_43 : f32 to vector<110x220xf32>
    %55 = arith.maximumf %53, %54 : vector<110x220xf32>
    %56 = arith.truncf %55 : vector<110x220xf32> to vector<110x220xbf16>
    %c0_44 = arith.constant 0 : index
    %c0_45 = arith.constant 0 : index
    %57 = vector.load %arg14[%c0_44, %c0_45] : memref<110x220xbf16, #tpu.memory_space<vmem>>, vector<110x220xbf16>
    tpu.vector_store %arg14[%c0_44, %c0_45], %56 {strides = array<i32>} : memref<110x220xbf16, #tpu.memory_space<vmem>>, vector<110x220xbf16>,
    %c1_46 = arith.constant 1 : index
    %58 = memref.load %arg2[%c1_46] : memref<6xf32, #tpu.memory_space<smem>>
    %c1_47 = arith.constant 1 : index
    %c0_48 = arith.constant 0 : index
    %c0_49 = arith.constant 0 : index
    %59 = vector.load %arg4[%c1_47, %c0_48, %c0_49] : memref<5x108x110xbf16, #tpu.memory_space<vmem>>, vector<1x108x110xbf16>
    %60 = vector.shape_cast %59 : vector<1x108x110xbf16> to vector<108x110xbf16>
    %c0_50 = arith.constant 0 : index
    %c0_51 = arith.constant 0 : index
    %61 = vector.load %arg14[%c0_50, %c0_51] : memref<110x220xbf16, #tpu.memory_space<vmem>>, vector<110x218xbf16>
    %cst_52 = arith.constant dense<0.000000e+00> : vector<108x218xf32>
    %62 = tpu.matmul %60, %61, %cst_52 {dimension_numbers = #tpu.dot_dimension_numbers<[1], [0], [0], [1], [0, 0, 1, 1], [], []>} : vector<108x110xbf16>, vector<110x218xbf16>, vector<108x218xf32> -> vector<108x218xf32>
    %c2_53 = arith.constant 2 : index
    %c0_54 = arith.constant 0 : index
    %c0_55 = arith.constant 0 : index
    %63 = vector.load %arg4[%c2_53, %c0_54, %c0_55] : memref<5x108x110xbf16, #tpu.memory_space<vmem>>, vector<1x108x110xbf16>
    %64 = vector.shape_cast %63 : vector<1x108x110xbf16> to vector<108x110xbf16>
    %c0_56 = arith.constant 0 : index
    %c1_57 = arith.constant 1 : index
    %65 = vector.load %arg14[%c0_56, %c1_57] : memref<110x220xbf16, #tpu.memory_space<vmem>>, vector<110x218xbf16>
    %cst_58 = arith.constant dense<0.000000e+00> : vector<108x218xf32>
    %66 = tpu.matmul %64, %65, %cst_58 {dimension_numbers = #tpu.dot_dimension_numbers<[1], [0], [0], [1], [0, 0, 1, 1], [], []>} : vector<108x110xbf16>, vector<110x218xbf16>, vector<108x218xf32> -> vector<108x218xf32>
    %67 = arith.addf %62, %66 : vector<108x218xf32>
    %c3_59 = arith.constant 3 : index
    %c0_60 = arith.constant 0 : index
    %c0_61 = arith.constant 0 : index
    %68 = vector.load %arg4[%c3_59, %c0_60, %c0_61] : memref<5x108x110xbf16, #tpu.memory_space<vmem>>, vector<1x108x110xbf16>
    %69 = vector.shape_cast %68 : vector<1x108x110xbf16> to vector<108x110xbf16>
    %c0_62 = arith.constant 0 : index
    %c2_63 = arith.constant 2 : index
    %70 = vector.load %arg14[%c0_62, %c2_63] : memref<110x220xbf16, #tpu.memory_space<vmem>>, vector<110x218xbf16>
    %cst_64 = arith.constant dense<0.000000e+00> : vector<108x218xf32>
    %71 = tpu.matmul %69, %70, %cst_64 {dimension_numbers = #tpu.dot_dimension_numbers<[1], [0], [0], [1], [0, 0, 1, 1], [], []>} : vector<108x110xbf16>, vector<110x218xbf16>, vector<108x218xf32> -> vector<108x218xf32>
    %72 = arith.addf %67, %71 : vector<108x218xf32>
    %cst_65 = arith.constant 0.000000e+00 : f32
    %73 = vector.broadcast %cst_65 : f32 to vector<108x1xf32>
    %c0_66 = arith.constant 0 : index
    %c0_67 = arith.constant 0 : index
    %c0_68 = arith.constant 0 : index
    %74 = vector.load %arg4[%c0_66, %c0_67, %c0_68] : memref<5x108x110xbf16, #tpu.memory_space<vmem>>, vector<1x108x110xbf16>
    %75 = vector.shape_cast %74 : vector<1x108x110xbf16> to vector<108x110xbf16>
    %c0_69 = arith.constant 0 : index
    %c0_70 = arith.constant 0 : index
    %76 = vector.load %arg14[%c0_69, %c0_70] : memref<110x220xbf16, #tpu.memory_space<vmem>>, vector<110x217xbf16>
    %cst_71 = arith.constant dense<0.000000e+00> : vector<108x217xf32>
    %77 = tpu.matmul %75, %76, %cst_71 {dimension_numbers = #tpu.dot_dimension_numbers<[1], [0], [0], [1], [0, 0, 1, 1], [], []>} : vector<108x110xbf16>, vector<110x217xbf16>, vector<108x217xf32> -> vector<108x217xf32>
    %78 = tpu.concatenate %73, %77 in 1 : vector<108x1xf32>, vector<108x217xf32> -> vector<108x218xf32>
    %79 = arith.addf %72, %78 : vector<108x218xf32>
    %c4_72 = arith.constant 4 : index
    %c0_73 = arith.constant 0 : index
    %c0_74 = arith.constant 0 : index
    %80 = vector.load %arg4[%c4_72, %c0_73, %c0_74] : memref<5x108x110xbf16, #tpu.memory_space<vmem>>, vector<1x108x110xbf16>
    %81 = vector.shape_cast %80 : vector<1x108x110xbf16> to vector<108x110xbf16>
    %c0_75 = arith.constant 0 : index
    %c3_76 = arith.constant 3 : index
    %82 = vector.load %arg14[%c0_75, %c3_76] : memref<110x220xbf16, #tpu.memory_space<vmem>>, vector<110x217xbf16>
    %cst_77 = arith.constant dense<0.000000e+00> : vector<108x217xf32>
    %83 = tpu.matmul %81, %82, %cst_77 {dimension_numbers = #tpu.dot_dimension_numbers<[1], [0], [0], [1], [0, 0, 1, 1], [], []>} : vector<108x110xbf16>, vector<110x217xbf16>, vector<108x217xf32> -> vector<108x217xf32>
    %84 = tpu.concatenate %83, %73 in 1 : vector<108x217xf32>, vector<108x1xf32> -> vector<108x218xf32>
    %85 = arith.addf %79, %84 : vector<108x218xf32>
    %86 = vector.broadcast %58 : f32 to vector<108x218xf32>
    %87 = arith.addf %85, %86 : vector<108x218xf32>
    %cst_78 = arith.constant 0.000000e+00 : f32
    %88 = vector.broadcast %cst_78 : f32 to vector<108x218xf32>
    %89 = arith.maximumf %87, %88 : vector<108x218xf32>
    %90 = arith.truncf %89 : vector<108x218xf32> to vector<108x218xbf16>
    %c0_79 = arith.constant 0 : index
    %c0_80 = arith.constant 0 : index
    %91 = vector.load %arg15[%c0_79, %c0_80] : memref<108x218xbf16, #tpu.memory_space<vmem>>, vector<108x218xbf16>
    tpu.vector_store %arg15[%c0_79, %c0_80], %90 {strides = array<i32>} : memref<108x218xbf16, #tpu.memory_space<vmem>>, vector<108x218xbf16>,
    %c2_81 = arith.constant 2 : index
    %92 = memref.load %arg2[%c2_81] : memref<6xf32, #tpu.memory_space<smem>>
    %c1_82 = arith.constant 1 : index
    %c0_83 = arith.constant 0 : index
    %c0_84 = arith.constant 0 : index
    %93 = vector.load %arg5[%c1_82, %c0_83, %c0_84] : memref<3x54x108xbf16, #tpu.memory_space<vmem>>, vector<1x54x108xbf16>
    %94 = vector.shape_cast %93 : vector<1x54x108xbf16> to vector<54x108xbf16>
    %c0_85 = arith.constant 0 : index
    %c0_86 = arith.constant 0 : index
    %95 = vector.load %arg15[%c0_85, %c0_86] : memref<108x218xbf16, #tpu.memory_space<vmem>>, vector<108x218xbf16>
    %cst_87 = arith.constant dense<0.000000e+00> : vector<54x218xf32>
    %96 = tpu.matmul %94, %95, %cst_87 {dimension_numbers = #tpu.dot_dimension_numbers<[1], [0], [0], [1], [0, 0, 1, 1], [], []>} : vector<54x108xbf16>, vector<108x218xbf16>, vector<54x218xf32> -> vector<54x218xf32>
    %cst_88 = arith.constant 0.000000e+00 : f32
    %97 = vector.broadcast %cst_88 : f32 to vector<54x1xf32>
    %c0_89 = arith.constant 0 : index
    %c0_90 = arith.constant 0 : index
    %c0_91 = arith.constant 0 : index
    %98 = vector.load %arg5[%c0_89, %c0_90, %c0_91] : memref<3x54x108xbf16, #tpu.memory_space<vmem>>, vector<1x54x108xbf16>
    %99 = vector.shape_cast %98 : vector<1x54x108xbf16> to vector<54x108xbf16>
    %c0_92 = arith.constant 0 : index
    %c0_93 = arith.constant 0 : index
    %100 = vector.load %arg15[%c0_92, %c0_93] : memref<108x218xbf16, #tpu.memory_space<vmem>>, vector<108x217xbf16>
    %cst_94 = arith.constant dense<0.000000e+00> : vector<54x217xf32>
    %101 = tpu.matmul %99, %100, %cst_94 {dimension_numbers = #tpu.dot_dimension_numbers<[1], [0], [0], [1], [0, 0, 1, 1], [], []>} : vector<54x108xbf16>, vector<108x217xbf16>, vector<54x217xf32> -> vector<54x217xf32>
    %102 = tpu.concatenate %97, %101 in 1 : vector<54x1xf32>, vector<54x217xf32> -> vector<54x218xf32>
    %103 = arith.addf %96, %102 : vector<54x218xf32>
    %c2_95 = arith.constant 2 : index
    %c0_96 = arith.constant 0 : index
    %c0_97 = arith.constant 0 : index
    %104 = vector.load %arg5[%c2_95, %c0_96, %c0_97] : memref<3x54x108xbf16, #tpu.memory_space<vmem>>, vector<1x54x108xbf16>
    %105 = vector.shape_cast %104 : vector<1x54x108xbf16> to vector<54x108xbf16>
    %c0_98 = arith.constant 0 : index
    %c1_99 = arith.constant 1 : index
    %106 = vector.load %arg15[%c0_98, %c1_99] : memref<108x218xbf16, #tpu.memory_space<vmem>>, vector<108x217xbf16>
    %cst_100 = arith.constant dense<0.000000e+00> : vector<54x217xf32>
    %107 = tpu.matmul %105, %106, %cst_100 {dimension_numbers = #tpu.dot_dimension_numbers<[1], [0], [0], [1], [0, 0, 1, 1], [], []>} : vector<54x108xbf16>, vector<108x217xbf16>, vector<54x217xf32> -> vector<54x217xf32>
    %108 = tpu.concatenate %107, %97 in 1 : vector<54x217xf32>, vector<54x1xf32> -> vector<54x218xf32>
    %109 = arith.addf %103, %108 : vector<54x218xf32>
    %110 = vector.broadcast %92 : f32 to vector<54x218xf32>
    %111 = arith.addf %109, %110 : vector<54x218xf32>
    %cst_101 = arith.constant 0.000000e+00 : f32
    %112 = vector.broadcast %cst_101 : f32 to vector<54x218xf32>
    %113 = arith.maximumf %111, %112 : vector<54x218xf32>
    %c0_102 = arith.constant 0 : index
    %c0_103 = arith.constant 0 : index
    %114 = vector.load %arg9[%c0_102, %c0_103] : memref<218x32xf32, #tpu.memory_space<vmem>>, vector<218x32xf32>
    %cst_104 = arith.constant dense<0.000000e+00> : vector<54x32xf32>
    %115 = tpu.matmul %113, %114, %cst_104 {dimension_numbers = #tpu.dot_dimension_numbers<[1], [0], [0], [1], [0, 0, 1, 1], [], []>} : vector<54x218xf32>, vector<218x32xf32>, vector<54x32xf32> -> vector<54x32xf32>
    %c0_105 = arith.constant 0 : index
    %c0_106 = arith.constant 0 : index
    %116 = vector.load %arg10[%c0_105, %c0_106] : memref<1x32xf32, #tpu.memory_space<vmem>>, vector<1x32xf32>
    %117 = vector.broadcast %116 : vector<1x32xf32> to vector<54x32xf32>
    %118 = arith.addf %115, %117 : vector<54x32xf32>
    %119 = arith.truncf %118 : vector<54x32xf32> to vector<54x32xbf16>
    %c3_107 = arith.constant 3 : index
    %120 = memref.load %arg2[%c3_107] : memref<6xf32, #tpu.memory_space<smem>>
    %c1_108 = arith.constant 1 : index
    %c0_109 = arith.constant 0 : index
    %c0_110 = arith.constant 0 : index
    %121 = vector.load %arg6[%c1_108, %c0_109, %c0_110] : memref<7x25x54xbf16, #tpu.memory_space<vmem>>, vector<1x25x54xbf16>
    %122 = vector.shape_cast %121 : vector<1x25x54xbf16> to vector<25x54xbf16>
    %123 = vector.extract_strided_slice %119 {offsets = [0, 0], sizes = [54, 28], strides = [1, 1]} : vector<54x32xbf16> to vector<54x28xbf16>
    %cst_111 = arith.constant dense<0.000000e+00> : vector<25x28xf32>
    %124 = tpu.matmul %122, %123, %cst_111 {dimension_numbers = #tpu.dot_dimension_numbers<[1], [0], [0], [1], [0, 0, 1, 1], [], []>} : vector<25x54xbf16>, vector<54x28xbf16>, vector<25x28xf32> -> vector<25x28xf32>
    %c2_112 = arith.constant 2 : index
    %c0_113 = arith.constant 0 : index
    %c0_114 = arith.constant 0 : index
    %125 = vector.load %arg6[%c2_112, %c0_113, %c0_114] : memref<7x25x54xbf16, #tpu.memory_space<vmem>>, vector<1x25x54xbf16>
    %126 = vector.shape_cast %125 : vector<1x25x54xbf16> to vector<25x54xbf16>
    %127 = vector.extract_strided_slice %119 {offsets = [0, 1], sizes = [54, 28], strides = [1, 1]} : vector<54x32xbf16> to vector<54x28xbf16>
    %cst_115 = arith.constant dense<0.000000e+00> : vector<25x28xf32>
    %128 = tpu.matmul %126, %127, %cst_115 {dimension_numbers = #tpu.dot_dimension_numbers<[1], [0], [0], [1], [0, 0, 1, 1], [], []>} : vector<25x54xbf16>, vector<54x28xbf16>, vector<25x28xf32> -> vector<25x28xf32>
    %129 = arith.addf %124, %128 : vector<25x28xf32>
    %c3_116 = arith.constant 3 : index
    %c0_117 = arith.constant 0 : index
    %c0_118 = arith.constant 0 : index
    %130 = vector.load %arg6[%c3_116, %c0_117, %c0_118] : memref<7x25x54xbf16, #tpu.memory_space<vmem>>, vector<1x25x54xbf16>
    %131 = vector.shape_cast %130 : vector<1x25x54xbf16> to vector<25x54xbf16>
    %132 = vector.extract_strided_slice %119 {offsets = [0, 2], sizes = [54, 28], strides = [1, 1]} : vector<54x32xbf16> to vector<54x28xbf16>
    %cst_119 = arith.constant dense<0.000000e+00> : vector<25x28xf32>
    %133 = tpu.matmul %131, %132, %cst_119 {dimension_numbers = #tpu.dot_dimension_numbers<[1], [0], [0], [1], [0, 0, 1, 1], [], []>} : vector<25x54xbf16>, vector<54x28xbf16>, vector<25x28xf32> -> vector<25x28xf32>
    %134 = arith.addf %129, %133 : vector<25x28xf32>
    %c4_120 = arith.constant 4 : index
    %c0_121 = arith.constant 0 : index
    %c0_122 = arith.constant 0 : index
    %135 = vector.load %arg6[%c4_120, %c0_121, %c0_122] : memref<7x25x54xbf16, #tpu.memory_space<vmem>>, vector<1x25x54xbf16>
    %136 = vector.shape_cast %135 : vector<1x25x54xbf16> to vector<25x54xbf16>
    %137 = vector.extract_strided_slice %119 {offsets = [0, 3], sizes = [54, 28], strides = [1, 1]} : vector<54x32xbf16> to vector<54x28xbf16>
    %cst_123 = arith.constant dense<0.000000e+00> : vector<25x28xf32>
    %138 = tpu.matmul %136, %137, %cst_123 {dimension_numbers = #tpu.dot_dimension_numbers<[1], [0], [0], [1], [0, 0, 1, 1], [], []>} : vector<25x54xbf16>, vector<54x28xbf16>, vector<25x28xf32> -> vector<25x28xf32>
    %139 = arith.addf %134, %138 : vector<25x28xf32>
    %c5_124 = arith.constant 5 : index
    %c0_125 = arith.constant 0 : index
    %c0_126 = arith.constant 0 : index
    %140 = vector.load %arg6[%c5_124, %c0_125, %c0_126] : memref<7x25x54xbf16, #tpu.memory_space<vmem>>, vector<1x25x54xbf16>
    %141 = vector.shape_cast %140 : vector<1x25x54xbf16> to vector<25x54xbf16>
    %142 = vector.extract_strided_slice %119 {offsets = [0, 4], sizes = [54, 28], strides = [1, 1]} : vector<54x32xbf16> to vector<54x28xbf16>
    %cst_127 = arith.constant dense<0.000000e+00> : vector<25x28xf32>
    %143 = tpu.matmul %141, %142, %cst_127 {dimension_numbers = #tpu.dot_dimension_numbers<[1], [0], [0], [1], [0, 0, 1, 1], [], []>} : vector<25x54xbf16>, vector<54x28xbf16>, vector<25x28xf32> -> vector<25x28xf32>
    %144 = arith.addf %139, %143 : vector<25x28xf32>
    %cst_128 = arith.constant 0.000000e+00 : f32
    %145 = vector.broadcast %cst_128 : f32 to vector<25x1xf32>
    %c0_129 = arith.constant 0 : index
    %c0_130 = arith.constant 0 : index
    %c0_131 = arith.constant 0 : index
    %146 = vector.load %arg6[%c0_129, %c0_130, %c0_131] : memref<7x25x54xbf16, #tpu.memory_space<vmem>>, vector<1x25x54xbf16>
    %147 = vector.shape_cast %146 : vector<1x25x54xbf16> to vector<25x54xbf16>
    %148 = vector.extract_strided_slice %119 {offsets = [0, 0], sizes = [54, 27], strides = [1, 1]} : vector<54x32xbf16> to vector<54x27xbf16>
    %cst_132 = arith.constant dense<0.000000e+00> : vector<25x27xf32>
    %149 = tpu.matmul %147, %148, %cst_132 {dimension_numbers = #tpu.dot_dimension_numbers<[1], [0], [0], [1], [0, 0, 1, 1], [], []>} : vector<25x54xbf16>, vector<54x27xbf16>, vector<25x27xf32> -> vector<25x27xf32>
    %150 = tpu.concatenate %145, %149 in 1 : vector<25x1xf32>, vector<25x27xf32> -> vector<25x28xf32>
    %151 = arith.addf %144, %150 : vector<25x28xf32>
    %c6_133 = arith.constant 6 : index
    %c0_134 = arith.constant 0 : index
    %c0_135 = arith.constant 0 : index
    %152 = vector.load %arg6[%c6_133, %c0_134, %c0_135] : memref<7x25x54xbf16, #tpu.memory_space<vmem>>, vector<1x25x54xbf16>
    %153 = vector.shape_cast %152 : vector<1x25x54xbf16> to vector<25x54xbf16>
    %154 = vector.extract_strided_slice %119 {offsets = [0, 5], sizes = [54, 27], strides = [1, 1]} : vector<54x32xbf16> to vector<54x27xbf16>
    %cst_136 = arith.constant dense<0.000000e+00> : vector<25x27xf32>
    %155 = tpu.matmul %153, %154, %cst_136 {dimension_numbers = #tpu.dot_dimension_numbers<[1], [0], [0], [1], [0, 0, 1, 1], [], []>} : vector<25x54xbf16>, vector<54x27xbf16>, vector<25x27xf32> -> vector<25x27xf32>
    %156 = tpu.concatenate %155, %145 in 1 : vector<25x27xf32>, vector<25x1xf32> -> vector<25x28xf32>
    %157 = arith.addf %151, %156 : vector<25x28xf32>
    %158 = vector.broadcast %120 : f32 to vector<25x28xf32>
    %159 = arith.addf %157, %158 : vector<25x28xf32>
    %cst_137 = arith.constant 0.000000e+00 : f32
    %160 = vector.broadcast %cst_137 : f32 to vector<25x28xf32>
    %161 = arith.maximumf %159, %160 : vector<25x28xf32>
    %162 = arith.truncf %161 : vector<25x28xf32> to vector<25x28xbf16>
    %c4_138 = arith.constant 4 : index
    %163 = memref.load %arg2[%c4_138] : memref<6xf32, #tpu.memory_space<smem>>
    %c1_139 = arith.constant 1 : index
    %c0_140 = arith.constant 0 : index
    %c0_141 = arith.constant 0 : index
    %164 = vector.load %arg7[%c1_139, %c0_140, %c0_141] : memref<5x23x25xbf16, #tpu.memory_space<vmem>>, vector<1x23x25xbf16>
    %165 = vector.shape_cast %164 : vector<1x23x25xbf16> to vector<23x25xbf16>
    %166 = vector.extract_strided_slice %162 {offsets = [0, 0], sizes = [25, 26], strides = [1, 1]} : vector<25x28xbf16> to vector<25x26xbf16>
    %cst_142 = arith.constant dense<0.000000e+00> : vector<23x26xf32>
    %167 = tpu.matmul %165, %166, %cst_142 {dimension_numbers = #tpu.dot_dimension_numbers<[1], [0], [0], [1], [0, 0, 1, 1], [], []>} : vector<23x25xbf16>, vector<25x26xbf16>, vector<23x26xf32> -> vector<23x26xf32>
    %c2_143 = arith.constant 2 : index
    %c0_144 = arith.constant 0 : index
    %c0_145 = arith.constant 0 : index
    %168 = vector.load %arg7[%c2_143, %c0_144, %c0_145] : memref<5x23x25xbf16, #tpu.memory_space<vmem>>, vector<1x23x25xbf16>
    %169 = vector.shape_cast %168 : vector<1x23x25xbf16> to vector<23x25xbf16>
    %170 = vector.extract_strided_slice %162 {offsets = [0, 1], sizes = [25, 26], strides = [1, 1]} : vector<25x28xbf16> to vector<25x26xbf16>
    %cst_146 = arith.constant dense<0.000000e+00> : vector<23x26xf32>
    %171 = tpu.matmul %169, %170, %cst_146 {dimension_numbers = #tpu.dot_dimension_numbers<[1], [0], [0], [1], [0, 0, 1, 1], [], []>} : vector<23x25xbf16>, vector<25x26xbf16>, vector<23x26xf32> -> vector<23x26xf32>
    %172 = arith.addf %167, %171 : vector<23x26xf32>
    %c3_147 = arith.constant 3 : index
    %c0_148 = arith.constant 0 : index
    %c0_149 = arith.constant 0 : index
    %173 = vector.load %arg7[%c3_147, %c0_148, %c0_149] : memref<5x23x25xbf16, #tpu.memory_space<vmem>>, vector<1x23x25xbf16>
    %174 = vector.shape_cast %173 : vector<1x23x25xbf16> to vector<23x25xbf16>
    %175 = vector.extract_strided_slice %162 {offsets = [0, 2], sizes = [25, 26], strides = [1, 1]} : vector<25x28xbf16> to vector<25x26xbf16>
    %cst_150 = arith.constant dense<0.000000e+00> : vector<23x26xf32>
    %176 = tpu.matmul %174, %175, %cst_150 {dimension_numbers = #tpu.dot_dimension_numbers<[1], [0], [0], [1], [0, 0, 1, 1], [], []>} : vector<23x25xbf16>, vector<25x26xbf16>, vector<23x26xf32> -> vector<23x26xf32>
    %177 = arith.addf %172, %176 : vector<23x26xf32>
    %cst_151 = arith.constant 0.000000e+00 : f32
    %178 = vector.broadcast %cst_151 : f32 to vector<23x1xf32>
    %c0_152 = arith.constant 0 : index
    %c0_153 = arith.constant 0 : index
    %c0_154 = arith.constant 0 : index
    %179 = vector.load %arg7[%c0_152, %c0_153, %c0_154] : memref<5x23x25xbf16, #tpu.memory_space<vmem>>, vector<1x23x25xbf16>
    %180 = vector.shape_cast %179 : vector<1x23x25xbf16> to vector<23x25xbf16>
    %181 = vector.extract_strided_slice %162 {offsets = [0, 0], sizes = [25, 25], strides = [1, 1]} : vector<25x28xbf16> to vector<25x25xbf16>
    %cst_155 = arith.constant dense<0.000000e+00> : vector<23x25xf32>
    %182 = tpu.matmul %180, %181, %cst_155 {dimension_numbers = #tpu.dot_dimension_numbers<[1], [0], [0], [1], [0, 0, 1, 1], [], []>} : vector<23x25xbf16>, vector<25x25xbf16>, vector<23x25xf32> -> vector<23x25xf32>
    %183 = tpu.concatenate %178, %182 in 1 : vector<23x1xf32>, vector<23x25xf32> -> vector<23x26xf32>
    %184 = arith.addf %177, %183 : vector<23x26xf32>
    %c4_156 = arith.constant 4 : index
    %c0_157 = arith.constant 0 : index
    %c0_158 = arith.constant 0 : index
    %185 = vector.load %arg7[%c4_156, %c0_157, %c0_158] : memref<5x23x25xbf16, #tpu.memory_space<vmem>>, vector<1x23x25xbf16>
    %186 = vector.shape_cast %185 : vector<1x23x25xbf16> to vector<23x25xbf16>
    %187 = vector.extract_strided_slice %162 {offsets = [0, 3], sizes = [25, 25], strides = [1, 1]} : vector<25x28xbf16> to vector<25x25xbf16>
    %cst_159 = arith.constant dense<0.000000e+00> : vector<23x25xf32>
    %188 = tpu.matmul %186, %187, %cst_159 {dimension_numbers = #tpu.dot_dimension_numbers<[1], [0], [0], [1], [0, 0, 1, 1], [], []>} : vector<23x25xbf16>, vector<25x25xbf16>, vector<23x25xf32> -> vector<23x25xf32>
    %189 = tpu.concatenate %188, %178 in 1 : vector<23x25xf32>, vector<23x1xf32> -> vector<23x26xf32>
    %190 = arith.addf %184, %189 : vector<23x26xf32>
    %191 = vector.broadcast %163 : f32 to vector<23x26xf32>
    %192 = arith.addf %190, %191 : vector<23x26xf32>
    %cst_160 = arith.constant 0.000000e+00 : f32
    %193 = vector.broadcast %cst_160 : f32 to vector<23x26xf32>
    %194 = arith.maximumf %192, %193 : vector<23x26xf32>
    %195 = arith.truncf %194 : vector<23x26xf32> to vector<23x26xbf16>
    %c5_161 = arith.constant 5 : index
    %196 = memref.load %arg2[%c5_161] : memref<6xf32, #tpu.memory_space<smem>>
    %c1_162 = arith.constant 1 : index
    %c0_163 = arith.constant 0 : index
    %c0_164 = arith.constant 0 : index
    %197 = vector.load %arg8[%c1_162, %c0_163, %c0_164] : memref<3x12x23xbf16, #tpu.memory_space<vmem>>, vector<1x12x23xbf16>
    %198 = vector.shape_cast %197 : vector<1x12x23xbf16> to vector<12x23xbf16>
    %cst_165 = arith.constant dense<0.000000e+00> : vector<12x26xf32>
    %199 = tpu.matmul %198, %195, %cst_165 {dimension_numbers = #tpu.dot_dimension_numbers<[1], [0], [0], [1], [0, 0, 1, 1], [], []>} : vector<12x23xbf16>, vector<23x26xbf16>, vector<12x26xf32> -> vector<12x26xf32>
    %cst_166 = arith.constant 0.000000e+00 : f32
    %200 = vector.broadcast %cst_166 : f32 to vector<12x1xf32>
    %c0_167 = arith.constant 0 : index
    %c0_168 = arith.constant 0 : index
    %c0_169 = arith.constant 0 : index
    %201 = vector.load %arg8[%c0_167, %c0_168, %c0_169] : memref<3x12x23xbf16, #tpu.memory_space<vmem>>, vector<1x12x23xbf16>
    %202 = vector.shape_cast %201 : vector<1x12x23xbf16> to vector<12x23xbf16>
    %203 = vector.extract_strided_slice %195 {offsets = [0, 0], sizes = [23, 25], strides = [1, 1]} : vector<23x26xbf16> to vector<23x25xbf16>
    %cst_170 = arith.constant dense<0.000000e+00> : vector<12x25xf32>
    %204 = tpu.matmul %202, %203, %cst_170 {dimension_numbers = #tpu.dot_dimension_numbers<[1], [0], [0], [1], [0, 0, 1, 1], [], []>} : vector<12x23xbf16>, vector<23x25xbf16>, vector<12x25xf32> -> vector<12x25xf32>
    %205 = tpu.concatenate %200, %204 in 1 : vector<12x1xf32>, vector<12x25xf32> -> vector<12x26xf32>
    %206 = arith.addf %199, %205 : vector<12x26xf32>
    %c2_171 = arith.constant 2 : index
    %c0_172 = arith.constant 0 : index
    %c0_173 = arith.constant 0 : index
    %207 = vector.load %arg8[%c2_171, %c0_172, %c0_173] : memref<3x12x23xbf16, #tpu.memory_space<vmem>>, vector<1x12x23xbf16>
    %208 = vector.shape_cast %207 : vector<1x12x23xbf16> to vector<12x23xbf16>
    %209 = vector.extract_strided_slice %195 {offsets = [0, 1], sizes = [23, 25], strides = [1, 1]} : vector<23x26xbf16> to vector<23x25xbf16>
    %cst_174 = arith.constant dense<0.000000e+00> : vector<12x25xf32>
    %210 = tpu.matmul %208, %209, %cst_174 {dimension_numbers = #tpu.dot_dimension_numbers<[1], [0], [0], [1], [0, 0, 1, 1], [], []>} : vector<12x23xbf16>, vector<23x25xbf16>, vector<12x25xf32> -> vector<12x25xf32>
    %211 = tpu.concatenate %210, %200 in 1 : vector<12x25xf32>, vector<12x1xf32> -> vector<12x26xf32>
    %212 = arith.addf %206, %211 : vector<12x26xf32>
    %213 = vector.broadcast %196 : f32 to vector<12x26xf32>
    %214 = arith.addf %212, %213 : vector<12x26xf32>
    %cst_175 = arith.constant 0.000000e+00 : f32
    %215 = vector.broadcast %cst_175 : f32 to vector<12x26xf32>
    %216 = arith.maximumf %214, %215 : vector<12x26xf32>
    %217 = vector.extract_strided_slice %216 {offsets = [0, 0], sizes = [1, 26], strides = [1, 1]} : vector<12x26xf32> to vector<1x26xf32>
    %c0_176 = arith.constant 0 : index
    %c0_177 = arith.constant 0 : index
    %218 = vector.load %arg16[%c0_176, %c0_177] : memref<1x312xf32, #tpu.memory_space<vmem>>, vector<1x26xf32>
    tpu.vector_store %arg16[%c0_176, %c0_177], %217 {strides = array<i32>} : memref<1x312xf32, #tpu.memory_space<vmem>>, vector<1x26xf32>,
    %219 = vector.extract_strided_slice %216 {offsets = [1, 0], sizes = [1, 26], strides = [1, 1]} : vector<12x26xf32> to vector<1x26xf32>
    %c0_178 = arith.constant 0 : index
    %c26 = arith.constant 26 : index
    %220 = vector.load %arg16[%c0_178, %c26] : memref<1x312xf32, #tpu.memory_space<vmem>>, vector<1x26xf32>
    tpu.vector_store %arg16[%c0_178, %c26], %219 {strides = array<i32>} : memref<1x312xf32, #tpu.memory_space<vmem>>, vector<1x26xf32>,
    %221 = vector.extract_strided_slice %216 {offsets = [2, 0], sizes = [1, 26], strides = [1, 1]} : vector<12x26xf32> to vector<1x26xf32>
    %c0_179 = arith.constant 0 : index
    %c52 = arith.constant 52 : index
    %222 = vector.load %arg16[%c0_179, %c52] : memref<1x312xf32, #tpu.memory_space<vmem>>, vector<1x26xf32>
    tpu.vector_store %arg16[%c0_179, %c52], %221 {strides = array<i32>} : memref<1x312xf32, #tpu.memory_space<vmem>>, vector<1x26xf32>,
    %223 = vector.extract_strided_slice %216 {offsets = [3, 0], sizes = [1, 26], strides = [1, 1]} : vector<12x26xf32> to vector<1x26xf32>
    %c0_180 = arith.constant 0 : index
    %c78 = arith.constant 78 : index
    %224 = vector.load %arg16[%c0_180, %c78] : memref<1x312xf32, #tpu.memory_space<vmem>>, vector<1x26xf32>
    tpu.vector_store %arg16[%c0_180, %c78], %223 {strides = array<i32>} : memref<1x312xf32, #tpu.memory_space<vmem>>, vector<1x26xf32>,
    %225 = vector.extract_strided_slice %216 {offsets = [4, 0], sizes = [1, 26], strides = [1, 1]} : vector<12x26xf32> to vector<1x26xf32>
    %c0_181 = arith.constant 0 : index
    %c104 = arith.constant 104 : index
    %226 = vector.load %arg16[%c0_181, %c104] : memref<1x312xf32, #tpu.memory_space<vmem>>, vector<1x26xf32>
    tpu.vector_store %arg16[%c0_181, %c104], %225 {strides = array<i32>} : memref<1x312xf32, #tpu.memory_space<vmem>>, vector<1x26xf32>,
    %227 = vector.extract_strided_slice %216 {offsets = [5, 0], sizes = [1, 26], strides = [1, 1]} : vector<12x26xf32> to vector<1x26xf32>
    %c0_182 = arith.constant 0 : index
    %c130 = arith.constant 130 : index
    %228 = vector.load %arg16[%c0_182, %c130] : memref<1x312xf32, #tpu.memory_space<vmem>>, vector<1x26xf32>
    tpu.vector_store %arg16[%c0_182, %c130], %227 {strides = array<i32>} : memref<1x312xf32, #tpu.memory_space<vmem>>, vector<1x26xf32>,
    %229 = vector.extract_strided_slice %216 {offsets = [6, 0], sizes = [1, 26], strides = [1, 1]} : vector<12x26xf32> to vector<1x26xf32>
    %c0_183 = arith.constant 0 : index
    %c156 = arith.constant 156 : index
    %230 = vector.load %arg16[%c0_183, %c156] : memref<1x312xf32, #tpu.memory_space<vmem>>, vector<1x26xf32>
    tpu.vector_store %arg16[%c0_183, %c156], %229 {strides = array<i32>} : memref<1x312xf32, #tpu.memory_space<vmem>>, vector<1x26xf32>,
    %231 = vector.extract_strided_slice %216 {offsets = [7, 0], sizes = [1, 26], strides = [1, 1]} : vector<12x26xf32> to vector<1x26xf32>
    %c0_184 = arith.constant 0 : index
    %c182 = arith.constant 182 : index
    %232 = vector.load %arg16[%c0_184, %c182] : memref<1x312xf32, #tpu.memory_space<vmem>>, vector<1x26xf32>
    tpu.vector_store %arg16[%c0_184, %c182], %231 {strides = array<i32>} : memref<1x312xf32, #tpu.memory_space<vmem>>, vector<1x26xf32>,
    %233 = vector.extract_strided_slice %216 {offsets = [8, 0], sizes = [1, 26], strides = [1, 1]} : vector<12x26xf32> to vector<1x26xf32>
    %c0_185 = arith.constant 0 : index
    %c208 = arith.constant 208 : index
    %234 = vector.load %arg16[%c0_185, %c208] : memref<1x312xf32, #tpu.memory_space<vmem>>, vector<1x26xf32>
    tpu.vector_store %arg16[%c0_185, %c208], %233 {strides = array<i32>} : memref<1x312xf32, #tpu.memory_space<vmem>>, vector<1x26xf32>,
    %235 = vector.extract_strided_slice %216 {offsets = [9, 0], sizes = [1, 26], strides = [1, 1]} : vector<12x26xf32> to vector<1x26xf32>
    %c0_186 = arith.constant 0 : index
    %c234 = arith.constant 234 : index
    %236 = vector.load %arg16[%c0_186, %c234] : memref<1x312xf32, #tpu.memory_space<vmem>>, vector<1x26xf32>
    tpu.vector_store %arg16[%c0_186, %c234], %235 {strides = array<i32>} : memref<1x312xf32, #tpu.memory_space<vmem>>, vector<1x26xf32>,
    %237 = vector.extract_strided_slice %216 {offsets = [10, 0], sizes = [1, 26], strides = [1, 1]} : vector<12x26xf32> to vector<1x26xf32>
    %c0_187 = arith.constant 0 : index
    %c260 = arith.constant 260 : index
    %238 = vector.load %arg16[%c0_187, %c260] : memref<1x312xf32, #tpu.memory_space<vmem>>, vector<1x26xf32>
    tpu.vector_store %arg16[%c0_187, %c260], %237 {strides = array<i32>} : memref<1x312xf32, #tpu.memory_space<vmem>>, vector<1x26xf32>,
    %239 = vector.extract_strided_slice %216 {offsets = [11, 0], sizes = [1, 26], strides = [1, 1]} : vector<12x26xf32> to vector<1x26xf32>
    %c0_188 = arith.constant 0 : index
    %c286 = arith.constant 286 : index
    %240 = vector.load %arg16[%c0_188, %c286] : memref<1x312xf32, #tpu.memory_space<vmem>>, vector<1x26xf32>
    tpu.vector_store %arg16[%c0_188, %c286], %239 {strides = array<i32>} : memref<1x312xf32, #tpu.memory_space<vmem>>, vector<1x26xf32>,
    %c0_189 = arith.constant 0 : index
    %c0_190 = arith.constant 0 : index
    %241 = vector.load %arg16[%c0_189, %c0_190] : memref<1x312xf32, #tpu.memory_space<vmem>>, vector<1x312xf32>
    %c0_191 = arith.constant 0 : index
    %c0_192 = arith.constant 0 : index
    %242 = vector.load %arg11[%c0_191, %c0_192] : memref<312x9xf32, #tpu.memory_space<vmem>>, vector<312x9xf32>
    %cst_193 = arith.constant dense<0.000000e+00> : vector<1x9xf32>
    %243 = tpu.matmul %241, %242, %cst_193 {dimension_numbers = #tpu.dot_dimension_numbers<[1], [0], [0], [1], [0, 0, 1, 1], [], []>} : vector<1x312xf32>, vector<312x9xf32>, vector<1x9xf32> -> vector<1x9xf32>
    %c0_194 = arith.constant 0 : index
    %c0_195 = arith.constant 0 : index
    %244 = vector.load %arg12[%c0_194, %c0_195] : memref<1x9xf32, #tpu.memory_space<vmem>>, vector<1x9xf32>
    %245 = arith.addf %243, %244 : vector<1x9xf32>
    %c0_196 = arith.constant 0 : index
    %c0_197 = arith.constant 0 : index
    %c0_198 = arith.constant 0 : index
    %246 = vector.load %arg13[%c0_196, %c0_197, %c0_198] : memref<1x1x9xf32, #tpu.memory_space<vmem>>, vector<1x1x9xf32>
    %247 = vector.shape_cast %246 : vector<1x1x9xf32> to vector<1x9xf32>
    %248 = vector.shape_cast %245 : vector<1x9xf32> to vector<1x1x9xf32>
    tpu.vector_store %arg13[%c0_196, %c0_197, %c0_198], %248 {strides = array<i32>} : memref<1x1x9xf32, #tpu.memory_space<vmem>>, vector<1x1x9xf32>,
    return
  }
  func.func @transform_0(%arg0: i32) -> (i32, i32, i32) {
    %c0_i32 = arith.constant 0 : i32
    %c0_i32_0 = arith.constant 0 : i32
    %c0_i32_1 = arith.constant 0 : i32
    return %arg0, %c0_i32, %c0_i32_0 : i32, i32, i32
  }
  func.func @transform_1(%arg0: i32) -> i32 {
    %c0_i32 = arith.constant 0 : i32
    %c0_i32_0 = arith.constant 0 : i32
    return %c0_i32 : i32
  }
  func.func @transform_2(%arg0: i32) -> (i32, i32, i32) {
    %c0_i32 = arith.constant 0 : i32
    %c0_i32_0 = arith.constant 0 : i32
    %c0_i32_1 = arith.constant 0 : i32
    %c0_i32_2 = arith.constant 0 : i32
    return %c0_i32, %c0_i32_0, %c0_i32_1 : i32, i32, i32
  }
  func.func @transform_3(%arg0: i32) -> (i32, i32, i32) {
    %c0_i32 = arith.constant 0 : i32
    %c0_i32_0 = arith.constant 0 : i32
    %c0_i32_1 = arith.constant 0 : i32
    %c0_i32_2 = arith.constant 0 : i32
    return %c0_i32, %c0_i32_0, %c0_i32_1 : i32, i32, i32
  }
  func.func @transform_4(%arg0: i32) -> (i32, i32, i32) {
    %c0_i32 = arith.constant 0 : i32
    %c0_i32_0 = arith.constant 0 : i32
    %c0_i32_1 = arith.constant 0 : i32
    %c0_i32_2 = arith.constant 0 : i32
    return %c0_i32, %c0_i32_0, %c0_i32_1 : i32, i32, i32
  }
  func.func @transform_5(%arg0: i32) -> (i32, i32, i32) {
    %c0_i32 = arith.constant 0 : i32
    %c0_i32_0 = arith.constant 0 : i32
    %c0_i32_1 = arith.constant 0 : i32
    %c0_i32_2 = arith.constant 0 : i32
    return %c0_i32, %c0_i32_0, %c0_i32_1 : i32, i32, i32
  }
  func.func @transform_6(%arg0: i32) -> (i32, i32, i32) {
    %c0_i32 = arith.constant 0 : i32
    %c0_i32_0 = arith.constant 0 : i32
    %c0_i32_1 = arith.constant 0 : i32
    %c0_i32_2 = arith.constant 0 : i32
    return %c0_i32, %c0_i32_0, %c0_i32_1 : i32, i32, i32
  }
  func.func @transform_7(%arg0: i32) -> (i32, i32, i32) {
    %c0_i32 = arith.constant 0 : i32
    %c0_i32_0 = arith.constant 0 : i32
    %c0_i32_1 = arith.constant 0 : i32
    %c0_i32_2 = arith.constant 0 : i32
    return %c0_i32, %c0_i32_0, %c0_i32_1 : i32, i32, i32
  }
  func.func @transform_8(%arg0: i32) -> (i32, i32) {
    %c0_i32 = arith.constant 0 : i32
    %c0_i32_0 = arith.constant 0 : i32
    %c0_i32_1 = arith.constant 0 : i32
    return %c0_i32, %c0_i32_0 : i32, i32
  }
  func.func @transform_9(%arg0: i32) -> (i32, i32) {
    %c0_i32 = arith.constant 0 : i32
    %c0_i32_0 = arith.constant 0 : i32
    %c0_i32_1 = arith.constant 0 : i32
    return %c0_i32, %c0_i32_0 : i32, i32
  }
  func.func @transform_10(%arg0: i32) -> (i32, i32) {
    %c0_i32 = arith.constant 0 : i32
    %c0_i32_0 = arith.constant 0 : i32
    %c0_i32_1 = arith.constant 0 : i32
    return %c0_i32, %c0_i32_0 : i32, i32
  }
  func.func @transform_11(%arg0: i32) -> (i32, i32) {
    %c0_i32 = arith.constant 0 : i32
    %c0_i32_0 = arith.constant 0 : i32
    %c0_i32_1 = arith.constant 0 : i32
    return %c0_i32, %c0_i32_0 : i32, i32
  }
  func.func @transform_12(%arg0: i32) -> (i32, i32, i32) {
    %c0_i32 = arith.constant 0 : i32
    %c0_i32_0 = arith.constant 0 : i32
    %c0_i32_1 = arith.constant 0 : i32
    return %arg0, %c0_i32, %c0_i32_0 : i32, i32, i32
  }
}

</mosaic_0001>

<bundles_post_ra>
// kernel: sepconv_forward.1
= control target key start
LH: loop header
LB: loop body
LE: loop exit
PB: predicated region body
PF: predicated region fallthrough
CT: control target
= control target key end

     0   :  { %s11768_s0 = inlined_call_operand.hbm [shape: f32[2,224,224], index: 0, kind: input, shape index: {}]   ;;  %s11769_s1 = inlined_call_operand.vmem [shape: f32[6], index: 1, kind: input, shape index: {}]   ;;  %s11770_s2 = inlined_call_operand.vmem [shape: bf16[7,110,224], index: 2, kind: input, shape index: {}]   ;;  %s11771_s3 = inlined_call_operand.hbm [shape: bf16[5,108,110], index: 3, kind: input, shape index: {}]   ;;  %s11772_s4 = inlined_call_operand.hbm [shape: bf16[3,54,108], index: 4, kind: input, shape index: {}]   ;;  %s11773_s5 = inlined_call_operand.vmem [shape: bf16[7,25,54], index: 5, kind: input, shape index: {}]   ;;  %s11774_s6 = inlined_call_operand.hbm [shape: bf16[5,23,25], index: 6, kind: input, shape index: {}]   ;;  %s11775_s7 = inlined_call_operand.hbm [shape: bf16[3,12,23], index: 7, kind: input, shape index: {}]   ;;  %s11776_s8 = inlined_call_operand.vmem [shape: f32[218,32], index: 8, kind: input, shape index: {}]   ;;  %s11777_s9 = inlined_call_operand.vmem [shape: f32[1,32], index: 9, kind: input, shape index: {}]   ;;  %s11778_s10 = inlined_call_operand.vmem [shape: f32[312,9], index: 10, kind: input, shape index: {}]   ;;  %s11779_s11 = inlined_call_operand.vmem [shape: f32[1,9], index: 11, kind: input, shape index: {}]   ;;  %s11780_s12 = inlined_call_operand.hbm [shape: f32[2,1,9], index: 12, kind: output, shape index: {}]  }
   0x1   :  { %11813 = sst [smem:[#allocation42_spill]] %s11769_s1 }
   0x2   :  { %11814 = sst [smem:[#allocation43_spill]] %s11771_s3 }
   0x3   :  { %11815 = sst [smem:[#allocation44_spill]] %s11772_s4 }
   0x4   :  { %11816 = sst [smem:[#allocation45_spill]] %s11774_s6 }
   0x5   :  { %11817 = sst [smem:[#allocation46_spill]] %s11775_s7 }
   0x6   :  { %17 = vsyncpa [#allocation6], 0 }
   0x7   :  { %19 = vsyncpa [#allocation6 + $0x1], 0 }
   0x8   :  { %20 = vsyncpa [#allocation8], 0 }
   0x9   :  { %21 = vsyncpa [#allocation11], 0 }
   0xa   :  { %22 = vsyncpa [#allocation14], 0 }
   0xb   :  { %23 = vsyncpa [#allocation7], 0 }
   0xc   :  { %25 = vsyncpa [#allocation7 + $0x1], 0  ;;  %s8440_s21 = smov 0   ;;  %s8442_s22 = smov 0  }
   0xd   :  { %s8444_s23 = smov 0   ;;  %s8446_s24 = smov 0  }
   0xe LB: > { %11818 = sst [smem:[#allocation22_spill]] %s8342_s23  ;;  %s8464_s28 = sadd.s32 4294967295, %s8346_s24   ;;  %s8346_s24 = sphi %s8446_s24, %s11931_s24   ;;  %s8342_s23 = sphi %s8444_s23, %s11933_s23   ;;  %s8338_s22 = sphi %s8442_s22, %s11935_s22   ;;  %s8334_s21 = sphi %s8440_s21, %s11934_s21  }
   0xf   : > { %11819 = sst [smem:[#allocation23_spill]] %s8346_s24  ;;  %p6663_p0 = scmp.ge.s32.totalorder %s8346_s24, 1 }
  0x10   : > { %s11820_s3 = sld [smem:[#allocation43_spill]]  ;;  %p52_p1 = scmp.eq.s32.totalorder %s8464_s28, 0 }
  0x11   : > { %p319_p2 = scmp.lt.s32.totalorder %s8346_s24, 3  ;;  %s8348_s30 = smov [#allocation10]  }
  0x12   : > { %s345_s13 = sshll.u32 %s8348_s30, 4  ;;  %s11822_s6 = sld [smem:[#allocation45_spill]]  ;;  %s346_s13 = int_to_ptr.vmem [resolvable:$true] %s345_s13 }
  0x13   : > { %p8469_p3 = pnand %p6663_p0, %p319_p2  ;;  %s11824_s1 = sld [smem:[#allocation42_spill]] }
  0x14   : > { %s8349_s25 = smov [#allocation13]   ;;  %s8350_s30 = smov 64  }
  0x15   : > { %p8007_p4 = pneg %p8469_p3  ;;  %s376_s26 = sshll.u32 %s8349_s25, 4  ;;  %s377_s26 = int_to_ptr.vmem [resolvable:$true] %s376_s26 }
  0x16   : > { %s343_s27 = sshll.u32 %s11820_s3, 4  ;;  %s8351_s3 = smov 4   ;;  %s344_s27 = int_to_ptr.hbm [resolvable:$true] %s343_s27 }
  0x17   : > { %p8481_p6 = pnand %p8007_p4, %p52_p1  ;;  %s11825_s4 = sld [smem:[#allocation44_spill]] }
  0x18   : > { %s374_s16 = sshll.u32 %s11822_s6, 4  ;;  %s8352_s18 = smov [#allocation9]   ;;  %s375_s16 = int_to_ptr.hbm [resolvable:$true] %s374_s16 }
  0x19   : > { %s331_s20 = sshll.u32 %s11824_s1, 4  ;;  %s11826_s7 = sld [smem:[#allocation46_spill]]  ;;  %s332_s20 = int_to_ptr.vmem [resolvable:$true] %s331_s20 }
  0x1a   : > { %8013 = dma.hbm_to_vmem [thread:$0]  (!%p8481_p6), %s344_s27, 4480, %s346_s13, [#allocation11], %s8350_s30, %s8350_s30, %s8351_s3  }
  0x1b   : > { %8019 = dma.hbm_to_vmem [thread:$0]  (!%p8481_p6), %s375_s16, 960, %s377_s26, [#allocation14], %s8350_s30, %s8350_s30, %s8351_s3  }
  0x1c   : > { %8010 = dma.vmem_to_smem (!%p8481_p6), %s332_s20, 16, %s8352_s18, [#allocation8]  }
  0x1d   : > { %s357_s6 = sshll.u32 %s11825_s4, 4  ;;  %s8353_s27 = smov [#allocation12]   ;;  %s358_s6 = int_to_ptr.hbm [resolvable:$true] %s357_s6 }
  0x1e   : > { %s359_s13 = sshll.u32 %s8353_s27, 4  ;;  %s8354_s20 = smov [#allocation15]   ;;  %s360_s13 = int_to_ptr.vmem [resolvable:$true] %s359_s13 }
  0x1f   : > { %s388_s16 = sshll.u32 %s11826_s7, 4  ;;  %s390_s26 = sshll.u32 %s8354_s20, 4  ;;  %s389_s16 = int_to_ptr.hbm [resolvable:$true] %s388_s16  ;;  %s391_s26 = int_to_ptr.vmem [resolvable:$true] %s390_s26 }
  0x20   : > { %8016 = dma.hbm_to_vmem [thread:$0]  (!%p8481_p6), %s358_s6, 1344, %s360_s13, [#allocation11], %s8350_s30, %s8350_s30, %s8351_s3  }
  0x21   : > { %8022 = dma.hbm_to_vmem [thread:$0]  (!%p8481_p6), %s389_s16, 384, %s391_s26, [#allocation14], %s8350_s30, %s8350_s30, %s8351_s3  }
  0x22   : > { %s6662_s14 = sadd.s32 4294967294, %s8346_s24   ;;  %s8506_s15 = sadd.s32 1, %s8346_s24  }
  0x23   : > { %11827 = sst [smem:[#allocation24_spill]] %s8506_s15  ;;  %s38_s18 = sadd.s32 1, %s8342_s23 }
  0x24   : > { %s35_s27 = ssub.s32 %s8346_s24, %s8506_s15  ;;  %p45_p7 = scmp.ne.s32.totalorder %s8342_s23, %s8338_s22 }
  0x25   : > { %p36_p8 = scmp.eq.s32.totalorder %s35_s27, 0  ;;  %p46_p9 = scmp.eq.s32.totalorder %s8346_s24, 0 }
  0x26   : > { %p51_p10 = scmp.ne.s32.totalorder %s8338_s22, %s8334_s21  ;;  %p306_p11 = scmp.eq.s32.totalorder %s8464_s28, 1 }
  0x27   : > { %s8518_s6 = scalar_select %p36_p8, %s8342_s23, %s38_s18  }
  0x28   : > { %p47_p12 = por %p46_p9, %p45_p7  ;;  %p8522_p13 = por %p52_p1, %p51_p10 }
  0x29   : > { %11828 = sst [smem:[#allocation25_spill]] %s8518_s6  ;;  %p8526_p0 = por %p306_p11, %p45_p7 }
  0x2a   : > { %p312_p2 = scmp.eq.s32.totalorder %s6662_s14, 1  ;;  %p8036_p4 = scmp.lt.s32.totalorder %s8346_s24, 2 }
  0x2b   : > { %s416_s30 = sand.u32 1, %s8342_s23   ;;  %s7981_s16 = smul.u32 448, %s8346_s24 }
  0x2c   : > { %p8532_p6 = por %p312_p2, %p51_p10  ;;  %s7980_s19 = smul.u32 448, %s416_s30 }
  0x2d   : > { %p8536_p8 = pnand %p8036_p4, %p47_p12  ;;  %s425_s18 = scalar_lea.hbm %s11768_s0, %s7981_s16 }
  0x2e   : > { %s420_s27 = scalar_lea.vmem [#allocation5], %s7980_s19  ;;  %s426_s14 = sshll.u32 %s425_s18, 4  ;;  %s427_s14 = int_to_ptr.hbm [resolvable:$true] %s426_s14 }
  0x2f   : > { %s428_s1 = sshll.u32 %s420_s27, 4  ;;  %s417_s4 = scalar_lea.sflag [#allocation6], %s416_s30  ;;  %s429_s1 = int_to_ptr.vmem [resolvable:$true] %s428_s1 }
  0x30   : > { %s8238_s7 = sshra.s32 %s427_s14, 4  ;;  %p8242_p9 = pneg %p8536_p8  ;;  %s8239_s7 = int_to_ptr.hbm [resolvable:$true] %s8238_s7 }
  0x31   : > { %s8240_s6 = scalar_lea.hbm %s8239_s7, 448  ;;  %s8245_s24 = scalar_lea.hbm %s11768_s0, 896 }
  0x32   : > { %p8241_p7 = scmp.ne.s32.totalorder %s8239_s7, %s8240_s6  ;;  %p8246_p12 = scmp.lt.s32.totalorder %s8239_s7, %s11768_s0 }
  0x33   : > { %p8247_p2 = scmp.lt.s32.totalorder %s8245_s24, %s8240_s6 }
  0x34   : > { %p8243_p10 = pnand %p8242_p9, %p8241_p7 }
  0x35   : > { %p8248_p4 = por %p8247_p2, %p8246_p12 }
  0x36   : > { %p8244_p11 = pneg %p8243_p10 }
  0x38   : > { %p8249_p5 = pnand %p8248_p4, %p8244_p11 }
  0x3a   : > { %8252 = shalt.err (!%p8249_p5)
}
  0x3b   : > { %s8355_s30 = smov 256   ;;  %s8356_s19 = smov 16  }
  0x3c   : > { %8026 = dma.hbm_to_vmem [thread:$0]  (!%p8536_p8), %s427_s14, 7168, %s429_s1, %s417_s4, %s8355_s30, %s8355_s30, %s8356_s19  }
  0x3d   : > { %440 = sbr.rel (%p8469_p3) target bundleno = 3555 (0xde3), region = 68 }
  0x42   : > { %s8557_s23 = sand.u32 1, %s8338_s22  }
  0x43   : > { %s7982_s15 = smul.u32 448, %s8557_s23  ;;  %s443_s7 = scalar_lea.sflag [#allocation6], %s8557_s23 }
  0x45   : > { %s8561_s24 = scalar_lea.vmem [#allocation5], %s7982_s15 }
  0x46   : > { %8313 = dma.done.wait (%p8522_p13), %s443_s7, 7168  }
  0x47   : > { %8315 = vsyncadd (%p8522_p13), %s443_s7, 4294960128 }
  0x48   : > { %8317 = dma.done.wait (%p52_p1), [#allocation8], 16  }
  0x49   : > { %8319 = vsyncadd (%p52_p1), [#allocation8], 4294967280 }
  0x4a   : > { %8321 = dma.done.wait (%p52_p1), [#allocation11], 5824  }
  0x4b   : > { %8323 = vsyncadd (%p52_p1), [#allocation11], 4294961472 }
  0x4c   : > { %8325 = dma.done.wait (%p52_p1), [#allocation14], 1344  }
  0x4d   : > { %8327 = vsyncadd (%p52_p1), [#allocation14], 4294965952 }
  0x4e   : > { %477 = sfence }
  0x4f   : > { %v559_v0 = vld [vmem:[%s8561_s24 + $0xe8] sm:$0xff]  ;;  %v561_v1 = vld [vmem:[%s8561_s24 + $0xf8] sm:$0xff]  ;;  %v558_v2 = vld [vmem:[%s8561_s24 + $0xe0] sm:$0xff]  ;;  %s8357_s1 = smov 127   ;;  %s8358_s4 = smov 126   ;;  %vm776_vm0 = vcmask 1039360  }
  0x50   : > { %v8582_v3 = vpack.c.bf16 %v561_v1, %v559_v0  ;;  %v560_v4 = vld [vmem:[%s8561_s24 + $0xf0] sm:$0xff]  ;;  %v554_v6 = vld [vmem:[%s8561_s24 + $0xc0] sm:$0xff]  ;;  %v555_v8 = vld [vmem:[%s8561_s24 + $0xc8] sm:$0xff]  ;;  %vm819_vm1 = vcmask 785408   ;;  %s8359_s18 = smov 125   ;;  %vm1411_vm2 = vcmask 1031168  }
  0x51   : > { %v8585_v5 = vpack.c.bf16 %v560_v4, %v558_v2  ;;  %v556_v7 = vld [vmem:[%s8561_s24 + $0xd0] sm:$0xff]  ;;  %v557_v9 = vld [vmem:[%s8561_s24 + $0xd8] sm:$0xff]  ;;  %v551_v11 = vld [vmem:[%s8561_s24 + $0xa8] sm:$0xff]  ;;  %s8360_s6 = smov 124   ;;  %vm1813_vm3 = vcmask 1022976   ;;  %vm2215_vm4 = vcmask 1014784  }
  0x52   : > { %750 = vrot.lane.b32.xlu0 %v8582_v3, %s8357_s1  ;;  %v8595_v10 = vpack.c.bf16 %v556_v7, %v554_v6  ;;  %v553_v12 = vld [vmem:[%s8561_s24 + $0xb8] sm:$0xff]  ;;  %v8601_v13 = vpack.c.bf16 %v557_v9, %v555_v8  ;;  %v583_v14 = vld [vmem:[%s8561_s24 + $0x1a8] sm:$0xff]  ;;  %v550_v20 = vld [vmem:[%s8561_s24 + $0xa0] sm:$0xff]  ;;  %s8361_s27 = smov 123   ;;  %vm3060_vm5 = vcmask 1006592   ;;  %s8362_s19 = smov 1  }
  0x53   : > { %748 = vrot.lane.b32.xlu1 %v8585_v5, %s8357_s1  ;;  %v585_v15 = vld [vmem:[%s8561_s24 + $0x1b8] sm:$0xff]  ;;  %v8605_v16 = vpack.c.bf16 %v553_v12, %v551_v11  ;;  %v547_v18 = vld [vmem:[%s8561_s24 + $0x88] sm:$0xff]  ;;  %v552_v21 = vld [vmem:[%s8561_s24 + $0xb0] sm:$0xff]  ;;  %s514_s25 = sld [smem:[#allocation9]]  ;;  %vm3300_vm6 = vcmask 744448   ;;  %vm2841_vm7 = vcmask 7168  }
  0x54   : > { %744 = vrot.lane.b32.xlu2 %v8595_v10, %s8357_s1  ;;  %v8607_v17 = vpack.c.bf16 %v585_v15, %v583_v14  ;;  %v549_v19 = vld [vmem:[%s8561_s24 + $0x98] sm:$0xff]  ;;  %v579_v23 = vld [vmem:[%s8561_s24 + $0x188] sm:$0xff]  ;;  %v8623_v25 = vpack.c.bf16 %v552_v21, %v550_v20  ;;  %v582_v27 = vld [vmem:[%s8561_s24 + $0x1a0] sm:$0xff]  ;;  %vm3414_vm8 = vcmask 1043456   ;;  %vm3415_vm9 = vcmask 752644   ;;  %s7251_s26 = sld [smem:[#allocation9 + $0x1]] }
  0x55   : > { %v8619_v22 = vpack.c.bf16 %v549_v19, %v547_v18  ;;  %v581_v24 = vld [vmem:[%s8561_s24 + $0x198] sm:$0xff]  ;;  %v584_v28 = vld [vmem:[%s8561_s24 + $0x1b0] sm:$0xff]  ;;  %v543_v29 = vld [vmem:[%s8561_s24 + $0x68] sm:$0xff]  ;;  %vm3430_vm11 = vcmask 1042432   ;;  %vm3431_vm12 = vcmask 751620   ;;  %vm3639_vm14 = vcmask 1046528  }
  0x56   : > { %v8625_v26 = vpack.c.bf16 %v581_v24, %v579_v23  ;;  %v545_v30 = vld [vmem:[%s8561_s24 + $0x78] sm:$0xff]  ;;  %v8637_v31 = vpack.c.bf16 %v584_v28, %v582_v27  ;;  %v546_v32 = vld [vmem:[%s8561_s24 + $0x80] sm:$0xff]  ;;  %v548_v33 = vld [vmem:[%s8561_s24 + $0x90] sm:$0xff]  ;;  %vm3617_vm15 = vcmask 900096   ;;  %s7518_s20 = sld [smem:[#allocation9 + $0x2]]  ;;  %s8366_s17 = smov 78  }
  0x57   : > { %11833 = vst [vmem:[#allocation26_spill] sm:$0xff] %v8619_v22  ;;  %v8641_v34 = vpack.c.bf16 %v545_v30, %v543_v29  ;;  %v8643_v35 = vpack.c.bf16 %v548_v33, %v546_v32  ;;  %v575_v36 = vld [vmem:[%s8561_s24 + $0x168] sm:$0xff]  ;;  %v577_v37 = vld [vmem:[%s8561_s24 + $0x178] sm:$0xff]  ;;  %v578_v38 = vld [vmem:[%s8561_s24 + $0x180] sm:$0xff]  ;;  %s7643_s29 = sld [smem:[#allocation9 + $0x3]]  ;;  %s8369_s14 = smov 28  }
  0x58   : > { %v580_v39 = vld [vmem:[%s8561_s24 + $0x190] sm:$0xff]  ;;  %v8655_v40 = vpack.c.bf16 %v577_v37, %v575_v36  ;;  %v539_v41 = vld [vmem:[%s8561_s24 + $0x48] sm:$0xff]  ;;  %v541_v42 = vld [vmem:[%s8561_s24 + $0x58] sm:$0xff]  ;;  %s8371_s16 = smov 80   ;;  %s8372_s30 = smov 106  }
  0x59   : > { %11834 = vst [vmem:[#allocation27_spill] sm:$0xff] %v8641_v34  ;;  %v8659_v43 = vpack.c.bf16 %v580_v39, %v578_v38  ;;  %v8661_v44 = vpack.c.bf16 %v541_v42, %v539_v41  ;;  %v542_v45 = vld [vmem:[%s8561_s24 + $0x60] sm:$0xff]  ;;  %v544_v46 = vld [vmem:[%s8561_s24 + $0x70] sm:$0xff]  ;;  %v571_v47 = vld [vmem:[%s8561_s24 + $0x148] sm:$0xff]  ;;  %s8373_s15 = smov 4   ;;  %s6534_s7 = scalar_lea.sflag [#allocation7], %s8557_s23 }
  0x5a   : > { %746 = vrot.lane.b32.xlu0 %v8601_v13, %s8357_s1  ;;  %v573_v48 = vld [vmem:[%s8561_s24 + $0x158] sm:$0xff]  ;;  %v8673_v49 = vpack.c.bf16 %v544_v46, %v542_v45  ;;  %v574_v50 = vld [vmem:[%s8561_s24 + $0x160] sm:$0xff]  ;;  %v576_v51 = vld [vmem:[%s8561_s24 + $0x170] sm:$0xff] }
  0x5b   : > { %742 = vrot.lane.b32.xlu1 %v8605_v16, %s8357_s1  ;;  %11835 = vst [vmem:[#allocation28_spill] sm:$0xff] %v8661_v44  ;;  %v8677_v52 = vpack.c.bf16 %v573_v48, %v571_v47  ;;  %v8679_v53 = vpack.c.bf16 %v576_v51, %v574_v50  ;;  %v535_v54 = vld [vmem:[%s8561_s24 + $0x28] sm:$0xff]  ;;  %v537_v55 = vld [vmem:[%s8561_s24 + $0x38] sm:$0xff]  ;;  %v538_v56 = vld [vmem:[%s8561_s24 + $0x40] sm:$0xff] }
  0x5c   : > { %774 = vrot.lane.b32.xlu2 %v8607_v17, %s8357_s1  ;;  %11836 = vst [vmem:[#allocation29_spill] sm:$0xff] %v8673_v49  ;;  %v540_v57 = vld [vmem:[%s8561_s24 + $0x50] sm:$0xff]  ;;  %v8691_v58 = vpack.c.bf16 %v537_v55, %v535_v54  ;;  %v567_v59 = vld [vmem:[%s8561_s24 + $0x128] sm:$0xff]  ;;  %v569_v60 = vld [vmem:[%s8561_s24 + $0x138] sm:$0xff] }
  0x5d   : > { %11837 = vst [vmem:[#allocation30_spill] sm:$0xff] %v8677_v52  ;;  %v8695_v61 = vpack.c.bf16 %v540_v57, %v538_v56  ;;  %v8697_v62 = vpack.c.bf16 %v569_v60, %v567_v59  ;;  %v570_v63 = vld [vmem:[%s8561_s24 + $0x140] sm:$0xff]  ;;  %v572_v0 = vld [vmem:[%s8561_s24 + $0x150] sm:$0xff]  ;;  %v531_v1 = vld [vmem:[%s8561_s24 + $0x8] sm:$0xff] }
  0x5e   : > { %11838 = vst [vmem:[#allocation31_spill] sm:$0xff] %v8691_v58  ;;  %v533_v2 = vld [vmem:[%s8561_s24 + $0x18] sm:$0xff]  ;;  %v8709_v4 = vpack.c.bf16 %v572_v0, %v570_v63  ;;  %v534_v6 = vld [vmem:[%s8561_s24 + $0x20] sm:$0xff]  ;;  %v536_v7 = vld [vmem:[%s8561_s24 + $0x30] sm:$0xff] }
  0x5f   : > { %11839 = vst [vmem:[#allocation32_spill] sm:$0xff] %v8695_v61  ;;  %v8713_v8 = vpack.c.bf16 %v533_v2, %v531_v1  ;;  %v8715_v9 = vpack.c.bf16 %v536_v7, %v534_v6  ;;  %v563_v11 = vld [vmem:[%s8561_s24 + $0x108] sm:$0xff]  ;;  %v565_v12 = vld [vmem:[%s8561_s24 + $0x118] sm:$0xff]  ;;  %v566_v14 = vld [vmem:[%s8561_s24 + $0x120] sm:$0xff] }
  0x60   : > { %11840 = vst [vmem:[#allocation33_spill] sm:$0xff] %v8697_v62  ;;  %v568_v15 = vld [vmem:[%s8561_s24 + $0x130] sm:$0xff]  ;;  %v8727_v18 = vpack.c.bf16 %v565_v12, %v563_v11  ;;  %v530_v19 = vld [vmem:[%s8561_s24] sm:$0xff]  ;;  %vm10295_vm10 = vmor %vm3415_vm9, %vm3414_vm8  ;;  %vm4936_vm9 = vcmask 1045504  }
  0x61   : > { %11841 = vst [vmem:[#allocation34_spill] sm:$0xff] %v8713_v8  ;;  %v532_v20 = vld [vmem:[%s8561_s24 + $0x10] sm:$0xff]  ;;  %v8731_v21 = vpack.c.bf16 %v568_v15, %v566_v14  ;;  %v562_v24 = vld [vmem:[%s8561_s24 + $0x100] sm:$0xff]  ;;  %vm3432_vm13 = vmor %vm3431_vm12, %vm3430_vm11  ;;  %vm5542_vm12 = vcmask 441344  }
  0x62   : > { %738 = vrot.lane.b32.xlu0 %v8619_v22, %s8357_s1  ;;  %11842 = vst [vmem:[#allocation35_spill] sm:$0xff] %v8715_v9  ;;  %v8733_v23 = vpack.c.bf16 %v532_v20, %v530_v19  ;;  %v564_v27 = vld [vmem:[%s8561_s24 + $0x110] sm:$0xff]  ;;  %v7803_v20 = vld [vmem:[%s11770_s2 + $0xe4] sm:$0xf0] }
  0x63   : > { %740 = vrot.lane.b32.xlu1 %v8623_v25, %s8357_s1  ;;  %11843 = vst [vmem:[#allocation36_spill] sm:$0xff] %v8727_v18  ;;  %v8743_v28 = vpack.c.bf16 %v564_v27, %v562_v24  ;;  %v6707_v19 = vld [vmem:[%s11770_s2 + $0xe0] sm:$0xf] }
  0x64   : > { %770 = vrot.lane.b32.xlu2 %v8625_v26, %s8357_s1  ;;  %11844 = vst [vmem:[#allocation37_spill] sm:$0xff] %v8731_v21 }
  0x65   : > { %11845 = vst [vmem:[#allocation38_spill] sm:$0xff] %v8733_v23 }
  0x66   : > { %11846 = vst [vmem:[#allocation39_spill] sm:$0xff] %v8743_v28 }
  0x6a   : > { %772 = vrot.lane.b32.xlu0 %v8637_v31, %s8357_s1 }
  0x6b   : > { %734 = vrot.lane.b32.xlu1 %v8641_v34, %s8357_s1 }
  0x6c   : > { %736 = vrot.lane.b32.xlu2 %v8643_v35, %s8357_s1 }
  0x72   : > { %766 = vrot.lane.b32.xlu0 %v8655_v40, %s8357_s1 }
  0x73   : > { %768 = vrot.lane.b32.xlu1 %v8659_v43, %s8357_s1 }
  0x74   : > { %730 = vrot.lane.b32.xlu2 %v8661_v44, %s8357_s1 }
  0x7a   : > { %732 = vrot.lane.b32.xlu0 %v8673_v49, %s8357_s1 }
  0x7b   : > { %762 = vrot.lane.b32.xlu1 %v8677_v52, %s8357_s1 }
  0x7c   : > { %764 = vrot.lane.b32.xlu2 %v8679_v53, %s8357_s1 }
  0x82   : > { %726 = vrot.lane.b32.xlu0 %v8691_v58, %s8357_s1 }
  0x83   : > { %728 = vrot.lane.b32.xlu1 %v8695_v61, %s8357_s1 }
  0x84   : > { %758 = vrot.lane.b32.xlu2 %v8697_v62, %s8357_s1 }
  0x8a   : > { %760 = vrot.lane.b32.xlu0 %v8709_v4, %s8357_s1 }
  0x8b   : > { %722 = vrot.lane.b32.xlu1 %v8713_v8, %s8357_s1 }
  0x8c   : > { %724 = vrot.lane.b32.xlu2 %v8715_v9, %s8357_s1 }
  0x92   : > { %754 = vrot.lane.b32.xlu0 %v8727_v18, %s8357_s1 }
  0x93   : > { %756 = vrot.lane.b32.xlu1 %v8731_v21, %s8357_s1 }
  0x94   : > { %720 = vrot.lane.b32.xlu2 %v8733_v23, %s8357_s1 }
  0x9a   : > { %752 = vrot.lane.b32.xlu0 %v8743_v28, %s8357_s1 }
  0x9b   : > { %1383 = vrot.lane.b32.xlu1 %v8585_v5, %s8358_s4 }
  0x9c   : > { %1385 = vrot.lane.b32.xlu2 %v8582_v3, %s8358_s4 }
  0xa2   : > { %1407 = vrot.lane.b32.xlu0 %v8637_v31, %s8358_s4 }
  0xa3   : > { %1409 = vrot.lane.b32.xlu1 %v8607_v17, %s8358_s4 }
  0xa4   : > { %1379 = vrot.lane.b32.xlu2 %v8595_v10, %s8358_s4 }
  0xaa   : > { %1381 = vrot.lane.b32.xlu0 %v8601_v13, %s8358_s4 }
  0xab   : > { %1403 = vrot.lane.b32.xlu1 %v8659_v43, %s8358_s4 }
  0xac   : > { %1405 = vrot.lane.b32.xlu2 %v8625_v26, %s8358_s4 }
  0xae   : > { %v745_v29 = vpop.permute.xlu2 %744 }
  0xb2   : > { %1375 = vrot.lane.b32.xlu0 %v8623_v25, %s8358_s4 }
  0xb3   : > { %1377 = vrot.lane.b32.xlu1 %v8605_v16, %s8358_s4 }
  0xb4   : > { %1399 = vrot.lane.b32.xlu2 %v8679_v53, %s8358_s4 }
  0xb6   : > { %v775_v30 = vpop.permute.xlu2 %774 }
  0xb7   : > { %975 = vmatpush.bf16.msra.mxu3 %v775_v30 }
  0xba   : > { %1401 = vrot.lane.b32.xlu0 %v8655_v40, %s8358_s4 }
  0xbb   : > { %1371 = vrot.lane.b32.xlu1 %v8643_v35, %s8358_s4 }
  0xbc   : > { %1373 = vrot.lane.b32.xlu2 %v8619_v22, %s8358_s4 }
  0xbe   : > { %v771_v32 = vpop.permute.xlu2 %770 }
  0xbf   : > { %976 = vmatpush.bf16.msra.mxu3 %v771_v32 }
  0xc2   : > { %1395 = vrot.lane.b32.xlu0 %v8709_v4, %s8358_s4 }
  0xc3   : > { %1397 = vrot.lane.b32.xlu1 %v8677_v52, %s8358_s4 }
  0xc4   : > { %v751_v33 = vpop.permute.xlu0 %750  ;;  %1367 = vrot.lane.b32.xlu2 %v8673_v49, %s8358_s4 }
  0xc5   : > { %v749_v36 = vpop.permute.xlu1 %748  ;;  %929 = vmatpush.bf16.msra.mxu2 %v751_v33 }
  0xc6   : > { %v784_v37 = vsel %vm776_vm0, %v749_v36, %v751_v33  ;;  %v737_v38 = vpop.permute.xlu2 %736  ;;  %v7802_v36 = vld [vmem:[%s11770_s2 + $0xe4] sm:$0xf] }
  0xc7   : > { %841 = vmatpush.bf16.msra.mxu0 %v784_v37  ;;  %v6709_v37 = vld [vmem:[%s11770_s2 + $0xe8] sm:$0xf0] }
  0xca   : > { %1369 = vrot.lane.b32.xlu0 %v8641_v34, %s8358_s4 }
  0xcb   : > { %1391 = vrot.lane.b32.xlu1 %v8731_v21, %s8358_s4 }
  0xcc   : > { %v747_v39 = vpop.permute.xlu0 %746  ;;  %1393 = vrot.lane.b32.xlu2 %v8697_v62, %s8358_s4 }
  0xcd   : > { %v743_v41 = vpop.permute.xlu1 %742  ;;  %930 = vmatpush.bf16.msra.mxu2 %v747_v39  ;;  %v783_v42 = vsel %vm776_vm0, %v745_v29, %v747_v39  ;;  %v6712_v39 = vor.u32 %v7802_v36, %v6709_v37  ;;  %v6749_v36 = vld [vmem:[%s11770_s2 + $0x138] sm:$0xf0] }
  0xce   : > { %842 = vmatpush.bf16.msra.mxu0 %v783_v42  ;;  %v731_v45 = vpop.permute.xlu2 %730 }
  0xd1   : > { %931 = vmatpush.bf16.msra.mxu2 %v743_v41 }
  0xd2   : > { %1363 = vrot.lane.b32.xlu0 %v8695_v61, %s8358_s4 }
  0xd3   : > { %1365 = vrot.lane.b32.xlu1 %v8661_v44, %s8358_s4 }
  0xd4   : > { %v739_v46 = vpop.permute.xlu0 %738  ;;  %1387 = vrot.lane.b32.xlu2 %v8743_v28, %s8358_s4 }
  0xd5   : > { %v741_v47 = vpop.permute.xlu1 %740  ;;  %932 = vmatpush.bf16.msra.mxu2 %v739_v46  ;;  %v781_v50 = vsel %vm776_vm0, %v737_v38, %v739_v46  ;;  %v7805_v46 = vld [vmem:[%s11770_s2 + $0xf4] sm:$0xf0] }
  0xd6   : > { %v782_v48 = vsel %vm776_vm0, %v741_v47, %v743_v41  ;;  %v765_v56 = vpop.permute.xlu2 %764 }
  0xd7   : > { %843 = vmatpush.bf16.msra.mxu0 %v782_v48 }
  0xda   : > { %1389 = vrot.lane.b32.xlu0 %v8727_v18, %s8358_s4 }
  0xdb   : > { %844 = vmatpush.bf16.msra.mxu0 %v781_v50  ;;  %1359 = vrot.lane.b32.xlu1 %v8715_v9, %s8358_s4 }
  0xdc   : > { %v773_v51 = vpop.permute.xlu0 %772  ;;  %1361 = vrot.lane.b32.xlu2 %v8691_v58, %s8358_s4 }
  0xdd   : > { %v735_v54 = vpop.permute.xlu1 %734  ;;  %v790_v55 = vsel %vm776_vm0, %v773_v51, %v775_v30  ;;  %v7804_v51 = vld [vmem:[%s11770_s2 + $0xf4] sm:$0xf] }
  0xde   : > { %887 = vmatpush.bf16.msra.mxu1 %v790_v55  ;;  %933 = vmatpush.bf16.msra.mxu2 %v735_v54  ;;  %v759_v63 = vpop.permute.xlu2 %758 }
  0xe2   : > { %934 = vmatpush.bf16.msra.mxu2 %v731_v45  ;;  %1355 = vrot.lane.b32.xlu0 %v8733_v23, %s8358_s4 }
  0xe3   : > { %1357 = vrot.lane.b32.xlu1 %v8713_v8, %s8358_s4 }
  0xe4   : > { %v767_v57 = vpop.permute.xlu0 %766  ;;  %1785 = vrot.lane.b32.xlu2 %v8585_v5, %s8359_s18 }
  0xe5   : > { %v769_v59 = vpop.permute.xlu1 %768  ;;  %977 = vmatpush.bf16.msra.mxu3 %v767_v57  ;;  %v788_v0 = vsel %vm776_vm0, %v765_v56, %v767_v57  ;;  %v6723_v56 = vld [vmem:[%s11770_s2 + $0x100] sm:$0xf]  ;;  %v7807_v57 = vld [vmem:[%s11770_s2 + $0x104] sm:$0xf0] }
  0xe6   : > { %v789_v60 = vsel %vm776_vm0, %v769_v59, %v771_v32  ;;  %v725_v7 = vpop.permute.xlu2 %724  ;;  %v6708_v32 = vor.u32 %v7803_v20, %v6707_v19  ;;  %v6724_v59 = vor.u32 %v7807_v57, %v6723_v56  ;;  %v7810_v20 = vld [vmem:[%s11770_s2 + $0x124] sm:$0xf] }
  0xe7   : > { %888 = vmatpush.bf16.msra.mxu1 %v789_v60  ;;  %v7806_v60 = vld [vmem:[%s11770_s2 + $0x104] sm:$0xf] }
  0xe8   : > { %v7790_v57 = vld [vmem:[%s11770_s2 + $0x84] sm:$0xf] }
  0xea   : > { %1787 = vrot.lane.b32.xlu0 %v8582_v3, %s8359_s18 }
  0xeb   : > { %889 = vmatpush.bf16.msra.mxu1 %v788_v0  ;;  %1809 = vrot.lane.b32.xlu1 %v8637_v31, %s8359_s18 }
  0xec   : > { %v733_v1 = vpop.permute.xlu0 %732  ;;  %1811 = vrot.lane.b32.xlu2 %v8607_v17, %s8359_s18 }
  0xed   : > { %v763_v2 = vpop.permute.xlu1 %762  ;;  %v780_v6 = vsel %vm776_vm0, %v733_v1, %v735_v54  ;;  %v6717_v54 = vld [vmem:[%s11770_s2 + $0xf8] sm:$0xf0]  ;;  %v6731_v1 = vld [vmem:[%s11770_s2 + $0x110] sm:$0xf] }
  0xee   : > { %845 = vmatpush.bf16.msra.mxu0 %v780_v6  ;;  %978 = vmatpush.bf16.msra.mxu3 %v763_v2  ;;  %v721_v24 = vpop.permute.xlu2 %720  ;;  %v6720_v55 = vor.u32 %v7804_v51, %v6717_v54  ;;  %v7789_v51 = vld [vmem:[%s11770_s2 + $0x74] sm:$0xf0] }
  0xf2   : > { %979 = vmatpush.bf16.msra.mxu3 %v759_v63  ;;  %1781 = vrot.lane.b32.xlu0 %v8595_v10, %s8359_s18 }
  0xf3   : > { %1783 = vrot.lane.b32.xlu1 %v8601_v13, %s8359_s18 }
  0xf4   : > { %v727_v11 = vpop.permute.xlu0 %726  ;;  %1805 = vrot.lane.b32.xlu2 %v8659_v43, %s8359_s18 }
  0xf5   : > { %v729_v12 = vpop.permute.xlu1 %728  ;;  %935 = vmatpush.bf16.msra.mxu2 %v727_v11  ;;  %v778_v15 = vsel %vm776_vm0, %v725_v7, %v727_v11  ;;  %v7808_v7 = vld [vmem:[%s11770_s2 + $0x114] sm:$0xf]  ;;  %v6733_v11 = vld [vmem:[%s11770_s2 + $0x118] sm:$0xf0] }
  0xf6   : > { %v779_v14 = vsel %vm776_vm0, %v729_v12, %v731_v45  ;;  %v6715_v45 = vld [vmem:[%s11770_s2 + $0xf0] sm:$0xf]  ;;  %v6736_v12 = vor.u32 %v7808_v7, %v6733_v11 }
  0xf7   : > { %846 = vmatpush.bf16.msra.mxu0 %v779_v14  ;;  %v6716_v50 = vor.u32 %v7805_v46, %v6715_v45  ;;  %v6739_v14 = vld [vmem:[%s11770_s2 + $0x120] sm:$0xf]  ;;  %v6757_v45 = vld [vmem:[%s11770_s2 + $0x148] sm:$0x70] }
  0xfa   : > { %1807 = vrot.lane.b32.xlu0 %v8625_v26, %s8359_s18 }
  0xfb   : > { %847 = vmatpush.bf16.msra.mxu0 %v778_v15  ;;  %1777 = vrot.lane.b32.xlu1 %v8623_v25, %s8359_s18  ;;  %v7811_v15 = vld [vmem:[%s11770_s2 + $0x124] sm:$0xf0] }
  0xfc   : > { %v761_v27 = vpop.permute.xlu0 %760  ;;  %1779 = vrot.lane.b32.xlu2 %v8605_v16, %s8359_s18  ;;  %v6740_v19 = vor.u32 %v7811_v15, %v6739_v14 }
  0xfd   : > { %v723_v29 = vpop.permute.xlu1 %722  ;;  %v787_v30 = vsel %vm776_vm0, %v761_v27, %v763_v2  ;;  %v7809_v2 = vld [vmem:[%s11770_s2 + $0x114] sm:$0xf0] }
  0xfe   : > { %936 = vmatpush.bf16.msra.mxu2 %v723_v29  ;;  %v777_v33 = vsel %vm776_vm0, %v721_v24, %v723_v29  ;;  %890 = vmatpush.bf16.msra.mxu1 %v787_v30  ;;  %v6732_v6 = vor.u32 %v7809_v2, %v6731_v1  ;;  %v6741_v24 = vld [vmem:[%s11770_s2 + $0x128] sm:$0xf0]  ;;  %v6747_v29 = vld [vmem:[%s11770_s2 + $0x130] sm:$0xf]  ;;  %v7813_v30 = vld [vmem:[%s11770_s2 + $0x134] sm:$0xf0] }
  0xff   : > { %848 = vmatpush.bf16.msra.mxu0 %v777_v33  ;;  %v6744_v27 = vor.u32 %v7810_v20, %v6741_v24  ;;  %v7812_v33 = vld [vmem:[%s11770_s2 + $0x134] sm:$0xf] }
 0x100   : > { %v6752_v37 = vor.u32 %v7812_v33, %v6749_v36  ;;  %v7792_v24 = vld [vmem:[%s11770_s2 + $0x94] sm:$0xf]  ;;  %v7793_v33 = vld [vmem:[%s11770_s2 + $0x94] sm:$0xf0] }
 0x101   : > { %937 = vmatmul.bf16.vlgmr.msra.gmra.mxu2 %v6708_v32 }
 0x102   : > { %1235 = vmatpush.bf16.msrb.mxu2 %v8607_v17  ;;  %849 = vmatmul.bf16.vlgmr.msra.gmra.mxu0 %v6708_v32  ;;  %v6748_v32 = vor.u32 %v7813_v30, %v6747_v29 }
 0x103   : > { %1189 = vmatpush.bf16.msrb.mxu0 %v8582_v3  ;;  %1801 = vrot.lane.b32.xlu0 %v8679_v53, %s8359_s18 }
 0x104   : > { %v755_v38 = vpop.permute.xlu0 %754  ;;  %1803 = vrot.lane.b32.xlu1 %v8655_v40, %s8359_s18  ;;  %1773 = vrot.lane.b32.xlu2 %v8643_v35, %s8359_s18 }
 0x105   : > { %v757_v41 = vpop.permute.xlu1 %756  ;;  %980 = vmatpush.bf16.msra.mxu3 %v755_v38 }
 0x106   : > { %1236 = vmatpush.bf16.msrb.mxu2 %v8625_v26  ;;  %v786_v42 = vsel %vm776_vm0, %v757_v41, %v759_v63  ;;  %v6725_v63 = vld [vmem:[%s11770_s2 + $0x108] sm:$0xf0] }
 0x107   : > { %1190 = vmatpush.bf16.msrb.mxu0 %v8601_v13  ;;  %891 = vmatpush.bf16.msra.mxu1 %v786_v42  ;;  %v6728_v0 = vor.u32 %v7806_v60, %v6725_v63  ;;  %v7814_v42 = vld [vmem:[%s11770_s2 + $0x144] sm:$0xf]  ;;  %v6785_v60 = vld [vmem:[%s11770_s2 + $0x80] sm:$0xf]  ;;  %v7791_v63 = vld [vmem:[%s11770_s2 + $0x84] sm:$0xf0] }
 0x108   : > { %6768 = vmatmul.msk.bf16.vlgmr.msra.gmra.mxu3 %vm819_vm1, %v6712_v39  ;;  %v6760_v46 = vor.u32 %v7814_v42, %v6757_v45  ;;  %v6786_v1 = vor.u32 %v7791_v63, %v6785_v60 }
 0x109   : > { %1147 = vmatpush.bf16.msrb.mxu3 %v8637_v31 }
 0x10a   : > { %1237 = vmatpush.bf16.msrb.mxu2 %v8655_v40 }
 0x10b   : > { %1191 = vmatpush.bf16.msrb.mxu0 %v8605_v16  ;;  %1775 = vrot.lane.b32.xlu0 %v8619_v22, %s8359_s18 }
 0x10c   : > { %v753_v47 = vpop.permute.xlu0 %752  ;;  %1797 = vrot.lane.b32.xlu1 %v8709_v4, %s8359_s18  ;;  %1799 = vrot.lane.b32.xlu2 %v8677_v52, %s8359_s18 }
 0x10d   : > { %1148 = vmatpush.bf16.msrb.mxu3 %v8659_v43  ;;  %v785_v48 = vsel %vm776_vm0, %v753_v47, %v755_v38  ;;  %v6755_v38 = vld [vmem:[%s11770_s2 + $0x140] sm:$0xf]  ;;  %v7788_v47 = vld [vmem:[%s11770_s2 + $0x74] sm:$0xf]  ;;  %v1384_v56 = vpop.permute.xlu1 %1383 }
 0x10e   : > { %1238 = vmatpush.bf16.msrb.mxu2 %v8677_v52  ;;  %892 = vmatpush.bf16.msra.mxu1 %v785_v48  ;;  %v6779_v48 = vld [vmem:[%s11770_s2 + $0x78] sm:$0xf0] }
 0x10f   : > { %1192 = vmatpush.bf16.msrb.mxu0 %v8619_v22  ;;  %v6782_v54 = vor.u32 %v7788_v47, %v6779_v48 }
 0x111   : > { %1149 = vmatpush.bf16.msrb.mxu3 %v8679_v53  ;;  %942 = vmatmul.bf16.gmra.mxu2 %v6716_v50 }
 0x112   : > { %1101 = vmatpush.bf16.msrb.mxu1 %v8585_v5  ;;  %1239 = vmatpush.bf16.msrb.mxu2 %v8697_v62 }
 0x113   : > { %1193 = vmatpush.bf16.msrb.mxu0 %v8641_v34  ;;  %6761 = vmatmul.msk.bf16.vlgmr.msra.gmra.mxu1 %vm819_vm1, %v6712_v39  ;;  %v7815_v39 = vld [vmem:[%s11770_s2 + $0x144] sm:$0x70] }
 0x114   : > { %854 = vmatmul.bf16.gmra.mxu0 %v6716_v50  ;;  %1769 = vrot.lane.b32.xlu0 %v8673_v49, %s8359_s18  ;;  %v6756_v41 = vor.u32 %v7815_v39, %v6755_v38  ;;  %v6777_v50 = vld [vmem:[%s11770_s2 + $0x70] sm:$0xf] }
 0x115   : > { %1150 = vmatpush.bf16.msrb.mxu3 %v8709_v4  ;;  %1771 = vrot.lane.b32.xlu1 %v8641_v34, %s8359_s18  ;;  %v1410_v7 = vpop.permute.xlu1 %1409 }
 0x116   : > { %1102 = vmatpush.bf16.msrb.mxu1 %v8595_v10  ;;  %1240 = vmatpush.bf16.msrb.mxu2 %v8727_v18 }
 0x117   : > { %1194 = vmatpush.bf16.msrb.mxu0 %v8661_v44  ;;  %1793 = vrot.lane.b32.xlu2 %v8731_v21, %s8359_s18 }
 0x118   : > { %6769 = vmatmul.msk.bf16.gmra.mxu3 %vm819_vm1, %v6720_v55 }
 0x119   : > { %1151 = vmatpush.bf16.msrb.mxu3 %v8731_v21 }
 0x11a   : > { %1103 = vmatpush.bf16.msrb.mxu1 %v8623_v25  ;;  %1609 = vmatpush.bf16.msra.mxu2 %v1410_v7 }
 0x11b   : > { %1195 = vmatpush.bf16.msrb.mxu0 %v8691_v58 }
 0x11c   : > { %1795 = vrot.lane.b32.xlu0 %v8697_v62, %s8359_s18 }
 0x11d   : > { %1152 = vmatpush.bf16.msrb.mxu3 %v8743_v28  ;;  %1765 = vrot.lane.b32.xlu1 %v8695_v61, %s8359_s18  ;;  %v1404_v29 = vpop.permute.xlu1 %1403 }
 0x11e   : > { %1104 = vmatpush.bf16.msrb.mxu1 %v8643_v35 }
 0x11f   : > { %1196 = vmatpush.bf16.msrb.mxu0 %v8713_v8  ;;  %1767 = vrot.lane.b32.xlu2 %v8661_v44, %s8359_s18 }
 0x121   : > { %947 = vmatmul.bf16.gmra.mxu2 %v6724_v59 }
 0x122   : > { %1105 = vmatpush.bf16.msrb.mxu1 %v8673_v49 }
 0x123   : > { %6762 = vmatmul.msk.bf16.gmra.mxu1 %vm819_vm1, %v6720_v55  ;;  %v6778_v55 = vor.u32 %v7789_v51, %v6777_v50 }
 0x124   : > { %859 = vmatmul.bf16.gmra.mxu0 %v6724_v59  ;;  %1789 = vrot.lane.b32.xlu0 %v8743_v28, %s8359_s18  ;;  %v6787_v59 = vld [vmem:[%s11770_s2 + $0x88] sm:$0xf0] }
 0x125   : > { %1791 = vrot.lane.b32.xlu1 %v8727_v18, %s8359_s18  ;;  %v1378_v48 = vpop.permute.xlu1 %1377 }
 0x126   : > { %1106 = vmatpush.bf16.msrb.mxu1 %v8695_v61 }
 0x127   : > { %1761 = vrot.lane.b32.xlu2 %v8715_v9, %s8359_s18 }
 0x128   : > { %6770 = vmatmul.msk.bf16.gmra.mxu3 %vm819_vm1, %v6728_v0 }
 0x12a   : > { %1107 = vmatpush.bf16.msrb.mxu1 %v8715_v9 }
 0x12c   : > { %1763 = vrot.lane.b32.xlu0 %v8691_v58, %s8359_s18 }
 0x12d   : > { %1757 = vrot.lane.b32.xlu1 %v8733_v23, %s8359_s18 }
 0x12e   : > { %1108 = vmatpush.bf16.msrb.mxu1 %v8733_v23 }
 0x12f   : > { %1759 = vrot.lane.b32.xlu2 %v8713_v8, %s8359_s18 }
 0x131   : > { %952 = vmatmul.bf16.gmra.mxu2 %v6732_v6 }
 0x133   : > { %6763 = vmatmul.msk.bf16.gmra.mxu1 %vm819_vm1, %v6728_v0  ;;  %v6790_v0 = vor.u32 %v7790_v57, %v6787_v59 }
 0x134   : > { %864 = vmatmul.bf16.gmra.mxu0 %v6732_v6  ;;  %v1386_v6 = vpop.permute.xlu2 %1385  ;;  %2187 = vrot.lane.b32.xlu0 %v8585_v5, %s8360_s6 }
 0x135   : > { %1563 = vmatpush.bf16.msra.mxu0 %v1386_v6  ;;  %v1419_v15 = vsel %vm1411_vm2, %v1384_v56, %v1386_v6  ;;  %2189 = vrot.lane.b32.xlu1 %v8582_v3, %s8360_s6  ;;  %v1372_v6 = vpop.permute.xlu1 %1371 }
 0x136   : > { %1475 = vmatpush.bf16.msra.mxu1 %v1419_v15 }
 0x137   : > { %2211 = vrot.lane.b32.xlu2 %v8637_v31, %s8360_s6 }
 0x138   : > { %6771 = vmatmul.msk.bf16.gmra.mxu3 %vm819_vm1, %v6736_v12 }
 0x13c   : > { %v1380_v20 = vpop.permute.xlu2 %1379  ;;  %2213 = vrot.lane.b32.xlu0 %v8607_v17, %s8360_s6 }
 0x13d   : > { %2183 = vrot.lane.b32.xlu1 %v8595_v10, %s8360_s6 }
 0x13f   : > { %2185 = vrot.lane.b32.xlu2 %v8601_v13, %s8360_s6 }
 0x141   : > { %957 = vmatmul.bf16.gmra.mxu2 %v6740_v19 }
 0x143   : > { %6764 = vmatmul.msk.bf16.gmra.mxu1 %vm819_vm1, %v6736_v12  ;;  %v1408_v12 = vpop.permute.xlu0 %1407 }
 0x144   : > { %869 = vmatmul.bf16.gmra.mxu0 %v6740_v19  ;;  %v1425_v14 = vsel %vm1411_vm2, %v1408_v12, %v1410_v7  ;;  %v1406_v47 = vpop.permute.xlu2 %1405  ;;  %2207 = vrot.lane.b32.xlu0 %v8659_v43, %s8360_s6  ;;  %v7795_v12 = vld [vmem:[%s11770_s2 + $0xa4] sm:$0xf0] }
 0x145   : > { %1521 = vmatpush.bf16.msra.mxu3 %v1425_v14  ;;  %1610 = vmatpush.bf16.msra.mxu2 %v1406_v47  ;;  %v1424_v59 = vsel %vm1411_vm2, %v1404_v29, %v1406_v47 }
 0x146   : > { %2209 = vrot.lane.b32.xlu1 %v8625_v26, %s8360_s6 }
 0x147   : > { %2179 = vrot.lane.b32.xlu2 %v8623_v25, %s8360_s6 }
 0x148   : > { %6772 = vmatmul.msk.bf16.gmra.mxu3 %vm819_vm1, %v6744_v27 }
 0x149   : > { %1522 = vmatpush.bf16.msra.mxu3 %v1424_v59 }
 0x14b   : > { %v1382_v38 = vpop.permute.xlu0 %1381 }
 0x14c   : > { %1564 = vmatpush.bf16.msra.mxu0 %v1382_v38  ;;  %v1418_v50 = vsel %vm1411_vm2, %v1380_v20, %v1382_v38  ;;  %2181 = vrot.lane.b32.xlu0 %v8605_v16, %s8360_s6 }
 0x14d   : > { %1476 = vmatpush.bf16.msra.mxu1 %v1418_v50 }
 0x14e   : > { %2203 = vrot.lane.b32.xlu1 %v8679_v53, %s8360_s6 }
 0x14f   : > { %2205 = vrot.lane.b32.xlu2 %v8655_v40, %s8360_s6 }
 0x150   : > { %1565 = vmatpush.bf16.msra.mxu0 %v1378_v48 }
 0x151   : > { %962 = vmatmul.bf16.gmra.mxu2 %v6748_v32 }
 0x153   : > { %6765 = vmatmul.msk.bf16.gmra.mxu1 %vm819_vm1, %v6744_v27  ;;  %v6795_v27 = vld [vmem:[%s11770_s2 + $0x98] sm:$0xf0]  ;;  %v1376_v56 = vpop.permute.xlu0 %1375 }
 0x154   : > { %874 = vmatmul.bf16.gmra.mxu0 %v6748_v32  ;;  %v6793_v32 = vld [vmem:[%s11770_s2 + $0x90] sm:$0xf]  ;;  %v6798_v39 = vor.u32 %v7792_v24, %v6795_v27  ;;  %v1417_v29 = vsel %vm1411_vm2, %v1376_v56, %v1378_v48  ;;  %v7796_v56 = vld [vmem:[%s11770_s2 + $0xb4] sm:$0xf]  ;;  %2175 = vrot.lane.b32.xlu0 %v8643_v35, %s8360_s6 }
 0x155   : > { %v6794_v42 = vor.u32 %v7793_v33, %v6793_v32  ;;  %1477 = vmatpush.bf16.msra.mxu1 %v1417_v29 }
 0x156   : > { %2177 = vrot.lane.b32.xlu1 %v8619_v22, %s8360_s6 }
 0x157   : > { %2199 = vrot.lane.b32.xlu2 %v8709_v4, %s8360_s6 }
 0x158   : > { %6773 = vmatmul.msk.bf16.gmra.mxu3 %vm819_vm1, %v6752_v37 }
 0x15c   : > { %2201 = vrot.lane.b32.xlu0 %v8677_v52, %s8360_s6 }
 0x15e   : > { %2171 = vrot.lane.b32.xlu1 %v8673_v49, %s8360_s6 }
 0x15f   : > { %2173 = vrot.lane.b32.xlu2 %v8641_v34, %s8360_s6 }
 0x161   : > { %967 = vmatmul.bf16.gmra.mxu2 %v6756_v41 }
 0x163   : > { %6766 = vmatmul.msk.bf16.gmra.mxu1 %vm819_vm1, %v6752_v37 }
 0x164   : > { %879 = vmatmul.bf16.gmra.mxu0 %v6756_v41  ;;  %2195 = vrot.lane.b32.xlu0 %v8731_v21, %s8360_s6 }
 0x166   : > { %2197 = vrot.lane.b32.xlu1 %v8697_v62, %s8360_s6 }
 0x167   : > { %2167 = vrot.lane.b32.xlu2 %v8695_v61, %s8360_s6 }
 0x168   : > { %6774 = vmatmul.msk.bf16.gmra.mxu3 %vm819_vm1, %v6760_v46 }
 0x16c   : > { %2169 = vrot.lane.b32.xlu0 %v8661_v44, %s8360_s6 }
 0x16e   : > { %2191 = vrot.lane.b32.xlu1 %v8743_v28, %s8360_s6 }
 0x16f   : > { %2193 = vrot.lane.b32.xlu2 %v8727_v18, %s8360_s6 }
 0x171   : > { %6838 = vmatmul.msk.bf16.vlgmr.msrb.gmra.mxu2 %vm819_vm1, %v6782_v54 }
 0x173   : > { %6767 = vmatmul.msk.bf16.gmra.mxu1 %vm819_vm1, %v6760_v46 }
 0x174   : > { %1197 = vmatmul.bf16.vlgmr.msrb.gmra.mxu0 %v6778_v55  ;;  %2163 = vrot.lane.b32.xlu0 %v8715_v9, %s8360_s6 }
 0x176   : > { %2165 = vrot.lane.b32.xlu1 %v8691_v58, %s8360_s6 }
 0x177   : > { %2159 = vrot.lane.b32.xlu2 %v8733_v23, %s8360_s6 }
 0x178   : > { %6831 = vmatmul.msk.bf16.vlgmr.msrb.gmra.mxu3 %vm819_vm1, %v6782_v54 }
 0x17c   : > { %2161 = vrot.lane.b32.xlu0 %v8713_v8, %s8360_s6 }
 0x17e   : > { %3032 = vrot.lane.b32.xlu1 %v8585_v5, %s8361_s27 }
 0x17f   : > { %v850_v2 = vpop.f32.mrf.mxu0  ;;  %3034 = vrot.lane.b32.xlu2 %v8582_v3, %s8361_s27 }
 0x181   : > { %6839 = vmatmul.msk.bf16.gmra.mxu2 %vm819_vm1, %v6790_v0 }
 0x183   : > { %1109 = vmatmul.bf16.vlgmr.msrb.gmra.mxu1 %v6778_v55 }
 0x184   : > { %1202 = vmatmul.bf16.gmra.mxu0 %v6786_v1  ;;  %v938_v11 = vpop.f32.mrf.mxu2  ;;  %3056 = vrot.lane.b32.xlu0 %v8637_v31, %s8361_s27 }
 0x186   : > { %3058 = vrot.lane.b32.xlu1 %v8607_v17, %s8361_s27 }
 0x187   : > { %v852_v19 = vpop.f32.mrf.mxu0  ;;  %3028 = vrot.lane.b32.xlu2 %v8595_v10, %s8361_s27 }
 0x188   : > { %6832 = vmatmul.msk.bf16.gmra.mxu3 %vm819_vm1, %v6790_v0  ;;  %v1400_v0 = vpop.permute.xlu2 %1399 }
 0x18b   : > { %v982_v30 = vpop.f32.mrf.mxu3 }
 0x18c   : > { %v940_v36 = vpop.f32.mrf.mxu2  ;;  %v9047_v37 = vadd.f32 %v982_v30, %v938_v11  ;;  %v6801_v11 = vld [vmem:[%s11770_s2 + $0xa0] sm:$0xf]  ;;  %3030 = vrot.lane.b32.xlu0 %v8601_v13, %s8361_s27 }
 0x18d   : > { %v6802_v27 = vor.u32 %v7795_v12, %v6801_v11 }
 0x18e   : > { %3052 = vrot.lane.b32.xlu1 %v8659_v43, %s8361_s27 }
 0x18f   : > { %3054 = vrot.lane.b32.xlu2 %v8625_v26, %s8361_s27 }
 0x190   : > { %v894_v41 = vpop.f32.mrf.mxu1  ;;  %v1374_v33 = vpop.permute.xlu2 %1373 }
 0x191   : > { %v855_v45 = vpop.f32.mrf.mxu0  ;;  %v9049_v46 = vadd.f32 %v894_v41, %v850_v2  ;;  %6840 = vmatmul.msk.bf16.gmra.mxu2 %vm819_vm1, %v6798_v39  ;;  %v6803_v2 = vld [vmem:[%s11770_s2 + $0xa8] sm:$0xf0]  ;;  %1566 = vmatpush.bf16.msra.mxu0 %v1374_v33  ;;  %v1416_v48 = vsel %vm1411_vm2, %v1372_v6, %v1374_v33 }
 0x192   : > { %1478 = vmatpush.bf16.msra.mxu1 %v1416_v48 }
 0x193   : > { %1114 = vmatmul.bf16.gmra.mxu1 %v6786_v1  ;;  %v984_v51 = vpop.f32.mrf.mxu3  ;;  %v7794_v1 = vld [vmem:[%s11770_s2 + $0xa4] sm:$0xf] }
 0x194   : > { %1207 = vmatmul.bf16.gmra.mxu0 %v6794_v42  ;;  %v943_v54 = vpop.f32.mrf.mxu2  ;;  %v9055_v55 = vadd.f32 %v984_v51, %v940_v36  ;;  %v6806_v20 = vor.u32 %v7794_v1, %v6803_v2  ;;  %v1398_v36 = vpop.permute.xlu1 %1397  ;;  %v7797_v1 = vld [vmem:[%s11770_s2 + $0xb4] sm:$0xf0]  ;;  %3024 = vrot.lane.b32.xlu0 %v8623_v25, %s8361_s27 }
 0x196   : > { %3026 = vrot.lane.b32.xlu1 %v8605_v16, %s8361_s27 }
 0x197   : > { %3048 = vrot.lane.b32.xlu2 %v8679_v53, %s8361_s27 }
 0x198   : > { %v896_v57 = vpop.f32.mrf.mxu1  ;;  %6833 = vmatmul.msk.bf16.gmra.mxu3 %vm819_vm1, %v6798_v39 }
 0x199   : > { %v857_v60 = vpop.f32.mrf.mxu0  ;;  %v9062_v63 = vadd.f32 %v896_v57, %v852_v19  ;;  %v1402_v19 = vpop.permute.xlu0 %1401  ;;  %v6811_v57 = vld [vmem:[%s11770_s2 + $0xb8] sm:$0xf0] }
 0x19a   : > { %1611 = vmatpush.bf16.msra.mxu2 %v1402_v19  ;;  %v1423_v38 = vsel %vm1411_vm2, %v1400_v0, %v1402_v19  ;;  %v6814_v11 = vor.u32 %v7796_v56, %v6811_v57  ;;  %v7798_v56 = vld [vmem:[%s11770_s2 + $0xc4] sm:$0xf]  ;;  %v6819_v57 = vld [vmem:[%s11770_s2 + $0xc8] sm:$0xf0] }
 0x19b   : > { %v987_v7 = vpop.f32.mrf.mxu3  ;;  %1523 = vmatpush.bf16.msra.mxu3 %v1423_v38 }
 0x19c   : > { %v945_v14 = vpop.f32.mrf.mxu2  ;;  %v9079_v15 = vadd.f32 %v987_v7, %v943_v54  ;;  %v1368_v54 = vpop.permute.xlu2 %1367  ;;  %3050 = vrot.lane.b32.xlu0 %v8655_v40, %s8361_s27 }
 0x19d   : > { %v1392_v59 = vpop.permute.xlu1 %1391 }
 0x19e   : > { %1612 = vmatpush.bf16.msra.mxu2 %v1398_v36  ;;  %3020 = vrot.lane.b32.xlu1 %v8643_v35, %s8361_s27 }
 0x1a0   : > { %v899_v24 = vpop.f32.mrf.mxu1 }
 0x1a1   : > { %v860_v30 = vpop.f32.mrf.mxu0  ;;  %v9086_v32 = vadd.f32 %v899_v24, %v855_v45  ;;  %6841 = vmatmul.msk.bf16.gmra.mxu2 %vm819_vm1, %v6806_v20  ;;  %v1396_v45 = vpop.permute.xlu0 %1395 }
 0x1a2   : > { %v1422_v19 = vsel %vm1411_vm2, %v1396_v45, %v1398_v36 }
 0x1a3   : > { %1119 = vmatmul.bf16.gmra.mxu1 %v6794_v42  ;;  %v989_v39 = vpop.f32.mrf.mxu3  ;;  %1524 = vmatpush.bf16.msra.mxu3 %v1422_v19 }
 0x1a4   : > { %1212 = vmatmul.bf16.gmra.mxu0 %v6802_v27  ;;  %v948_v41 = vpop.f32.mrf.mxu2  ;;  %v9092_v47 = vadd.f32 %v989_v39, %v945_v14  ;;  %v1394_v29 = vpop.permute.xlu2 %1393  ;;  %3044 = vrot.lane.b32.xlu0 %v8709_v4, %s8361_s27 }
 0x1a5   : > { %1613 = vmatpush.bf16.msra.mxu2 %v1394_v29  ;;  %v1366_v33 = vpop.permute.xlu1 %1365  ;;  %v1421_v45 = vsel %vm1411_vm2, %v1392_v59, %v1394_v29 }
 0x1a7   : > { %1525 = vmatpush.bf16.msra.mxu3 %v1421_v45 }
 0x1a8   : > { %v901_v42 = vpop.f32.mrf.mxu1  ;;  %6834 = vmatmul.msk.bf16.gmra.mxu3 %vm819_vm1, %v6806_v20 }
 0x1a9   : > { %v862_v50 = vpop.f32.mrf.mxu0  ;;  %v9099_v51 = vadd.f32 %v901_v42, %v857_v60  ;;  %v6809_v60 = vld [vmem:[%s11770_s2 + $0xb0] sm:$0xf]  ;;  %v1370_v7 = vpop.permute.xlu0 %1369 }
 0x1aa   : > { %1567 = vmatpush.bf16.msra.mxu0 %v1370_v7  ;;  %v6810_v14 = vor.u32 %v7797_v1, %v6809_v60  ;;  %v1415_v38 = vsel %vm1411_vm2, %v1368_v54, %v1370_v7  ;;  %v7799_v60 = vld [vmem:[%s11770_s2 + $0xc4] sm:$0xf0] }
 0x1ab   : > { %v992_v0 = vpop.f32.mrf.mxu3  ;;  %1479 = vmatpush.bf16.msra.mxu1 %v1415_v38 }
 0x1ac   : > { %v950_v2 = vpop.f32.mrf.mxu2  ;;  %v9116_v6 = vadd.f32 %v992_v0, %v948_v41  ;;  %v1388_v54 = vpop.permute.xlu2 %1387 }
 0x1ad   : > { %v1360_v0 = vpop.permute.xlu1 %1359 }
 0x1ae   : > { %1568 = vmatpush.bf16.msra.mxu0 %v1366_v33 }
 0x1b0   : > { %v904_v12 = vpop.f32.mrf.mxu1 }
 0x1b1   : > { %v865_v20 = vpop.f32.mrf.mxu0  ;;  %v9123_v24 = vadd.f32 %v904_v12, %v860_v30  ;;  %6842 = vmatmul.msk.bf16.gmra.mxu2 %vm819_vm1, %v6814_v11  ;;  %v1364_v30 = vpop.permute.xlu0 %1363 }
 0x1b2   : > { %v1414_v29 = vsel %vm1411_vm2, %v1364_v30, %v1366_v33 }
 0x1b3   : > { %1124 = vmatmul.bf16.gmra.mxu1 %v6802_v27  ;;  %v994_v39 = vpop.f32.mrf.mxu3 }
 0x1b4   : > { %1217 = vmatmul.bf16.gmra.mxu0 %v6810_v14  ;;  %v953_v36 = vpop.f32.mrf.mxu2  ;;  %v9129_v41 = vadd.f32 %v994_v39, %v950_v2  ;;  %1480 = vmatpush.bf16.msra.mxu1 %v1414_v29 }
 0x1b5   : > { %v1358_v45 = vpop.permute.xlu1 %1357 }
 0x1b8   : > { %v906_v27 = vpop.f32.mrf.mxu1  ;;  %6835 = vmatmul.msk.bf16.gmra.mxu3 %vm819_vm1, %v6814_v11  ;;  %v6822_v11 = vor.u32 %v7798_v56, %v6819_v57 }
 0x1b9   : > { %v867_v42 = vpop.f32.mrf.mxu0  ;;  %v9136_v48 = vadd.f32 %v906_v27, %v862_v50  ;;  %v6817_v50 = vld [vmem:[%s11770_s2 + $0xc0] sm:$0xf]  ;;  %v1390_v7 = vpop.permute.xlu0 %1389 }
 0x1ba   : > { %1614 = vmatpush.bf16.msra.mxu2 %v1390_v7  ;;  %v6818_v19 = vor.u32 %v7799_v60, %v6817_v50  ;;  %v1362_v27 = vpop.permute.xlu2 %1361  ;;  %v6827_v50 = vld [vmem:[%s11770_s2 + $0xd8] sm:$0x70] }
 0x1bb   : > { %v997_v59 = vpop.f32.mrf.mxu3  ;;  %1569 = vmatpush.bf16.msra.mxu0 %v1362_v27 }
 0x1bc   : > { %v955_v1 = vpop.f32.mrf.mxu2  ;;  %v9153_v2 = vadd.f32 %v997_v59, %v953_v36  ;;  %v1420_v36 = vsel %vm1411_vm2, %v1388_v54, %v1390_v7  ;;  %v7800_v59 = vld [vmem:[%s11770_s2 + $0xd4] sm:$0xf] }
 0x1bd   : > { %1526 = vmatpush.bf16.msra.mxu3 %v1420_v36 }
 0x1bf   : > { %1570 = vmatpush.bf16.msra.mxu0 %v1358_v45 }
 0x1c0   : > { %v909_v12 = vpop.f32.mrf.mxu1 }
 0x1c1   : > { %v870_v38 = vpop.f32.mrf.mxu0  ;;  %v9160_v39 = vadd.f32 %v909_v12, %v865_v20  ;;  %6843 = vmatmul.msk.bf16.gmra.mxu2 %vm819_vm1, %v6822_v11  ;;  %v1413_v20 = vsel %vm1411_vm2, %v1360_v0, %v1362_v27  ;;  %v6830_v12 = vor.u32 %v7800_v59, %v6827_v50 }
 0x1c2   : > { %1481 = vmatpush.bf16.msra.mxu1 %v1413_v20 }
 0x1c3   : > { %1129 = vmatmul.bf16.gmra.mxu1 %v6810_v14  ;;  %v999_v56 = vpop.f32.mrf.mxu3 }
 0x1c4   : > { %1222 = vmatmul.bf16.gmra.mxu0 %v6818_v19  ;;  %v958_v57 = vpop.f32.mrf.mxu2  ;;  %v9166_v33 = vadd.f32 %v999_v56, %v955_v1  ;;  %v6825_v1 = vld [vmem:[%s11770_s2 + $0xd0] sm:$0xf] }
 0x1c8   : > { %v911_v14 = vpop.f32.mrf.mxu1  ;;  %6836 = vmatmul.msk.bf16.gmra.mxu3 %vm819_vm1, %v6822_v11  ;;  %v1356_v11 = vpop.permute.xlu0 %1355 }
 0x1c9   : > { %v872_v30 = vpop.f32.mrf.mxu0  ;;  %v9173_v54 = vadd.f32 %v911_v14, %v867_v42  ;;  %v7801_v42 = vld [vmem:[%s11770_s2 + $0xd4] sm:$0x70]  ;;  %v1412_v36 = vsel %vm1411_vm2, %v1356_v11, %v1358_v45 }
 0x1ca   : > { %v6826_v27 = vor.u32 %v7801_v42, %v6825_v1  ;;  %1482 = vmatpush.bf16.msra.mxu1 %v1412_v36  ;;  %v6861_v42 = vld [vmem:[%s11770_s2 + $0x150] sm:$0xf] }
 0x1cb   : > { %v1002_v60 = vpop.f32.mrf.mxu3 }
 0x1cc   : > { %v960_v0 = vpop.f32.mrf.mxu2  ;;  %v9190_v7 = vadd.f32 %v1002_v60, %v958_v57 }
 0x1d0   : > { %v914_v29 = vpop.f32.mrf.mxu1 }
 0x1d1   : > { %v875_v56 = vpop.f32.mrf.mxu0  ;;  %v9197_v14 = vadd.f32 %v914_v29, %v870_v38  ;;  %6844 = vmatmul.msk.bf16.gmra.mxu2 %vm819_vm1, %v6830_v12  ;;  %v7816_v38 = vld [vmem:[%s11770_s2 + $0x154] sm:$0xf] }
 0x1d3   : > { %1134 = vmatmul.bf16.gmra.mxu1 %v6818_v19  ;;  %v1004_v57 = vpop.f32.mrf.mxu3  ;;  %v6863_v19 = vld [vmem:[%s11770_s2 + $0x158] sm:$0xf0] }
 0x1d4   : > { %1227 = vmatmul.bf16.gmra.mxu0 %v6826_v27  ;;  %v963_v20 = vpop.f32.mrf.mxu2  ;;  %v9202_v59 = vadd.f32 %v1004_v57, %v960_v0 }
 0x1d8   : > { %v916_v50 = vpop.f32.mrf.mxu1  ;;  %6837 = vmatmul.msk.bf16.gmra.mxu3 %vm819_vm1, %v6830_v12  ;;  %v6866_v12 = vor.u32 %v7816_v38, %v6863_v19 }
 0x1d9   : > { %v877_v60 = vpop.f32.mrf.mxu0  ;;  %v9204_v1 = vadd.f32 %v916_v50, %v872_v30  ;;  %v7817_v30 = vld [vmem:[%s11770_s2 + $0x154] sm:$0xf0] }
 0x1da   : > { %v6862_v36 = vor.u32 %v7817_v30, %v6861_v42  ;;  %v1788_v42 = vpop.permute.xlu0 %1787 }
 0x1db   : > { %v1007_v45 = vpop.f32.mrf.mxu3  ;;  %1965 = vmatpush.bf16.msrb.mxu0 %v1788_v42 }
 0x1dc   : > { %v965_v0 = vpop.f32.mrf.mxu2  ;;  %v9219_v11 = vadd.f32 %v1007_v45, %v963_v20  ;;  %v1786_v20 = vpop.permute.xlu2 %1785 }
 0x1e0   : > { %v919_v29 = vpop.f32.mrf.mxu1 }
 0x1e1   : > { %v880_v57 = vpop.f32.mrf.mxu0  ;;  %v9221_v50 = vadd.f32 %v919_v29, %v875_v56  ;;  %6922 = vmatmul.msk.bf16.vlgmr.msra.gmra.mxu2 %vm819_vm1, %v6866_v12  ;;  %v7818_v56 = vld [vmem:[%s11770_s2 + $0x164] sm:$0xf] }
 0x1e3   : > { %1139 = vmatmul.bf16.gmra.mxu1 %v6826_v27  ;;  %v1009_v8 = vpop.f32.mrf.mxu3  ;;  %v6871_v27 = vld [vmem:[%s11770_s2 + $0x168] sm:$0xf0] }
 0x1e4   : > { %1571 = vmatmul.bf16.vlgmr.msra.gmra.mxu0 %v6862_v36  ;;  %v968_v58 = vpop.f32.mrf.mxu2  ;;  %v9224_v23 = vadd.f32 %v1009_v8, %v965_v0  ;;  %v6869_v8 = vld [vmem:[%s11770_s2 + $0x160] sm:$0xf]  ;;  %v6874_v45 = vor.u32 %v7818_v56, %v6871_v27  ;;  %v1812_v62 = vpop.permute.xlu2 %1811 }
 0x1e5   : > { %2011 = vmatpush.bf16.msrb.mxu2 %v1812_v62  ;;  %v1810_v27 = vpop.permute.xlu1 %1809 }
 0x1e8   : > { %v921_v9 = vpop.f32.mrf.mxu1  ;;  %6915 = vmatmul.msk.bf16.vlgmr.msra.gmra.mxu3 %vm819_vm1, %v6866_v12 }
 0x1e9   : > { %v882_v28 = vpop.f32.mrf.mxu0  ;;  %v9226_v18 = vadd.f32 %v921_v9, %v877_v60  ;;  %v7819_v9 = vld [vmem:[%s11770_s2 + $0x164] sm:$0xf0] }
 0x1ea   : > { %v6870_v0 = vor.u32 %v7819_v9, %v6869_v8  ;;  %v1827_v8 = vsel %vm1813_vm3, %v1810_v27, %v1812_v62  ;;  %v6879_v62 = vld [vmem:[%s11770_s2 + $0x178] sm:$0xf0] }
 0x1eb   : > { %v1012_v38 = vpop.f32.mrf.mxu3  ;;  %1923 = vmatpush.bf16.msrb.mxu3 %v1827_v8 }
 0x1ec   : > { %v970_v60 = vpop.f32.mrf.mxu2  ;;  %v9241_v19 = vadd.f32 %v1012_v38, %v968_v58  ;;  %v1782_v38 = vpop.permute.xlu0 %1781 }
 0x1f0   : > { %v924_v30 = vpop.f32.mrf.mxu1 }
 0x1f1   : > { %v9243_v12 = vadd.f32 %v924_v30, %v880_v57  ;;  %v1198_v29 = vpop.f32.mrf.mxu0  ;;  %6923 = vmatmul.msk.bf16.gmra.mxu2 %vm819_vm1, %v6874_v45 }
 0x1f2   : > { %v1199_v44 = vadd.f32 %v1198_v29, %v9047_v37  ;;  %v1821_v37 = vsel %vm1813_vm3, %v1786_v20, %v1788_v42  ;;  %v1784_v29 = vpop.permute.xlu1 %1783 }
 0x1f3   : > { %1483 = vmatmul.bf16.vlgmr.msra.gmra.mxu1 %v6862_v36  ;;  %v1014_v61 = vpop.f32.mrf.mxu3  ;;  %1966 = vmatpush.bf16.msrb.mxu0 %v1784_v29 }
 0x1f4   : > { %1576 = vmatmul.bf16.gmra.mxu0 %v6870_v0  ;;  %v9247_v21 = vadd.f32 %v1014_v61, %v970_v60  ;;  %v1242_v58 = vpop.f32.mrf.mxu2  ;;  %1877 = vmatpush.bf16.msrb.mxu1 %v1821_v37  ;;  %v1806_v61 = vpop.permute.xlu2 %1805 }
 0x1f5   : > { %v9249_v56 = vadd.f32 %v1242_v58, %v1199_v44  ;;  %v7820_v44 = vld [vmem:[%s11770_s2 + $0x174] sm:$0xf]  ;;  %v1808_v58 = vpop.permute.xlu0 %1807 }
 0x1f6   : > { %v6882_v42 = vor.u32 %v7820_v44, %v6879_v62  ;;  %2012 = vmatpush.bf16.msrb.mxu2 %v1808_v58 }
 0x1f8   : > { %v926_v57 = vpop.f32.mrf.mxu1  ;;  %6916 = vmatmul.msk.bf16.gmra.mxu3 %vm819_vm1, %v6874_v45 }
 0x1f9   : > { %v9253_v9 = vadd.f32 %v926_v57, %v882_v28  ;;  %v1200_v36 = vpop.f32.mrf.mxu0  ;;  %v6877_v28 = vld [vmem:[%s11770_s2 + $0x170] sm:$0xf] }
 0x1fa   : > { %v1201_v30 = vadd.f32 %v1200_v36, %v9055_v55  ;;  %v7821_v55 = vld [vmem:[%s11770_s2 + $0x174] sm:$0xf0] }
 0x1fb   : > { %v1154_v60 = vpop.f32.mrf.mxu3  ;;  %v6878_v57 = vor.u32 %v7821_v55, %v6877_v28  ;;  %v1778_v55 = vpop.permute.xlu1 %1777 }
 0x1fc   : > { %v1244_v20 = vpop.f32.mrf.mxu2  ;;  %v1780_v34 = vpop.permute.xlu2 %1779 }
 0x1fd   : > { %v9269_v45 = vadd.f32 %v1244_v20, %v1201_v30  ;;  %v1820_v30 = vsel %vm1813_vm3, %v1782_v38, %v1784_v29  ;;  %1967 = vmatpush.bf16.msrb.mxu0 %v1780_v34 }
 0x1fe   : > { %1878 = vmatpush.bf16.msrb.mxu1 %v1820_v30 }
 0x200   : > { %v1110_v27 = vpop.f32.mrf.mxu1 }
 0x201   : > { %v1111_v8 = vadd.f32 %v1110_v27, %v9049_v46  ;;  %v1203_v37 = vpop.f32.mrf.mxu0  ;;  %6924 = vmatmul.msk.bf16.gmra.mxu2 %vm819_vm1, %v6882_v42  ;;  %v1802_v46 = vpop.permute.xlu0 %1801 }
 0x202   : > { %v1204_v36 = vadd.f32 %v1203_v37, %v9079_v15  ;;  %v1826_v15 = vsel %vm1813_vm3, %v1806_v61, %v1808_v58  ;;  %v6887_v37 = vld [vmem:[%s11770_s2 + $0x188] sm:$0xf0] }
 0x203   : > { %v9273_v49 = vadd.f32 %v1154_v60, %v1111_v8  ;;  %1488 = vmatmul.bf16.gmra.mxu1 %v6870_v0  ;;  %v1156_v44 = vpop.f32.mrf.mxu3  ;;  %1924 = vmatpush.bf16.msrb.mxu3 %v1826_v15  ;;  %v7822_v8 = vld [vmem:[%s11770_s2 + $0x184] sm:$0xf]  ;;  %v1804_v30 = vpop.permute.xlu1 %1803  ;;  %v1819_v15 = vsel %vm1813_vm3, %v1778_v55, %v1780_v34 }
 0x204   : > { %1581 = vmatmul.bf16.gmra.mxu0 %v6878_v57  ;;  %v1247_v62 = vpop.f32.mrf.mxu2  ;;  %v1774_v29 = vpop.permute.xlu2 %1773  ;;  %2013 = vmatpush.bf16.msrb.mxu2 %v1804_v30 }
 0x205   : > { %v9277_v28 = vadd.f32 %v1247_v62, %v1204_v36  ;;  %v6890_v36 = vor.u32 %v7822_v8, %v6887_v37  ;;  %1879 = vmatpush.bf16.msrb.mxu1 %v1819_v15  ;;  %v1825_v8 = vsel %vm1813_vm3, %v1802_v46, %v1804_v30 }
 0x207   : > { %1925 = vmatpush.bf16.msrb.mxu3 %v1825_v8 }
 0x208   : > { %v1112_v20 = vpop.f32.mrf.mxu1  ;;  %6917 = vmatmul.msk.bf16.gmra.mxu3 %vm819_vm1, %v6882_v42 }
 0x209   : > { %v1113_v60 = vadd.f32 %v1112_v20, %v9062_v63  ;;  %v1205_v27 = vpop.f32.mrf.mxu0  ;;  %v6885_v63 = vld [vmem:[%s11770_s2 + $0x180] sm:$0xf] }
 0x20a   : > { %v1206_v0 = vadd.f32 %v1205_v27, %v9092_v47  ;;  %v7823_v47 = vld [vmem:[%s11770_s2 + $0x184] sm:$0xf0] }
 0x20b   : > { %v9283_v38 = vadd.f32 %v1156_v44, %v1113_v60  ;;  %v1159_v61 = vpop.f32.mrf.mxu3  ;;  %v1776_v44 = vpop.permute.xlu0 %1775  ;;  %v6886_v20 = vor.u32 %v7823_v47, %v6885_v63 }
 0x20c   : > { %v1249_v42 = vpop.f32.mrf.mxu2  ;;  %1968 = vmatpush.bf16.msrb.mxu0 %v1776_v44 }
 0x20d   : > { %v9297_v58 = vadd.f32 %v1249_v42, %v1206_v0  ;;  %v1800_v0 = vpop.permute.xlu2 %1799 }
 0x20e   : > { %2014 = vmatpush.bf16.msrb.mxu2 %v1800_v0 }
 0x210   : > { %v1115_v62 = vpop.f32.mrf.mxu1 }
 0x211   : > { %v1116_v60 = vadd.f32 %v1115_v62, %v9086_v32  ;;  %v1208_v27 = vpop.f32.mrf.mxu0  ;;  %6925 = vmatmul.msk.bf16.gmra.mxu2 %vm819_vm1, %v6890_v36  ;;  %v1798_v32 = vpop.permute.xlu1 %1797  ;;  %v6895_v62 = vld [vmem:[%s11770_s2 + $0x198] sm:$0xf0] }
 0x212   : > { %v1209_v52 = vadd.f32 %v1208_v27, %v9116_v6  ;;  %v1818_v6 = vsel %vm1813_vm3, %v1774_v29, %v1776_v44 }
 0x213   : > { %v9302_v22 = vadd.f32 %v1159_v61, %v1116_v60  ;;  %1493 = vmatmul.bf16.gmra.mxu1 %v6878_v57  ;;  %v1161_v37 = vpop.f32.mrf.mxu3  ;;  %v1770_v63 = vpop.permute.xlu0 %1769 }
 0x214   : > { %1586 = vmatmul.bf16.gmra.mxu0 %v6886_v20  ;;  %v1252_v34 = vpop.f32.mrf.mxu2  ;;  %1880 = vmatpush.bf16.msrb.mxu1 %v1818_v6 }
 0x215   : > { %v9306_v55 = vadd.f32 %v1252_v34, %v1209_v52  ;;  %v1794_v30 = vpop.permute.xlu2 %1793  ;;  %v7824_v52 = vld [vmem:[%s11770_s2 + $0x194] sm:$0xf]  ;;  %v1824_v34 = vsel %vm1813_vm3, %v1798_v32, %v1800_v0 }
 0x216   : > { %v6898_v15 = vor.u32 %v7824_v52, %v6895_v62  ;;  %1926 = vmatpush.bf16.msrb.mxu3 %v1824_v34  ;;  %v6903_v34 = vld [vmem:[%s11770_s2 + $0x1a8] sm:$0xf0] }
 0x218   : > { %v1117_v47 = vpop.f32.mrf.mxu1  ;;  %6918 = vmatmul.msk.bf16.gmra.mxu3 %vm819_vm1, %v6890_v36 }
 0x219   : > { %v1118_v61 = vadd.f32 %v1117_v47, %v9099_v51  ;;  %v1210_v42 = vpop.f32.mrf.mxu0  ;;  %v6893_v51 = vld [vmem:[%s11770_s2 + $0x190] sm:$0xf]  ;;  %v1772_v60 = vpop.permute.xlu1 %1771 }
 0x21a   : > { %v1211_v57 = vadd.f32 %v1210_v42, %v9129_v41  ;;  %v7825_v41 = vld [vmem:[%s11770_s2 + $0x194] sm:$0xf0]  ;;  %1969 = vmatpush.bf16.msrb.mxu0 %v1772_v60  ;;  %v1817_v52 = vsel %vm1813_vm3, %v1770_v63, %v1772_v60 }
 0x21b   : > { %v9312_v46 = vadd.f32 %v1161_v37, %v1118_v61  ;;  %v1164_v29 = vpop.f32.mrf.mxu3  ;;  %v1796_v27 = vpop.permute.xlu0 %1795  ;;  %v6894_v37 = vor.u32 %v7825_v41, %v6893_v51  ;;  %1881 = vmatpush.bf16.msrb.mxu1 %v1817_v52 }
 0x21c   : > { %v1254_v36 = vpop.f32.mrf.mxu2  ;;  %2015 = vmatpush.bf16.msrb.mxu2 %v1796_v27 }
 0x21d   : > { %v9326_v44 = vadd.f32 %v1254_v36, %v1211_v57  ;;  %v1768_v57 = vpop.permute.xlu2 %1767 }
 0x21e   : > { %1970 = vmatpush.bf16.msrb.mxu0 %v1768_v57 }
 0x220   : > { %v1120_v8 = vpop.f32.mrf.mxu1 }
 0x221   : > { %v1121_v47 = vadd.f32 %v1120_v8, %v9123_v24  ;;  %v1213_v6 = vpop.f32.mrf.mxu0  ;;  %6926 = vmatmul.msk.bf16.gmra.mxu2 %vm819_vm1, %v6898_v15  ;;  %v1766_v24 = vpop.permute.xlu1 %1765  ;;  %v7826_v8 = vld [vmem:[%s11770_s2 + $0x1a4] sm:$0xf] }
 0x222   : > { %v1214_v61 = vadd.f32 %v1213_v6, %v9153_v2  ;;  %v1823_v2 = vsel %vm1813_vm3, %v1794_v30, %v1796_v27 }
 0x223   : > { %v9331_v42 = vadd.f32 %v1164_v29, %v1121_v47  ;;  %1498 = vmatmul.bf16.gmra.mxu1 %v6886_v20  ;;  %v1166_v62 = vpop.f32.mrf.mxu3  ;;  %v1790_v51 = vpop.permute.xlu0 %1789  ;;  %1927 = vmatpush.bf16.msrb.mxu3 %v1823_v2  ;;  %v6906_v47 = vor.u32 %v7826_v8, %v6903_v34 }
 0x224   : > { %1591 = vmatmul.bf16.gmra.mxu0 %v6894_v37  ;;  %v1257_v0 = vpop.f32.mrf.mxu2 }
 0x225   : > { %v9335_v32 = vadd.f32 %v1257_v0, %v1214_v61  ;;  %v1762_v60 = vpop.permute.xlu2 %1761  ;;  %v1816_v0 = vsel %vm1813_vm3, %v1766_v24, %v1768_v57 }
 0x226   : > { %1882 = vmatpush.bf16.msrb.mxu1 %v1816_v0 }
 0x228   : > { %v1122_v41 = vpop.f32.mrf.mxu1  ;;  %6919 = vmatmul.msk.bf16.gmra.mxu3 %vm819_vm1, %v6898_v15 }
 0x229   : > { %v1123_v29 = vadd.f32 %v1122_v41, %v9136_v48  ;;  %v1215_v36 = vpop.f32.mrf.mxu0  ;;  %v6901_v48 = vld [vmem:[%s11770_s2 + $0x1a0] sm:$0xf]  ;;  %v1792_v6 = vpop.permute.xlu1 %1791 }
 0x22a   : > { %v1216_v20 = vadd.f32 %v1215_v36, %v9166_v33  ;;  %v7827_v33 = vld [vmem:[%s11770_s2 + $0x1a4] sm:$0xf0]  ;;  %2016 = vmatpush.bf16.msrb.mxu2 %v1792_v6  ;;  %v1822_v8 = vsel %vm1813_vm3, %v1790_v51, %v1792_v6  ;;  %v7828_v51 = vld [vmem:[%s11770_s2 + $0x1b4] sm:$0xf] }
 0x22b   : > { %v9341_v63 = vadd.f32 %v1166_v62, %v1123_v29  ;;  %v1169_v30 = vpop.f32.mrf.mxu3  ;;  %v1764_v61 = vpop.permute.xlu0 %1763  ;;  %v6902_v62 = vor.u32 %v7827_v33, %v6901_v48  ;;  %1928 = vmatpush.bf16.msrb.mxu3 %v1822_v8 }
 0x22c   : > { %v1259_v15 = vpop.f32.mrf.mxu2  ;;  %1971 = vmatpush.bf16.msrb.mxu0 %v1764_v61  ;;  %v1815_v48 = vsel %vm1813_vm3, %v1762_v60, %v1764_v61 }
 0x22d   : > { %v9355_v27 = vadd.f32 %v1259_v15, %v1216_v20  ;;  %v1760_v20 = vpop.permute.xlu2 %1759  ;;  %1883 = vmatpush.bf16.msrb.mxu1 %v1815_v48  ;;  %v6911_v15 = vld [vmem:[%s11770_s2 + $0x1b8] sm:$0x70] }
 0x22e   : > { %v6914_v61 = vor.u32 %v7828_v51, %v6911_v15 }
 0x230   : > { %v1125_v52 = vpop.f32.mrf.mxu1  ;;  %1972 = vmatpush.bf16.msrb.mxu0 %v1760_v20 }
 0x231   : > { %v1126_v41 = vadd.f32 %v1125_v52, %v9160_v39  ;;  %v1218_v2 = vpop.f32.mrf.mxu0  ;;  %6927 = vmatmul.msk.bf16.gmra.mxu2 %vm819_vm1, %v6906_v47  ;;  %v1758_v52 = vpop.permute.xlu1 %1757 }
 0x232   : > { %v1219_v29 = vadd.f32 %v1218_v2, %v9190_v7  ;;  %v1814_v2 = vsel %vm1813_vm3, %v1758_v52, %v1760_v20 }
 0x233   : > { %v9360_v36 = vadd.f32 %v1169_v30, %v1126_v41  ;;  %1503 = vmatmul.bf16.gmra.mxu1 %v6894_v37  ;;  %v1171_v34 = vpop.f32.mrf.mxu3 }
 0x234   : > { %1596 = vmatmul.bf16.gmra.mxu0 %v6902_v62  ;;  %v1262_v57 = vpop.f32.mrf.mxu2  ;;  %1884 = vmatpush.bf16.msrb.mxu1 %v1814_v2 }
 0x235   : > { %v9364_v24 = vadd.f32 %v1262_v57, %v1219_v29 }
 0x238   : > { %v1127_v39 = vpop.f32.mrf.mxu1  ;;  %6920 = vmatmul.msk.bf16.gmra.mxu3 %vm819_vm1, %v6906_v47 }
 0x239   : > { %v1128_v7 = vadd.f32 %v1127_v39, %v9173_v54  ;;  %v1220_v30 = vpop.f32.mrf.mxu0  ;;  %v6909_v54 = vld [vmem:[%s11770_s2 + $0x1b0] sm:$0xf] }
 0x23a   : > { %v1221_v33 = vadd.f32 %v1220_v30, %v9202_v59  ;;  %v7829_v59 = vld [vmem:[%s11770_s2 + $0x1b4] sm:$0x70] }
 0x23b   : > { %v9370_v37 = vadd.f32 %v1171_v34, %v1128_v7  ;;  %v1174_v6 = vpop.f32.mrf.mxu3  ;;  %v6910_v41 = vor.u32 %v7829_v59, %v6909_v54 }
 0x23c   : > { %v1264_v60 = vpop.f32.mrf.mxu2 }
 0x23d   : > { %v9384_v47 = vadd.f32 %v1264_v60, %v1221_v33 }
 0x240   : > { %v1130_v0 = vpop.f32.mrf.mxu1 }
 0x241   : > { %v1131_v29 = vadd.f32 %v1130_v0, %v9197_v14  ;;  %v1223_v8 = vpop.f32.mrf.mxu0  ;;  %6928 = vmatmul.msk.bf16.gmra.mxu2 %vm819_vm1, %v6914_v61 }
 0x242   : > { %v1224_v34 = vadd.f32 %v1223_v8, %v9219_v11  ;;  %v7830_v11 = vld [vmem:[%s11770_s2 + $0x1c4] sm:$0xf] }
 0x243   : > { %v9389_v57 = vadd.f32 %v1174_v6, %v1131_v29  ;;  %1508 = vmatmul.bf16.gmra.mxu1 %v6902_v62  ;;  %v1176_v39 = vpop.f32.mrf.mxu3  ;;  %v6947_v62 = vld [vmem:[%s11770_s2 + $0x1c8] sm:$0xf0] }
 0x244   : > { %1601 = vmatmul.bf16.gmra.mxu0 %v6910_v41  ;;  %v1267_v48 = vpop.f32.mrf.mxu2  ;;  %v6950_v59 = vor.u32 %v7830_v11, %v6947_v62 }
 0x245   : > { %v9392_v7 = vadd.f32 %v1267_v48, %v1224_v34 }
 0x248   : > { %v1132_v30 = vpop.f32.mrf.mxu1  ;;  %6921 = vmatmul.msk.bf16.gmra.mxu3 %vm819_vm1, %v6914_v61 }
 0x249   : > { %v1133_v33 = vadd.f32 %v1132_v30, %v9204_v1  ;;  %v1225_v20 = vpop.f32.mrf.mxu0  ;;  %v6945_v1 = vld [vmem:[%s11770_s2 + $0x1c0] sm:$0xf] }
 0x24a   : > { %v1226_v14 = vadd.f32 %v1225_v20, %v9224_v23  ;;  %v7831_v23 = vld [vmem:[%s11770_s2 + $0x1c4] sm:$0xf0] }
 0x24b   : > { %v9397_v51 = vadd.f32 %v1176_v39, %v1133_v33  ;;  %v1179_v15 = vpop.f32.mrf.mxu3  ;;  %v6946_v61 = vor.u32 %v7831_v23, %v6945_v1 }
 0x24c   : > { %v1269_v6 = vpop.f32.mrf.mxu2 }
 0x24d   : > { %v9411_v54 = vadd.f32 %v1269_v6, %v1226_v14  ;;  %v6955_v14 = vld [vmem:[%s11770_s2 + $0x1d8] sm:$0xf0] }
 0x250   : > { %v1135_v60 = vpop.f32.mrf.mxu1 }
 0x251   : > { %v1136_v52 = vadd.f32 %v1135_v60, %v9221_v50  ;;  %v1228_v0 = vpop.f32.mrf.mxu0  ;;  %7006 = vmatmul.msk.bf16.vlgmr.msrb.gmra.mxu2 %vm819_vm1, %v6950_v59 }
 0x252   : > { %v1229_v2 = vadd.f32 %v1228_v0, %v9241_v19  ;;  %v2188_v19 = vpop.permute.xlu0 %2187 }
 0x253   : > { %v9415_v29 = vadd.f32 %v1179_v15, %v1136_v52  ;;  %1513 = vmatmul.bf16.gmra.mxu1 %v6910_v41  ;;  %v1181_v8 = vpop.f32.mrf.mxu3  ;;  %v7832_v41 = vld [vmem:[%s11770_s2 + $0x1d4] sm:$0xf]  ;;  %v2190_v52 = vpop.permute.xlu1 %2189 }
 0x254   : > { %1973 = vmatmul.bf16.vlgmr.msrb.gmra.mxu0 %v6946_v61  ;;  %v1272_v34 = vpop.f32.mrf.mxu2  ;;  %v6958_v1 = vor.u32 %v7832_v41, %v6955_v14 }
 0x255   : > { %v9418_v39 = vadd.f32 %v1272_v34, %v1229_v2  ;;  %2367 = vmatpush.bf16.msra.mxu0 %v2190_v52 }
 0x258   : > { %v1137_v48 = vpop.f32.mrf.mxu1  ;;  %6999 = vmatmul.msk.bf16.vlgmr.msrb.gmra.mxu3 %vm819_vm1, %v6950_v59 }
 0x259   : > { %v1138_v30 = vadd.f32 %v1137_v48, %v9226_v18  ;;  %v1230_v33 = vpop.f32.mrf.mxu0  ;;  %v6953_v18 = vld [vmem:[%s11770_s2 + $0x1d0] sm:$0xf] }
 0x25a   : > { %v1231_v20 = vadd.f32 %v1230_v33, %v9247_v21  ;;  %v7833_v21 = vld [vmem:[%s11770_s2 + $0x1d4] sm:$0xf0]  ;;  %v2214_v2 = vpop.permute.xlu0 %2213 }
 0x25b   : > { %v9423_v50 = vadd.f32 %v1181_v8, %v1138_v30  ;;  %v1184_v11 = vpop.f32.mrf.mxu3  ;;  %v6954_v6 = vor.u32 %v7833_v21, %v6953_v18  ;;  %2413 = vmatpush.bf16.msra.mxu2 %v2214_v2  ;;  %v2212_v30 = vpop.permute.xlu2 %2211 }
 0x25c   : > { %v1274_v62 = vpop.f32.mrf.mxu2 }
 0x25d   : > { %v9437_v15 = vadd.f32 %v1274_v62, %v1231_v20  ;;  %v2223_v20 = vsel %vm2215_vm4, %v2188_v19, %v2190_v52  ;;  %v7834_v19 = vld [vmem:[%s11770_s2 + $0x1e4] sm:$0xf]  ;;  %v6961_v62 = vld [vmem:[%s11770_s2 + $0x1e0] sm:$0xf] }
 0x25e   : > { %2279 = vmatpush.bf16.msra.mxu1 %v2223_v20 }
 0x260   : > { %v1140_v23 = vpop.f32.mrf.mxu1 }
 0x261   : > { %v1141_v59 = vadd.f32 %v1140_v23, %v9243_v12  ;;  %v1572_v60 = vpop.f32.mrf.mxu0  ;;  %7007 = vmatmul.msk.bf16.gmra.mxu2 %vm819_vm1, %v6958_v1 }
 0x262   : > { %v2208_v21 = vpop.permute.xlu0 %2207 }
 0x263   : > { %v9440_v0 = vadd.f32 %v1184_v11, %v1141_v59  ;;  %1885 = vmatmul.bf16.vlgmr.msrb.gmra.mxu1 %v6946_v61  ;;  %v1186_v8 = vpop.f32.mrf.mxu3  ;;  %v2229_v11 = vsel %vm2215_vm4, %v2212_v30, %v2214_v2  ;;  %v2184_v61 = vpop.permute.xlu1 %2183 }
 0x264   : > { %1978 = vmatmul.bf16.gmra.mxu0 %v6954_v6  ;;  %v1616_v34 = vpop.f32.mrf.mxu2  ;;  %2325 = vmatpush.bf16.msra.mxu3 %v2229_v11  ;;  %v2186_v52 = vpop.permute.xlu2 %2185 }
 0x265   : > { %v1617_v48 = vadd.f32 %v1616_v34, %v1572_v60  ;;  %2368 = vmatpush.bf16.msra.mxu0 %v2186_v52 }
 0x267   : > { %v9445_v12 = vadd.f32 %v1617_v48, %v9249_v56  ;;  %v6963_v56 = vld [vmem:[%s11770_s2 + $0x1e8] sm:$0xf0] }
 0x268   : > { %v1142_v33 = vpop.f32.mrf.mxu1  ;;  %7000 = vmatmul.msk.bf16.gmra.mxu3 %vm819_vm1, %v6958_v1  ;;  %v7835_v1 = vld [vmem:[%s11770_s2 + $0x1e4] sm:$0xf0]  ;;  %v6966_v60 = vor.u32 %v7834_v19, %v6963_v56 }
 0x269   : > { %v1143_v41 = vadd.f32 %v1142_v33, %v9253_v9  ;;  %v1574_v14 = vpop.f32.mrf.mxu0 }
 0x26b   : > { %v9450_v18 = vadd.f32 %v1186_v8, %v1143_v41  ;;  %v1528_v9 = vpop.f32.mrf.mxu3  ;;  %v6962_v8 = vor.u32 %v7835_v1, %v6961_v62  ;;  %v2210_v33 = vpop.permute.xlu1 %2209 }
 0x26c   : > { %v1618_v23 = vpop.f32.mrf.mxu2  ;;  %2414 = vmatpush.bf16.msra.mxu2 %v2210_v33  ;;  %v2182_v41 = vpop.permute.xlu0 %2181  ;;  %v2228_v62 = vsel %vm2215_vm4, %v2208_v21, %v2210_v33 }
 0x26d   : > { %v1619_v59 = vadd.f32 %v1618_v23, %v1574_v14  ;;  %2369 = vmatpush.bf16.msra.mxu0 %v2182_v41  ;;  %v2180_v56 = vpop.permute.xlu2 %2179  ;;  %2326 = vmatpush.bf16.msra.mxu3 %v2228_v62 }
 0x26f   : > { %v9467_v34 = vadd.f32 %v1619_v59, %v9269_v45  ;;  %v2222_v45 = vsel %vm2215_vm4, %v2184_v61, %v2186_v52  ;;  %v6971_v59 = vld [vmem:[%s11770_s2 + $0x1f8] sm:$0xf0] }
 0x270   : > { %v1484_v2 = vpop.f32.mrf.mxu1  ;;  %2280 = vmatpush.bf16.msra.mxu1 %v2222_v45 }
 0x271   : > { %v1529_v48 = vadd.f32 %v1528_v9, %v1484_v2  ;;  %v1577_v30 = vpop.f32.mrf.mxu0  ;;  %7008 = vmatmul.msk.bf16.gmra.mxu2 %vm819_vm1, %v6966_v60  ;;  %v7837_v2 = vld [vmem:[%s11770_s2 + $0x1f4] sm:$0xf0] }
 0x273   : > { %v9474_v20 = vadd.f32 %v1529_v48, %v9273_v49  ;;  %1890 = vmatmul.bf16.gmra.mxu1 %v6954_v6  ;;  %v1530_v14 = vpop.f32.mrf.mxu3  ;;  %v2204_v23 = vpop.permute.xlu1 %2203 }
 0x274   : > { %1983 = vmatmul.bf16.gmra.mxu0 %v6962_v8  ;;  %v1621_v11 = vpop.f32.mrf.mxu2  ;;  %v2176_v21 = vpop.permute.xlu0 %2175 }
 0x275   : > { %v1622_v19 = vadd.f32 %v1621_v11, %v1577_v30  ;;  %v2206_v33 = vpop.permute.xlu2 %2205  ;;  %v2221_v11 = vsel %vm2215_vm4, %v2180_v56, %v2182_v41 }
 0x276   : > { %2415 = vmatpush.bf16.msra.mxu2 %v2206_v33  ;;  %2281 = vmatpush.bf16.msra.mxu1 %v2221_v11  ;;  %v7839_v11 = vld [vmem:[%s11770_s2 + $0x204] sm:$0xf0] }
 0x277   : > { %v9482_v49 = vadd.f32 %v1622_v19, %v9277_v28  ;;  %v7836_v28 = vld [vmem:[%s11770_s2 + $0x1f4] sm:$0xf] }
 0x278   : > { %v1486_v9 = vpop.f32.mrf.mxu1  ;;  %7001 = vmatmul.msk.bf16.gmra.mxu3 %vm819_vm1, %v6966_v60  ;;  %v6969_v60 = vld [vmem:[%s11770_s2 + $0x1f0] sm:$0xf]  ;;  %v6974_v30 = vor.u32 %v7836_v28, %v6971_v59 }
 0x279   : > { %v1531_v6 = vadd.f32 %v1530_v14, %v1486_v9  ;;  %v1579_v1 = vpop.f32.mrf.mxu0  ;;  %v6970_v14 = vor.u32 %v7837_v2, %v6969_v60 }
 0x27b   : > { %v9490_v61 = vadd.f32 %v1531_v6, %v9283_v38  ;;  %v1533_v52 = vpop.f32.mrf.mxu3  ;;  %v2178_v6 = vpop.permute.xlu1 %2177 }
 0x27c   : > { %v1623_v38 = vpop.f32.mrf.mxu2  ;;  %2370 = vmatpush.bf16.msra.mxu0 %v2178_v6  ;;  %v2202_v56 = vpop.permute.xlu0 %2201  ;;  %v2220_v2 = vsel %vm2215_vm4, %v2176_v21, %v2178_v6 }
 0x27d   : > { %v1624_v48 = vadd.f32 %v1623_v38, %v1579_v1  ;;  %2416 = vmatpush.bf16.msra.mxu2 %v2202_v56  ;;  %2282 = vmatpush.bf16.msra.mxu1 %v2220_v2 }
 0x27f   : > { %v9508_v19 = vadd.f32 %v1624_v48, %v9297_v58  ;;  %v2227_v58 = vsel %vm2215_vm4, %v2204_v23, %v2206_v33  ;;  %v6979_v33 = vld [vmem:[%s11770_s2 + $0x208] sm:$0xf0] }
 0x280   : > { %v1489_v45 = vpop.f32.mrf.mxu1  ;;  %2327 = vmatpush.bf16.msra.mxu3 %v2227_v58 }
 0x281   : > { %v1534_v9 = vadd.f32 %v1533_v52, %v1489_v45  ;;  %v1582_v62 = vpop.f32.mrf.mxu0  ;;  %7009 = vmatmul.msk.bf16.gmra.mxu2 %vm819_vm1, %v6974_v30  ;;  %v2200_v52 = vpop.permute.xlu2 %2199 }
 0x283   : > { %v9515_v41 = vadd.f32 %v1534_v9, %v9302_v22  ;;  %1895 = vmatmul.bf16.gmra.mxu1 %v6962_v8  ;;  %v1535_v1 = vpop.f32.mrf.mxu3  ;;  %v2172_v48 = vpop.permute.xlu1 %2171 }
 0x284   : > { %1988 = vmatmul.bf16.gmra.mxu0 %v6970_v14  ;;  %v1626_v28 = vpop.f32.mrf.mxu2  ;;  %v2196_v21 = vpop.permute.xlu0 %2195 }
 0x285   : > { %v1627_v59 = vadd.f32 %v1626_v28, %v1582_v62  ;;  %v2226_v28 = vsel %vm2215_vm4, %v2200_v52, %v2202_v56 }
 0x286   : > { %2328 = vmatpush.bf16.msra.mxu3 %v2226_v28 }
 0x287   : > { %v9523_v22 = vadd.f32 %v1627_v59, %v9306_v55  ;;  %v7838_v55 = vld [vmem:[%s11770_s2 + $0x204] sm:$0xf] }
 0x288   : > { %v1491_v60 = vpop.f32.mrf.mxu1  ;;  %7002 = vmatmul.msk.bf16.gmra.mxu3 %vm819_vm1, %v6974_v30  ;;  %v6977_v30 = vld [vmem:[%s11770_s2 + $0x200] sm:$0xf]  ;;  %v6982_v62 = vor.u32 %v7838_v55, %v6979_v33 }
 0x289   : > { %v1536_v8 = vadd.f32 %v1535_v1, %v1491_v60  ;;  %v1584_v38 = vpop.f32.mrf.mxu0  ;;  %v2174_v6 = vpop.permute.xlu2 %2173  ;;  %v6978_v1 = vor.u32 %v7839_v11, %v6977_v30 }
 0x28a   : > { %2371 = vmatpush.bf16.msra.mxu0 %v2174_v6 }
 0x28b   : > { %v9531_v23 = vadd.f32 %v1536_v8, %v9312_v46  ;;  %v1538_v45 = vpop.f32.mrf.mxu3  ;;  %v2198_v8 = vpop.permute.xlu1 %2197 }
 0x28c   : > { %v1628_v46 = vpop.f32.mrf.mxu2  ;;  %2417 = vmatpush.bf16.msra.mxu2 %v2198_v8  ;;  %v2170_v52 = vpop.permute.xlu0 %2169 }
 0x28d   : > { %11847 = vst [vmem:[#allocation40_spill] sm:$0xff] %v9531_v23  ;;  %v1629_v9 = vadd.f32 %v1628_v46, %v1584_v38  ;;  %v11849_v38 = vld [vmem:[#allocation26_spill] sm:$0xff]  ;;  %v2225_v46 = vsel %vm2215_vm4, %v2196_v21, %v2198_v8 }
 0x28e   : > { %3022 = vrot.lane.b32.xlu2 %v11849_v38, %s8361_s27  ;;  %2372 = vmatpush.bf16.msra.mxu0 %v2170_v52 }
 0x28f   : > { %v9549_v59 = vadd.f32 %v1629_v9, %v9326_v44  ;;  %v2219_v44 = vsel %vm2215_vm4, %v2172_v48, %v2174_v6  ;;  %v11851_v9 = vld [vmem:[#allocation30_spill] sm:$0xff]  ;;  %2329 = vmatpush.bf16.msra.mxu3 %v2225_v46  ;;  %v11853_v48 = vld [vmem:[#allocation27_spill] sm:$0xff]  ;;  %v11854_v6 = vld [vmem:[#allocation29_spill] sm:$0xff] }
 0x290   : > { %v1494_v58 = vpop.f32.mrf.mxu1  ;;  %2283 = vmatpush.bf16.msra.mxu1 %v2219_v44  ;;  %3046 = vrot.lane.b32.xlu1 %v11851_v9, %s8361_s27  ;;  %v7841_v44 = vld [vmem:[%s11770_s2 + $0x214] sm:$0xf0] }
 0x291   : > { %11848 = vst [vmem:[#allocation41_spill] sm:$0xff] %v9549_v59  ;;  %v1539_v60 = vadd.f32 %v1538_v45, %v1494_v58  ;;  %v1587_v2 = vpop.f32.mrf.mxu0  ;;  %7010 = vmatmul.msk.bf16.gmra.mxu2 %vm819_vm1, %v6982_v62  ;;  %v2168_v30 = vpop.permute.xlu2 %2167  ;;  %3018 = vrot.lane.b32.xlu0 %v11853_v48, %s8361_s27 }
 0x293   : > { %v9556_v56 = vadd.f32 %v1539_v60, %v9331_v42  ;;  %1900 = vmatmul.bf16.gmra.mxu1 %v6970_v14  ;;  %v1540_v55 = vpop.f32.mrf.mxu3  ;;  %v2192_v28 = vpop.permute.xlu1 %2191 }
 0x294   : > { %1993 = vmatmul.bf16.gmra.mxu0 %v6978_v1  ;;  %v1631_v33 = vpop.f32.mrf.mxu2  ;;  %v2164_v60 = vpop.permute.xlu0 %2163 }
 0x295   : > { %11850 = vst [vmem:[#allocation26_spill] sm:$0xff] %v9556_v56  ;;  %v1632_v45 = vadd.f32 %v1631_v33, %v1587_v2  ;;  %v6987_v2 = vld [vmem:[%s11770_s2 + $0x218] sm:$0xf0] }
 0x296   : > { %3016 = vrot.lane.b32.xlu2 %v11854_v6, %s8361_s27 }
 0x297   : > { %v9564_v42 = vadd.f32 %v1632_v45, %v9335_v32  ;;  %v7840_v32 = vld [vmem:[%s11770_s2 + $0x214] sm:$0xf] }
 0x298   : > { %v1496_v11 = vpop.f32.mrf.mxu1  ;;  %7003 = vmatmul.msk.bf16.gmra.mxu3 %vm819_vm1, %v6982_v62  ;;  %v6985_v62 = vld [vmem:[%s11770_s2 + $0x210] sm:$0xf]  ;;  %v6990_v33 = vor.u32 %v7840_v32, %v6987_v2  ;;  %v11858_v2 = vld [vmem:[#allocation33_spill] sm:$0xff] }
 0x299   : > { %11852 = vst [vmem:[#allocation30_spill] sm:$0xff] %v9564_v42  ;;  %v1541_v14 = vadd.f32 %v1540_v55, %v1496_v11  ;;  %v1589_v58 = vpop.f32.mrf.mxu0  ;;  %v2194_v45 = vpop.permute.xlu2 %2193  ;;  %v9586_v46 = vor.u32 %v7841_v44, %v6985_v62 }
 0x29a   : > { %2418 = vmatpush.bf16.msra.mxu2 %v2194_v45 }
 0x29b   : > { %v9572_v21 = vadd.f32 %v1541_v14, %v9341_v63  ;;  %v1543_v8 = vpop.f32.mrf.mxu3  ;;  %v2218_v14 = vsel %vm2215_vm4, %v2168_v30, %v2170_v52  ;;  %v2166_v23 = vpop.permute.xlu1 %2165 }
 0x29c   : > { %v1633_v63 = vpop.f32.mrf.mxu2  ;;  %2284 = vmatpush.bf16.msra.mxu1 %v2218_v14  ;;  %2373 = vmatpush.bf16.msra.mxu0 %v2166_v23  ;;  %v2162_v52 = vpop.permute.xlu0 %2161 }
 0x29d   : > { %11855 = vst [vmem:[#allocation27_spill] sm:$0xff] %v9572_v21  ;;  %v1634_v55 = vadd.f32 %v1633_v63, %v1589_v58  ;;  %v11856_v21 = vld [vmem:[#allocation37_spill] sm:$0xff]  ;;  %v11857_v58 = vld [vmem:[#allocation32_spill] sm:$0xff] }
 0x29e   : > { %3040 = vrot.lane.b32.xlu1 %v11856_v21, %s8361_s27  ;;  %2715 = vmatpush.bf16.msrb.mxu2 %v8607_v17 }
 0x29f   : > { %v9592_v42 = vadd.f32 %v1634_v55, %v9355_v27  ;;  %3012 = vrot.lane.b32.xlu0 %v11857_v58, %s8361_s27  ;;  %v2224_v27 = vsel %vm2215_vm4, %v2192_v28, %v2194_v45  ;;  %3042 = vrot.lane.b32.xlu2 %v11858_v2, %s8361_s27  ;;  %v11859_v28 = vld [vmem:[#allocation28_spill] sm:$0xff] }
 0x2a0   : > { %v1499_v11 = vpop.f32.mrf.mxu1  ;;  %2330 = vmatpush.bf16.msra.mxu3 %v2224_v27  ;;  %2374 = vmatpush.bf16.msra.mxu0 %v2162_v52 }
 0x2a1   : > { %v1544_v56 = vadd.f32 %v1543_v8, %v1499_v11  ;;  %v1592_v59 = vpop.f32.mrf.mxu0  ;;  %7011 = vmatmul.msk.bf16.gmra.mxu2 %vm819_vm1, %v6990_v33  ;;  %v2160_v63 = vpop.permute.xlu2 %2159  ;;  %v11862_v11 = vld [vmem:[#allocation35_spill] sm:$0xff] }
 0x2a2   : > { %2716 = vmatpush.bf16.msrb.mxu2 %v8625_v26  ;;  %v2216_v45 = vsel %vm2215_vm4, %v2160_v63, %v2162_v52 }
 0x2a3   : > { %v9598_v32 = vadd.f32 %v1544_v56, %v9360_v36  ;;  %1905 = vmatmul.bf16.gmra.mxu1 %v6978_v1  ;;  %v1545_v30 = vpop.f32.mrf.mxu3  ;;  %v2217_v56 = vsel %vm2215_vm4, %v2164_v60, %v2166_v23  ;;  %vm4803_vm4 = vcmask 1041408  }
 0x2a4   : > { %1998 = vmatmul.bf16.gmra.mxu0 %v9586_v46  ;;  %2627 = vmatpush.bf16.msrb.mxu3 %v8637_v31  ;;  %v1636_v17 = vpop.f32.mrf.mxu2  ;;  %v11860_v31 = vld [vmem:[#allocation36_spill] sm:$0xff] }
 0x2a5   : > { %v1637_v36 = vadd.f32 %v1636_v17, %v1592_v59  ;;  %2669 = vmatpush.bf16.msrb.mxu0 %v8582_v3  ;;  %2285 = vmatpush.bf16.msra.mxu1 %v2217_v56  ;;  %v6993_v59 = vld [vmem:[%s11770_s2 + $0x220] sm:$0xf] }
 0x2a6   : > { %3014 = vrot.lane.b32.xlu1 %v11859_v28, %s8361_s27  ;;  %2717 = vmatpush.bf16.msrb.mxu2 %v8655_v40  ;;  %v6995_v40 = vld [vmem:[%s11770_s2 + $0x228] sm:$0x70] }
 0x2a7   : > { %v9612_v8 = vadd.f32 %v1637_v36, %v9364_v24  ;;  %3038 = vrot.lane.b32.xlu0 %v11860_v31, %s8361_s27  ;;  %v7842_v24 = vld [vmem:[%s11770_s2 + $0x224] sm:$0xf] }
 0x2a8   : > { %v1501_v1 = vpop.f32.mrf.mxu1  ;;  %7004 = vmatmul.msk.bf16.gmra.mxu3 %vm819_vm1, %v6990_v33  ;;  %v6998_v44 = vor.u32 %v7842_v24, %v6995_v40 }
 0x2a9   : > { %v1546_v26 = vadd.f32 %v1545_v30, %v1501_v1  ;;  %v1594_v62 = vpop.f32.mrf.mxu0  ;;  %2670 = vmatpush.bf16.msrb.mxu0 %v8601_v13  ;;  %2628 = vmatpush.bf16.msrb.mxu3 %v8659_v43  ;;  %v11861_v43 = vld [vmem:[#allocation39_spill] sm:$0xff] }
 0x2aa   : > { %2718 = vmatpush.bf16.msrb.mxu2 %v11851_v9  ;;  %3036 = vrot.lane.b32.xlu2 %v11861_v43, %s8361_s27 }
 0x2ab   : > { %v9619_v3 = vadd.f32 %v1546_v26, %v9370_v37  ;;  %v1548_v23 = vpop.f32.mrf.mxu3  ;;  %v7843_v37 = vld [vmem:[%s11770_s2 + $0x224] sm:$0x70]  ;;  %2286 = vmatpush.bf16.msra.mxu1 %v2216_v45 }
 0x2ac   : > { %v1638_v13 = vpop.f32.mrf.mxu2  ;;  %v6994_v33 = vor.u32 %v7843_v37, %v6993_v59 }
 0x2ad   : > { %v1639_v60 = vadd.f32 %v1638_v13, %v1594_v62  ;;  %2671 = vmatpush.bf16.msrb.mxu0 %v8605_v16  ;;  %2629 = vmatpush.bf16.msrb.mxu3 %v8679_v53  ;;  %v11863_v16 = vld [vmem:[#allocation38_spill] sm:$0xff]  ;;  %v7846_v13 = vld [vmem:[%s11770_s2 + $0x244] sm:$0xf] }
 0x2ae   : > { %3008 = vrot.lane.b32.xlu1 %v11862_v11, %s8361_s27  ;;  %2719 = vmatpush.bf16.msrb.mxu2 %v11858_v2 }
 0x2af   : > { %v9644_v9 = vadd.f32 %v1639_v60, %v9384_v47  ;;  %2581 = vmatpush.bf16.msrb.mxu1 %v8585_v5  ;;  %3004 = vrot.lane.b32.xlu0 %v11863_v16, %s8361_s27  ;;  %v11864_v5 = vld [vmem:[#allocation31_spill] sm:$0xff]  ;;  %v7847_v60 = vld [vmem:[%s11770_s2 + $0x244] sm:$0xf0] }
 0x2b0   : > { %v1504_v55 = vpop.f32.mrf.mxu1 }
 0x2b1   : > { %v1549_v14 = vadd.f32 %v1548_v23, %v1504_v55  ;;  %v1597_v27 = vpop.f32.mrf.mxu0  ;;  %7012 = vmatmul.msk.bf16.gmra.mxu2 %vm819_vm1, %v6998_v44  ;;  %2630 = vmatpush.bf16.msrb.mxu3 %v8709_v4 }
 0x2b2   : > { %2672 = vmatpush.bf16.msrb.mxu0 %v11849_v38  ;;  %2720 = vmatpush.bf16.msrb.mxu2 %v11860_v31 }
 0x2b3   : > { %v9651_v53 = vadd.f32 %v1549_v14, %v9389_v57  ;;  %1910 = vmatmul.bf16.gmra.mxu1 %v9586_v46  ;;  %v1550_v47 = vpop.f32.mrf.mxu3  ;;  %3010 = vrot.lane.b32.xlu2 %v11864_v5, %s8361_s27  ;;  %v11865_v46 = vld [vmem:[#allocation34_spill] sm:$0xff] }
 0x2b4   : > { %2003 = vmatmul.bf16.gmra.mxu0 %v6994_v33  ;;  %v1641_v52 = vpop.f32.mrf.mxu2  ;;  %2582 = vmatpush.bf16.msrb.mxu1 %v8595_v10 }
 0x2b5   : > { %v1642_v57 = vadd.f32 %v1641_v52, %v1597_v27  ;;  %2631 = vmatpush.bf16.msrb.mxu3 %v11856_v21  ;;  %v7844_v21 = vld [vmem:[%s11770_s2 + $0x234] sm:$0xf] }
 0x2b6   : > { %3006 = vrot.lane.b32.xlu1 %v11865_v46, %s8361_s27  ;;  %2673 = vmatpush.bf16.msrb.mxu0 %v11853_v48  ;;  %v7029_v48 = vld [vmem:[%s11770_s2 + $0x230] sm:$0xf] }
 0x2b7   : > { %v9665_v4 = vadd.f32 %v1642_v57, %v9392_v7  ;;  %v7031_v7 = vld [vmem:[%s11770_s2 + $0x238] sm:$0xf0] }
 0x2b8   : > { %v1506_v30 = vpop.f32.mrf.mxu1  ;;  %7005 = vmatmul.msk.bf16.gmra.mxu3 %vm819_vm1, %v6998_v44  ;;  %2583 = vmatpush.bf16.msrb.mxu1 %v8623_v25  ;;  %v7845_v25 = vld [vmem:[%s11770_s2 + $0x234] sm:$0xf0]  ;;  %v7034_v1 = vor.u32 %v7844_v21, %v7031_v7 }
 0x2b9   : > { %v1551_v17 = vadd.f32 %v1550_v47, %v1506_v30  ;;  %v1599_v38 = vpop.f32.mrf.mxu0  ;;  %2632 = vmatpush.bf16.msrb.mxu3 %v11861_v43  ;;  %v7030_v26 = vor.u32 %v7845_v25, %v7029_v48  ;;  %v7849_v21 = vld [vmem:[%s11770_s2 + $0x254] sm:$0xf0] }
 0x2ba   : > { %2674 = vmatpush.bf16.msrb.mxu0 %v11859_v28 }
 0x2bb   : > { %v9671_v10 = vadd.f32 %v1551_v17, %v9397_v51  ;;  %v1553_v2 = vpop.f32.mrf.mxu3  ;;  %v7047_v17 = vld [vmem:[%s11770_s2 + $0x258] sm:$0xf0] }
 0x2bc   : > { %v1643_v51 = vpop.f32.mrf.mxu2  ;;  %2584 = vmatpush.bf16.msrb.mxu1 %v8643_v35 }
 0x2bd   : > { %v1644_v36 = vadd.f32 %v1643_v51, %v1599_v38 }
 0x2be   : > { %2675 = vmatpush.bf16.msrb.mxu0 %v11864_v5 }
 0x2bf   : > { %v9689_v62 = vadd.f32 %v1644_v36, %v9411_v54 }
 0x2c0   : > { %v1509_v56 = vpop.f32.mrf.mxu1  ;;  %2585 = vmatpush.bf16.msrb.mxu1 %v11854_v6 }
 0x2c1   : > { %v1554_v31 = vadd.f32 %v1553_v2, %v1509_v56  ;;  %v1602_v24 = vpop.f32.mrf.mxu0  ;;  %7090 = vmatmul.msk.bf16.vlgmr.msra.gmra.mxu2 %vm819_vm1, %v7034_v1 }
 0x2c2   : > { %2676 = vmatpush.bf16.msrb.mxu0 %v11865_v46 }
 0x2c3   : > { %v9694_v40 = vadd.f32 %v1554_v31, %v9415_v29  ;;  %1915 = vmatmul.bf16.gmra.mxu1 %v6994_v33  ;;  %v1555_v35 = vpop.f32.mrf.mxu3 }
 0x2c4   : > { %2375 = vmatmul.bf16.vlgmr.msra.gmra.mxu0 %v7030_v26  ;;  %v1646_v28 = vpop.f32.mrf.mxu2  ;;  %2586 = vmatpush.bf16.msrb.mxu1 %v11857_v58  ;;  %v7039_v58 = vld [vmem:[%s11770_s2 + $0x248] sm:$0xf0] }
 0x2c5   : > { %v1647_v54 = vadd.f32 %v1646_v28, %v1602_v24  ;;  %v7042_v63 = vor.u32 %v7846_v13, %v7039_v58  ;;  %v7851_v13 = vld [vmem:[%s11770_s2 + $0x264] sm:$0xf0] }
 0x2c7   : > { %v9700_v59 = vadd.f32 %v1647_v54, %v9418_v39  ;;  %v7037_v39 = vld [vmem:[%s11770_s2 + $0x240] sm:$0xf] }
 0x2c8   : > { %v1511_v23 = vpop.f32.mrf.mxu1  ;;  %7083 = vmatmul.msk.bf16.vlgmr.msra.gmra.mxu3 %vm819_vm1, %v7034_v1  ;;  %2587 = vmatpush.bf16.msrb.mxu1 %v11862_v11  ;;  %v7038_v33 = vor.u32 %v7847_v60, %v7037_v39 }
 0x2c9   : > { %v1556_v37 = vadd.f32 %v1555_v35, %v1511_v23  ;;  %v1604_v6 = vpop.f32.mrf.mxu0 }
 0x2cb   : > { %v9705_v29 = vadd.f32 %v1556_v37, %v9423_v50  ;;  %v1558_v43 = vpop.f32.mrf.mxu3  ;;  %v7055_v37 = vld [vmem:[%s11770_s2 + $0x268] sm:$0xf0] }
 0x2cc   : > { %v1648_v44 = vpop.f32.mrf.mxu2  ;;  %2588 = vmatpush.bf16.msrb.mxu1 %v11863_v16 }
 0x2cd   : > { %v1649_v50 = vadd.f32 %v1648_v44, %v1604_v6 }
 0x2cf   : > { %v9721_v45 = vadd.f32 %v1649_v50, %v9437_v15 }
 0x2d0   : > { %v1514_v55 = vpop.f32.mrf.mxu1 }
 0x2d1   : > { %v1559_v11 = vadd.f32 %v1558_v43, %v1514_v55  ;;  %v1974_v14 = vpop.f32.mrf.mxu0  ;;  %7091 = vmatmul.msk.bf16.gmra.mxu2 %vm819_vm1, %v7042_v63 }
 0x2d3   : > { %v9724_v27 = vadd.f32 %v1559_v11, %v9440_v0  ;;  %2287 = vmatmul.bf16.vlgmr.msra.gmra.mxu1 %v7030_v26  ;;  %v1560_v47 = vpop.f32.mrf.mxu3  ;;  %v7848_v0 = vld [vmem:[%s11770_s2 + $0x254] sm:$0xf] }
 0x2d4   : > { %2380 = vmatmul.bf16.gmra.mxu0 %v7038_v33  ;;  %v2018_v52 = vpop.f32.mrf.mxu2  ;;  %v7050_v2 = vor.u32 %v7848_v0, %v7047_v17  ;;  %v7853_v17 = vld [vmem:[%s11770_s2 + $0x274] sm:$0xf0] }
 0x2d5   : > { %v2019_v5 = vadd.f32 %v2018_v52, %v1974_v14 }
 0x2d7   : > { %v9728_v57 = vadd.f32 %v2019_v5, %v9445_v12  ;;  %v7045_v12 = vld [vmem:[%s11770_s2 + $0x250] sm:$0xf] }
 0x2d8   : > { %v1516_v16 = vpop.f32.mrf.mxu1  ;;  %7084 = vmatmul.msk.bf16.gmra.mxu3 %vm819_vm1, %v7042_v63  ;;  %v7046_v25 = vor.u32 %v7849_v21, %v7045_v12 }
 0x2d9   : > { %v1561_v30 = vadd.f32 %v1560_v47, %v1516_v16  ;;  %v1976_v46 = vpop.f32.mrf.mxu0 }
 0x2db   : > { %v9732_v15 = vadd.f32 %v1561_v30, %v9450_v18  ;;  %v1930_v38 = vpop.f32.mrf.mxu3 }
 0x2dc   : > { %v2020_v7 = vpop.f32.mrf.mxu2 }
 0x2dd   : > { %v2021_v18 = vadd.f32 %v2020_v7, %v1976_v46  ;;  %v7063_v46 = vld [vmem:[%s11770_s2 + $0x278] sm:$0xf0] }
 0x2df   : > { %v9747_v51 = vadd.f32 %v2021_v18, %v9467_v34 }
 0x2e0   : > { %v1886_v48 = vpop.f32.mrf.mxu1 }
 0x2e1   : > { %v1931_v36 = vadd.f32 %v1930_v38, %v1886_v48  ;;  %v1979_v1 = vpop.f32.mrf.mxu0  ;;  %7092 = vmatmul.msk.bf16.gmra.mxu2 %vm819_vm1, %v7050_v2 }
 0x2e3   : > { %v9750_v56 = vadd.f32 %v1931_v36, %v9474_v20  ;;  %2292 = vmatmul.bf16.gmra.mxu1 %v7038_v33  ;;  %v1932_v26 = vpop.f32.mrf.mxu3  ;;  %v7850_v20 = vld [vmem:[%s11770_s2 + $0x264] sm:$0xf] }
 0x2e4   : > { %2385 = vmatmul.bf16.gmra.mxu0 %v7046_v25  ;;  %v2023_v31 = vpop.f32.mrf.mxu2  ;;  %v7058_v43 = vor.u32 %v7850_v20, %v7055_v37 }
 0x2e5   : > { %v2024_v24 = vadd.f32 %v2023_v31, %v1979_v1  ;;  %v11868_v1 = vld [vmem:[#allocation26_spill] sm:$0xff] }
 0x2e7   : > { %v9754_v28 = vadd.f32 %v2024_v24, %v9482_v49  ;;  %v7053_v49 = vld [vmem:[%s11770_s2 + $0x260] sm:$0xf] }
 0x2e8   : > { %v1888_v35 = vpop.f32.mrf.mxu1  ;;  %7085 = vmatmul.msk.bf16.gmra.mxu3 %vm819_vm1, %v7050_v2  ;;  %v7054_v60 = vor.u32 %v7851_v13, %v7053_v49  ;;  %v11867_v2 = vld [vmem:[#allocation41_spill] sm:$0xff]  ;;  %v11870_v49 = vld [vmem:[#allocation27_spill] sm:$0xff] }
 0x2e9   : > { %v1933_v54 = vadd.f32 %v1932_v26, %v1888_v35  ;;  %v1981_v23 = vpop.f32.mrf.mxu0 }
 0x2eb   : > { %v9758_v34 = vadd.f32 %v1933_v54, %v9490_v61  ;;  %v1935_v6 = vpop.f32.mrf.mxu3 }
 0x2ec   : > { %v2025_v58 = vpop.f32.mrf.mxu2 }
 0x2ed   : > { %v2026_v61 = vadd.f32 %v2025_v58, %v1981_v23  ;;  %v11869_v23 = vld [vmem:[#allocation30_spill] sm:$0xff]  ;;  %v7854_v58 = vld [vmem:[%s11770_s2 + $0x284] sm:$0xf] }
 0x2ef   : > { %v9773_v44 = vadd.f32 %v2026_v61, %v9508_v19  ;;  %v11866_v19 = vld [vmem:[#allocation40_spill] sm:$0xff]  ;;  %v7071_v61 = vld [vmem:[%s11770_s2 + $0x288] sm:$0xf0] }
 0x2f0   : > { %v1891_v39 = vpop.f32.mrf.mxu1 }
 0x2f1   : > { %v1936_v50 = vadd.f32 %v1935_v6, %v1891_v39  ;;  %v1984_v63 = vpop.f32.mrf.mxu0  ;;  %7093 = vmatmul.msk.bf16.gmra.mxu2 %vm819_vm1, %v7058_v43  ;;  %v7069_v39 = vld [vmem:[%s11770_s2 + $0x280] sm:$0xf] }
 0x2f3   : > { %v9776_v55 = vadd.f32 %v1936_v50, %v9515_v41  ;;  %2297 = vmatmul.bf16.gmra.mxu1 %v7046_v25  ;;  %v1937_v33 = vpop.f32.mrf.mxu3  ;;  %v7852_v41 = vld [vmem:[%s11770_s2 + $0x274] sm:$0xf] }
 0x2f4   : > { %2390 = vmatmul.bf16.gmra.mxu0 %v7054_v60  ;;  %v2028_v11 = vpop.f32.mrf.mxu2  ;;  %v7066_v21 = vor.u32 %v7852_v41, %v7063_v46 }
 0x2f5   : > { %v2029_v14 = vadd.f32 %v2028_v11, %v1984_v63 }
 0x2f7   : > { %v9780_v52 = vadd.f32 %v2029_v14, %v9523_v22  ;;  %v7061_v22 = vld [vmem:[%s11770_s2 + $0x270] sm:$0xf] }
 0x2f8   : > { %v1893_v47 = vpop.f32.mrf.mxu1  ;;  %7086 = vmatmul.msk.bf16.gmra.mxu3 %vm819_vm1, %v7058_v43  ;;  %v7062_v18 = vor.u32 %v7853_v17, %v7061_v22 }
 0x2f9   : > { %v1938_v5 = vadd.f32 %v1937_v33, %v1893_v47  ;;  %v1986_v16 = vpop.f32.mrf.mxu0  ;;  %v7074_v33 = vor.u32 %v7854_v58, %v7071_v61 }
 0x2fb   : > { %v9784_v30 = vadd.f32 %v1938_v5, %v11866_v19  ;;  %v1940_v0 = vpop.f32.mrf.mxu3 }
 0x2fc   : > { %v2030_v38 = vpop.f32.mrf.mxu2 }
 0x2fd   : > { %v2031_v12 = vadd.f32 %v2030_v38, %v1986_v16 }
 0x2ff   : > { %v9799_v48 = vadd.f32 %v2031_v12, %v11867_v2 }
 0x300   : > { %v1896_v7 = vpop.f32.mrf.mxu1 }
 0x301   : > { %v1941_v25 = vadd.f32 %v1940_v0, %v1896_v7  ;;  %v1989_v36 = vpop.f32.mrf.mxu0  ;;  %7094 = vmatmul.msk.bf16.gmra.mxu2 %vm819_vm1, %v7066_v21 }
 0x303   : > { %v9802_v26 = vadd.f32 %v1941_v25, %v11868_v1  ;;  %2302 = vmatmul.bf16.gmra.mxu1 %v7054_v60  ;;  %v1942_v31 = vpop.f32.mrf.mxu3  ;;  %v7855_v60 = vld [vmem:[%s11770_s2 + $0x284] sm:$0xf0] }
 0x304   : > { %2395 = vmatmul.bf16.gmra.mxu0 %v7062_v18  ;;  %v2033_v24 = vpop.f32.mrf.mxu2  ;;  %v7070_v14 = vor.u32 %v7855_v60, %v7069_v39  ;;  %v7101_v39 = vld [vmem:[%s11770_s2 + $0x8] sm:$0xf0] }
 0x305   : > { %v2034_v35 = vadd.f32 %v2033_v24, %v1989_v36 }
 0x307   : > { %v9806_v20 = vadd.f32 %v2034_v35, %v11869_v23 }
 0x308   : > { %v1898_v54 = vpop.f32.mrf.mxu1  ;;  %7087 = vmatmul.msk.bf16.gmra.mxu3 %vm819_vm1, %v7066_v21  ;;  %v7079_v21 = vld [vmem:[%s11770_s2 + $0x298] sm:$0x70] }
 0x309   : > { %v1943_v37 = vadd.f32 %v1942_v31, %v1898_v54  ;;  %v1991_v6 = vpop.f32.mrf.mxu0 }
 0x30b   : > { %v9810_v13 = vadd.f32 %v1943_v37, %v11870_v49  ;;  %v1945_v43 = vpop.f32.mrf.mxu3 }
 0x30c   : > { %v2035_v50 = vpop.f32.mrf.mxu2 }
 0x30d   : > { %v2036_v63 = vadd.f32 %v2035_v50, %v1991_v6  ;;  %v7859_v50 = vld [vmem:[%s11770_s2 + $0x4] sm:$0xf0] }
 0x30f   : > { %v9825_v47 = vadd.f32 %v2036_v63, %v9592_v42 }
 0x310   : > { %v1901_v11 = vpop.f32.mrf.mxu1 }
 0x311   : > { %v1946_v5 = vadd.f32 %v1945_v43, %v1901_v11  ;;  %v1994_v16 = vpop.f32.mrf.mxu0  ;;  %7095 = vmatmul.msk.bf16.gmra.mxu2 %vm819_vm1, %v7074_v33 }
 0x313   : > { %v9828_v19 = vadd.f32 %v1946_v5, %v9598_v32  ;;  %2307 = vmatmul.bf16.gmra.mxu1 %v7062_v18  ;;  %v1947_v41 = vpop.f32.mrf.mxu3  ;;  %v7856_v32 = vld [vmem:[%s11770_s2 + $0x294] sm:$0xf]  ;;  %v7857_v18 = vld [vmem:[%s11770_s2 + $0x294] sm:$0x70] }
 0x314   : > { %2400 = vmatmul.bf16.gmra.mxu0 %v7070_v14  ;;  %v2038_v46 = vpop.f32.mrf.mxu2  ;;  %v7082_v25 = vor.u32 %v7856_v32, %v7079_v21 }
 0x315   : > { %v2039_v0 = vadd.f32 %v2038_v46, %v1994_v16 }
 0x317   : > { %v9832_v17 = vadd.f32 %v2039_v0, %v9612_v8  ;;  %v7077_v8 = vld [vmem:[%s11770_s2 + $0x290] sm:$0xf] }
 0x318   : > { %v1903_v22 = vpop.f32.mrf.mxu1  ;;  %7088 = vmatmul.msk.bf16.gmra.mxu3 %vm819_vm1, %v7074_v33  ;;  %v7078_v1 = vor.u32 %v7857_v18, %v7077_v8  ;;  %v7109_v8 = vld [vmem:[%s11770_s2 + $0x18] sm:$0xf0] }
 0x319   : > { %v1948_v38 = vadd.f32 %v1947_v41, %v1903_v22  ;;  %v1996_v12 = vpop.f32.mrf.mxu0 }
 0x31b   : > { %v9836_v42 = vadd.f32 %v1948_v38, %v9619_v3  ;;  %v1950_v7 = vpop.f32.mrf.mxu3 }
 0x31c   : > { %v2040_v2 = vpop.f32.mrf.mxu2 }
 0x31d   : > { %v2041_v3 = vadd.f32 %v2040_v2, %v1996_v12  ;;  %v7861_v2 = vld [vmem:[%s11770_s2 + $0x14] sm:$0xf0] }
 0x31f   : > { %v9851_v31 = vadd.f32 %v2041_v3, %v9644_v9 }
 0x320   : > { %v1906_v36 = vpop.f32.mrf.mxu1 }
 0x321   : > { %v1951_v24 = vadd.f32 %v1950_v7, %v1906_v36  ;;  %v1999_v35 = vpop.f32.mrf.mxu0  ;;  %7096 = vmatmul.msk.bf16.gmra.mxu2 %vm819_vm1, %v7082_v25 }
 0x323   : > { %v9854_v54 = vadd.f32 %v1951_v24, %v9651_v53  ;;  %2312 = vmatmul.bf16.gmra.mxu1 %v7070_v14  ;;  %v1952_v23 = vpop.f32.mrf.mxu3  ;;  %v7858_v53 = vld [vmem:[%s11770_s2 + $0x4] sm:$0xf] }
 0x324   : > { %2405 = vmatmul.bf16.gmra.mxu0 %v7078_v1  ;;  %v2043_v37 = vpop.f32.mrf.mxu2  ;;  %v7104_v33 = vor.u32 %v7858_v53, %v7101_v39 }
 0x325   : > { %v2044_v6 = vadd.f32 %v2043_v37, %v1999_v35  ;;  %v3033_v37 = vpop.permute.xlu1 %3032 }
 0x327   : > { %v9858_v58 = vadd.f32 %v2044_v6, %v9665_v4  ;;  %v7099_v4 = vld [vmem:[%s11770_s2] sm:$0xf] }
 0x328   : > { %v1908_v49 = vpop.f32.mrf.mxu1  ;;  %7089 = vmatmul.msk.bf16.gmra.mxu3 %vm819_vm1, %v7082_v25  ;;  %v7100_v14 = vor.u32 %v7859_v50, %v7099_v4 }
 0x329   : > { %v1953_v61 = vadd.f32 %v1952_v23, %v1908_v49  ;;  %v2001_v43 = vpop.f32.mrf.mxu0  ;;  %v3035_v49 = vpop.permute.xlu2 %3034 }
 0x32a   : > { %3212 = vmatpush.bf16.msra.mxu0 %v3035_v49 }
 0x32b   : > { %v9862_v9 = vadd.f32 %v1953_v61, %v9671_v10  ;;  %v1955_v60 = vpop.f32.mrf.mxu3 }
 0x32c   : > { %v2045_v63 = vpop.f32.mrf.mxu2 }
 0x32d   : > { %v2046_v10 = vadd.f32 %v2045_v63, %v2001_v43  ;;  %v3059_v50 = vpop.permute.xlu1 %3058  ;;  %v3057_v63 = vpop.permute.xlu0 %3056 }
 0x32e   : > { %3258 = vmatpush.bf16.msra.mxu2 %v3059_v50 }
 0x32f   : > { %v9877_v5 = vadd.f32 %v2046_v10, %v9689_v62 }
 0x330   : > { %v1911_v11 = vpop.f32.mrf.mxu1 }
 0x331   : > { %v1956_v16 = vadd.f32 %v1955_v60, %v1911_v11  ;;  %v2004_v41 = vpop.f32.mrf.mxu0  ;;  %7160 = vmatmul.msk.bf16.vlgmr.msrb.gmra.mxu2 %vm819_vm1, %v7104_v33  ;;  %v3029_v10 = vpop.permute.xlu2 %3028  ;;  %v3074_v11 = vsel %vm3060_vm5, %v3057_v63, %v3059_v50 }
 0x332   : > { %3170 = vmatpush.bf16.msra.mxu3 %v3074_v11 }
 0x333   : > { %v9880_v46 = vadd.f32 %v1956_v16, %v9694_v40  ;;  %2317 = vmatmul.bf16.gmra.mxu1 %v7078_v1  ;;  %v1957_v0 = vpop.f32.mrf.mxu3  ;;  %v7860_v40 = vld [vmem:[%s11770_s2 + $0x14] sm:$0xf]  ;;  %v7863_v16 = vld [vmem:[%s11770_s2 + $0x24] sm:$0xf0] }
 0x334   : > { %2677 = vmatmul.bf16.vlgmr.msrb.gmra.mxu0 %v7100_v14  ;;  %v2048_v22 = vpop.f32.mrf.mxu2  ;;  %v7112_v25 = vor.u32 %v7860_v40, %v7109_v8 }
 0x335   : > { %v2049_v38 = vadd.f32 %v2048_v22, %v2004_v41 }
 0x337   : > { %v9884_v32 = vadd.f32 %v2049_v38, %v9700_v59  ;;  %v7107_v59 = vld [vmem:[%s11770_s2 + $0x10] sm:$0xf] }
 0x338   : > { %v1913_v12 = vpop.f32.mrf.mxu1  ;;  %7153 = vmatmul.msk.bf16.vlgmr.msrb.gmra.mxu3 %vm819_vm1, %v7104_v33  ;;  %v7108_v1 = vor.u32 %v7861_v2, %v7107_v59  ;;  %v7862_v33 = vld [vmem:[%s11770_s2 + $0x24] sm:$0xf]  ;;  %v3031_v2 = vpop.permute.xlu0 %3030 }
 0x339   : > { %v1958_v21 = vadd.f32 %v1957_v0, %v1913_v12  ;;  %v2006_v7 = vpop.f32.mrf.mxu0  ;;  %v3068_v0 = vsel %vm3060_vm5, %v3033_v37, %v3035_v49  ;;  %3213 = vmatpush.bf16.msra.mxu0 %v3031_v2  ;;  %v3067_v49 = vsel %vm3060_vm5, %v3029_v10, %v3031_v2 }
 0x33a   : > { %3124 = vmatpush.bf16.msra.mxu1 %v3068_v0 }
 0x33b   : > { %v9888_v62 = vadd.f32 %v1958_v21, %v9705_v29  ;;  %v1960_v18 = vpop.f32.mrf.mxu3 }
 0x33c   : > { %v2050_v3 = vpop.f32.mrf.mxu2 }
 0x33d   : > { %v2051_v29 = vadd.f32 %v2050_v3, %v2006_v7  ;;  %v3055_v3 = vpop.permute.xlu2 %3054 }
 0x33e   : > { %3259 = vmatpush.bf16.msra.mxu2 %v3055_v3  ;;  %3125 = vmatpush.bf16.msra.mxu1 %v3067_v49 }
 0x33f   : > { %v9903_v24 = vadd.f32 %v2051_v29, %v9721_v45 }
 0x340   : > { %v1916_v36 = vpop.f32.mrf.mxu1 }
 0x341   : > { %v1961_v35 = vadd.f32 %v1960_v18, %v1916_v36  ;;  %v2376_v23 = vpop.f32.mrf.mxu0  ;;  %7161 = vmatmul.msk.bf16.gmra.mxu2 %vm819_vm1, %v7112_v25  ;;  %v3053_v18 = vpop.permute.xlu1 %3052 }
 0x342   : > { %v3073_v50 = vsel %vm3060_vm5, %v3053_v18, %v3055_v3 }
 0x343   : > { %v9906_v6 = vadd.f32 %v1961_v35, %v9724_v27  ;;  %2589 = vmatmul.bf16.vlgmr.msrb.gmra.mxu1 %v7100_v14  ;;  %v1962_v61 = vpop.f32.mrf.mxu3  ;;  %3171 = vmatpush.bf16.msra.mxu3 %v3073_v50 }
 0x344   : > { %2682 = vmatmul.bf16.gmra.mxu0 %v7108_v1  ;;  %v2420_v43 = vpop.f32.mrf.mxu2 }
 0x345   : > { %v2421_v53 = vadd.f32 %v2420_v43, %v2376_v23  ;;  %v3049_v43 = vpop.permute.xlu2 %3048 }
 0x347   : > { %v9910_v60 = vadd.f32 %v2421_v53, %v9728_v57  ;;  %v7117_v57 = vld [vmem:[%s11770_s2 + $0x28] sm:$0xf0]  ;;  %v7864_v53 = vld [vmem:[%s11770_s2 + $0x34] sm:$0xf] }
 0x348   : > { %v1918_v39 = vpop.f32.mrf.mxu1  ;;  %7154 = vmatmul.msk.bf16.gmra.mxu3 %vm819_vm1, %v7112_v25  ;;  %v7120_v38 = vor.u32 %v7862_v33, %v7117_v57 }
 0x349   : > { %v1963_v45 = vadd.f32 %v1962_v61, %v1918_v39  ;;  %v2378_v4 = vpop.f32.mrf.mxu0  ;;  %v3025_v61 = vpop.permute.xlu0 %3024 }
 0x34b   : > { %v9914_v27 = vadd.f32 %v1963_v45, %v9732_v15  ;;  %v2332_v14 = vpop.f32.mrf.mxu3  ;;  %v7115_v15 = vld [vmem:[%s11770_s2 + $0x20] sm:$0xf]  ;;  %v7123_v45 = vld [vmem:[%s11770_s2 + $0x30] sm:$0xf] }
 0x34c   : > { %v2422_v41 = vpop.f32.mrf.mxu2  ;;  %v7116_v21 = vor.u32 %v7863_v16, %v7115_v15 }
 0x34d   : > { %v2423_v22 = vadd.f32 %v2422_v41, %v2378_v4 }
 0x34f   : > { %v9931_v7 = vadd.f32 %v2423_v22, %v9747_v51  ;;  %v3023_v22 = vpop.permute.xlu2 %3022 }
 0x350   : > { %v2288_v12 = vpop.f32.mrf.mxu1 }
 0x351   : > { %11871 = vst [vmem:[#allocation29_spill] sm:$0xff] %v9931_v7  ;;  %v2333_v40 = vadd.f32 %v2332_v14, %v2288_v12  ;;  %v2381_v8 = vpop.f32.mrf.mxu0  ;;  %7162 = vmatmul.msk.bf16.gmra.mxu2 %vm819_vm1, %v7120_v38  ;;  %v3051_v0 = vpop.permute.xlu0 %3050 }
 0x352   : > { %3260 = vmatpush.bf16.msra.mxu2 %v3051_v0  ;;  %v3072_v3 = vsel %vm3060_vm5, %v3049_v43, %v3051_v0 }
 0x353   : > { %v9934_v59 = vadd.f32 %v2333_v40, %v9750_v56  ;;  %2594 = vmatmul.bf16.gmra.mxu1 %v7108_v1  ;;  %v2334_v29 = vpop.f32.mrf.mxu3  ;;  %v3027_v56 = vpop.permute.xlu1 %3026  ;;  %3172 = vmatpush.bf16.msra.mxu3 %v3072_v3 }
 0x354   : > { %2687 = vmatmul.bf16.gmra.mxu0 %v7116_v21  ;;  %v2425_v25 = vpop.f32.mrf.mxu2  ;;  %v3066_v40 = vsel %vm3060_vm5, %v3025_v61, %v3027_v56 }
 0x355   : > { %v2426_v36 = vadd.f32 %v2425_v25, %v2381_v8  ;;  %3214 = vmatpush.bf16.msra.mxu0 %v3027_v56  ;;  %3126 = vmatpush.bf16.msra.mxu1 %v3066_v40 }
 0x357   : > { %v9938_v51 = vadd.f32 %v2426_v36, %v9754_v28  ;;  %v7125_v28 = vld [vmem:[%s11770_s2 + $0x38] sm:$0xf0]  ;;  %v3017_v36 = vpop.permute.xlu2 %3016 }
 0x358   : > { %v2290_v35 = vpop.f32.mrf.mxu1  ;;  %7155 = vmatmul.msk.bf16.gmra.mxu3 %vm819_vm1, %v7120_v38  ;;  %v7128_v10 = vor.u32 %v7864_v53, %v7125_v28 }
 0x359   : > { %v2335_v23 = vadd.f32 %v2334_v29, %v2290_v35  ;;  %v2383_v37 = vpop.f32.mrf.mxu0  ;;  %3215 = vmatpush.bf16.msra.mxu0 %v3023_v22  ;;  %v3045_v25 = vpop.permute.xlu0 %3044  ;;  %v7866_v35 = vld [vmem:[%s11770_s2 + $0x44] sm:$0xf] }
 0x35b   : > { %v9943_v1 = vadd.f32 %v2335_v23, %v9758_v34  ;;  %v2337_v39 = vpop.f32.mrf.mxu3  ;;  %v7865_v34 = vld [vmem:[%s11770_s2 + $0x34] sm:$0xf0]  ;;  %v3021_v16 = vpop.permute.xlu1 %3020 }
 0x35c   : > { %v2427_v4 = vpop.f32.mrf.mxu2  ;;  %v7124_v57 = vor.u32 %v7865_v34, %v7123_v45  ;;  %v3065_v49 = vsel %vm3060_vm5, %v3021_v16, %v3023_v22 }
 0x35d   : > { %11872 = vst [vmem:[#allocation37_spill] sm:$0xff] %v9943_v1  ;;  %v2428_v63 = vadd.f32 %v2427_v4, %v2383_v37  ;;  %v7131_v37 = vld [vmem:[%s11770_s2 + $0x40] sm:$0xf]  ;;  %3127 = vmatpush.bf16.msra.mxu1 %v3065_v49 }
 0x35f   : > { %v9959_v11 = vadd.f32 %v2428_v63, %v9773_v44 }
 0x360   : > { %v2293_v33 = vpop.f32.mrf.mxu1 }
 0x361   : > { %v2338_v14 = vadd.f32 %v2337_v39, %v2293_v33  ;;  %v2386_v15 = vpop.f32.mrf.mxu0  ;;  %7163 = vmatmul.msk.bf16.gmra.mxu2 %vm819_vm1, %v7128_v10  ;;  %v3019_v63 = vpop.permute.xlu0 %3018 }
 0x362   : > { %3216 = vmatpush.bf16.msra.mxu0 %v3019_v63 }
 0x363   : > { %v9962_v41 = vadd.f32 %v2338_v14, %v9776_v55  ;;  %2599 = vmatmul.bf16.gmra.mxu1 %v7116_v21  ;;  %v2339_v38 = vpop.f32.mrf.mxu3  ;;  %v3047_v21 = vpop.permute.xlu1 %3046 }
 0x364   : > { %2692 = vmatmul.bf16.gmra.mxu0 %v7124_v57  ;;  %v2430_v12 = vpop.f32.mrf.mxu2  ;;  %3261 = vmatpush.bf16.msra.mxu2 %v3047_v21 }
 0x365   : > { %v2431_v44 = vadd.f32 %v2430_v12, %v2386_v15  ;;  %v3071_v15 = vsel %vm3060_vm5, %v3045_v25, %v3047_v21 }
 0x366   : > { %3173 = vmatpush.bf16.msra.mxu3 %v3071_v15 }
 0x367   : > { %v9967_v18 = vadd.f32 %v2431_v44, %v9780_v52  ;;  %v7133_v52 = vld [vmem:[%s11770_s2 + $0x48] sm:$0xf0] }
 0x368   : > { %v2295_v8 = vpop.f32.mrf.mxu1  ;;  %7156 = vmatmul.msk.bf16.gmra.mxu3 %vm819_vm1, %v7128_v10  ;;  %v7136_v43 = vor.u32 %v7866_v35, %v7133_v52  ;;  %v3043_v10 = vpop.permute.xlu2 %3042 }
 0x369   : > { %v2340_v55 = vadd.f32 %v2339_v38, %v2295_v8  ;;  %v2388_v2 = vpop.f32.mrf.mxu0  ;;  %3262 = vmatpush.bf16.msra.mxu2 %v3043_v10  ;;  %v3064_v38 = vsel %vm3060_vm5, %v3017_v36, %v3019_v63  ;;  %v3013_v40 = vpop.permute.xlu0 %3012  ;;  %v7868_v8 = vld [vmem:[%s11770_s2 + $0x54] sm:$0xf] }
 0x36a   : > { %3128 = vmatpush.bf16.msra.mxu1 %v3064_v38 }
 0x36b   : > { %v9972_v29 = vadd.f32 %v2340_v55, %v9784_v30  ;;  %v2342_v23 = vpop.f32.mrf.mxu3  ;;  %v7867_v30 = vld [vmem:[%s11770_s2 + $0x44] sm:$0xf0]  ;;  %v3041_v4 = vpop.permute.xlu1 %3040 }
 0x36c   : > { %v2432_v56 = vpop.f32.mrf.mxu2  ;;  %v7132_v28 = vor.u32 %v7867_v30, %v7131_v37  ;;  %v3070_v3 = vsel %vm3060_vm5, %v3041_v4, %v3043_v10 }
 0x36d   : > { %v2433_v61 = vadd.f32 %v2432_v56, %v2388_v2  ;;  %v7139_v2 = vld [vmem:[%s11770_s2 + $0x50] sm:$0xf]  ;;  %3174 = vmatpush.bf16.msra.mxu3 %v3070_v3 }
 0x36f   : > { %v9988_v39 = vadd.f32 %v2433_v61, %v9799_v48 }
 0x370   : > { %v2298_v53 = vpop.f32.mrf.mxu1  ;;  %v3037_v44 = vpop.permute.xlu2 %3036 }
 0x371   : > { %v2343_v45 = vadd.f32 %v2342_v23, %v2298_v53  ;;  %v2391_v34 = vpop.f32.mrf.mxu0  ;;  %7164 = vmatmul.msk.bf16.gmra.mxu2 %vm819_vm1, %v7136_v43  ;;  %v3039_v61 = vpop.permute.xlu0 %3038 }
 0x372   : > { %3263 = vmatpush.bf16.msra.mxu2 %v3039_v61  ;;  %v3069_v63 = vsel %vm3060_vm5, %v3037_v44, %v3039_v61 }
 0x373   : > { %v9991_v50 = vadd.f32 %v2343_v45, %v9802_v26  ;;  %2604 = vmatmul.bf16.gmra.mxu1 %v7124_v57  ;;  %v2344_v33 = vpop.f32.mrf.mxu3  ;;  %v3015_v57 = vpop.permute.xlu1 %3014  ;;  %3175 = vmatpush.bf16.msra.mxu3 %v3069_v63 }
 0x374   : > { %2697 = vmatmul.bf16.gmra.mxu0 %v7132_v28  ;;  %v2435_v14 = vpop.f32.mrf.mxu2 }
 0x375   : > { %v2436_v48 = vadd.f32 %v2435_v14, %v2391_v34  ;;  %3217 = vmatpush.bf16.msra.mxu0 %v3015_v57  ;;  %v3063_v34 = vsel %vm3060_vm5, %v3013_v40, %v3015_v57 }
 0x376   : > { %3129 = vmatpush.bf16.msra.mxu1 %v3063_v34 }
 0x377   : > { %v9996_v0 = vadd.f32 %v2436_v48, %v9806_v20  ;;  %v7141_v20 = vld [vmem:[%s11770_s2 + $0x58] sm:$0xf0]  ;;  %v7870_v48 = vld [vmem:[%s11770_s2 + $0x64] sm:$0xf] }
 0x378   : > { %v2300_v16 = vpop.f32.mrf.mxu1  ;;  %7157 = vmatmul.msk.bf16.gmra.mxu3 %vm819_vm1, %v7136_v43  ;;  %v7144_v36 = vor.u32 %v7868_v8, %v7141_v20  ;;  %v3011_v43 = vpop.permute.xlu2 %3010 }
 0x379   : > { %v2345_v26 = vadd.f32 %v2344_v33, %v2300_v16  ;;  %v2393_v22 = vpop.f32.mrf.mxu0  ;;  %3218 = vmatpush.bf16.msra.mxu0 %v3011_v43  ;;  %v3005_v40 = vpop.permute.xlu0 %3004 }
 0x37b   : > { %v10001_v12 = vadd.f32 %v2345_v26, %v9810_v13  ;;  %v2347_v55 = vpop.f32.mrf.mxu3  ;;  %v7869_v13 = vld [vmem:[%s11770_s2 + $0x54] sm:$0xf0]  ;;  %v3009_v56 = vpop.permute.xlu1 %3008  ;;  %v7147_v26 = vld [vmem:[%s11770_s2 + $0x60] sm:$0xf] }
 0x37c   : > { %v2437_v21 = vpop.f32.mrf.mxu2  ;;  %v7140_v52 = vor.u32 %v7869_v13, %v7139_v2  ;;  %v3062_v15 = vsel %vm3060_vm5, %v3009_v56, %v3011_v43  ;;  %v7873_v43 = vld [vmem:[%s11770_s2 + $0x2a4] sm:$0xf0] }
 0x37d   : > { %v2438_v25 = vadd.f32 %v2437_v21, %v2393_v22  ;;  %3130 = vmatpush.bf16.msra.mxu1 %v3062_v15 }
 0x37f   : > { %v10017_v23 = vadd.f32 %v2438_v25, %v9825_v47 }
 0x380   : > { %v2303_v35 = vpop.f32.mrf.mxu1 }
 0x381   : > { %v2348_v37 = vadd.f32 %v2347_v55, %v2303_v35  ;;  %v2396_v30 = vpop.f32.mrf.mxu0  ;;  %7165 = vmatmul.msk.bf16.gmra.mxu2 %vm819_vm1, %v7144_v36 }
 0x383   : > { %v10020_v49 = vadd.f32 %v2348_v37, %v9828_v19  ;;  %2609 = vmatmul.bf16.gmra.mxu1 %v7132_v28  ;;  %v2349_v53 = vpop.f32.mrf.mxu3  ;;  %v3007_v33 = vpop.permute.xlu1 %3006 }
 0x384   : > { %2702 = vmatmul.bf16.gmra.mxu0 %v7140_v52  ;;  %v2440_v45 = vpop.f32.mrf.mxu2  ;;  %v3061_v20 = vsel %vm3060_vm5, %v3005_v40, %v3007_v33  ;;  %vm4804_vm5 = vcmask 734212  }
 0x385   : > { %v2441_v47 = vadd.f32 %v2440_v45, %v2396_v30  ;;  %3219 = vmatpush.bf16.msra.mxu0 %v3007_v33  ;;  %3131 = vmatpush.bf16.msra.mxu1 %v3061_v20 }
 0x387   : > { %v10026_v19 = vadd.f32 %v2441_v47, %v9832_v17  ;;  %v7149_v17 = vld [vmem:[%s11770_s2 + $0x68] sm:$0x70] }
 0x388   : > { %v2305_v4 = vpop.f32.mrf.mxu1  ;;  %7158 = vmatmul.msk.bf16.gmra.mxu3 %vm819_vm1, %v7144_v36  ;;  %v7152_v38 = vor.u32 %v7870_v48, %v7149_v17 }
 0x389   : > { %v2350_v28 = vadd.f32 %v2349_v53, %v2305_v4  ;;  %v2398_v10 = vpop.f32.mrf.mxu0 }
 0x38b   : > { %v10030_v14 = vadd.f32 %v2350_v28, %v9836_v42  ;;  %v2352_v16 = vpop.f32.mrf.mxu3  ;;  %v7871_v42 = vld [vmem:[%s11770_s2 + $0x64] sm:$0x70] }
 0x38c   : > { %v2442_v22 = vpop.f32.mrf.mxu2  ;;  %v7148_v8 = vor.u32 %v7871_v42, %v7147_v26 }
 0x38d   : > { %v2443_v57 = vadd.f32 %v2442_v22, %v2398_v10  ;;  %v7193_v22 = vld [vmem:[%s11770_s2 + $0x2b8] sm:$0xf0] }
 0x38f   : > { %v10047_v55 = vadd.f32 %v2443_v57, %v9851_v31 }
 0x390   : > { %v2308_v44 = vpop.f32.mrf.mxu1 }
 0x391   : > { %v2353_v2 = vadd.f32 %v2352_v16, %v2308_v44  ;;  %v2401_v13 = vpop.f32.mrf.mxu0  ;;  %7166 = vmatmul.msk.bf16.gmra.mxu2 %vm819_vm1, %v7152_v38 }
 0x393   : > { %v10050_v21 = vadd.f32 %v2353_v2, %v9854_v54  ;;  %2614 = vmatmul.bf16.gmra.mxu1 %v7140_v52  ;;  %v2354_v3 = vpop.f32.mrf.mxu3  ;;  %v7872_v54 = vld [vmem:[%s11770_s2 + $0x2a4] sm:$0xf]  ;;  %v7185_v52 = vld [vmem:[%s11770_s2 + $0x2a8] sm:$0xf0] }
 0x394   : > { %2707 = vmatmul.bf16.gmra.mxu0 %v7148_v8  ;;  %v2445_v25 = vpop.f32.mrf.mxu2  ;;  %v7188_v45 = vor.u32 %v7872_v54, %v7185_v52 }
 0x395   : > { %v2446_v36 = vadd.f32 %v2445_v25, %v2401_v13 }
 0x397   : > { %v10054_v37 = vadd.f32 %v2446_v36, %v9858_v58  ;;  %v7183_v58 = vld [vmem:[%s11770_s2 + $0x2a0] sm:$0xf] }
 0x398   : > { %v2310_v35 = vpop.f32.mrf.mxu1  ;;  %7159 = vmatmul.msk.bf16.gmra.mxu3 %vm819_vm1, %v7152_v38  ;;  %v7184_v47 = vor.u32 %v7873_v43, %v7183_v58  ;;  %v7875_v38 = vld [vmem:[%s11770_s2 + $0x2b4] sm:$0xf0]  ;;  %v7199_v43 = vld [vmem:[%s11770_s2 + $0x2c0] sm:$0xf] }
 0x399   : > { %v2355_v30 = vadd.f32 %v2354_v3, %v2310_v35  ;;  %v2403_v31 = vpop.f32.mrf.mxu0 }
 0x39b   : > { %v10058_v56 = vadd.f32 %v2355_v30, %v9862_v9  ;;  %v2357_v61 = vpop.f32.mrf.mxu3 }
 0x39c   : > { %v2447_v53 = vpop.f32.mrf.mxu2 }
 0x39d   : > { %v2448_v9 = vadd.f32 %v2447_v53, %v2403_v31  ;;  %v7877_v53 = vld [vmem:[%s11770_s2 + $0x2c4] sm:$0xf0] }
 0x39f   : > { %v10073_v4 = vadd.f32 %v2448_v9, %v9877_v5 }
 0x3a0   : > { %v2313_v34 = vpop.f32.mrf.mxu1 }
 0x3a1   : > { %v2358_v63 = vadd.f32 %v2357_v61, %v2313_v34  ;;  %v2406_v28 = vpop.f32.mrf.mxu0  ;;  %7244 = vmatmul.msk.bf16.vlgmr.msra.gmra.mxu2 %vm819_vm1, %v7188_v45  ;;  %v7201_v61 = vld [vmem:[%s11770_s2 + $0x2c8] sm:$0xf0] }
 0x3a3   : > { %v10076_v10 = vadd.f32 %v2358_v63, %v9880_v46  ;;  %2619 = vmatmul.bf16.gmra.mxu1 %v7148_v8  ;;  %v2359_v33 = vpop.f32.mrf.mxu3  ;;  %v7874_v46 = vld [vmem:[%s11770_s2 + $0x2b4] sm:$0xf] }
 0x3a4   : > { %3220 = vmatmul.bf16.vlgmr.msra.gmra.mxu0 %v7184_v47  ;;  %v2450_v15 = vpop.f32.mrf.mxu2  ;;  %v7196_v44 = vor.u32 %v7874_v46, %v7193_v22  ;;  %v7878_v46 = vld [vmem:[%s11770_s2 + $0x2d4] sm:$0xf]  ;;  %v7209_v22 = vld [vmem:[%s11770_s2 + $0x2d8] sm:$0xf0] }
 0x3a5   : > { %v2451_v48 = vadd.f32 %v2450_v15, %v2406_v28 }
 0x3a7   : > { %v10080_v16 = vadd.f32 %v2451_v48, %v9884_v32  ;;  %v7191_v32 = vld [vmem:[%s11770_s2 + $0x2b0] sm:$0xf] }
 0x3a8   : > { %v2315_v17 = vpop.f32.mrf.mxu1  ;;  %7237 = vmatmul.msk.bf16.vlgmr.msra.gmra.mxu3 %vm819_vm1, %v7188_v45  ;;  %v7192_v20 = vor.u32 %v7875_v38, %v7191_v32  ;;  %v7207_v32 = vld [vmem:[%s11770_s2 + $0x2d0] sm:$0xf]  ;;  %v7879_v38 = vld [vmem:[%s11770_s2 + $0x2d4] sm:$0xf0] }
 0x3a9   : > { %v2360_v26 = vadd.f32 %v2359_v33, %v2315_v17  ;;  %v2408_v42 = vpop.f32.mrf.mxu0 }
 0x3ab   : > { %v10084_v5 = vadd.f32 %v2360_v26, %v9888_v62  ;;  %v2362_v57 = vpop.f32.mrf.mxu3 }
 0x3ac   : > { %v2452_v40 = vpop.f32.mrf.mxu2 }
 0x3ad   : > { %v2453_v62 = vadd.f32 %v2452_v40, %v2408_v42 }
 0x3af   : > { %v10099_v2 = vadd.f32 %v2453_v62, %v9903_v24 }
 0x3b0   : > { %v2318_v8 = vpop.f32.mrf.mxu1 }
 0x3b1   : > { %v2363_v13 = vadd.f32 %v2362_v57, %v2318_v8  ;;  %v2678_v3 = vpop.f32.mrf.mxu0  ;;  %7245 = vmatmul.msk.bf16.gmra.mxu2 %vm819_vm1, %v7196_v44 }
 0x3b3   : > { %v10102_v25 = vadd.f32 %v2363_v13, %v9906_v6  ;;  %3132 = vmatmul.bf16.vlgmr.msra.gmra.mxu1 %v7184_v47  ;;  %v2364_v36 = vpop.f32.mrf.mxu3  ;;  %v7876_v6 = vld [vmem:[%s11770_s2 + $0x2c4] sm:$0xf]  ;;  %v7200_v47 = vor.u32 %v7877_v53, %v7199_v43  ;;  %v7215_v53 = vld [vmem:[%s11770_s2 + $0x2e0] sm:$0xf] }
 0x3b4   : > { %3225 = vmatmul.bf16.gmra.mxu0 %v7192_v20  ;;  %v2722_v35 = vpop.f32.mrf.mxu2  ;;  %v7204_v45 = vor.u32 %v7876_v6, %v7201_v61  ;;  %v7880_v61 = vld [vmem:[%s11770_s2 + $0x2e4] sm:$0xf] }
 0x3b5   : > { %v10105_v30 = vadd.f32 %v2722_v35, %v2678_v3 }
 0x3b8   : > { %v2320_v31 = vpop.f32.mrf.mxu1  ;;  %7238 = vmatmul.msk.bf16.gmra.mxu3 %vm819_vm1, %v7196_v44  ;;  %v7212_v44 = vor.u32 %v7878_v46, %v7209_v22 }
 0x3b9   : > { %v2365_v54 = vadd.f32 %v2364_v36, %v2320_v31  ;;  %v2680_v52 = vpop.f32.mrf.mxu0 }
 0x3bb   : > { %v10109_v24 = vadd.f32 %v2365_v54, %v9914_v27  ;;  %v2634_v58 = vpop.f32.mrf.mxu3 }
 0x3bc   : > { %v2724_v9 = vpop.f32.mrf.mxu2 }
 0x3bd   : > { %v10123_v27 = vadd.f32 %v2724_v9, %v2680_v52  ;;  %v7881_v9 = vld [vmem:[%s11770_s2 + $0x2e4] sm:$0xf0] }
 0x3c0   : > { %v2590_v34 = vpop.f32.mrf.mxu1 }
 0x3c1   : > { %v10125_v63 = vadd.f32 %v2634_v58, %v2590_v34  ;;  %v2683_v28 = vpop.f32.mrf.mxu0  ;;  %7246 = vmatmul.msk.bf16.gmra.mxu2 %vm819_vm1, %v7204_v45  ;;  %v7217_v58 = vld [vmem:[%s11770_s2 + $0x2e8] sm:$0xf0] }
 0x3c2   : > { %v7220_v34 = vor.u32 %v7880_v61, %v7217_v58 }
 0x3c3   : > { %3137 = vmatmul.bf16.gmra.mxu1 %v7192_v20  ;;  %v2636_v33 = vpop.f32.mrf.mxu3  ;;  %v7208_v20 = vor.u32 %v7879_v38, %v7207_v32  ;;  %v7882_v32 = vld [vmem:[%s11770_s2 + $0x2f4] sm:$0xf] }
 0x3c4   : > { %3230 = vmatmul.bf16.gmra.mxu0 %v7200_v47  ;;  %v2727_v15 = vpop.f32.mrf.mxu2 }
 0x3c5   : > { %v10128_v48 = vadd.f32 %v2727_v15, %v2683_v28  ;;  %v7216_v28 = vor.u32 %v7881_v9, %v7215_v53 }
 0x3c8   : > { %v2592_v17 = vpop.f32.mrf.mxu1  ;;  %7239 = vmatmul.msk.bf16.gmra.mxu3 %vm819_vm1, %v7204_v45 }
 0x3c9   : > { %v10130_v26 = vadd.f32 %v2636_v33, %v2592_v17  ;;  %v2685_v42 = vpop.f32.mrf.mxu0 }
 0x3cb   : > { %v2639_v57 = vpop.f32.mrf.mxu3 }
 0x3cc   : > { %v2729_v40 = vpop.f32.mrf.mxu2 }
 0x3cd   : > { %v10145_v62 = vadd.f32 %v2729_v40, %v2685_v42  ;;  %v7225_v40 = vld [vmem:[%s11770_s2 + $0x2f8] sm:$0xf0] }
 0x3d0   : > { %v2595_v8 = vpop.f32.mrf.mxu1 }
 0x3d1   : > { %v10147_v13 = vadd.f32 %v2639_v57, %v2595_v8  ;;  %v2688_v3 = vpop.f32.mrf.mxu0  ;;  %7247 = vmatmul.msk.bf16.gmra.mxu2 %vm819_vm1, %v7212_v44  ;;  %v7883_v8 = vld [vmem:[%s11770_s2 + $0x2f4] sm:$0xf0] }
 0x3d3   : > { %3142 = vmatmul.bf16.gmra.mxu1 %v7200_v47  ;;  %v2641_v36 = vpop.f32.mrf.mxu3 }
 0x3d4   : > { %3235 = vmatmul.bf16.gmra.mxu0 %v7208_v20  ;;  %v2732_v35 = vpop.f32.mrf.mxu2 }
 0x3d5   : > { %v10150_v31 = vadd.f32 %v2732_v35, %v2688_v3 }
 0x3d8   : > { %v2597_v54 = vpop.f32.mrf.mxu1  ;;  %7240 = vmatmul.msk.bf16.gmra.mxu3 %vm819_vm1, %v7212_v44  ;;  %v7223_v44 = vld [vmem:[%s11770_s2 + $0x2f0] sm:$0xf] }
 0x3d9   : > { %v10152_v52 = vadd.f32 %v2641_v36, %v2597_v54  ;;  %v10154_v6 = vpop.f32.mrf.mxu0  ;;  %v7228_v36 = vor.u32 %v7882_v32, %v7225_v40  ;;  %v7224_v35 = vor.u32 %v7883_v8, %v7223_v44  ;;  %v7885_v32 = vld [vmem:[%s11770_s2 + $0x304] sm:$0x70] }
 0x3db   : > { %v2644_v43 = vpop.f32.mrf.mxu3 }
 0x3dc   : > { %v10169_v45 = vpop.f32.mrf.mxu2 }
 0x3e0   : > { %v2600_v47 = vpop.f32.mrf.mxu1 }
 0x3e1   : > { %v10171_v33 = vadd.f32 %v2644_v43, %v2600_v47  ;;  %v2693_v15 = vpop.f32.mrf.mxu0  ;;  %7248 = vmatmul.msk.bf16.gmra.mxu2 %vm819_vm1, %v7220_v34 }
 0x3e3   : > { %3147 = vmatmul.bf16.gmra.mxu1 %v7208_v20  ;;  %v10174_v17 = vpop.f32.mrf.mxu3 }
 0x3e4   : > { %3240 = vmatmul.bf16.gmra.mxu0 %v7216_v28  ;;  %v2737_v42 = vpop.f32.mrf.mxu2 }
 0x3e5   : > { %v2738_v46 = vadd.f32 %v2737_v42, %v2693_v15  ;;  %v7233_v42 = vld [vmem:[%s11770_s2 + $0x308] sm:$0x70] }
 0x3e7   : > { %2811 = vrot.lane.b32.xlu0 %v2738_v46, %s8362_s19 }
 0x3e8   : > { %v10176_v22 = vpop.f32.mrf.mxu1  ;;  %7241 = vmatmul.msk.bf16.gmra.mxu3 %vm819_vm1, %v7220_v34 }
 0x3e9   : > { %v2695_v57 = vpop.f32.mrf.mxu0 }
 0x3eb   : > { %v2649_v38 = vpop.f32.mrf.mxu3 }
 0x3ec   : > { %v2739_v20 = vpop.f32.mrf.mxu2 }
 0x3ed   : > { %v2740_v9 = vadd.f32 %v2739_v20, %v2695_v57  ;;  %v7231_v57 = vld [vmem:[%s11770_s2 + $0x300] sm:$0xf] }
 0x3f0   : > { %v2605_v3 = vpop.f32.mrf.mxu1 }
 0x3f1   : > { %v2650_v54 = vadd.f32 %v2649_v38, %v2605_v3  ;;  %v2698_v61 = vpop.f32.mrf.mxu0  ;;  %7249 = vmatmul.msk.bf16.gmra.mxu2 %vm819_vm1, %v7228_v36  ;;  %v7232_v3 = vor.u32 %v7885_v32, %v7231_v57 }
 0x3f3   : > { %3152 = vmatmul.bf16.gmra.mxu1 %v7216_v28  ;;  %2809 = vrot.lane.b32.xlu2 %v2650_v54, %s8362_s19  ;;  %v2651_v58 = vpop.f32.mrf.mxu3  ;;  %v7884_v28 = vld [vmem:[%s11770_s2 + $0x304] sm:$0xf] }
 0x3f4   : > { %3245 = vmatmul.bf16.gmra.mxu0 %v7224_v35  ;;  %v2742_v43 = vpop.f32.mrf.mxu2  ;;  %v7236_v44 = vor.u32 %v7884_v28, %v7233_v42 }
 0x3f5   : > { %v2743_v38 = vadd.f32 %v2742_v43, %v2698_v61 }
 0x3f8   : > { %v2607_v53 = vpop.f32.mrf.mxu1  ;;  %7242 = vmatmul.msk.bf16.gmra.mxu3 %vm819_vm1, %v7228_v36 }
 0x3f9   : > { %v2652_v34 = vadd.f32 %v2651_v58, %v2607_v53  ;;  %v2700_v47 = vpop.f32.mrf.mxu0 }
 0x3fb   : > { %2813 = vrot.lane.b32.xlu1 %v2652_v34, %s8362_s19  ;;  %2815 = vrot.lane.b32.xlu2 %v2740_v9, %s8362_s19  ;;  %v2654_v15 = vpop.f32.mrf.mxu3 }
 0x3fc   : > { %v2744_v46 = vpop.f32.mrf.mxu2 }
 0x3fd   : > { %v2745_v53 = vadd.f32 %v2744_v46, %v2700_v47 }
 0x400   : > { %v2610_v40 = vpop.f32.mrf.mxu1 }
 0x401   : > { %v2655_v8 = vadd.f32 %v2654_v15, %v2610_v40  ;;  %v2703_v20 = vpop.f32.mrf.mxu0  ;;  %7250 = vmatmul.msk.bf16.gmra.mxu2 %vm819_vm1, %v7236_v44 }
 0x403   : > { %3157 = vmatmul.bf16.gmra.mxu1 %v7224_v35  ;;  %2817 = vrot.lane.b32.xlu1 %v2655_v8, %s8362_s19  ;;  %v2656_v36 = vpop.f32.mrf.mxu3 }
 0x404   : > { %2819 = vrot.lane.b32.xlu2 %v2743_v38, %s8362_s19  ;;  %3250 = vmatmul.bf16.gmra.mxu0 %v7232_v3  ;;  %v2747_v54 = vpop.f32.mrf.mxu2 }
 0x405   : > { %v2748_v43 = vadd.f32 %v2747_v54, %v2703_v20 }
 0x408   : > { %v2612_v58 = vpop.f32.mrf.mxu1  ;;  %7243 = vmatmul.msk.bf16.gmra.mxu3 %vm819_vm1, %v7236_v44  ;;  %vm4674_vm1 = vcmask 728064  }
 0x409   : > { %v2657_v9 = vadd.f32 %v2656_v36, %v2612_v58  ;;  %v2705_v34 = vpop.f32.mrf.mxu0 }
 0x40b   : > { %2821 = vrot.lane.b32.xlu0 %v2657_v9, %s8362_s19  ;;  %2823 = vrot.lane.b32.xlu1 %v2745_v53, %s8362_s19  ;;  %v2659_v35 = vpop.f32.mrf.mxu3 }
 0x40c   : > { %v2749_v61 = vpop.f32.mrf.mxu2 }
 0x40d   : > { %v2750_v32 = vadd.f32 %v2749_v61, %v2705_v34 }
 0x410   : > { %v2615_v15 = vpop.f32.mrf.mxu1 }
 0x411   : > { %v2660_v28 = vadd.f32 %v2659_v35, %v2615_v15  ;;  %v2708_v42 = vpop.f32.mrf.mxu0 }
 0x413   : > { %3162 = vmatmul.bf16.gmra.mxu1 %v7232_v3  ;;  %2825 = vrot.lane.b32.xlu0 %v2660_v28, %s8362_s19  ;;  %v2661_v47 = vpop.f32.mrf.mxu3 }
 0x414   : > { %2827 = vrot.lane.b32.xlu1 %v2748_v43, %s8362_s19  ;;  %v2752_v46 = vpop.f32.mrf.mxu2 }
 0x415   : > { %v2753_v20 = vadd.f32 %v2752_v46, %v2708_v42 }
 0x418   : > { %v2617_v57 = vpop.f32.mrf.mxu1 }
 0x419   : > { %v2662_v38 = vadd.f32 %v2661_v47, %v2617_v57  ;;  %v2710_v40 = vpop.f32.mrf.mxu0  ;;  %v2647_v47 = vadd.f32 %v10174_v17, %v10176_v22 }
 0x41b   : > { %2831 = vrot.lane.b32.xlu0 %v2750_v32, %s8362_s19  ;;  %2829 = vrot.lane.b32.xlu2 %v2662_v38, %s8362_s19  ;;  %v2664_v44 = vpop.f32.mrf.mxu3  ;;  %v2735_v32 = vadd.f32 %v10169_v45, %v10154_v6 }
 0x41c   : > { %v2754_v8 = vpop.f32.mrf.mxu2 }
 0x41d   : > { %v2755_v35 = vadd.f32 %v2754_v8, %v2710_v40 }
 0x420   : > { %v2620_v36 = vpop.f32.mrf.mxu1 }
 0x421   : > { %v2665_v54 = vadd.f32 %v2664_v44, %v2620_v36  ;;  %v3221_v3 = vpop.f32.mrf.mxu0 }
 0x423   : > { %2835 = vrot.lane.b32.xlu0 %v2753_v20, %s8362_s19  ;;  %2833 = vrot.lane.b32.xlu2 %v2665_v54, %s8362_s19  ;;  %v2666_v58 = vpop.f32.mrf.mxu3 }
 0x424   : > { %v3265_v53 = vpop.f32.mrf.mxu2 }
 0x425   : > { %v10221_v9 = vadd.f32 %v3265_v53, %v3221_v3 }
 0x428   : > { %v2622_v34 = vpop.f32.mrf.mxu1 }
 0x429   : > { %v2667_v61 = vadd.f32 %v2666_v58, %v2622_v34  ;;  %v10223_v43 = vpop.f32.mrf.mxu0 }
 0x42a   : > { %11873 = vst [vmem:[#allocation32_spill] sm:$0xff] %v10223_v43 }
 0x42b   : > { %2837 = vrot.lane.b32.xlu1 %v2667_v61, %s8362_s19  ;;  %2839 = vrot.lane.b32.xlu2 %v2755_v35, %s8362_s19  ;;  %v3177_v15 = vpop.f32.mrf.mxu3 }
 0x42c   : > { %2801 = vrot.lane.b32.xlu0 %v10171_v33, %s8362_s19  ;;  %v10229_v28 = vpop.f32.mrf.mxu2 }
 0x42d   : > { %11874 = vst [vmem:[#allocation33_spill] sm:$0xff] %v10229_v28 }
 0x430   : > { %v3133_v42 = vpop.f32.mrf.mxu1 }
 0x431   : > { %v10233_v46 = vadd.f32 %v3177_v15, %v3133_v42  ;;  %v3226_v57 = vpop.f32.mrf.mxu0 }
 0x433   : > { %2803 = vrot.lane.b32.xlu1 %v10150_v31, %s8362_s19  ;;  %2805 = vrot.lane.b32.xlu2 %v2647_v47, %s8362_s19  ;;  %v10241_v33 = vpop.f32.mrf.mxu3 }
 0x434   : > { %2807 = vrot.lane.b32.xlu0 %v2735_v32, %s8362_s19  ;;  %11875 = vst [vmem:[#allocation28_spill] sm:$0xff] %v10241_v33  ;;  %v3270_v38 = vpop.f32.mrf.mxu2 }
 0x435   : > { %v10243_v40 = vadd.f32 %v3270_v38, %v3226_v57 }
 0x438   : > { %v10245_v44 = vpop.f32.mrf.mxu1 }
 0x439   : > { %11876 = vst [vmem:[#allocation36_spill] sm:$0xff] %v10245_v44  ;;  %v10247_v17 = vpop.f32.mrf.mxu0 }
 0x43b   : > { %2795 = vrot.lane.b32.xlu2 %v10128_v48, %s8362_s19  ;;  %2793 = vrot.lane.b32.xlu1 %v10147_v13, %s8362_s19  ;;  %v3182_v31 = vpop.f32.mrf.mxu3 }
 0x43c   : > { %2797 = vrot.lane.b32.xlu0 %v10152_v52, %s8362_s19  ;;  %v10255_v6 = vpop.f32.mrf.mxu2 }
 0x440   : > { %v3138_v45 = vpop.f32.mrf.mxu1 }
 0x441   : > { %v10257_v22 = vadd.f32 %v3182_v31, %v3138_v45  ;;  %v3231_v8 = vpop.f32.mrf.mxu0  ;;  %v10289_v45 = vstv %s514_s25  ;;  %s8367_s25 = smov 104  }
 0x443   : > { %2799 = vrot.lane.b32.xlu1 %v10145_v62, %s8362_s19  ;;  %2785 = vrot.lane.b32.xlu2 %v10125_v63, %s8362_s19  ;;  %v10265_v48 = vpop.f32.mrf.mxu3 }
 0x444   : > { %2787 = vrot.lane.b32.xlu0 %v10105_v30, %s8362_s19  ;;  %v3275_v13 = vpop.f32.mrf.mxu2 }
 0x445   : > { %v10267_v52 = vadd.f32 %v3275_v13, %v3231_v8 }
 0x448   : > { %v10269_v20 = vpop.f32.mrf.mxu1 }
 0x449   : > { %v10271_v36 = vpop.f32.mrf.mxu0 }
 0x44b   : > { %2789 = vrot.lane.b32.xlu1 %v10130_v26, %s8362_s19  ;;  %2791 = vrot.lane.b32.xlu2 %v10123_v27, %s8362_s19  ;;  %v3187_v62 = vpop.f32.mrf.mxu3 }
 0x44c   : > { %v10277_v63 = vpop.f32.mrf.mxu2 }
 0x44d   : > { %v2810_v61 = vpop.permute.xlu2 %2809 }
 0x44e   : > { %v2890_v32 = vsel %vm2841_vm7, 0.0, %v2810_v61 }
 0x44f   : > { %v2910_v13 = vadd.f32 %v2890_v32, %v10020_v49 }
 0x450   : > { %v3143_v54 = vpop.f32.mrf.mxu1 }
 0x451   : > { %v10279_v30 = vadd.f32 %v3187_v62, %v3143_v54  ;;  %v3236_v3 = vpop.f32.mrf.mxu0 }
 0x453   : > { %v10281_v58 = vpop.f32.mrf.mxu3 }
 0x454   : > { %v3280_v53 = vpop.f32.mrf.mxu2 }
 0x455   : > { %v3281_v35 = vadd.f32 %v3280_v53, %v3236_v3  ;;  %v2816_v53 = vpop.permute.xlu2 %2815 }
 0x457   : > { %v3307_v27 = vsel %vm3300_vm6, %v3281_v35, 0.0 }
 0x458   : > { %v10283_v34 = vpop.f32.mrf.mxu1 }
 0x459   : > { %v2812_v26 = vpop.permute.xlu0 %2811  ;;  %v3238_v42 = vpop.f32.mrf.mxu0 }
 0x45a   : > { %v2848_v15 = vsel %vm2841_vm7, %v2810_v61, %v2812_v26 }
 0x45b   : > { %v2911_v47 = vadd.f32 %v2848_v15, %v9996_v0  ;;  %v3192_v57 = vpop.f32.mrf.mxu3 }
 0x45c   : > { %v3282_v38 = vpop.f32.mrf.mxu2 }
 0x45d   : > { %v3328_v31 = vadd.f32 %v3307_v27, %v2911_v47  ;;  %v3283_v32 = vadd.f32 %v3282_v38, %v3238_v42  ;;  %v7886_v27 = vld [vmem:[#allocation10 + $0x38] sm:$0xff] }
 0x45f   : > { %v3357_v54 = vadd.f32 %v10289_v45, %v3328_v31  ;;  %v3308_v1 = vsel %vm3300_vm6, %v3283_v32, 0.0 }
 0x460   : > { %v3148_v8 = vpop.f32.mrf.mxu1 }
 0x461   : > { %v3193_v62 = vadd.f32 %v3192_v57, %v3148_v8  ;;  %v3241_v26 = vpop.f32.mrf.mxu0  ;;  %v3385_v15 = vmax.f32 %v3357_v54, 0.0  ;;  %v2820_v57 = vpop.permute.xlu2 %2819 }
 0x463   : > { %v3327_v3 = vadd.f32 %v3193_v62, %v2910_v13  ;;  %v3194_v0 = vpop.f32.mrf.mxu3 }
 0x464   : > { %v3285_v7 = vpop.f32.mrf.mxu2 }
 0x465   : > { %v3356_v35 = vadd.f32 %v10289_v45, %v3327_v3  ;;  %v3286_v28 = vadd.f32 %v3285_v7, %v3241_v26 }
 0x467   : > { %v3384_v61 = vmax.f32 %v3356_v35, 0.0 }
 0x468   : > { %v3150_v49 = vpop.f32.mrf.mxu1 }
 0x469   : > { %v3406_v47 = vpack.c.bf16 %v3385_v15, %v3384_v61  ;;  %v3195_v54 = vadd.f32 %v3194_v0, %v3150_v49  ;;  %v3243_v15 = vpop.f32.mrf.mxu0 }
 0x46b   : > { %3423 = vst.msk [vmem:[#allocation2 + $0x30] sm:$0xff] %vm10295_vm10, %v3406_v47  ;;  %v3197_v8 = vpop.f32.mrf.mxu3 }
 0x46c   : > { %v3287_v47 = vpop.f32.mrf.mxu2 }
 0x46d   : > { %v2814_v31 = vpop.permute.xlu1 %2813 }
 0x46e   : > { %v2849_v13 = vsel %vm2841_vm7, %v2814_v31, %v2816_v53  ;;  %v2891_v62 = vsel %vm2841_vm7, 0.0, %v2814_v31 }
 0x46f   : > { %v2912_v3 = vadd.f32 %v2891_v62, %v10030_v14  ;;  %v2913_v35 = vadd.f32 %v2849_v13, %v10017_v23  ;;  %v3309_v23 = vsel %vm3300_vm6, %v3286_v28, 0.0 }
 0x470   : > { %v3153_v33 = vpop.f32.mrf.mxu1 }
 0x471   : > { %v3329_v61 = vadd.f32 %v3195_v54, %v2912_v3  ;;  %v3330_v44 = vadd.f32 %v3308_v1, %v2913_v35  ;;  %v3198_v31 = vadd.f32 %v3197_v8, %v3153_v33  ;;  %v3246_v8 = vpop.f32.mrf.mxu0  ;;  %v3288_v3 = vadd.f32 %v3287_v47, %v3243_v15 }
 0x473   : > { %v3358_v42 = vadd.f32 %v10289_v45, %v3329_v61  ;;  %v3359_v38 = vadd.f32 %v10289_v45, %v3330_v44  ;;  %v3199_v13 = vpop.f32.mrf.mxu3 }
 0x475   : > { %v3386_v53 = vmax.f32 %v3358_v42, 0.0  ;;  %v3387_v43 = vmax.f32 %v3359_v38, 0.0  ;;  %v2818_v0 = vpop.permute.xlu1 %2817  ;;  %v10308_v49 = vpop.permute.xlu2 %2829 }
 0x476   : > { %v2850_v14 = vsel %vm2841_vm7, %v2818_v0, %v2820_v57  ;;  %v2892_v32 = vsel %vm2841_vm7, 0.0, %v2818_v0  ;;  %v3290_v57 = vpop.f32.mrf.mxu2 }
 0x477   : > { %v3407_v1 = vpack.c.bf16 %v3387_v43, %v3386_v53  ;;  %v2914_v7 = vadd.f32 %v2892_v32, %v10050_v21  ;;  %v2915_v26 = vadd.f32 %v2850_v14, %v10026_v19  ;;  %v3310_v32 = vsel %vm3300_vm6, %v3288_v3, 0.0 }
 0x478   : > { %v3155_v62 = vpop.f32.mrf.mxu1 }
 0x479   : > { %3424 = vst.msk [vmem:[#allocation2 + $0x38] sm:$0xff] %vm10295_vm10, %v3407_v1  ;;  %v3331_v33 = vadd.f32 %v3198_v31, %v2914_v7  ;;  %v3332_v44 = vadd.f32 %v3309_v23, %v2915_v26  ;;  %v3200_v0 = vadd.f32 %v3199_v13, %v3155_v62  ;;  %v3291_v7 = vadd.f32 %v3290_v57, %v3246_v8 }
 0x47b   : > { %v3360_v54 = vadd.f32 %v10289_v45, %v3331_v33  ;;  %v3361_v28 = vadd.f32 %v10289_v45, %v3332_v44  ;;  %v3202_v53 = vpop.f32.mrf.mxu3  ;;  %v3248_v44 = vpop.f32.mrf.mxu0 }
 0x47d   : > { %v3388_v35 = vmax.f32 %v3360_v54, 0.0  ;;  %v3389_v61 = vmax.f32 %v3361_v28, 0.0  ;;  %v2822_v43 = vpop.permute.xlu0 %2821  ;;  %v2824_v42 = vpop.permute.xlu1 %2823 }
 0x47e   : > { %v2893_v21 = vsel %vm2841_vm7, 0.0, %v2822_v43  ;;  %v2851_v19 = vsel %vm2841_vm7, %v2822_v43, %v2824_v42  ;;  %v10321_v38 = vpop.permute.xlu2 %2833 }
 0x47f   : > { %v3408_v31 = vpack.c.bf16 %v3389_v61, %v3388_v35  ;;  %v2916_v23 = vadd.f32 %v2893_v21, %v10058_v56  ;;  %v2917_v14 = vadd.f32 %v2851_v19, %v10047_v55  ;;  %v3292_v56 = vpop.f32.mrf.mxu2  ;;  %v3311_v61 = vsel %vm3300_vm6, %v3291_v7, 0.0 }
 0x480   : > { %v3158_v15 = vpop.f32.mrf.mxu1  ;;  %v2895_v21 = vsel %vm2841_vm7, 0.0, %v10308_v49 }
 0x481   : > { %3425 = vst.msk [vmem:[#allocation2 + $0x40] sm:$0xff] %vm10295_vm10, %v3408_v31  ;;  %v3333_v47 = vadd.f32 %v3200_v0, %v2916_v23  ;;  %v3334_v1 = vadd.f32 %v3310_v32, %v2917_v14  ;;  %v3203_v62 = vadd.f32 %v3202_v53, %v3158_v15  ;;  %v2920_v14 = vadd.f32 %v2895_v21, %v10084_v5 }
 0x482   : > { %v2896_v5 = vsel %vm2841_vm7, 0.0, %v10321_v38 }
 0x483   : > { %v3362_v26 = vadd.f32 %v10289_v45, %v3333_v47  ;;  %v3363_v33 = vadd.f32 %v10289_v45, %v3334_v1  ;;  %v3204_v57 = vpop.f32.mrf.mxu3 }
 0x485   : > { %v3390_v54 = vmax.f32 %v3362_v26, 0.0  ;;  %v3391_v13 = vmax.f32 %v3363_v33, 0.0  ;;  %v2826_v28 = vpop.permute.xlu0 %2825 }
 0x486   : > { %v2894_v55 = vsel %vm2841_vm7, 0.0, %v2826_v28  ;;  %v2828_v3 = vpop.permute.xlu1 %2827  ;;  %v2840_v35 = vpop.permute.xlu2 %2839 }
 0x487   : > { %v3409_v43 = vpack.c.bf16 %v3391_v13, %v3390_v54  ;;  %v2918_v42 = vadd.f32 %v2894_v55, %v10076_v10  ;;  %v2852_v8 = vsel %vm2841_vm7, %v2826_v28, %v2828_v3  ;;  %v3293_v10 = vadd.f32 %v3292_v56, %v3248_v44  ;;  %v3251_v54 = vpop.f32.mrf.mxu0  ;;  %v3295_v13 = vpop.f32.mrf.mxu2 }
 0x488   : > { %v2919_v19 = vadd.f32 %v2852_v8, %v10054_v37  ;;  %v3160_v53 = vpop.f32.mrf.mxu1 }
 0x489   : > { %3426 = vst.msk [vmem:[#allocation2 + $0x48] sm:$0xff] %vm10295_vm10, %v3409_v43  ;;  %v3335_v31 = vadd.f32 %v3203_v62, %v2918_v42  ;;  %v3205_v0 = vadd.f32 %v3204_v57, %v3160_v53  ;;  %v3312_v44 = vsel %vm3300_vm6, %v3293_v10, 0.0 }
 0x48a   : > { %v3336_v23 = vadd.f32 %v3311_v61, %v2919_v19 }
 0x48b   : > { %v3364_v32 = vadd.f32 %v10289_v45, %v3335_v31  ;;  %v3337_v1 = vadd.f32 %v3205_v0, %v2920_v14  ;;  %v3207_v28 = vpop.f32.mrf.mxu3 }
 0x48c   : > { %v3365_v15 = vadd.f32 %v10289_v45, %v3336_v23 }
 0x48d   : > { %v3392_v47 = vmax.f32 %v3364_v32, 0.0  ;;  %v2832_v7 = vpop.permute.xlu0 %2831  ;;  %v3366_v3 = vadd.f32 %v10289_v45, %v3337_v1 }
 0x48e   : > { %v3393_v26 = vmax.f32 %v3365_v15, 0.0  ;;  %v2853_v37 = vsel %vm2841_vm7, %v10308_v49, %v2832_v7  ;;  %v10344_v33 = vpop.permute.xlu2 %2805  ;;  %v3296_v49 = vadd.f32 %v3295_v13, %v3251_v54 }
 0x48f   : > { %v2921_v62 = vadd.f32 %v2853_v37, %v10073_v4  ;;  %v2922_v4 = vadd.f32 %v2896_v5, %v10102_v25  ;;  %v3394_v8 = vmax.f32 %v3366_v3, 0.0  ;;  %v3253_v25 = vpop.f32.mrf.mxu0  ;;  %v3297_v10 = vpop.f32.mrf.mxu2  ;;  %v2889_v13 = vsel %vm2841_vm7, 0.0, %v10344_v33 }
 0x490   : > { %v3410_v56 = vpack.c.bf16 %v3393_v26, %v3392_v47  ;;  %v3163_v55 = vpop.f32.mrf.mxu1  ;;  %v3313_v53 = vsel %vm3300_vm6, %v3296_v49, 0.0  ;;  %v3298_v7 = vadd.f32 %v3297_v10, %v3253_v25 }
 0x491   : > { %v3338_v61 = vadd.f32 %v3312_v44, %v2921_v62  ;;  %v3208_v43 = vadd.f32 %v3207_v28, %v3163_v55 }
 0x492   : > { %3427 = vst.msk [vmem:[#allocation2 + $0x50] sm:$0xff] %vm10295_vm10, %v3410_v56 }
 0x493   : > { %v3367_v42 = vadd.f32 %v10289_v45, %v3338_v61  ;;  %v3339_v21 = vadd.f32 %v3208_v43, %v2922_v4  ;;  %v3314_v43 = vsel %vm3300_vm6, %v3298_v7, 0.0 }
 0x495   : > { %v3395_v57 = vmax.f32 %v3367_v42, 0.0  ;;  %v2836_v19 = vpop.permute.xlu0 %2835  ;;  %v3368_v32 = vadd.f32 %v10289_v45, %v3339_v21 }
 0x496   : > { %v2854_v31 = vsel %vm2841_vm7, %v10321_v38, %v2836_v19  ;;  %v10358_v0 = vpop.permute.xlu2 %2795  ;;  %v3209_v38 = vpop.f32.mrf.mxu3 }
 0x497   : > { %v3411_v23 = vpack.c.bf16 %v3395_v57, %v3394_v8  ;;  %v2923_v14 = vadd.f32 %v2854_v31, %v10080_v16  ;;  %v3396_v26 = vmax.f32 %v3368_v32, 0.0 }
 0x498   : > { %v3165_v1 = vpop.f32.mrf.mxu1 }
 0x499   : > { %3428 = vst.msk [vmem:[#allocation2 + $0x58] sm:$0xff] %vm10295_vm10, %v3411_v23  ;;  %v3340_v15 = vadd.f32 %v3313_v53, %v2923_v14  ;;  %v3210_v16 = vadd.f32 %v3209_v38, %v3165_v1 }
 0x49b   : > { %v3369_v47 = vadd.f32 %v10289_v45, %v3340_v15 }
 0x49d   : > { %v3397_v37 = vmax.f32 %v3369_v47, 0.0  ;;  %v2838_v54 = vpop.permute.xlu1 %2837 }
 0x49e   : > { %v2855_v62 = vsel %vm2841_vm7, %v2838_v54, %v2840_v35  ;;  %v2897_v5 = vsel %vm2841_vm7, 0.0, %v2838_v54  ;;  %v2802_v44 = vpop.permute.xlu0 %2801  ;;  %v10369_v56 = vpop.permute.xlu2 %2785  ;;  %v7903_v35 = vld [vmem:[#allocation2 + $0x54] sm:$0xf] }
 0x49f   : > { %v3412_v28 = vpack.c.bf16 %v3397_v37, %v3396_v26  ;;  %v2924_v55 = vadd.f32 %v2897_v5, %v10109_v24  ;;  %v2925_v3 = vadd.f32 %v2855_v62, %v10099_v2  ;;  %v2888_v61 = vsel %vm2841_vm7, 0.0, %v2802_v44 }
 0x4a0   : > { %v2906_v49 = vadd.f32 %v2888_v61, %v9991_v50  ;;  %v2884_v42 = vsel %vm2841_vm7, 0.0, %v10369_v56  ;;  %v7324_v4 = vld [vmem:[#allocation2 + $0x58] sm:$0xf0]  ;;  %v2908_v2 = vadd.f32 %v2889_v13, %v10001_v12  ;;  %v3278_v12 = vadd.f32 %v10277_v63, %v10271_v36  ;;  %v7322_v63 = vld [vmem:[#allocation2 + $0x50] sm:$0xf] }
 0x4a1   : > { %3429 = vst.msk [vmem:[#allocation2 + $0x60] sm:$0xff] %vm10295_vm10, %v3412_v28  ;;  %v3341_v8 = vadd.f32 %v3210_v16, %v2924_v55  ;;  %v3342_v57 = vadd.f32 %v3314_v43, %v2925_v3  ;;  %v2898_v24 = vadd.f32 %v2884_v42, %v9934_v59  ;;  %v10381_v21 = vor.u32 %v7903_v35, %v7324_v4 }
 0x4a2   : > { %v3323_v19 = vadd.f32 %v10279_v30, %v2906_v49  ;;  %v3190_v59 = vadd.f32 %v10281_v58, %v10283_v34  ;;  %v3305_v58 = vsel %vm3300_vm6, %v10267_v52, 0.0  ;;  %v3306_v34 = vsel %vm3300_vm6, %v3278_v12, 0.0 }
 0x4a3   : > { %v3370_v50 = vadd.f32 %v10289_v45, %v3341_v8  ;;  %v3371_v53 = vadd.f32 %v10289_v45, %v3342_v57  ;;  %v10388_v31 = vadd.f32 %v10233_v46, %v2898_v24  ;;  %3592 = vrot.lane.b32.xlu1 %v10381_v21, %s8357_s1  ;;  %v7904_v46 = vld [vmem:[#allocation2 + $0x54] sm:$0xf0] }
 0x4a4   : > { %v3325_v32 = vadd.f32 %v3190_v59, %v2908_v2  ;;  %v3352_v7 = vadd.f32 %v10289_v45, %v3323_v19  ;;  %v10406_v37 = vor.u32 %v7904_v46, %v7322_v63  ;;  %v3301_v59 = vsel %vm3300_vm6, %v10221_v9, 0.0  ;;  %v7901_v9 = vld [vmem:[#allocation2 + $0x44] sm:$0xf] }
 0x4a5   : > { %v3398_v23 = vmax.f32 %v3370_v50, 0.0  ;;  %v3399_v14 = vmax.f32 %v3371_v53, 0.0  ;;  %v2804_v30 = vpop.permute.xlu1 %2803 }
 0x4a6   : > { %v2846_v25 = vsel %vm2841_vm7, %v2802_v44, %v2804_v30  ;;  %v2808_v10 = vpop.permute.xlu0 %2807  ;;  %v3354_v38 = vadd.f32 %v10289_v45, %v3325_v32  ;;  %v7308_v30 = vld [vmem:[#allocation2 + $0x38] sm:$0xf0] }
 0x4a7   : > { %v3413_v15 = vpack.c.bf16 %v3399_v14, %v3398_v23  ;;  %v2907_v47 = vadd.f32 %v2846_v25, %v9967_v18  ;;  %v2847_v1 = vsel %vm2841_vm7, %v10344_v33, %v2808_v10  ;;  %v3380_v33 = vmax.f32 %v3352_v7, 0.0  ;;  %v7316_v14 = vld [vmem:[#allocation2 + $0x48] sm:$0xf0]  ;;  %v7314_v7 = vld [vmem:[#allocation2 + $0x40] sm:$0xf] }
 0x4a8   : > { %v2909_v36 = vadd.f32 %v2847_v1, %v9988_v39  ;;  %v3303_v39 = vsel %vm3300_vm6, %v10243_v40, 0.0  ;;  %v3382_v62 = vmax.f32 %v3354_v38, 0.0  ;;  %v7330_v40 = vld [vmem:[#allocation2 + $0x60] sm:$0xf]  ;;  %v7905_v8 = vld [vmem:[#allocation2 + $0x64] sm:$0xf] }
 0x4a9   : > { %3433 = vst.msk [vmem:[#allocation2 + $0x68] sm:$0x77] %vm3432_vm13, %v3413_v15  ;;  %v3324_v26 = vadd.f32 %v3305_v58, %v2907_v47  ;;  %v7902_v15 = vld [vmem:[#allocation2 + $0x44] sm:$0xf0]  ;;  %v7899_v1 = vld [vmem:[#allocation2 + $0x34] sm:$0xf] }
 0x4aa   : > { %v3326_v18 = vadd.f32 %v3306_v34, %v2909_v36  ;;  %v10464_v34 = vor.u32 %v7901_v9, %v7316_v14  ;;  %vm5903_vm13 = vcmask 220160  }
 0x4ab   : > { %v3353_v54 = vadd.f32 %v10289_v45, %v3324_v26  ;;  %3590 = vrot.lane.b32.xlu1 %v10406_v37, %s8357_s1 }
 0x4ac   : > { %v3355_v52 = vadd.f32 %v10289_v45, %v3326_v18  ;;  %v10472_v18 = vor.u32 %v7902_v15, %v7314_v7 }
 0x4ad   : > { %v3381_v13 = vmax.f32 %v3353_v54, 0.0  ;;  %v2794_v16 = vpop.permute.xlu1 %2793  ;;  %v7900_v54 = vld [vmem:[#allocation2 + $0x34] sm:$0xf0] }
 0x4ae   : > { %v3383_v5 = vmax.f32 %v3355_v52, 0.0  ;;  %v2798_v44 = vpop.permute.xlu0 %2797  ;;  %v2844_v28 = vsel %vm2841_vm7, %v2794_v16, %v10358_v0  ;;  %v2886_v55 = vsel %vm2841_vm7, 0.0, %v2794_v16 }
 0x4af   : > { %v3404_v3 = vpack.c.bf16 %v3381_v13, %v3380_v33  ;;  %v2887_v61 = vsel %vm2841_vm7, 0.0, %v2798_v44  ;;  %v2902_v43 = vadd.f32 %v2886_v55, %v9962_v41  ;;  %v2903_v49 = vadd.f32 %v2844_v28, %v9938_v51  ;;  %v11880_v33 = vld [vmem:[#allocation33_spill] sm:$0xff] }
 0x4b0   : > { %v3405_v42 = vpack.c.bf16 %v3383_v5, %v3382_v62  ;;  %v2904_v35 = vadd.f32 %v2887_v61, %v9972_v29  ;;  %v7906_v4 = vld [vmem:[#allocation2 + $0x64] sm:$0x70]  ;;  %v7332_v57 = vld [vmem:[#allocation2 + $0x68] sm:$0x70]  ;;  %v3273_v51 = vadd.f32 %v10255_v6, %v10247_v17  ;;  %v3185_v41 = vadd.f32 %v10265_v48, %v10269_v20  ;;  %v2792_v62 = vpop.permute.xlu2 %2791 }
 0x4b1   : > { %3421 = vst.msk [vmem:[#allocation2 + $0x20] sm:$0xff] %vm10295_vm10, %v3404_v3  ;;  %v3319_v0 = vadd.f32 %v10257_v22, %v2902_v43  ;;  %v3320_v24 = vadd.f32 %v3303_v39, %v2903_v49  ;;  %v10425_v2 = vor.u32 %v7906_v4, %v7330_v40  ;;  %v10427_v19 = vor.u32 %v7905_v8, %v7332_v57  ;;  %v11879_v39 = vld [vmem:[#allocation32_spill] sm:$0xff]  ;;  %v11883_v8 = vld [vmem:[#allocation37_spill] sm:$0xff] }
 0x4b2   : > { %3422 = vst.msk [vmem:[#allocation2 + $0x28] sm:$0xff] %vm10295_vm10, %v3405_v42  ;;  %v3321_v6 = vadd.f32 %v3185_v41, %v2904_v35  ;;  %v3304_v32 = vsel %vm3300_vm6, %v3273_v51, 0.0  ;;  %v3268_v13 = vadd.f32 %v11880_v33, %v11879_v39  ;;  %v11881_v40 = vld [vmem:[#allocation36_spill] sm:$0xff]  ;;  %v7376_v39 = vld [vmem:[#allocation10 + $0x68] sm:$0xf] }
 0x4b3   : > { %v3348_v29 = vadd.f32 %v10289_v45, %v3319_v0  ;;  %v3349_v50 = vadd.f32 %v10289_v45, %v3320_v24  ;;  %3594 = vrot.lane.b32.xlu2 %v10425_v2, %s8357_s1  ;;  %3596 = vrot.lane.b32.xlu0 %v10427_v19, %s8357_s1  ;;  %v10443_v22 = vsel %vm3639_vm14, %v10425_v2, 0  ;;  %v10447_v17 = vsel %vm3639_vm14, %v10427_v19, 0  ;;  %v11882_v42 = vld [vmem:[#allocation28_spill] sm:$0xff]  ;;  %v11884_v0 = vld [vmem:[#allocation29_spill] sm:$0xff]  ;;  %v7892_v33 = vld [vmem:[#allocation10 + $0x68] sm:$0x30] }
 0x4b4   : > { %3809 = vmatpush.bf16.msrb.mxu0 %v10443_v22  ;;  %3853 = vmatpush.bf16.msrb.mxu2 %v10447_v17  ;;  %v3350_v36 = vadd.f32 %v10289_v45, %v3321_v6  ;;  %v3180_v35 = vadd.f32 %v11882_v42, %v11881_v40  ;;  %v7921_v40 = vld [vmem:[#allocation10] sm:$0xff] }
 0x4b5   : > { %v3376_v48 = vmax.f32 %v3348_v29, 0.0  ;;  %v3377_v20 = vmax.f32 %v3349_v50, 0.0  ;;  %v2800_v53 = vpop.permute.xlu1 %2799  ;;  %v3302_v29 = vsel %vm3300_vm6, %v3268_v13, 0.0  ;;  %vm4805_vm6 = vmor %vm4804_vm5, %vm4803_vm4 }
 0x4b6   : > { %v2788_v12 = vpop.permute.xlu0 %2787  ;;  %v2845_v23 = vsel %vm2841_vm7, %v2798_v44, %v2800_v53  ;;  %v3378_v5 = vmax.f32 %v3350_v36, 0.0 }
 0x4b7   : > { %v3402_v25 = vpack.c.bf16 %v3377_v20, %v3376_v48  ;;  %v2842_v10 = vsel %vm2841_vm7, %v10369_v56, %v2788_v12  ;;  %v2905_v46 = vadd.f32 %v2845_v23, %v9959_v11  ;;  %v10466_v56 = vor.u32 %v7899_v1, %v7308_v30 }
 0x4b8   : > { %v2899_v47 = vadd.f32 %v2842_v10, %v9910_v60  ;;  %3810 = vmatpush.bf16.msrb.mxu0 %v10406_v37  ;;  %3854 = vmatpush.bf16.msrb.mxu2 %v10381_v21  ;;  %v7897_v58 = vld [vmem:[#allocation2 + $0x24] sm:$0xf]  ;;  %v3344_v60 = vadd.f32 %v10289_v45, %v10388_v31  ;;  %v7306_v31 = vld [vmem:[#allocation2 + $0x30] sm:$0xf]  ;;  %v7298_v51 = vld [vmem:[#allocation2 + $0x20] sm:$0xf] }
 0x4b9   : > { %3419 = vst.msk [vmem:[#allocation2 + $0x10] sm:$0xff] %vm10295_vm10, %v3402_v25  ;;  %v3322_v63 = vadd.f32 %v3304_v32, %v2905_v46  ;;  %v7300_v11 = vld [vmem:[#allocation2 + $0x28] sm:$0xf0]  ;;  %v10486_v55 = vor.u32 %v7900_v54, %v7306_v31  ;;  %v7898_v41 = vld [vmem:[#allocation2 + $0x24] sm:$0xf0] }
 0x4ba   : > { %v3316_v26 = vadd.f32 %v3301_v59, %v2899_v47  ;;  %v10470_v38 = vor.u32 %v7897_v58, %v7300_v11  ;;  %v3372_v3 = vmax.f32 %v3344_v60, 0.0  ;;  %v10501_v20 = vor.u32 %v7898_v41, %v7298_v51 }
 0x4bb   : > { %v3351_v52 = vadd.f32 %v10289_v45, %v3322_v63  ;;  %3588 = vrot.lane.b32.xlu0 %v10464_v34, %s8357_s1  ;;  %3584 = vrot.lane.b32.xlu2 %v10466_v56, %s8357_s1  ;;  %v7889_v63 = vld [vmem:[#allocation10 + $0x50] sm:$0xff] }
 0x4bc   : > { %v3345_v16 = vadd.f32 %v10289_v45, %v3316_v26  ;;  %3580 = vrot.lane.b32.xlu1 %v10470_v38, %s8357_s1  ;;  %3811 = vmatpush.bf16.msrb.mxu0 %v10472_v18 }
 0x4bd   : > { %v3379_v44 = vmax.f32 %v3351_v52, 0.0  ;;  %3855 = vmatpush.bf16.msrb.mxu2 %v10464_v34  ;;  %v2790_v28 = vpop.permute.xlu1 %2789 }
 0x4be   : > { %v3373_v61 = vmax.f32 %v3345_v16, 0.0  ;;  %v2843_v43 = vsel %vm2841_vm7, %v2790_v28, %v2792_v62  ;;  %v2885_v49 = vsel %vm2841_vm7, 0.0, %v2790_v28  ;;  %v7377_v16 = vor.u32 %v7892_v33, %v7376_v39 }
 0x4bf   : > { %v3403_v4 = vpack.c.bf16 %v3379_v44, %v3378_v5  ;;  %v2900_v57 = vadd.f32 %v2885_v49, %v11883_v8  ;;  %v2901_v24 = vadd.f32 %v2843_v43, %v11884_v0  ;;  %v7907_v43 = vld [vmem:[#allocation10 + $0x70] sm:$0xff] }
 0x4c0   : > { %v3400_v50 = vpack.c.bf16 %v3373_v61, %v3372_v3  ;;  %3812 = vmatpush.bf16.msrb.mxu0 %v10486_v55  ;;  %v7290_v30 = vld [vmem:[#allocation2 + $0x10] sm:$0xf]  ;;  %v7895_v25 = vld [vmem:[#allocation2 + $0x14] sm:$0xf] }
 0x4c1   : > { %3420 = vst.msk [vmem:[#allocation2 + $0x18] sm:$0xff] %vm10295_vm10, %v3403_v4  ;;  %v3317_v6 = vadd.f32 %v3180_v35, %v2900_v57  ;;  %v3318_v48 = vadd.f32 %v3302_v29, %v2901_v24  ;;  %3856 = vmatpush.bf16.msrb.mxu2 %v10466_v56  ;;  %v7908_v29 = vld [vmem:[#allocation10 + $0x78] sm:$0xff] }
 0x4c2   : > { %3417 = vst.msk [vmem:[#allocation2] sm:$0xff] %vm10295_vm10, %v3400_v50  ;;  %v7922_v50 = vld [vmem:[#allocation10 + $0x8] sm:$0xff] }
 0x4c3   : > { %v3346_v53 = vadd.f32 %v10289_v45, %v3317_v6  ;;  %v3347_v59 = vadd.f32 %v10289_v45, %v3318_v48  ;;  %3586 = vrot.lane.b32.xlu0 %v10472_v18, %s8357_s1  ;;  %3582 = vrot.lane.b32.xlu2 %v10486_v55, %s8357_s1 }
 0x4c4   : > { %3578 = vrot.lane.b32.xlu1 %v10501_v20, %s8357_s1  ;;  %3813 = vmatpush.bf16.msrb.mxu0 %v10501_v20 }
 0x4c5   : > { %v3374_v12 = vmax.f32 %v3346_v53, 0.0  ;;  %v3375_v23 = vmax.f32 %v3347_v59, 0.0  ;;  %3857 = vmatpush.bf16.msrb.mxu2 %v10470_v38 }
 0x4c7   : > { %v3401_v14 = vpack.c.bf16 %v3375_v23, %v3374_v12 }
 0x4c8   : > { %v7896_v32 = vld [vmem:[#allocation2 + $0x14] sm:$0xf0]  ;;  %v7292_v45 = vld [vmem:[#allocation2 + $0x18] sm:$0xf0] }
 0x4c9   : > { %3418 = vst.msk [vmem:[#allocation2 + $0x8] sm:$0xff] %vm10295_vm10, %v3401_v14  ;;  %v10515_v10 = vor.u32 %v7896_v32, %v7290_v30  ;;  %v10517_v46 = vor.u32 %v7895_v25, %v7292_v45  ;;  %v7282_v15 = vld [vmem:[#allocation2] sm:$0xf]  ;;  %v7893_v9 = vld [vmem:[#allocation2 + $0x4] sm:$0xf]  ;;  %vm4923_vm10 = vcmask 883712  }
 0x4cb   : > { %3814 = vmatpush.bf16.msrb.mxu0 %v10515_v10  ;;  %3576 = vrot.lane.b32.xlu0 %v10517_v46, %s8357_s1 }
 0x4cc   : > { %3858 = vmatpush.bf16.msrb.mxu2 %v10517_v46 }
 0x4d0   : > { %v7894_v47 = vld [vmem:[#allocation2 + $0x4] sm:$0xf0]  ;;  %v7284_v1 = vld [vmem:[#allocation2 + $0x8] sm:$0xf0] }
 0x4d1   : > { %v10523_v58 = vor.u32 %v7894_v47, %v7282_v15  ;;  %v7287_v36 = vor.u32 %v7893_v9, %v7284_v1  ;;  %v7923_v15 = vld [vmem:[#allocation10 + $0x10] sm:$0xff] }
 0x4d3   : > { %3574 = vrot.lane.b32.xlu0 %v10515_v10, %s8357_s1  ;;  %3570 = vrot.lane.b32.xlu1 %v10523_v58, %s8357_s1 }
 0x4d4   : > { %3815 = vmatpush.bf16.msrb.mxu0 %v10523_v58  ;;  %3572 = vrot.lane.b32.xlu2 %v7287_v36, %s8357_s1 }
 0x4d5   : > { %3859 = vmatpush.bf16.msrb.mxu2 %v7287_v36 }
 0x4d7   : > { %7378 = vmatmul.msk.bf16.vlgmr.msrb.gmra.mxu0 %vm3617_vm15, %v7886_v27 }
 0x4d8   : > { %4207 = vmatpush.bf16.msra.mxu0 %v10443_v22  ;;  %7385 = vmatmul.msk.bf16.vlgmr.msrb.gmra.mxu2 %vm3617_vm15, %v7886_v27  ;;  %v7887_v22 = vld [vmem:[#allocation10 + $0x40] sm:$0xff] }
 0x4d9   : > { %4251 = vmatpush.bf16.msra.mxu2 %v10447_v17  ;;  %v7888_v17 = vld [vmem:[#allocation10 + $0x48] sm:$0xff] }
 0x4db   : > { %3968 = vrot.lane.b32.xlu0 %v10381_v21, %s8358_s4  ;;  %3970 = vrot.lane.b32.xlu1 %v10425_v2, %s8358_s4 }
 0x4dc   : > { %4208 = vmatpush.bf16.msra.mxu0 %v10406_v37  ;;  %3972 = vrot.lane.b32.xlu2 %v10427_v19, %s8358_s4 }
 0x4dd   : > { %4252 = vmatpush.bf16.msra.mxu2 %v10381_v21 }
 0x4e0   : > { %4209 = vmatpush.bf16.msra.mxu0 %v10472_v18 }
 0x4e1   : > { %4253 = vmatpush.bf16.msra.mxu2 %v10464_v34 }
 0x4e3   : > { %3966 = vrot.lane.b32.xlu0 %v10406_v37, %s8358_s4  ;;  %3960 = vrot.lane.b32.xlu1 %v10466_v56, %s8358_s4 }
 0x4e4   : > { %4210 = vmatpush.bf16.msra.mxu0 %v10486_v55  ;;  %3964 = vrot.lane.b32.xlu2 %v10464_v34, %s8358_s4 }
 0x4e5   : > { %4254 = vmatpush.bf16.msra.mxu2 %v10466_v56 }
 0x4e7   : > { %7379 = vmatmul.msk.bf16.gmra.mxu0 %vm3617_vm15, %v7887_v22 }
 0x4e8   : > { %4211 = vmatpush.bf16.msra.mxu0 %v10501_v20  ;;  %7386 = vmatmul.msk.bf16.gmra.mxu2 %vm3617_vm15, %v7887_v22 }
 0x4e9   : > { %4255 = vmatpush.bf16.msra.mxu2 %v10470_v38 }
 0x4eb   : > { %3956 = vrot.lane.b32.xlu0 %v10470_v38, %s8358_s4  ;;  %3958 = vrot.lane.b32.xlu1 %v10486_v55, %s8358_s4 }
 0x4ec   : > { %4212 = vmatpush.bf16.msra.mxu0 %v10515_v10  ;;  %3962 = vrot.lane.b32.xlu2 %v10472_v18, %s8358_s4 }
 0x4ed   : > { %4256 = vmatpush.bf16.msra.mxu2 %v10517_v46 }
 0x4f0   : > { %4213 = vmatpush.bf16.msra.mxu0 %v10523_v58 }
 0x4f1   : > { %4257 = vmatpush.bf16.msra.mxu2 %v7287_v36 }
 0x4f3   : > { %3954 = vrot.lane.b32.xlu0 %v10501_v20, %s8358_s4  ;;  %3948 = vrot.lane.b32.xlu1 %v7287_v36, %s8358_s4 }
 0x4f4   : > { %3952 = vrot.lane.b32.xlu2 %v10517_v46, %s8358_s4 }
 0x4f7   : > { %7380 = vmatmul.msk.bf16.gmra.mxu0 %vm3617_vm15, %v7888_v17 }
 0x4f8   : > { %7387 = vmatmul.msk.bf16.gmra.mxu2 %vm3617_vm15, %v7888_v17 }
 0x4fb   : > { %3946 = vrot.lane.b32.xlu0 %v10523_v58, %s8358_s4  ;;  %4538 = vrot.lane.b32.xlu1 %v10427_v19, %s8359_s18 }
 0x4fc   : > { %3950 = vrot.lane.b32.xlu2 %v10515_v10, %s8358_s4 }
 0x503   : > { %4536 = vrot.lane.b32.xlu0 %v10425_v2, %s8359_s18  ;;  %4530 = vrot.lane.b32.xlu1 %v10464_v34, %s8359_s18  ;;  %v7891_v34 = vld [vmem:[#allocation10 + $0x60] sm:$0xff] }
 0x504   : > { %4534 = vrot.lane.b32.xlu2 %v10381_v21, %s8359_s18  ;;  %v7890_v21 = vld [vmem:[#allocation10 + $0x58] sm:$0xff] }
 0x507   : > { %7381 = vmatmul.msk.bf16.gmra.mxu0 %vm3617_vm15, %v7889_v63 }
 0x508   : > { %7388 = vmatmul.msk.bf16.gmra.mxu2 %vm3617_vm15, %v7889_v63 }
 0x50b   : > { %4526 = vrot.lane.b32.xlu0 %v10466_v56, %s8359_s18  ;;  %4528 = vrot.lane.b32.xlu1 %v10472_v18, %s8359_s18 }
 0x50c   : > { %4532 = vrot.lane.b32.xlu2 %v10406_v37, %s8359_s18 }
 0x50d   : > { %v3595_v2 = vpop.permute.xlu2 %3594 }
 0x513   : > { %4524 = vrot.lane.b32.xlu0 %v10486_v55, %s8359_s18  ;;  %4518 = vrot.lane.b32.xlu1 %v10517_v46, %s8359_s18 }
 0x514   : > { %4522 = vrot.lane.b32.xlu2 %v10470_v38, %s8359_s18 }
 0x515   : > { %v3585_v37 = vpop.permute.xlu2 %3584  ;;  %v3593_v19 = vpop.permute.xlu1 %3592 }
 0x517   : > { %7382 = vmatmul.msk.bf16.gmra.mxu0 %vm3617_vm15, %v7890_v21 }
 0x518   : > { %7389 = vmatmul.msk.bf16.gmra.mxu2 %vm3617_vm15, %v7890_v21 }
 0x51b   : > { %4514 = vrot.lane.b32.xlu0 %v7287_v36, %s8359_s18  ;;  %4516 = vrot.lane.b32.xlu1 %v10515_v10, %s8359_s18  ;;  %v7909_v10 = vld [vmem:[#allocation10 + $0x80] sm:$0xff] }
 0x51c   : > { %4520 = vrot.lane.b32.xlu2 %v10501_v20, %s8359_s18 }
 0x51d   : > { %v3583_v11 = vpop.permute.xlu2 %3582  ;;  %v3591_v38 = vpop.permute.xlu1 %3590 }
 0x51e   : > { %v3603_v18 = vsel %vm776_vm0, %v3591_v38, %v3593_v19  ;;  %v3601_v44 = vsel %vm776_vm0, %v3583_v11, %v3585_v37  ;;  %v7924_v11 = vld [vmem:[#allocation10 + $0x18] sm:$0xff] }
 0x524   : > { %4512 = vrot.lane.b32.xlu2 %v10523_v58, %s8359_s18 }
 0x525   : > { %v3597_v56 = vpop.permute.xlu0 %3596 }
 0x526   : > { %v3604_v7 = vsel %vm776_vm0, %v3595_v2, %v3597_v56  ;;  %v3644_v60 = vsel %vm3639_vm14, %v3597_v56, 0 }
 0x527   : > { %v3641_v26 = vsel %vm3639_vm14, %v3604_v7, 0  ;;  %7383 = vmatmul.msk.bf16.gmra.mxu0 %vm3617_vm15, %v7891_v34  ;;  %3691 = vmatpush.bf16.msrb.mxu3 %v3644_v60 }
 0x528   : > { %7390 = vmatmul.msk.bf16.gmra.mxu2 %vm3617_vm15, %v7891_v34  ;;  %3647 = vmatpush.bf16.msrb.mxu1 %v3641_v26 }
 0x52b   : > { %3692 = vmatpush.bf16.msrb.mxu3 %v3593_v19  ;;  %v7910_v19 = vld [vmem:[#allocation10 + $0x88] sm:$0xff] }
 0x52c   : > { %3648 = vmatpush.bf16.msrb.mxu1 %v3603_v18 }
 0x52d   : > { %v3589_v54 = vpop.permute.xlu0 %3588 }
 0x52e   : > { %v3573_v52 = vpop.permute.xlu2 %3572  ;;  %v3581_v13 = vpop.permute.xlu1 %3580 }
 0x52f   : > { %3693 = vmatpush.bf16.msrb.mxu3 %v3589_v54 }
 0x533   : > { %3694 = vmatpush.bf16.msrb.mxu3 %v3585_v37 }
 0x535   : > { %v3587_v31 = vpop.permute.xlu0 %3586 }
 0x536   : > { %v3973_v62 = vpop.permute.xlu2 %3972  ;;  %v3602_v5 = vsel %vm776_vm0, %v3587_v31, %v3589_v54  ;;  %v3579_v28 = vpop.permute.xlu1 %3578 }
 0x537   : > { %7384 = vmatmul.msk.bf16.gmra.mxu0 %vm3617_vm15, %v7377_v16  ;;  %3649 = vmatpush.bf16.msrb.mxu1 %v3602_v5  ;;  %v3600_v3 = vsel %vm776_vm0, %v3579_v28, %v3581_v13  ;;  %v4018_v49 = vsel %vm3639_vm14, %v3973_v62, 0 }
 0x538   : > { %7391 = vmatmul.msk.bf16.gmra.mxu2 %vm3617_vm15, %v7377_v16  ;;  %3695 = vmatpush.bf16.msrb.mxu3 %v3581_v13 }
 0x53b   : > { %3650 = vmatpush.bf16.msrb.mxu1 %v3601_v44  ;;  %v7925_v44 = vld [vmem:[#allocation10 + $0x20] sm:$0xff] }
 0x53d   : > { %v3577_v55 = vpop.permute.xlu0 %3576 }
 0x53e   : > { %3696 = vmatpush.bf16.msrb.mxu3 %v3577_v55  ;;  %v3965_v61 = vpop.permute.xlu2 %3964 }
 0x53f   : > { %3651 = vmatpush.bf16.msrb.mxu1 %v3600_v3 }
 0x542   : > { %3697 = vmatpush.bf16.msrb.mxu3 %v3573_v52 }
 0x545   : > { %v3575_v42 = vpop.permute.xlu0 %3574  ;;  %v3571_v35 = vpop.permute.xlu1 %3570  ;;  %7343 = vmatmul.msk.bf16.vlgmr.msrb.gmra.mxu3 %vm3617_vm15, %v7907_v43 }
 0x546   : > { %4065 = vmatpush.bf16.msra.mxu3 %v4018_v49  ;;  %v3599_v4 = vsel %vm776_vm0, %v3575_v42, %v3577_v55  ;;  %v3963_v8 = vpop.permute.xlu2 %3962  ;;  %v3598_v57 = vsel %vm776_vm0, %v3571_v35, %v3573_v52 }
 0x547   : > { %7462 = vmatmul.msk.bf16.vlgmr.msra.gmra.mxu0 %vm3617_vm15, %v7921_v40  ;;  %3652 = vmatpush.bf16.msrb.mxu1 %v3599_v4  ;;  %v3978_v12 = vsel %vm1411_vm2, %v3963_v8, %v3965_v61 }
 0x548   : > { %7469 = vmatmul.msk.bf16.vlgmr.msra.gmra.mxu2 %vm3617_vm15, %v7921_v40 }
 0x54b   : > { %3653 = vmatpush.bf16.msrb.mxu1 %v3598_v57 }
 0x54d   : > { %v3969_v0 = vpop.permute.xlu0 %3968  ;;  %v3971_v24 = vpop.permute.xlu1 %3970 }
 0x54e   : > { %v3980_v51 = vsel %vm1411_vm2, %v3971_v24, %v3973_v62  ;;  %7336 = vmatmul.msk.bf16.vlgmr.msrb.gmra.mxu1 %vm3617_vm15, %v7907_v43  ;;  %4066 = vmatpush.bf16.msra.mxu3 %v3969_v0  ;;  %v3953_v6 = vpop.permute.xlu2 %3952  ;;  %v7911_v62 = vld [vmem:[#allocation10 + $0x90] sm:$0xff] }
 0x54f   : > { %v4015_v41 = vsel %vm3639_vm14, %v3980_v51, 0 }
 0x550   : > { %4021 = vmatpush.bf16.msra.mxu1 %v4015_v41  ;;  %v7926_v41 = vld [vmem:[#allocation10 + $0x28] sm:$0xff] }
 0x552   : > { %4067 = vmatpush.bf16.msra.mxu3 %v3965_v61 }
 0x554   : > { %v10628_v48 = vpop.f32.mrf.mxu0 }
 0x555   : > { %v3967_v20 = vpop.permute.xlu0 %3966  ;;  %v3961_v53 = vpop.permute.xlu1 %3960  ;;  %7344 = vmatmul.msk.bf16.gmra.mxu3 %vm3617_vm15, %v7908_v29 }
 0x556   : > { %4068 = vmatpush.bf16.msra.mxu3 %v3961_v53  ;;  %v3979_v59 = vsel %vm1411_vm2, %v3967_v20, %v3969_v0  ;;  %v3951_v25 = vpop.permute.xlu2 %3950  ;;  %v7912_v0 = vld [vmem:[#allocation10 + $0x98] sm:$0xff]  ;;  %v7278_v20 = vld [vmem:[#allocation10 + $0xa0] sm:$0xf] }
 0x557   : > { %7463 = vmatmul.msk.bf16.gmra.mxu0 %vm3617_vm15, %v7922_v50  ;;  %4022 = vmatpush.bf16.msra.mxu1 %v3979_v59  ;;  %v3975_v27 = vsel %vm1411_vm2, %v3951_v25, %v3953_v6  ;;  %v7460_v59 = vld [vmem:[#allocation10 + $0x30] sm:$0xf] }
 0x558   : > { %7470 = vmatmul.msk.bf16.gmra.mxu2 %vm3617_vm15, %v7922_v50 }
 0x55b   : > { %v10635_v23 = vpop.f32.mrf.mxu2  ;;  %4023 = vmatpush.bf16.msra.mxu1 %v3978_v12  ;;  %v7927_v12 = vld [vmem:[#allocation10 + $0x30] sm:$0x30] }
 0x55c   : > { %v10637_v14 = vpop.f32.mrf.mxu0  ;;  %v7461_v25 = vor.u32 %v7927_v12, %v7460_v59 }
 0x55d   : > { %v3957_v30 = vpop.permute.xlu0 %3956  ;;  %v3959_v32 = vpop.permute.xlu1 %3958 }
 0x55e   : > { %7337 = vmatmul.msk.bf16.gmra.mxu1 %vm3617_vm15, %v7908_v29  ;;  %4069 = vmatpush.bf16.msra.mxu3 %v3957_v30  ;;  %v3977_v45 = vsel %vm1411_vm2, %v3959_v32, %v3961_v53  ;;  %v4535_v36 = vpop.permute.xlu2 %4534  ;;  %v7913_v53 = vld [vmem:[#allocation10 + $0xa0] sm:$0x30] }
 0x55f   : > { %4024 = vmatpush.bf16.msra.mxu1 %v3977_v45 }
 0x562   : > { %4070 = vmatpush.bf16.msra.mxu3 %v3953_v6 }
 0x563   : > { %v10641_v46 = vpop.f32.mrf.mxu2 }
 0x564   : > { %v10643_v47 = vpop.f32.mrf.mxu0 }
 0x565   : > { %v3955_v9 = vpop.permute.xlu0 %3954  ;;  %v3949_v1 = vpop.permute.xlu1 %3948  ;;  %7345 = vmatmul.msk.bf16.gmra.mxu3 %vm3617_vm15, %v7909_v10 }
 0x566   : > { %4071 = vmatpush.bf16.msra.mxu3 %v3949_v1  ;;  %v3976_v58 = vsel %vm1411_vm2, %v3955_v9, %v3957_v30  ;;  %v4533_v34 = vpop.permute.xlu2 %4532  ;;  %v7279_v30 = vor.u32 %v7913_v53, %v7278_v20  ;;  %v7914_v9 = vld [vmem:[#allocation10 + $0xa8] sm:$0xff] }
 0x567   : > { %7464 = vmatmul.msk.bf16.gmra.mxu0 %vm3617_vm15, %v7923_v15  ;;  %4025 = vmatpush.bf16.msra.mxu1 %v3976_v58  ;;  %v4545_v52 = vsel %vm1813_vm3, %v4533_v34, %v4535_v36 }
 0x568   : > { %7471 = vmatmul.msk.bf16.gmra.mxu2 %vm3617_vm15, %v7923_v15 }
 0x56b   : > { %v10650_v22 = vpop.f32.mrf.mxu2  ;;  %4026 = vmatpush.bf16.msra.mxu1 %v3975_v27 }
 0x56c   : > { %v10652_v17 = vpop.f32.mrf.mxu0 }
 0x56d   : > { %v3947_v63 = vpop.permute.xlu0 %3946  ;;  %v4539_v2 = vpop.permute.xlu1 %4538 }
 0x56e   : > { %v4584_v21 = vsel %vm3639_vm14, %v4539_v2, 0  ;;  %7338 = vmatmul.msk.bf16.gmra.mxu1 %vm3617_vm15, %v7909_v10  ;;  %v3974_v37 = vsel %vm1411_vm2, %v3947_v63, %v3949_v1  ;;  %v4523_v39 = vpop.permute.xlu2 %4522  ;;  %v7915_v63 = vld [vmem:[#allocation10 + $0xb0] sm:$0xff]  ;;  %vm4788_vm2 = vcmask 736260  }
 0x56f   : > { %4027 = vmatpush.bf16.msra.mxu1 %v3974_v37  ;;  %4631 = vmatpush.bf16.msrb.mxu3 %v4584_v21 }
 0x573   : > { %v10657_v56 = vpop.f32.mrf.mxu2  ;;  %4632 = vmatpush.bf16.msrb.mxu3 %v4535_v36 }
 0x574   : > { %v10659_v7 = vpop.f32.mrf.mxu0 }
 0x575   : > { %v4537_v60 = vpop.permute.xlu0 %4536  ;;  %v4531_v26 = vpop.permute.xlu1 %4530  ;;  %7346 = vmatmul.msk.bf16.gmra.mxu3 %vm3617_vm15, %v7910_v19 }
 0x576   : > { %v4546_v38 = vsel %vm1813_vm3, %v4537_v60, %v4539_v2  ;;  %v4521_v43 = vpop.permute.xlu2 %4520 }
 0x577   : > { %v4581_v18 = vsel %vm3639_vm14, %v4546_v38, 0  ;;  %7465 = vmatmul.msk.bf16.gmra.mxu0 %vm3617_vm15, %v7924_v11  ;;  %4633 = vmatpush.bf16.msrb.mxu3 %v4531_v26  ;;  %v4542_v49 = vsel %vm1813_vm3, %v4521_v43, %v4523_v39  ;;  %vm5964_vm14 = vcmask 1044480  }
 0x578   : > { %7472 = vmatmul.msk.bf16.gmra.mxu2 %vm3617_vm15, %v7924_v11  ;;  %4587 = vmatpush.bf16.msrb.mxu1 %v4581_v18 }
 0x57b   : > { %v10666_v54 = vpop.f32.mrf.mxu2 }
 0x57c   : > { %v10669_v33 = vpop.f32.mrf.mxu0  ;;  %4588 = vmatpush.bf16.msrb.mxu1 %v4545_v52 }
 0x57d   : > { %11885 = vst [vmem:[#allocation39_spill] sm:$0xff] %v10669_v33  ;;  %v4527_v13 = vpop.permute.xlu0 %4526  ;;  %v4529_v16 = vpop.permute.xlu1 %4528  ;;  %v7920_v33 = vld [vmem:[#allocation10 + $0xd8] sm:$0x30] }
 0x57e   : > { %7339 = vmatmul.msk.bf16.gmra.mxu1 %vm3617_vm15, %v7910_v19  ;;  %4634 = vmatpush.bf16.msrb.mxu3 %v4527_v13  ;;  %v4544_v31 = vsel %vm1813_vm3, %v4529_v16, %v4531_v26  ;;  %v4513_v57 = vpop.permute.xlu2 %4512  ;;  %v7916_v26 = vld [vmem:[#allocation10 + $0xb8] sm:$0xff] }
 0x580   : > { %4589 = vmatpush.bf16.msrb.mxu1 %v4544_v31 }
 0x582   : > { %4635 = vmatpush.bf16.msrb.mxu3 %v4523_v39 }
 0x583   : > { %v10673_v5 = vpop.f32.mrf.mxu2 }
 0x584   : > { %11886 = vst [vmem:[#allocation35_spill] sm:$0xff] %v10673_v5  ;;  %v10675_v28 = vpop.f32.mrf.mxu0 }
 0x585   : > { %v4525_v55 = vpop.permute.xlu0 %4524  ;;  %v4519_v3 = vpop.permute.xlu1 %4518  ;;  %7347 = vmatmul.msk.bf16.gmra.mxu3 %vm3617_vm15, %v7911_v62 }
 0x586   : > { %4636 = vmatpush.bf16.msrb.mxu3 %v4519_v3  ;;  %v4543_v61 = vsel %vm1813_vm3, %v4525_v55, %v4527_v13 }
 0x587   : > { %7466 = vmatmul.msk.bf16.gmra.mxu0 %vm3617_vm15, %v7925_v44  ;;  %4590 = vmatpush.bf16.msrb.mxu1 %v4543_v61 }
 0x588   : > { %7473 = vmatmul.msk.bf16.gmra.mxu2 %vm3617_vm15, %v7925_v44  ;;  %v7917_v44 = vld [vmem:[#allocation10 + $0xc0] sm:$0xff] }
 0x58b   : > { %v10682_v40 = vpop.f32.mrf.mxu2  ;;  %4591 = vmatpush.bf16.msrb.mxu1 %v4542_v49 }
 0x58c   : > { %v10684_v42 = vpop.f32.mrf.mxu0 }
 0x58d   : > { %v4515_v35 = vpop.permute.xlu0 %4514  ;;  %v4517_v4 = vpop.permute.xlu1 %4516 }
 0x58e   : > { %7340 = vmatmul.msk.bf16.gmra.mxu1 %vm3617_vm15, %v7911_v62  ;;  %4637 = vmatpush.bf16.msrb.mxu3 %v4515_v35  ;;  %v4541_v8 = vsel %vm1813_vm3, %v4517_v4, %v4519_v3  ;;  %v4540_v24 = vsel %vm1813_vm3, %v4513_v57, %v4515_v35  ;;  %v7918_v57 = vld [vmem:[#allocation10 + $0xc8] sm:$0xff]  ;;  %vm11023_vm3 = vmor %vm4788_vm2, %vm3414_vm8 }
 0x58f   : > { %4592 = vmatpush.bf16.msrb.mxu1 %v4541_v8 }
 0x593   : > { %v10689_v51 = vpop.f32.mrf.mxu2  ;;  %4593 = vmatpush.bf16.msrb.mxu1 %v4540_v24 }
 0x594   : > { %v10691_v29 = vpop.f32.mrf.mxu0 }
 0x595   : > { %7348 = vmatmul.msk.bf16.gmra.mxu3 %vm3617_vm15, %v7912_v0 }
 0x597   : > { %7467 = vmatmul.msk.bf16.gmra.mxu0 %vm3617_vm15, %v7926_v41 }
 0x598   : > { %7474 = vmatmul.msk.bf16.gmra.mxu2 %vm3617_vm15, %v7926_v41 }
 0x59b   : > { %v10696_v50 = vpop.f32.mrf.mxu2 }
 0x59c   : > { %v10698_v6 = vpop.f32.mrf.mxu0 }
 0x59e   : > { %7341 = vmatmul.msk.bf16.gmra.mxu1 %vm3617_vm15, %v7912_v0 }
 0x5a3   : > { %v10701_v32 = vpop.f32.mrf.mxu2 }
 0x5a4   : > { %v10703_v45 = vpop.f32.mrf.mxu0 }
 0x5a5   : > { %7349 = vmatmul.msk.bf16.gmra.mxu3 %vm3617_vm15, %v7279_v30 }
 0x5a7   : > { %7468 = vmatmul.msk.bf16.gmra.mxu0 %vm3617_vm15, %v7461_v25 }
 0x5a8   : > { %7475 = vmatmul.msk.bf16.gmra.mxu2 %vm3617_vm15, %v7461_v25  ;;  %v7919_v25 = vld [vmem:[#allocation10 + $0xd0] sm:$0xff] }
 0x5ab   : > { %v10708_v10 = vpop.f32.mrf.mxu2 }
 0x5ac   : > { %v10710_v15 = vpop.f32.mrf.mxu0 }
 0x5ae   : > { %7342 = vmatmul.msk.bf16.gmra.mxu1 %vm3617_vm15, %v7279_v30 }
 0x5b3   : > { %v10713_v1 = vpop.f32.mrf.mxu2 }
 0x5b4   : > { %11887 = vst [vmem:[#allocation38_spill] sm:$0xff] %v10713_v1  ;;  %v10715_v58 = vpop.f32.mrf.mxu0 }
 0x5b5   : > { %11888 = vst [vmem:[#allocation31_spill] sm:$0xff] %v10715_v58  ;;  %7427 = vmatmul.msk.bf16.vlgmr.msra.gmra.mxu3 %vm3617_vm15, %v7914_v9 }
 0x5bb   : > { %v10718_v36 = vpop.f32.mrf.mxu2 }
 0x5bc   : > { %11889 = vst [vmem:[#allocation34_spill] sm:$0xff] %v10718_v36  ;;  %v10720_v27 = vpop.f32.mrf.mxu0 }
 0x5bd   : > { %11890 = vst [vmem:[#allocation40_spill] sm:$0xff] %v10720_v27 }
 0x5be   : > { %7420 = vmatmul.msk.bf16.vlgmr.msra.gmra.mxu1 %vm3617_vm15, %v7914_v9 }
 0x5c3   : > { %v10723_v2 = vpop.f32.mrf.mxu2 }
 0x5c4   : > { %11891 = vst [vmem:[#allocation41_spill] sm:$0xff] %v10723_v2  ;;  %v10725_v21 = vpop.f32.mrf.mxu0 }
 0x5c5   : > { %7428 = vmatmul.msk.bf16.gmra.mxu3 %vm3617_vm15, %v7915_v63 }
 0x5c8   : > { %v10728_v37 = vpop.f32.mrf.mxu3 }
 0x5cb   : > { %v10730_v19 = vpop.f32.mrf.mxu2  ;;  %v10732_v34 = vpop.f32.mrf.mxu1 }
 0x5cc   : > { %v10734_v11 = vpop.f32.mrf.mxu0 }
 0x5ce   : > { %7421 = vmatmul.msk.bf16.gmra.mxu1 %vm3617_vm15, %v7915_v63 }
 0x5d0   : > { %v10737_v60 = vpop.f32.mrf.mxu3 }
 0x5d3   : > { %v10739_v38 = vpop.f32.mrf.mxu2  ;;  %v10741_v18 = vpop.f32.mrf.mxu1 }
 0x5d4   : > { %v10743_v52 = vpop.f32.mrf.mxu0 }
 0x5d5   : > { %7429 = vmatmul.msk.bf16.gmra.mxu3 %vm3617_vm15, %v7916_v26 }
 0x5d8   : > { %v10746_v39 = vpop.f32.mrf.mxu3 }
 0x5db   : > { %v10748_v13 = vpop.f32.mrf.mxu2  ;;  %v10750_v16 = vpop.f32.mrf.mxu1 }
 0x5dc   : > { %v10752_v31 = vpop.f32.mrf.mxu0 }
 0x5de   : > { %7422 = vmatmul.msk.bf16.gmra.mxu1 %vm3617_vm15, %v7916_v26 }
 0x5e0   : > { %v10755_v62 = vpop.f32.mrf.mxu3 }
 0x5e3   : > { %v10757_v55 = vpop.f32.mrf.mxu2  ;;  %v10759_v3 = vpop.f32.mrf.mxu1 }
 0x5e4   : > { %v10761_v61 = vpop.f32.mrf.mxu0 }
 0x5e5   : > { %7430 = vmatmul.msk.bf16.gmra.mxu3 %vm3617_vm15, %v7917_v44 }
 0x5e8   : > { %v10764_v43 = vpop.f32.mrf.mxu3 }
 0x5eb   : > { %v10766_v49 = vpop.f32.mrf.mxu2  ;;  %v10768_v35 = vpop.f32.mrf.mxu1 }
 0x5ec   : > { %v10770_v4 = vpop.f32.mrf.mxu0 }
 0x5ee   : > { %7423 = vmatmul.msk.bf16.gmra.mxu1 %vm3617_vm15, %v7917_v44 }
 0x5f0   : > { %v10773_v8 = vpop.f32.mrf.mxu3 }
 0x5f1   : > { %11892 = vst [vmem:[#allocation26_spill] sm:$0xff] %v10773_v8 }
 0x5f3   : > { %v10775_v0 = vpop.f32.mrf.mxu2  ;;  %v10777_v24 = vpop.f32.mrf.mxu1 }
 0x5f4   : > { %11893 = vst [vmem:[#allocation30_spill] sm:$0xff] %v10777_v24  ;;  %v4230_v41 = vpop.f32.mrf.mxu0 }
 0x5f5   : > { %7431 = vmatmul.msk.bf16.gmra.mxu3 %vm3617_vm15, %v7918_v57  ;;  %4346 = vrot.lane.b32.xlu0 %v4230_v41, %s8362_s19 }
 0x5f8   : > { %v10781_v20 = vpop.f32.mrf.mxu3 }
 0x5fb   : > { %v4274_v53 = vpop.f32.mrf.mxu2  ;;  %v10783_v59 = vpop.f32.mrf.mxu1 }
 0x5fc   : > { %4348 = vrot.lane.b32.xlu1 %v4274_v53, %s8362_s19  ;;  %v4232_v12 = vpop.f32.mrf.mxu0 }
 0x5fd   : > { %4350 = vrot.lane.b32.xlu2 %v4232_v12, %s8362_s19  ;;  %v7418_v12 = vld [vmem:[#allocation10 + $0xd8] sm:$0xf] }
 0x5fe   : > { %7424 = vmatmul.msk.bf16.gmra.mxu1 %vm3617_vm15, %v7918_v57  ;;  %v7419_v24 = vor.u32 %v7920_v33, %v7418_v12  ;;  %v7928_v12 = vld [vmem:[#allocation10 + $0xe0] sm:$0xff] }
 0x600   : > { %v10788_v30 = vpop.f32.mrf.mxu3 }
 0x603   : > { %v4276_v9 = vpop.f32.mrf.mxu2  ;;  %v10790_v63 = vpop.f32.mrf.mxu1 }
 0x604   : > { %4352 = vrot.lane.b32.xlu0 %v4276_v9, %s8362_s19  ;;  %v4235_v26 = vpop.f32.mrf.mxu0 }
 0x605   : > { %7432 = vmatmul.msk.bf16.gmra.mxu3 %vm3617_vm15, %v7919_v25  ;;  %4354 = vrot.lane.b32.xlu2 %v4235_v26, %s8362_s19 }
 0x608   : > { %v10795_v44 = vpop.f32.mrf.mxu3 }
 0x60b   : > { %v4279_v41 = vpop.f32.mrf.mxu2  ;;  %v10797_v53 = vpop.f32.mrf.mxu1 }
 0x60c   : > { %4356 = vrot.lane.b32.xlu0 %v4279_v41, %s8362_s19  ;;  %v4237_v57 = vpop.f32.mrf.mxu0 }
 0x60d   : > { %4358 = vrot.lane.b32.xlu1 %v4237_v57, %s8362_s19 }
 0x60e   : > { %7425 = vmatmul.msk.bf16.gmra.mxu1 %vm3617_vm15, %v7919_v25 }
 0x610   : > { %v10802_v9 = vpop.f32.mrf.mxu3 }
 0x613   : > { %v4281_v5 = vpop.f32.mrf.mxu2  ;;  %v10804_v8 = vpop.f32.mrf.mxu1 }
 0x614   : > { %v4240_v26 = vpop.f32.mrf.mxu0  ;;  %4360 = vrot.lane.b32.xlu2 %v4281_v5, %s8362_s19 }
 0x615   : > { %7433 = vmatmul.msk.bf16.gmra.mxu3 %vm3617_vm15, %v7419_v24  ;;  %4362 = vrot.lane.b32.xlu1 %v4240_v26, %s8362_s19 }
 0x618   : > { %v10809_v41 = vpop.f32.mrf.mxu3 }
 0x61b   : > { %v4284_v57 = vpop.f32.mrf.mxu2  ;;  %v10811_v2 = vpop.f32.mrf.mxu1 }
 0x61c   : > { %v4242_v25 = vpop.f32.mrf.mxu0  ;;  %4364 = vrot.lane.b32.xlu2 %v4284_v57, %s8362_s19 }
 0x61d   : > { %4366 = vrot.lane.b32.xlu0 %v4242_v25, %s8362_s19 }
 0x61e   : > { %7426 = vmatmul.msk.bf16.gmra.mxu1 %vm3617_vm15, %v7419_v24 }
 0x620   : > { %v10816_v33 = vpop.f32.mrf.mxu3 }
 0x621   : > { %11894 = vst [vmem:[#allocation27_spill] sm:$0xff] %v10816_v33 }
 0x623   : > { %v4286_v5 = vpop.f32.mrf.mxu2  ;;  %v10818_v27 = vpop.f32.mrf.mxu1 }
 0x624   : > { %4368 = vrot.lane.b32.xlu1 %v4286_v5, %s8362_s19  ;;  %v4245_v26 = vpop.f32.mrf.mxu0  ;;  %v7929_v5 = vld [vmem:[#allocation10 + $0xe8] sm:$0xff] }
 0x625   : > { %7511 = vmatmul.msk.bf16.vlgmr.msrb.gmra.mxu3 %vm3617_vm15, %v7928_v12  ;;  %4370 = vrot.lane.b32.xlu0 %v4245_v26, %s8362_s19  ;;  %v3862_v26 = vadd.f32 %v10635_v23, %v10728_v37  ;;  %v3864_v23 = vadd.f32 %v10641_v46, %v10737_v60  ;;  %v3867_v46 = vadd.f32 %v10650_v22, %v10746_v39 }
 0x626   : > { %v3869_v22 = vadd.f32 %v10657_v56, %v10755_v62  ;;  %v3828_v62 = vadd.f32 %v10659_v7, %v10768_v35  ;;  %v3833_v7 = vadd.f32 %v10675_v28, %v10783_v59 }
 0x628   : > { %v10823_v58 = vpop.f32.mrf.mxu3 }
 0x62b   : > { %v4289_v57 = vpop.f32.mrf.mxu2  ;;  %v10825_v36 = vpop.f32.mrf.mxu1 }
 0x62c   : > { %4372 = vrot.lane.b32.xlu1 %v4289_v57, %s8362_s19  ;;  %v4247_v24 = vpop.f32.mrf.mxu0 }
 0x62d   : > { %4374 = vrot.lane.b32.xlu2 %v4247_v24, %s8362_s19  ;;  %v3818_v24 = vadd.f32 %v10628_v48, %v10732_v34  ;;  %v7930_v48 = vld [vmem:[#allocation10 + $0xf0] sm:$0xff]  ;;  %v3820_v34 = vadd.f32 %v10637_v14, %v10741_v18  ;;  %v3823_v14 = vadd.f32 %v10643_v47, %v10750_v16  ;;  %v7931_v47 = vld [vmem:[#allocation10 + $0xf8] sm:$0xff] }
 0x62e   : > { %7504 = vmatmul.msk.bf16.vlgmr.msrb.gmra.mxu1 %vm3617_vm15, %v7928_v12 }
 0x630   : > { %v10830_v25 = vpop.f32.mrf.mxu3 }
 0x631   : > { %11895 = vst [vmem:[#allocation32_spill] sm:$0xff] %v10830_v25 }
 0x633   : > { %v4291_v1 = vpop.f32.mrf.mxu2  ;;  %v10832_v33 = vpop.f32.mrf.mxu1 }
 0x634   : > { %4338 = vrot.lane.b32.xlu1 %v10761_v61, %s8362_s19  ;;  %4376 = vrot.lane.b32.xlu0 %v4291_v1, %s8362_s19 }
 0x635   : > { %4340 = vrot.lane.b32.xlu2 %v10766_v49, %s8362_s19  ;;  %7512 = vmatmul.msk.bf16.gmra.mxu3 %vm3617_vm15, %v7929_v5 }
 0x638   : > { %v4073_v12 = vpop.f32.mrf.mxu3 }
 0x639   : > { %v10842_v57 = vadd.f32 %v4073_v12, %v3862_v26 }
 0x63b   : > { %v4029_v25 = vpop.f32.mrf.mxu1 }
 0x63c   : > { %4344 = vrot.lane.b32.xlu1 %v10775_v0, %s8362_s19  ;;  %4342 = vrot.lane.b32.xlu0 %v10770_v4, %s8362_s19  ;;  %v10850_v1 = vadd.f32 %v4029_v25, %v3818_v24 }
 0x63d   : > { %4330 = vrot.lane.b32.xlu2 %v10743_v52, %s8362_s19 }
 0x63e   : > { %7505 = vmatmul.msk.bf16.gmra.mxu1 %vm3617_vm15, %v7929_v5 }
 0x640   : > { %v4075_v37 = vpop.f32.mrf.mxu3 }
 0x641   : > { %v10857_v61 = vadd.f32 %v4075_v37, %v3864_v23 }
 0x643   : > { %v4031_v49 = vpop.f32.mrf.mxu1 }
 0x644   : > { %4334 = vrot.lane.b32.xlu1 %v10752_v31, %s8362_s19  ;;  %4332 = vrot.lane.b32.xlu0 %v10748_v13, %s8362_s19  ;;  %v10865_v52 = vadd.f32 %v4031_v49, %v3820_v34 }
 0x645   : > { %4336 = vrot.lane.b32.xlu2 %v10757_v55, %s8362_s19  ;;  %7513 = vmatmul.msk.bf16.gmra.mxu3 %vm3617_vm15, %v7930_v48 }
 0x648   : > { %v4078_v60 = vpop.f32.mrf.mxu3 }
 0x649   : > { %v10872_v4 = vadd.f32 %v4078_v60, %v3867_v46  ;;  %v3835_v46 = vadd.f32 %v10684_v42, %v10790_v63 }
 0x64b   : > { %v4034_v18 = vpop.f32.mrf.mxu1 }
 0x64c   : > { %4324 = vrot.lane.b32.xlu1 %v10730_v19, %s8362_s19  ;;  %4322 = vrot.lane.b32.xlu0 %v10725_v21, %s8362_s19  ;;  %v10880_v13 = vadd.f32 %v4034_v18, %v3823_v14  ;;  %v3825_v19 = vadd.f32 %v10652_v17, %v10759_v3  ;;  %v3879_v14 = vadd.f32 %v10689_v51, %v10788_v30 }
 0x64d   : > { %4326 = vrot.lane.b32.xlu2 %v10734_v11, %s8362_s19  ;;  %v3872_v11 = vadd.f32 %v10666_v54, %v10764_v43  ;;  %v3877_v54 = vadd.f32 %v10682_v40, %v10781_v20  ;;  %v7933_v20 = vld [vmem:[#allocation10 + $0x108] sm:$0xff] }
 0x64e   : > { %7506 = vmatmul.msk.bf16.gmra.mxu1 %vm3617_vm15, %v7930_v48 }
 0x650   : > { %v4080_v39 = vpop.f32.mrf.mxu3 }
 0x651   : > { %v10887_v31 = vadd.f32 %v4080_v39, %v3869_v22 }
 0x653   : > { %v4036_v16 = vpop.f32.mrf.mxu1 }
 0x654   : > { %4328 = vrot.lane.b32.xlu0 %v10739_v38, %s8362_s19  ;;  %v10893_v21 = vadd.f32 %v4036_v16, %v3825_v19  ;;  %v7932_v38 = vld [vmem:[#allocation10 + $0x100] sm:$0xff]  ;;  %v3882_v19 = vadd.f32 %v10696_v50, %v10795_v44  ;;  %v3884_v44 = vadd.f32 %v10701_v32, %v10802_v9  ;;  %v3887_v9 = vadd.f32 %v10708_v10, %v10809_v41 }
 0x655   : > { %7514 = vmatmul.msk.bf16.gmra.mxu3 %vm3617_vm15, %v7931_v47 }
 0x657   : > { %v4351_v26 = vpop.permute.xlu2 %4350 }
 0x658   : > { %v4083_v55 = vpop.f32.mrf.mxu3  ;;  %v4427_v28 = vsel %vm2841_vm7, 0.0, %v4351_v26 }
 0x659   : > { %v10898_v56 = vadd.f32 %v4083_v55, %v3872_v11  ;;  %v3838_v55 = vadd.f32 %v10691_v29, %v10797_v53 }
 0x65b   : > { %v4039_v0 = vpop.f32.mrf.mxu1 }
 0x65c   : > { %v10902_v25 = vadd.f32 %v4039_v0, %v3828_v62 }
 0x65e   : > { %7507 = vmatmul.msk.bf16.gmra.mxu1 %vm3617_vm15, %v7931_v47 }
 0x65f   : > { %v4355_v59 = vpop.permute.xlu2 %4354 }
 0x660   : > { %v10905_v17 = vpop.f32.mrf.mxu3  ;;  %v4428_v51 = vsel %vm2841_vm7, 0.0, %v4355_v59 }
 0x663   : > { %v10907_v3 = vpop.f32.mrf.mxu1 }
 0x665   : > { %7515 = vmatmul.msk.bf16.gmra.mxu3 %vm3617_vm15, %v7932_v38 }
 0x667   : > { %v4347_v5 = vpop.permute.xlu0 %4346 }
 0x668   : > { %v4088_v43 = vpop.f32.mrf.mxu3  ;;  %v4426_v24 = vsel %vm2841_vm7, 0.0, %v4347_v5 }
 0x669   : > { %v4121_v12 = vadd.f32 %v4088_v43, %v3877_v54  ;;  %v7502_v54 = vld [vmem:[#allocation10 + $0x110] sm:$0xf]  ;;  %v7934_v43 = vld [vmem:[#allocation10 + $0x110] sm:$0x30] }
 0x66b   : > { %v4044_v35 = vpop.f32.mrf.mxu1 }
 0x66c   : > { %v4120_v23 = vadd.f32 %v4044_v35, %v3833_v7  ;;  %v7503_v35 = vor.u32 %v7934_v43, %v7502_v54 }
 0x66e   : > { %v4349_v37 = vpop.permute.xlu1 %4348  ;;  %7508 = vmatmul.msk.bf16.gmra.mxu1 %vm3617_vm15, %v7932_v38  ;;  %v10916_v48 = vadd.f32 %v4426_v24, %v4120_v23  ;;  %v4361_v0 = vpop.permute.xlu2 %4360  ;;  %v3840_v24 = vadd.f32 %v10698_v6, %v10804_v8  ;;  %v3843_v6 = vadd.f32 %v10703_v45, %v10811_v2  ;;  %v11897_v45 = vld [vmem:[#allocation38_spill] sm:$0xff] }
 0x66f   : > { %v4384_v34 = vsel %vm2841_vm7, %v4347_v5, %v4349_v37 }
 0x670   : > { %v10919_v49 = vadd.f32 %v4384_v34, %v4121_v12  ;;  %v4090_v40 = vpop.f32.mrf.mxu3 }
 0x671   : > { %v4123_v22 = vadd.f32 %v4090_v40, %v3879_v14 }
 0x673   : > { %v4046_v60 = vpop.f32.mrf.mxu1 }
 0x674   : > { %v4122_v18 = vadd.f32 %v4046_v60, %v3835_v46 }
 0x675   : > { %7516 = vmatmul.msk.bf16.gmra.mxu3 %vm3617_vm15, %v7933_v20 }
 0x676   : > { %v4353_v39 = vpop.permute.xlu0 %4352  ;;  %v10927_v47 = vadd.f32 %v4427_v28, %v4122_v18 }
 0x677   : > { %v4385_v16 = vsel %vm2841_vm7, %v4351_v26, %v4353_v39 }
 0x678   : > { %v10932_v42 = vadd.f32 %v4385_v16, %v4123_v22  ;;  %v4093_v63 = vpop.f32.mrf.mxu3 }
 0x679   : > { %v4125_v11 = vadd.f32 %v4093_v63, %v3882_v19  ;;  %v3845_v19 = vadd.f32 %v10710_v15, %v10818_v27 }
 0x67b   : > { %v4049_v30 = vpop.f32.mrf.mxu1 }
 0x67c   : > { %v4124_v62 = vadd.f32 %v4049_v30, %v3838_v55 }
 0x67e   : > { %v4357_v38 = vpop.permute.xlu0 %4356  ;;  %7509 = vmatmul.msk.bf16.gmra.mxu1 %vm3617_vm15, %v7933_v20  ;;  %v10938_v50 = vadd.f32 %v4428_v51, %v4124_v62  ;;  %v4365_v20 = vpop.permute.xlu2 %4364 }
 0x67f   : > { %v4386_v5 = vsel %vm2841_vm7, %v4355_v59, %v4357_v38  ;;  %v4359_v26 = vpop.permute.xlu1 %4358  ;;  %v11898_v38 = vld [vmem:[#allocation34_spill] sm:$0xff] }
 0x680   : > { %v10943_v12 = vadd.f32 %v4386_v5, %v4125_v11  ;;  %v4095_v29 = vpop.f32.mrf.mxu3  ;;  %v4387_v53 = vsel %vm2841_vm7, %v4359_v26, %v4361_v0  ;;  %v4429_v23 = vsel %vm2841_vm7, 0.0, %v4359_v26  ;;  %v11896_v11 = vld [vmem:[#allocation27_spill] sm:$0xff]  ;;  %v3892_v54 = vadd.f32 %v11898_v38, %v10823_v58 }
 0x681   : > { %v4127_v7 = vadd.f32 %v4095_v29, %v3884_v44  ;;  %v3889_v2 = vadd.f32 %v11897_v45, %v11896_v11  ;;  %v11899_v26 = vld [vmem:[#allocation31_spill] sm:$0xff] }
 0x682   : > { %v3848_v29 = vadd.f32 %v11899_v26, %v10825_v36 }
 0x683   : > { %v10949_v37 = vadd.f32 %v4387_v53, %v4127_v7  ;;  %v4051_v34 = vpop.f32.mrf.mxu1 }
 0x684   : > { %v4126_v40 = vadd.f32 %v4051_v34, %v3840_v24 }
 0x685   : > { %7517 = vmatmul.msk.bf16.gmra.mxu3 %vm3617_vm15, %v7503_v35 }
 0x686   : > { %v10952_v32 = vadd.f32 %v4429_v23, %v4126_v40 }
 0x687   : > { %v4363_v46 = vpop.permute.xlu1 %4362  ;;  %v4375_v55 = vpop.permute.xlu2 %4374 }
 0x688   : > { %v4098_v28 = vpop.f32.mrf.mxu3  ;;  %v4388_v59 = vsel %vm2841_vm7, %v4363_v46, %v4365_v20  ;;  %v4430_v8 = vsel %vm2841_vm7, 0.0, %v4363_v46  ;;  %v11900_v20 = vld [vmem:[#allocation40_spill] sm:$0xff] }
 0x689   : > { %v4129_v60 = vadd.f32 %v4098_v28, %v3887_v9  ;;  %v3850_v46 = vadd.f32 %v11900_v20, %v10832_v33  ;;  %v4433_v28 = vsel %vm2841_vm7, 0.0, %v4375_v55 }
 0x68b   : > { %v10960_v14 = vadd.f32 %v4388_v59, %v4129_v60  ;;  %v4054_v18 = vpop.f32.mrf.mxu1  ;;  %v11901_v59 = vld [vmem:[#allocation32_spill] sm:$0xff]  ;;  %v11902_v60 = vld [vmem:[#allocation41_spill] sm:$0xff] }
 0x68c   : > { %v4128_v22 = vadd.f32 %v4054_v18, %v3843_v6  ;;  %v3894_v6 = vadd.f32 %v11902_v60, %v11901_v59 }
 0x68e   : > { %7510 = vmatmul.msk.bf16.gmra.mxu1 %vm3617_vm15, %v7503_v35  ;;  %v10963_v39 = vadd.f32 %v4430_v8, %v4128_v22  ;;  %vm5957_vm15 = vcmask 203776  }
 0x68f   : > { %v4367_v10 = vpop.permute.xlu0 %4366  ;;  %v10980_v24 = vpop.permute.xlu2 %4340 }
 0x690   : > { %v4100_v41 = vpop.f32.mrf.mxu3  ;;  %v4431_v63 = vsel %vm2841_vm7, 0.0, %v4367_v10 }
 0x691   : > { %v4131_v30 = vadd.f32 %v4100_v41, %v3889_v2 }
 0x693   : > { %v4056_v16 = vpop.f32.mrf.mxu1 }
 0x694   : > { %v4130_v51 = vadd.f32 %v4056_v16, %v3845_v19 }
 0x696   : > { %v10970_v62 = vadd.f32 %v4431_v63, %v4130_v51  ;;  %v4369_v0 = vpop.permute.xlu1 %4368 }
 0x697   : > { %v4389_v43 = vsel %vm2841_vm7, %v4367_v10, %v4369_v0  ;;  %v4371_v27 = vpop.permute.xlu0 %4370  ;;  %v4331_v16 = vpop.permute.xlu2 %4330 }
 0x698   : > { %v10975_v44 = vadd.f32 %v4389_v43, %v4131_v30  ;;  %v4103_v15 = vpop.f32.mrf.mxu3  ;;  %v4432_v7 = vsel %vm2841_vm7, 0.0, %v4371_v27  ;;  %v4422_v43 = vsel %vm2841_vm7, 0.0, %v4331_v16 }
 0x699   : > { %v4133_v5 = vadd.f32 %v4103_v15, %v3892_v54 }
 0x69b   : > { %v4059_v53 = vpop.f32.mrf.mxu1 }
 0x69c   : > { %v4132_v35 = vadd.f32 %v4059_v53, %v3848_v29  ;;  %v4438_v29 = vadd.f32 %v4422_v43, %v10880_v13  ;;  %v11008_v53 = vstv %s7251_s26  ;;  %s8368_s26 = smov 2  }
 0x69e   : > { %v10982_v23 = vadd.f32 %v4432_v7, %v4132_v35  ;;  %v4373_v34 = vpop.permute.xlu1 %4372 }
 0x69f   : > { %v4390_v58 = vsel %vm2841_vm7, %v4371_v27, %v4373_v34  ;;  %v4337_v30 = vpop.permute.xlu2 %4336 }
 0x6a0   : > { %v10985_v40 = vadd.f32 %v4390_v58, %v4133_v5  ;;  %v4105_v9 = vpop.f32.mrf.mxu3 }
 0x6a1   : > { %v4135_v18 = vadd.f32 %v4105_v9, %v3894_v6 }
 0x6a3   : > { %v4061_v36 = vpop.f32.mrf.mxu1 }
 0x6a4   : > { %v4134_v8 = vadd.f32 %v4061_v36, %v3850_v46 }
 0x6a6   : > { %v4339_v22 = vpop.permute.xlu1 %4338  ;;  %v4377_v10 = vpop.permute.xlu0 %4376  ;;  %v10992_v41 = vadd.f32 %v4433_v28, %v4134_v8 }
 0x6a7   : > { %v4391_v19 = vsel %vm2841_vm7, %v4375_v55, %v4377_v10  ;;  %v4327_v35 = vpop.permute.xlu2 %4326 }
 0x6a8   : > { %v10995_v63 = vadd.f32 %v4391_v19, %v4135_v18  ;;  %v4639_v11 = vpop.f32.mrf.mxu3  ;;  %v4421_v36 = vsel %vm2841_vm7, 0.0, %v4327_v35 }
 0x6ab   : > { %v4595_v45 = vpop.f32.mrf.mxu1 }
 0x6ae   : > { %v10997_v33 = vpop.permute.xlu1 %4344  ;;  %v10999_v2 = vpop.permute.xlu0 %4342 }
 0x6b0   : > { %v11001_v51 = vpop.f32.mrf.mxu3 }
 0x6b3   : > { %v4597_v0 = vpop.f32.mrf.mxu1 }
 0x6b6   : > { %v4335_v38 = vpop.permute.xlu1 %4334  ;;  %v4333_v54 = vpop.permute.xlu0 %4332 }
 0x6b7   : > { %v4380_v55 = vsel %vm2841_vm7, %v4331_v16, %v4333_v54  ;;  %v4381_v34 = vsel %vm2841_vm7, %v4335_v38, %v4337_v30  ;;  %v4423_v20 = vsel %vm2841_vm7, 0.0, %v4335_v38  ;;  %v4675_v16 = vsel %vm4674_vm1, %v4639_v11, 0.0 }
 0x6b8   : > { %v4439_v15 = vadd.f32 %v4380_v55, %v10872_v4  ;;  %v4644_v27 = vpop.f32.mrf.mxu3  ;;  %v4441_v13 = vadd.f32 %v4381_v34, %v10887_v31  ;;  %v4440_v30 = vadd.f32 %v4423_v20, %v10893_v21 }
 0x6b9   : > { %v4677_v5 = vsel %vm4674_vm1, %v4644_v27, 0.0 }
 0x6ba   : > { %v4694_v26 = vadd.f32 %v4677_v5, %v4439_v15 }
 0x6bb   : > { %v4600_v7 = vpop.f32.mrf.mxu1 }
 0x6bc   : > { %v4723_v58 = vadd.f32 %v11008_v53, %v4694_v26  ;;  %v4693_v9 = vadd.f32 %v4600_v7, %v4438_v29 }
 0x6be   : > { %v4722_v46 = vadd.f32 %v11008_v53, %v4693_v9  ;;  %v4325_v4 = vpop.permute.xlu1 %4324  ;;  %v4323_v28 = vpop.permute.xlu0 %4322  ;;  %v4751_v6 = vmax.f32 %v4723_v58, 0.0 }
 0x6bf   : > { %v4378_v59 = vsel %vm2841_vm7, %v4323_v28, %v4325_v4  ;;  %v4420_v60 = vsel %vm2841_vm7, 0.0, %v4323_v28 }
 0x6c0   : > { %v4750_v8 = vmax.f32 %v4722_v46, 0.0  ;;  %v4434_v18 = vadd.f32 %v4420_v60, %v10850_v1  ;;  %v4435_v10 = vadd.f32 %v4378_v59, %v10842_v57  ;;  %v4646_v19 = vpop.f32.mrf.mxu3  ;;  %v4382_v1 = vsel %vm2841_vm7, %v4339_v22, %v10980_v24 }
 0x6c1   : > { %v4678_v31 = vsel %vm4674_vm1, %v4646_v19, 0.0  ;;  %v4436_v57 = vadd.f32 %v4421_v36, %v10865_v52  ;;  %v4443_v52 = vadd.f32 %v4382_v1, %v10898_v56  ;;  %v11907_v19 = vld [vmem:[#allocation30_spill] sm:$0xff] }
 0x6c2   : > { %v4776_v54 = vpack.c.bf16 %v4751_v6, %v4750_v8  ;;  %v4689_v43 = vadd.f32 %v4595_v45, %v4434_v18  ;;  %v4690_v55 = vadd.f32 %v4675_v16, %v4435_v10  ;;  %v4696_v15 = vadd.f32 %v4678_v31, %v4441_v13  ;;  %v11905_v8 = vld [vmem:[#allocation26_spill] sm:$0xff]  ;;  %v11906_v18 = vld [vmem:[#allocation35_spill] sm:$0xff] }
 0x6c3   : > { %v4602_v27 = vpop.f32.mrf.mxu1  ;;  %v4424_v45 = vsel %vm2841_vm7, 0.0, %v4339_v22  ;;  %v4691_v29 = vadd.f32 %v4597_v0, %v4436_v57  ;;  %v4676_v13 = vsel %vm4674_vm1, %v11001_v51, 0.0  ;;  %v11908_v16 = vld [vmem:[#allocation39_spill] sm:$0xff]  ;;  %v4383_v31 = vsel %vm2841_vm7, %v10999_v2, %v10997_v33 }
 0x6c4   : > { %4792 = vst.msk [vmem:[#allocation3 + $0x10] sm:$0xff] %vm11023_vm3, %v4776_v54  ;;  %v4718_v21 = vadd.f32 %v11008_v53, %v4689_v43  ;;  %v4719_v11 = vadd.f32 %v11008_v53, %v4690_v55  ;;  %v4725_v5 = vadd.f32 %v11008_v53, %v4696_v15  ;;  %v4695_v26 = vadd.f32 %v4602_v27, %v4440_v30 }
 0x6c5   : > { %v4442_v0 = vadd.f32 %v4424_v45, %v10902_v25  ;;  %v4720_v59 = vadd.f32 %v11008_v53, %v4691_v29  ;;  %v3830_v30 = vadd.f32 %v11908_v16, %v11907_v19  ;;  %v4425_v57 = vsel %vm2841_vm7, 0.0, %v10999_v2 }
 0x6c6   : > { %v4746_v7 = vmax.f32 %v4718_v21, 0.0  ;;  %v4747_v34 = vmax.f32 %v4719_v11, 0.0  ;;  %v4724_v24 = vadd.f32 %v11008_v53, %v4695_v26  ;;  %v4329_v58 = vpop.permute.xlu0 %4328  ;;  %v4753_v46 = vmax.f32 %v4725_v5, 0.0 }
 0x6c7   : > { %v4379_v9 = vsel %vm2841_vm7, %v4327_v35, %v4329_v58  ;;  %v4748_v43 = vmax.f32 %v4720_v59, 0.0  ;;  %v4118_v1 = vadd.f32 %v10907_v3, %v3830_v30 }
 0x6c8   : > { %v4774_v20 = vpack.c.bf16 %v4747_v34, %v4746_v7  ;;  %v4752_v4 = vmax.f32 %v4724_v24, 0.0  ;;  %v4437_v28 = vadd.f32 %v4379_v9, %v10857_v61  ;;  %v4649_v36 = vpop.f32.mrf.mxu3  ;;  %v3874_v61 = vadd.f32 %v11906_v18, %v11905_v8 }
 0x6c9   : > { %v4679_v22 = vsel %vm4674_vm1, %v4649_v36, 0.0  ;;  %v4444_v29 = vadd.f32 %v4425_v57, %v4118_v1 }
 0x6ca   : > { %4790 = vst.msk [vmem:[#allocation3] sm:$0xff] %vm11023_vm3, %v4774_v20  ;;  %v4777_v56 = vpack.c.bf16 %v4753_v46, %v4752_v4  ;;  %v4692_v35 = vadd.f32 %v4676_v13, %v4437_v28  ;;  %v4698_v60 = vadd.f32 %v4679_v22, %v4443_v52  ;;  %v4119_v54 = vadd.f32 %v10905_v17, %v3874_v61 }
 0x6cb   : > { %v4605_v6 = vpop.f32.mrf.mxu1 }
 0x6cc   : > { %4793 = vst.msk [vmem:[#allocation3 + $0x18] sm:$0xff] %vm11023_vm3, %v4777_v56  ;;  %v4721_v51 = vadd.f32 %v11008_v53, %v4692_v35  ;;  %v4727_v10 = vadd.f32 %v11008_v53, %v4698_v60  ;;  %v4697_v25 = vadd.f32 %v4605_v6, %v4442_v0  ;;  %v4445_v27 = vadd.f32 %v4383_v31, %v4119_v54 }
 0x6ce   : > { %v4749_v55 = vmax.f32 %v4721_v51, 0.0  ;;  %v4726_v15 = vadd.f32 %v11008_v53, %v4697_v25  ;;  %v4755_v11 = vmax.f32 %v4727_v10, 0.0 }
 0x6d0   : > { %v4775_v21 = vpack.c.bf16 %v4749_v55, %v4748_v43  ;;  %v4754_v5 = vmax.f32 %v4726_v15, 0.0  ;;  %v4651_v26 = vpop.f32.mrf.mxu3 }
 0x6d1   : > { %v4680_v45 = vsel %vm4674_vm1, %v4651_v26, 0.0 }
 0x6d2   : > { %4791 = vst.msk [vmem:[#allocation3 + $0x8] sm:$0xff] %vm11023_vm3, %v4775_v21  ;;  %v4778_v17 = vpack.c.bf16 %v4755_v11, %v4754_v5  ;;  %v4700_v33 = vadd.f32 %v4680_v45, %v4445_v27 }
 0x6d3   : > { %v4607_v7 = vpop.f32.mrf.mxu1 }
 0x6d4   : > { %4794 = vst.msk [vmem:[#allocation3 + $0x20] sm:$0xff] %vm11023_vm3, %v4778_v17  ;;  %v4729_v3 = vadd.f32 %v11008_v53, %v4700_v33  ;;  %v4699_v2 = vadd.f32 %v4607_v7, %v4444_v29 }
 0x6d6   : > { %v4728_v34 = vadd.f32 %v11008_v53, %v4699_v2  ;;  %v4757_v24 = vmax.f32 %v4729_v3, 0.0 }
 0x6d8   : > { %v4756_v58 = vmax.f32 %v4728_v34, 0.0  ;;  %v4654_v52 = vpop.f32.mrf.mxu3 }
 0x6d9   : > { %v4681_v9 = vsel %vm4674_vm1, %v4654_v52, 0.0 }
 0x6da   : > { %v4779_v20 = vpack.c.bf16 %v4757_v24, %v4756_v58  ;;  %v4702_v46 = vadd.f32 %v4681_v9, %v10919_v49 }
 0x6db   : > { %v4610_v4 = vpop.f32.mrf.mxu1 }
 0x6dc   : > { %4795 = vst.msk [vmem:[#allocation3 + $0x28] sm:$0xff] %vm11023_vm3, %v4779_v20  ;;  %v4731_v28 = vadd.f32 %v11008_v53, %v4702_v46  ;;  %v4701_v36 = vadd.f32 %v4610_v4, %v10916_v48 }
 0x6de   : > { %v4730_v13 = vadd.f32 %v11008_v53, %v4701_v36  ;;  %v4759_v22 = vmax.f32 %v4731_v28, 0.0 }
 0x6e0   : > { %v4758_v0 = vmax.f32 %v4730_v13, 0.0  ;;  %v4656_v59 = vpop.f32.mrf.mxu3 }
 0x6e1   : > { %v4682_v56 = vsel %vm4674_vm1, %v4656_v59, 0.0 }
 0x6e2   : > { %v4780_v35 = vpack.c.bf16 %v4759_v22, %v4758_v0  ;;  %v4704_v60 = vadd.f32 %v4682_v56, %v10932_v42 }
 0x6e3   : > { %v4612_v6 = vpop.f32.mrf.mxu1 }
 0x6e4   : > { %4796 = vst.msk [vmem:[#allocation3 + $0x30] sm:$0xff] %vm11023_vm3, %v4780_v35  ;;  %v4733_v49 = vadd.f32 %v11008_v53, %v4704_v60  ;;  %v4703_v8 = vadd.f32 %v4612_v6, %v10927_v47 }
 0x6e6   : > { %v4732_v48 = vadd.f32 %v11008_v53, %v4703_v8  ;;  %v4761_v18 = vmax.f32 %v4733_v49, 0.0 }
 0x6e8   : > { %v4760_v61 = vmax.f32 %v4732_v48, 0.0  ;;  %v4659_v51 = vpop.f32.mrf.mxu3 }
 0x6e9   : > { %v4683_v10 = vsel %vm4674_vm1, %v4659_v51, 0.0 }
 0x6ea   : > { %v4781_v25 = vpack.c.bf16 %v4761_v18, %v4760_v61  ;;  %v4706_v19 = vadd.f32 %v4683_v10, %v10943_v12 }
 0x6eb   : > { %v4615_v16 = vpop.f32.mrf.mxu1 }
 0x6ec   : > { %4797 = vst.msk [vmem:[#allocation3 + $0x38] sm:$0xff] %vm11023_vm3, %v4781_v25  ;;  %v4735_v42 = vadd.f32 %v11008_v53, %v4706_v19  ;;  %v4705_v30 = vadd.f32 %v4615_v16, %v10938_v50 }
 0x6ee   : > { %v4734_v47 = vadd.f32 %v11008_v53, %v4705_v30  ;;  %v4763_v31 = vmax.f32 %v4735_v42, 0.0 }
 0x6f0   : > { %v4762_v54 = vmax.f32 %v4734_v47, 0.0  ;;  %v4661_v43 = vpop.f32.mrf.mxu3 }
 0x6f1   : > { %v4684_v55 = vsel %vm4674_vm1, %v4661_v43, 0.0  ;;  %v7940_v43 = vld [vmem:[#allocation3 + $0x14] sm:$0xf] }
 0x6f2   : > { %v4782_v15 = vpack.c.bf16 %v4763_v31, %v4762_v54  ;;  %v4708_v1 = vadd.f32 %v4684_v55, %v10949_v37  ;;  %v7944_v54 = vld [vmem:[#allocation3 + $0x34] sm:$0xf] }
 0x6f3   : > { %v4617_v57 = vpop.f32.mrf.mxu1  ;;  %v7559_v47 = vld [vmem:[#allocation3 + $0x38] sm:$0xf0] }
 0x6f4   : > { %4798 = vst.msk [vmem:[#allocation3 + $0x40] sm:$0xff] %vm11023_vm3, %v4782_v15  ;;  %v4737_v12 = vadd.f32 %v11008_v53, %v4708_v1  ;;  %v4707_v27 = vadd.f32 %v4617_v57, %v10952_v32  ;;  %v11140_v55 = vor.u32 %v7944_v54, %v7559_v47  ;;  %v7943_v1 = vld [vmem:[#allocation3 + $0x24] sm:$0xf0] }
 0x6f6   : > { %v4736_v50 = vadd.f32 %v11008_v53, %v4707_v27  ;;  %v4765_v21 = vmax.f32 %v4737_v12, 0.0 }
 0x6f8   : > { %v4764_v11 = vmax.f32 %v4736_v50, 0.0  ;;  %v4664_v5 = vpop.f32.mrf.mxu3 }
 0x6f9   : > { %v4685_v26 = vsel %vm4674_vm1, %v4664_v5, 0.0 }
 0x6fa   : > { %v4783_v45 = vpack.c.bf16 %v4765_v21, %v4764_v11  ;;  %v4710_v29 = vadd.f32 %v4685_v26, %v10960_v14  ;;  %v7549_v26 = vld [vmem:[#allocation3 + $0x20] sm:$0xf] }
 0x6fb   : > { %v4620_v17 = vpop.f32.mrf.mxu1  ;;  %v7946_v14 = vld [vmem:[#allocation3 + $0x44] sm:$0xf]  ;;  %v7565_v12 = vld [vmem:[#allocation3 + $0x40] sm:$0xf] }
 0x6fc   : > { %4799 = vst.msk [vmem:[#allocation3 + $0x48] sm:$0xff] %vm11023_vm3, %v4783_v45  ;;  %v4739_v37 = vadd.f32 %v11008_v53, %v4710_v29  ;;  %v4709_v33 = vadd.f32 %v4620_v17, %v10963_v39  ;;  %v7550_v29 = vor.u32 %v7943_v1, %v7549_v26 }
 0x6fe   : > { %v4738_v32 = vadd.f32 %v11008_v53, %v4709_v33  ;;  %v4767_v7 = vmax.f32 %v4739_v37, 0.0  ;;  %v7535_v33 = vld [vmem:[#allocation3 + $0x8] sm:$0xf0] }
 0x700   : > { %v4766_v3 = vmax.f32 %v4738_v32, 0.0  ;;  %v4666_v2 = vpop.f32.mrf.mxu3  ;;  %v7938_v32 = vld [vmem:[#allocation3 + $0x4] sm:$0xf] }
 0x701   : > { %v4686_v34 = vsel %vm4674_vm1, %v4666_v2, 0.0  ;;  %v7557_v2 = vld [vmem:[#allocation3 + $0x30] sm:$0xf] }
 0x702   : > { %v4784_v24 = vpack.c.bf16 %v4767_v7, %v4766_v3  ;;  %v4712_v58 = vadd.f32 %v4686_v34, %v10975_v44  ;;  %v7538_v7 = vor.u32 %v7938_v32, %v7535_v33  ;;  %v7945_v3 = vld [vmem:[#allocation3 + $0x34] sm:$0xf0] }
 0x703   : > { %v4622_v52 = vpop.f32.mrf.mxu1  ;;  %v7567_v9 = vld [vmem:[#allocation3 + $0x48] sm:$0xf0]  ;;  %v7947_v15 = vld [vmem:[#allocation3 + $0x44] sm:$0xf0]  ;;  %v7558_v34 = vor.u32 %v7945_v3, %v7557_v2  ;;  %v5366_v33 = vld [vmem:[%s11776_s8 + $0x70] sm:$0xff] }
 0x704   : > { %4800 = vst.msk [vmem:[#allocation3 + $0x50] sm:$0xff] %vm11023_vm3, %v4784_v24  ;;  %v4741_v20 = vadd.f32 %v11008_v53, %v4712_v58  ;;  %v4711_v39 = vadd.f32 %v4622_v52, %v10970_v62  ;;  %v11112_v46 = vor.u32 %v7946_v14, %v7567_v9  ;;  %v7566_v5 = vor.u32 %v7947_v15, %v7565_v12  ;;  %v7551_v24 = vld [vmem:[#allocation3 + $0x28] sm:$0xf0]  ;;  %v7939_v58 = vld [vmem:[#allocation3 + $0x4] sm:$0xf0]  ;;  %v5378_v3 = vld [vmem:[%s11776_s8 + $0xd0] sm:$0xff] }
 0x705   : > { %v7942_v52 = vld [vmem:[#allocation3 + $0x24] sm:$0xf]  ;;  %v7533_v14 = vld [vmem:[#allocation3] sm:$0xf]  ;;  %v5365_v2 = vld [vmem:[%s11776_s8 + $0x68] sm:$0xff] }
 0x706   : > { %v4740_v4 = vadd.f32 %v11008_v53, %v4711_v39  ;;  %5199 = vrot.lane.b32.xlu0 %v11112_v46, %s8357_s1  ;;  %v4769_v28 = vmax.f32 %v4741_v20, 0.0  ;;  %v7554_v9 = vor.u32 %v7942_v52, %v7551_v24  ;;  %v7534_v20 = vor.u32 %v7939_v58, %v7533_v14  ;;  %v7941_v39 = vld [vmem:[#allocation3 + $0x14] sm:$0xf0]  ;;  %v5377_v24 = vld [vmem:[%s11776_s8 + $0xc8] sm:$0xff]  ;;  %v5364_v58 = vld [vmem:[%s11776_s8 + $0x60] sm:$0xff] }
 0x707   : > { %v5376_v52 = vld [vmem:[%s11776_s8 + $0xc0] sm:$0xff]  ;;  %v5363_v14 = vld [vmem:[%s11776_s8 + $0x58] sm:$0xff] }
 0x708   : > { %v4768_v36 = vmax.f32 %v4740_v4, 0.0  ;;  %v4669_v44 = vpop.f32.mrf.mxu3  ;;  %v7541_v4 = vld [vmem:[#allocation3 + $0x10] sm:$0xf] }
 0x709   : > { %v4687_v13 = vsel %vm4674_vm1, %v4669_v44, 0.0  ;;  %v7953_v44 = vld [vmem:[#allocation12 + $0x8] sm:$0xff] }
 0x70a   : > { %v4785_v22 = vpack.c.bf16 %v4769_v28, %v4768_v36  ;;  %v4714_v0 = vadd.f32 %v4687_v13, %v10985_v40  ;;  %v7542_v28 = vor.u32 %v7941_v39, %v7541_v4  ;;  %v7952_v36 = vld [vmem:[#allocation12] sm:$0xff]  ;;  %v7954_v13 = vld [vmem:[#allocation12 + $0x10] sm:$0xff] }
 0x70b   : > { %v4625_v59 = vpop.f32.mrf.mxu1  ;;  %v7948_v61 = vld [vmem:[#allocation3 + $0x54] sm:$0xf]  ;;  %v7573_v10 = vld [vmem:[#allocation3 + $0x50] sm:$0xf]  ;;  %v5362_v39 = vld [vmem:[%s11776_s8 + $0x50] sm:$0xff] }
 0x70c   : > { %4801 = vst.msk [vmem:[#allocation3 + $0x58] sm:$0xff] %vm11023_vm3, %v4785_v22  ;;  %v4743_v62 = vadd.f32 %v11008_v53, %v4714_v0  ;;  %v4713_v56 = vadd.f32 %v4625_v59, %v10982_v23  ;;  %v7935_v59 = vld [vmem:[#allocation12 + $0x1c] sm:$0xff] }
 0x70e   : > { %v4742_v35 = vadd.f32 %v11008_v53, %v4713_v56  ;;  %v4771_v60 = vmax.f32 %v4743_v62, 0.0  ;;  %v7936_v56 = vld [vmem:[#allocation12 + $0x24] sm:$0xff] }
 0x710   : > { %v4770_v6 = vmax.f32 %v4742_v35, 0.0  ;;  %v4671_v49 = vpop.f32.mrf.mxu3 }
 0x711   : > { %v4688_v8 = vsel %vm4674_vm1, %v4671_v49, 0.0 }
 0x712   : > { %v4786_v48 = vpack.c.bf16 %v4771_v60, %v4770_v6  ;;  %v4716_v18 = vadd.f32 %v4688_v8, %v10995_v63 }
 0x713   : > { %v4627_v40 = vpop.f32.mrf.mxu1  ;;  %v7575_v51 = vld [vmem:[#allocation3 + $0x58] sm:$0xf0]  ;;  %v7949_v25 = vld [vmem:[#allocation3 + $0x54] sm:$0xf0] }
 0x714   : > { %4802 = vst.msk [vmem:[#allocation3 + $0x60] sm:$0xff] %vm11023_vm3, %v4786_v48  ;;  %v4745_v23 = vadd.f32 %v11008_v53, %v4716_v18  ;;  %v4715_v19 = vadd.f32 %v4627_v40, %v10992_v41  ;;  %v11130_v16 = vor.u32 %v7948_v61, %v7575_v51  ;;  %v11132_v42 = vor.u32 %v7949_v25, %v7573_v10  ;;  %v7543_v41 = vld [vmem:[#allocation3 + $0x18] sm:$0xf0] }
 0x715   : > { %v7937_v40 = vld [vmem:[#allocation12 + $0x2c] sm:$0xff] }
 0x716   : > { %v4744_v30 = vadd.f32 %v11008_v53, %v4715_v19  ;;  %5203 = vrot.lane.b32.xlu2 %v11130_v16, %s8357_s1  ;;  %5201 = vrot.lane.b32.xlu0 %v11132_v42, %s8357_s1  ;;  %v4773_v63 = vmax.f32 %v4745_v23, 0.0  ;;  %v11142_v53 = vor.u32 %v7940_v43, %v7543_v41  ;;  %v4815_v43 = vld [vmem:[#allocation12 + $0x34] sm:$0x7] }
 0x718   : > { %v4772_v38 = vmax.f32 %v4744_v30, 0.0 }
 0x71a   : > { %v4787_v31 = vpack.c.bf16 %v4773_v63, %v4772_v38  ;;  %v7955_v63 = vld [vmem:[#allocation12 + $0x38] sm:$0xff] }
 0x71b   : > { %v7950_v57 = vld [vmem:[#allocation3 + $0x64] sm:$0xf]  ;;  %v7581_v50 = vld [vmem:[#allocation3 + $0x60] sm:$0xf] }
 0x71c   : > { %4806 = vst.msk [vmem:[#allocation3 + $0x68] sm:$0x33] %vm4805_vm6, %v4787_v31 }
 0x71e   : > { %5195 = vrot.lane.b32.xlu2 %v11140_v55, %s8357_s1  ;;  %5187 = vrot.lane.b32.xlu0 %v11142_v53, %s8357_s1 }
 0x723   : > { %v7583_v27 = vld [vmem:[#allocation3 + $0x68] sm:$0x30]  ;;  %v7951_v21 = vld [vmem:[#allocation3 + $0x64] sm:$0x30] }
 0x724   : > { %v7586_v11 = vor.u32 %v7950_v57, %v7583_v27  ;;  %v7582_v45 = vor.u32 %v7951_v21, %v7581_v50  ;;  %v7956_v57 = vld [vmem:[#allocation12 + $0x40] sm:$0xff] }
 0x726   : > { %5207 = vrot.lane.b32.xlu1 %v7586_v11, %s8357_s1  ;;  %5197 = vrot.lane.b32.xlu2 %v7566_v5, %s8357_s1  ;;  %v4938_v17 = vsel %vm4936_vm9, %v7582_v45, 0  ;;  %v4941_v37 = vsel %vm4936_vm9, %v7586_v11, 0  ;;  %v7957_v11 = vld [vmem:[#allocation12 + $0x48] sm:$0xff] }
 0x727   : > { %5189 = vrot.lane.b32.xlu0 %v7550_v29, %s8357_s1  ;;  %4944 = vmatpush.bf16.msrb.mxu0 %v4938_v17 }
 0x728   : > { %4972 = vmatpush.bf16.msrb.mxu2 %v4941_v37 }
 0x72b   : > { %4945 = vmatpush.bf16.msrb.mxu0 %v11132_v42 }
 0x72c   : > { %4973 = vmatpush.bf16.msrb.mxu2 %v11130_v16 }
 0x72e   : > { %5205 = vrot.lane.b32.xlu1 %v7582_v45, %s8357_s1  ;;  %5183 = vrot.lane.b32.xlu2 %v7538_v7, %s8357_s1  ;;  %v5162_v45 = vld [vmem:[#allocation12 + $0x50] sm:$0x7] }
 0x72f   : > { %4946 = vmatpush.bf16.msrb.mxu0 %v7566_v5 }
 0x730   : > { %4974 = vmatpush.bf16.msrb.mxu2 %v11112_v46 }
 0x733   : > { %4947 = vmatpush.bf16.msrb.mxu0 %v7558_v34 }
 0x734   : > { %4975 = vmatpush.bf16.msrb.mxu2 %v11140_v55 }
 0x736   : > { %5191 = vrot.lane.b32.xlu1 %v7554_v9, %s8357_s1  ;;  %5181 = vrot.lane.b32.xlu2 %v7534_v20, %s8357_s1 }
 0x737   : > { %4948 = vmatpush.bf16.msrb.mxu0 %v7550_v29 }
 0x738   : > { %4976 = vmatpush.bf16.msrb.mxu2 %v7554_v9 }
 0x73b   : > { %4949 = vmatpush.bf16.msrb.mxu0 %v7542_v28 }
 0x73c   : > { %4977 = vmatpush.bf16.msrb.mxu2 %v11142_v53 }
 0x73e   : > { %5193 = vrot.lane.b32.xlu1 %v7558_v34, %s8357_s1 }
 0x73f   : > { %4950 = vmatpush.bf16.msrb.mxu0 %v7534_v20 }
 0x740   : > { %4978 = vmatpush.bf16.msrb.mxu2 %v7538_v7 }
 0x742   : > { %7587 = vmatmul.msk.bf16.vlgmr.msrb.gmra.mxu0 %vm4923_vm10, %v7952_v36 }
 0x743   : > { %5100 = vmatpush.bf16.msra.mxu0 %v4938_v17  ;;  %7591 = vmatmul.msk.bf16.vlgmr.msrb.gmra.mxu2 %vm4923_vm10, %v7952_v36  ;;  %v5361_v36 = vld [vmem:[%s11776_s8 + $0x48] sm:$0xff] }
 0x744   : > { %5128 = vmatpush.bf16.msra.mxu2 %v4941_v37  ;;  %v5367_v37 = vld [vmem:[%s11776_s8 + $0x78] sm:$0xff] }
 0x746   : > { %5185 = vrot.lane.b32.xlu1 %v7542_v28, %s8357_s1 }
 0x747   : > { %5101 = vmatpush.bf16.msra.mxu0 %v11132_v42 }
 0x748   : > { %5129 = vmatpush.bf16.msra.mxu2 %v11130_v16 }
 0x74b   : > { %5102 = vmatpush.bf16.msra.mxu0 %v7566_v5 }
 0x74c   : > { %5130 = vmatpush.bf16.msra.mxu2 %v11112_v46  ;;  %v4836_v46 = vld [vmem:[#allocation12 + $0x18] sm:$0x7] }
 0x74d   : > { %v4850_v22 = vunpack.c.l.b16 %v4836_v46  ;;  %v5359_v46 = vld [vmem:[%s11776_s8 + $0x38] sm:$0xff] }
 0x74f   : > { %5103 = vmatpush.bf16.msra.mxu0 %v7558_v34  ;;  %v4854_v0 = vpack.c.b16 %v4850_v22, %v4850_v22 }
 0x750   : > { %5131 = vmatpush.bf16.msra.mxu2 %v11140_v55  ;;  %v5082_v55 = vunpack.c.l.b16 %v4815_v43 }
 0x752   : > { %7588 = vmatmul.msk.bf16.gmra.mxu0 %vm4923_vm10, %v7953_v44  ;;  %v5086_v15 = vpack.c.b16 %v5082_v55, %v5082_v55 }
 0x753   : > { %5104 = vmatpush.bf16.msra.mxu0 %v7550_v29  ;;  %7592 = vmatmul.msk.bf16.gmra.mxu2 %vm4923_vm10, %v7953_v44  ;;  %v5176_v29 = vunpack.c.l.b16 %v5162_v45  ;;  %v5373_v44 = vld [vmem:[%s11776_s8 + $0xa8] sm:$0xff] }
 0x754   : > { %5132 = vmatpush.bf16.msra.mxu2 %v7554_v9  ;;  %v5375_v9 = vld [vmem:[%s11776_s8 + $0xb8] sm:$0xff] }
 0x755   : > { %v5180_v34 = vpack.c.b16 %v5176_v29, %v5176_v29 }
 0x757   : > { %5105 = vmatpush.bf16.msra.mxu0 %v7542_v28  ;;  %v5374_v28 = vld [vmem:[%s11776_s8 + $0xb0] sm:$0xff] }
 0x758   : > { %5133 = vmatpush.bf16.msra.mxu2 %v11142_v53 }
 0x75b   : > { %5106 = vmatpush.bf16.msra.mxu0 %v7534_v20 }
 0x75c   : > { %5134 = vmatpush.bf16.msra.mxu2 %v7538_v7  ;;  %v5379_v7 = vld [vmem:[%s11776_s8 + $0xd8] sm:$0x3] }
 0x75f   : > { %5409 = vmatpush.msrb.mxu0 %v5367_v37 }
 0x760   : > { %7635 = vmatpush.msk.msrb.mxu2 %vm4803_vm4, %v5379_v7 }
 0x761   : > { %5410 = vmatpush.msrb.mxu0 %v5366_v33 }
 0x762   : > { %7589 = vmatmul.msk.bf16.gmra.mxu0 %vm4923_vm10, %v7954_v13  ;;  %5452 = vmatpush.msrb.mxu2 %v5378_v3 }
 0x763   : > { %7593 = vmatmul.msk.bf16.gmra.mxu2 %vm4923_vm10, %v7954_v13  ;;  %5411 = vmatpush.msrb.mxu0 %v5365_v2  ;;  %v5360_v13 = vld [vmem:[%s11776_s8 + $0x40] sm:$0xff] }
 0x764   : > { %5453 = vmatpush.msrb.mxu2 %v5377_v24 }
 0x765   : > { %5412 = vmatpush.msrb.mxu0 %v5364_v58 }
 0x766   : > { %5454 = vmatpush.msrb.mxu2 %v5376_v52 }
 0x767   : > { %5413 = vmatpush.msrb.mxu0 %v5363_v14 }
 0x768   : > { %5455 = vmatpush.msrb.mxu2 %v5375_v9 }
 0x769   : > { %5414 = vmatpush.msrb.mxu0 %v5362_v39 }
 0x76a   : > { %5456 = vmatpush.msrb.mxu2 %v5374_v28 }
 0x76b   : > { %5415 = vmatpush.msrb.mxu0 %v5361_v36 }
 0x76c   : > { %5457 = vmatpush.msrb.mxu2 %v5373_v44 }
 0x76d   : > { %5416 = vmatpush.msrb.mxu0 %v5360_v13 }
 0x76f   : > { %5417 = vmatpush.msrb.mxu0 %v5359_v46 }
 0x770   : > { %v5204_v62 = vpop.permute.xlu2 %5203 }
 0x772   : > { %7590 = vmatmul.msk.bf16.gmra.mxu0 %vm4923_vm10, %v4854_v0 }
 0x773   : > { %7594 = vmatmul.msk.bf16.gmra.mxu2 %vm4923_vm10, %v4854_v0 }
 0x778   : > { %v5200_v35 = vpop.permute.xlu0 %5199  ;;  %v5196_v49 = vpop.permute.xlu2 %5195 }
 0x780   : > { %v5198_v51 = vpop.permute.xlu2 %5197 }
 0x781   : > { %v5213_v19 = vsel %vm776_vm0, %v5198_v51, %v5200_v35  ;;  %v5370_v51 = vld [vmem:[%s11776_s8 + $0x90] sm:$0xff] }
 0x782   : > { %7607 = vmatmul.msk.bf16.vlgmr.msra.gmra.mxu0 %vm4923_vm10, %v7935_v59 }
 0x783   : > { %7611 = vmatmul.msk.bf16.vlgmr.msra.gmra.mxu2 %vm4923_vm10, %v7935_v59 }
 0x788   : > { %v5202_v8 = vpop.permute.xlu0 %5201  ;;  %v5184_v16 = vpop.permute.xlu2 %5183 }
 0x789   : > { %v5214_v10 = vsel %vm776_vm0, %v5202_v8, %v5204_v62  ;;  %v5357_v8 = vld [vmem:[%s11776_s8 + $0x28] sm:$0xff] }
 0x790   : > { %v5188_v23 = vpop.permute.xlu0 %5187  ;;  %v5182_v54 = vpop.permute.xlu2 %5181 }
 0x791   : > { %v5209_v53 = vsel %vm776_vm0, %v5182_v54, %v5184_v16 }
 0x792   : > { %7608 = vmatmul.msk.bf16.gmra.mxu0 %vm4923_vm10, %v7936_v56 }
 0x793   : > { %7612 = vmatmul.msk.bf16.gmra.mxu2 %vm4923_vm10, %v7936_v56 }
 0x798   : > { %v5208_v60 = vpop.permute.xlu1 %5207 }
 0x799   : > { %v5244_v6 = vsel %vm4936_vm9, %v5208_v60, 0  ;;  %v5190_v38 = vpop.permute.xlu0 %5189 }
 0x79a   : > { %5275 = vmatpush.bf16.msra.mxu3 %v5244_v6  ;;  %v5358_v6 = vld [vmem:[%s11776_s8 + $0x30] sm:$0xff] }
 0x79b   : > { %5418 = vmatpush.msrb.mxu0 %v5358_v6 }
 0x79d   : > { %5419 = vmatpush.msrb.mxu0 %v5357_v8 }
 0x79e   : > { %5276 = vmatpush.bf16.msra.mxu3 %v5204_v62 }
 0x7a0   : > { %v5206_v48 = vpop.permute.xlu1 %5205 }
 0x7a1   : > { %v5215_v18 = vsel %vm776_vm0, %v5206_v48, %v5208_v60 }
 0x7a2   : > { %v5241_v61 = vsel %vm4936_vm9, %v5215_v18, 0  ;;  %5277 = vmatpush.bf16.msra.mxu3 %v5200_v35  ;;  %7609 = vmatmul.msk.bf16.gmra.mxu0 %vm4923_vm10, %v7937_v40 }
 0x7a3   : > { %5247 = vmatpush.bf16.msra.mxu1 %v5241_v61  ;;  %7613 = vmatmul.msk.bf16.gmra.mxu2 %vm4923_vm10, %v7937_v40  ;;  %v5371_v61 = vld [vmem:[%s11776_s8 + $0x98] sm:$0xff]  ;;  %v5356_v40 = vld [vmem:[%s11776_s8 + $0x20] sm:$0xff] }
 0x7a4   : > { %5420 = vmatpush.msrb.mxu0 %v5356_v40 }
 0x7a6   : > { %5278 = vmatpush.bf16.msra.mxu3 %v5196_v49 }
 0x7a7   : > { %5248 = vmatpush.bf16.msra.mxu1 %v5214_v10  ;;  %v5355_v10 = vld [vmem:[%s11776_s8 + $0x18] sm:$0xff] }
 0x7a8   : > { %v5192_v25 = vpop.permute.xlu1 %5191  ;;  %5421 = vmatpush.msrb.mxu0 %v5355_v10 }
 0x7a9   : > { %v5211_v47 = vsel %vm776_vm0, %v5190_v38, %v5192_v25 }
 0x7aa   : > { %5279 = vmatpush.bf16.msra.mxu3 %v5192_v25  ;;  %v5369_v25 = vld [vmem:[%s11776_s8 + $0x88] sm:$0xff] }
 0x7ab   : > { %5249 = vmatpush.bf16.msra.mxu1 %v5213_v19  ;;  %v5368_v19 = vld [vmem:[%s11776_s8 + $0x80] sm:$0xff] }
 0x7ae   : > { %5280 = vmatpush.bf16.msra.mxu3 %v5188_v23 }
 0x7b0   : > { %v5194_v42 = vpop.permute.xlu1 %5193 }
 0x7b1   : > { %v5212_v30 = vsel %vm776_vm0, %v5194_v42, %v5196_v49  ;;  %v5372_v49 = vld [vmem:[%s11776_s8 + $0xa0] sm:$0xff] }
 0x7b2   : > { %5250 = vmatpush.bf16.msra.mxu1 %v5212_v30  ;;  %5281 = vmatpush.bf16.msra.mxu3 %v5184_v16  ;;  %v5353_v16 = vld [vmem:[%s11776_s8 + $0x8] sm:$0xff] }
 0x7b3   : > { %7614 = vmatmul.msk.bf16.gmra.mxu2 %vm4923_vm10, %v5086_v15  ;;  %7610 = vmatmul.msk.bf16.gmra.mxu0 %vm4923_vm10, %v5086_v15 }
 0x7b4   : > { %5458 = vmatpush.msrb.mxu2 %v5372_v49 }
 0x7b5   : > { %7631 = vmatmul.msk.bf16.vlgmr.msra.gmra.mxu3 %vm4923_vm10, %v7955_v63 }
 0x7b6   : > { %5251 = vmatpush.bf16.msra.mxu1 %v5211_v47  ;;  %5459 = vmatpush.msrb.mxu2 %v5371_v61 }
 0x7b8   : > { %v5186_v41 = vpop.permute.xlu1 %5185  ;;  %5460 = vmatpush.msrb.mxu2 %v5370_v51 }
 0x7b9   : > { %v5210_v31 = vsel %vm776_vm0, %v5186_v41, %v5188_v23  ;;  %v5354_v23 = vld [vmem:[%s11776_s8 + $0x10] sm:$0xff]  ;;  %vm5384_vm0 = vcmask 736256  }
 0x7ba   : > { %5252 = vmatpush.bf16.msra.mxu1 %v5210_v31  ;;  %5461 = vmatpush.msrb.mxu2 %v5369_v25 }
 0x7bb   : > { %5422 = vmatpush.msrb.mxu0 %v5354_v23 }
 0x7bc   : > { %5462 = vmatpush.msrb.mxu2 %v5368_v19 }
 0x7bd   : > { %5423 = vmatpush.msrb.mxu0 %v5353_v16 }
 0x7be   : > { %5253 = vmatpush.bf16.msra.mxu1 %v5209_v53 }
 0x7bf   : > { %v4952_v1 = vpop.f32.mrf.mxu0 }
 0x7c0   : > { %5013 = vrot.lane.b32.xlu0 %v4952_v1, %s8362_s19 }
 0x7c1   : > { %7627 = vmatmul.msk.bf16.vlgmr.msra.gmra.mxu1 %vm4923_vm10, %v7955_v63  ;;  %v5352_v63 = vld [vmem:[%s11776_s8] sm:$0xff] }
 0x7c2   : > { %5424 = vmatpush.msrb.mxu0 %v5352_v63 }
 0x7c5   : > { %7632 = vmatmul.msk.bf16.gmra.mxu3 %vm4923_vm10, %v7956_v57 }
 0x7c6   : > { %v4980_v12 = vpop.f32.mrf.mxu2 }
 0x7c7   : > { %5015 = vrot.lane.b32.xlu1 %v4980_v12, %s8362_s19  ;;  %v4954_v27 = vpop.f32.mrf.mxu0 }
 0x7c8   : > { %5017 = vrot.lane.b32.xlu2 %v4954_v27, %s8362_s19  ;;  %v11314_v27 = vstv %s7518_s20  ;;  %s8370_s20 = smov 54  }
 0x7ce   : > { %v4982_v50 = vpop.f32.mrf.mxu2 }
 0x7cf   : > { %5019 = vrot.lane.b32.xlu0 %v4982_v50, %s8362_s19  ;;  %v4957_v21 = vpop.f32.mrf.mxu0 }
 0x7d0   : > { %5021 = vrot.lane.b32.xlu1 %v4957_v21, %s8362_s19 }
 0x7d1   : > { %7628 = vmatmul.msk.bf16.gmra.mxu1 %vm4923_vm10, %v7956_v57 }
 0x7d5   : > { %7633 = vmatmul.msk.bf16.gmra.mxu3 %vm4923_vm10, %v7957_v11 }
 0x7d6   : > { %v4985_v5 = vpop.f32.mrf.mxu2 }
 0x7d7   : > { %v4959_v26 = vpop.f32.mrf.mxu0  ;;  %5023 = vrot.lane.b32.xlu2 %v4985_v5, %s8362_s19 }
 0x7d8   : > { %5025 = vrot.lane.b32.xlu0 %v4959_v26, %s8362_s19 }
 0x7de   : > { %v4987_v17 = vpop.f32.mrf.mxu2 }
 0x7df   : > { %5027 = vrot.lane.b32.xlu1 %v4987_v17, %s8362_s19  ;;  %v4962_v32 = vpop.f32.mrf.mxu0 }
 0x7e0   : > { %5029 = vrot.lane.b32.xlu2 %v4962_v32, %s8362_s19 }
 0x7e1   : > { %7629 = vmatmul.msk.bf16.gmra.mxu1 %vm4923_vm10, %v7957_v11 }
 0x7e5   : > { %7634 = vmatmul.msk.bf16.gmra.mxu3 %vm4923_vm10, %v5180_v34 }
 0x7e6   : > { %v4990_v20 = vpop.f32.mrf.mxu2 }
 0x7e7   : > { %5031 = vrot.lane.b32.xlu0 %v4990_v20, %s8362_s19  ;;  %v4964_v4 = vpop.f32.mrf.mxu0 }
 0x7e8   : > { %5033 = vrot.lane.b32.xlu1 %v4964_v4, %s8362_s19 }
 0x7ee   : > { %v4992_v22 = vpop.f32.mrf.mxu2 }
 0x7ef   : > { %v4967_v0 = vpop.f32.mrf.mxu0  ;;  %5035 = vrot.lane.b32.xlu2 %v4992_v22, %s8362_s19 }
 0x7f0   : > { %5037 = vrot.lane.b32.xlu0 %v4967_v0, %s8362_s19 }
 0x7f1   : > { %7630 = vmatmul.msk.bf16.gmra.mxu1 %vm4923_vm10, %v5180_v34 }
 0x7f6   : > { %v4995_v59 = vpop.f32.mrf.mxu2 }
 0x7f7   : > { %5039 = vrot.lane.b32.xlu1 %v4995_v59, %s8362_s19  ;;  %v4969_v62 = vpop.f32.mrf.mxu0 }
 0x7fe   : > { %v4997_v56 = vpop.f32.mrf.mxu2 }
 0x7ff   : > { %v5108_v35 = vpop.f32.mrf.mxu0 }
 0x806   : > { %v5136_v60 = vpop.f32.mrf.mxu2 }
 0x807   : > { %v5110_v18 = vpop.f32.mrf.mxu0 }
 0x80e   : > { %v5138_v48 = vpop.f32.mrf.mxu2 }
 0x80f   : > { %v5113_v30 = vpop.f32.mrf.mxu0 }
 0x816   : > { %v5141_v42 = vpop.f32.mrf.mxu2 }
 0x817   : > { %v11303_v47 = vpop.f32.mrf.mxu0 }
 0x81e   : > { %v11301_v38 = vpop.f32.mrf.mxu2 }
 0x81f   : > { %v11307_v54 = vpop.f32.mrf.mxu0 }
 0x822   : > { %v5018_v50 = vpop.permute.xlu2 %5017 }
 0x823   : > { %v5063_v3 = vsel %vm2841_vm7, 0.0, %v5018_v50 }
 0x824   : > { %v5111_v20 = vadd.f32 %v5110_v18, %v5063_v3 }
 0x826   : > { %v11305_v41 = vpop.f32.mrf.mxu2 }
 0x827   : > { %v11317_v29 = vpop.f32.mrf.mxu0 }
 0x82e   : > { %v11312_v12 = vpop.f32.mrf.mxu2 }
 0x830   : > { %v11328_v44 = vpop.f32.mrf.mxu0 }
 0x831   : > { %v5024_v14 = vpop.permute.xlu2 %5023 }
 0x832   : > { %v5014_v31 = vpop.permute.xlu0 %5013 }
 0x833   : > { %v5062_v53 = vsel %vm2841_vm7, 0.0, %v5014_v31 }
 0x834   : > { %v5109_v11 = vadd.f32 %v5108_v35, %v5062_v53 }
 0x836   : > { %v11323_v58 = vpop.f32.mrf.mxu2 }
 0x838   : > { %v5283_v43 = vpop.f32.mrf.mxu3  ;;  %v5125_v61 = vpop.f32.mrf.mxu0 }
 0x839   : > { %v5016_v55 = vpop.permute.xlu1 %5015  ;;  %v5302_v1 = vsel %vm4674_vm1, %v5283_v43, 0.0 }
 0x83a   : > { %v5041_v15 = vsel %vm2841_vm7, %v5014_v31, %v5016_v55  ;;  %v5030_v16 = vpop.permute.xlu2 %5029 }
 0x83b   : > { %v5137_v57 = vadd.f32 %v5136_v60, %v5041_v15 }
 0x83d   : > { %v5310_v21 = vadd.f32 %v5302_v1, %v5137_v57 }
 0x83e   : > { %v5255_v5 = vpop.f32.mrf.mxu1  ;;  %v5153_v60 = vpop.f32.mrf.mxu2 }
 0x83f   : > { %v5325_v26 = vadd.f32 %v11314_v27, %v5310_v21  ;;  %v5309_v45 = vadd.f32 %v5255_v5, %v5109_v11  ;;  %v5066_v11 = vsel %vm2841_vm7, 0.0, %v5030_v16 }
 0x840   : > { %v5285_v17 = vpop.f32.mrf.mxu3 }
 0x841   : > { %v5339_v37 = vmax.f32 %v5325_v26, 0.0  ;;  %v5324_v33 = vadd.f32 %v11314_v27, %v5309_v45  ;;  %v5020_v32 = vpop.permute.xlu0 %5019  ;;  %v5303_v52 = vsel %vm4674_vm1, %v5285_v17, 0.0 }
 0x842   : > { %v5042_v7 = vsel %vm2841_vm7, %v5018_v50, %v5020_v32  ;;  %v5022_v2 = vpop.permute.xlu1 %5021 }
 0x843   : > { %v5338_v34 = vmax.f32 %v5324_v33, 0.0  ;;  %v5139_v24 = vadd.f32 %v5138_v48, %v5042_v7  ;;  %7636 = vmatmul.msk.f32.vlgmr.msrb.gmra.mxu2 %vm5384_vm0, %v5339_v37  ;;  %v5043_v39 = vsel %vm2841_vm7, %v5022_v2, %v5024_v14  ;;  %v5064_v62 = vsel %vm2841_vm7, 0.0, %v5022_v2 }
 0x844   : > { %v5142_v13 = vadd.f32 %v5141_v42, %v5043_v39  ;;  %v5114_v49 = vadd.f32 %v5113_v30, %v5064_v62  ;;  %v5119_v33 = vadd.f32 %v11307_v54, %v5066_v11 }
 0x845   : > { %v5312_v9 = vadd.f32 %v5303_v52, %v5139_v24  ;;  %5425 = vmatmul.f32.vlgmr.msrb.gmra.mxu0 %v5338_v34 }
 0x846   : > { %v5257_v4 = vpop.f32.mrf.mxu1 }
 0x847   : > { %v5327_v28 = vadd.f32 %v11314_v27, %v5312_v9  ;;  %v5311_v36 = vadd.f32 %v5257_v4, %v5111_v20 }
 0x848   : > { %v5288_v46 = vpop.f32.mrf.mxu3 }
 0x849   : > { %v5341_v22 = vmax.f32 %v5327_v28, 0.0  ;;  %v5326_v0 = vadd.f32 %v11314_v27, %v5311_v36  ;;  %v5304_v59 = vsel %vm4674_vm1, %v5288_v46, 0.0  ;;  %v5036_v17 = vpop.permute.xlu2 %5035 }
 0x84a   : > { %v5314_v56 = vadd.f32 %v5304_v59, %v5142_v13  ;;  %v5026_v18 = vpop.permute.xlu0 %5025 }
 0x84b   : > { %v5340_v35 = vmax.f32 %v5326_v0, 0.0  ;;  %7637 = vmatmul.msk.f32.gmra.mxu2 %vm5384_vm0, %v5341_v22  ;;  %v5065_v19 = vsel %vm2841_vm7, 0.0, %v5026_v18 }
 0x84c   : > { %v5329_v6 = vadd.f32 %v11314_v27, %v5314_v56  ;;  %v5116_v43 = vadd.f32 %v11303_v47, %v5065_v19 }
 0x84d   : > { %5428 = vmatmul.f32.gmra.mxu0 %v5340_v35 }
 0x84e   : > { %v5260_v8 = vpop.f32.mrf.mxu1  ;;  %v5343_v51 = vmax.f32 %v5329_v6, 0.0 }
 0x84f   : > { %v5313_v48 = vadd.f32 %v5260_v8, %v5114_v49 }
 0x850   : > { %v5290_v40 = vpop.f32.mrf.mxu3 }
 0x851   : > { %v5328_v10 = vadd.f32 %v11314_v27, %v5313_v48  ;;  %v5028_v25 = vpop.permute.xlu1 %5027  ;;  %v5305_v30 = vsel %vm4674_vm1, %v5290_v40, 0.0 }
 0x852   : > { %v5044_v23 = vsel %vm2841_vm7, %v5026_v18, %v5028_v25 }
 0x853   : > { %v5342_v42 = vmax.f32 %v5328_v10, 0.0  ;;  %v5144_v63 = vadd.f32 %v11301_v38, %v5044_v23  ;;  %7638 = vmatmul.msk.f32.gmra.mxu2 %vm5384_vm0, %v5343_v51 }
 0x855   : > { %v5316_v31 = vadd.f32 %v5305_v30, %v5144_v63  ;;  %5431 = vmatmul.f32.gmra.mxu0 %v5342_v42 }
 0x856   : > { %v5262_v55 = vpop.f32.mrf.mxu1 }
 0x857   : > { %v5331_v53 = vadd.f32 %v11314_v27, %v5316_v31  ;;  %v5315_v15 = vadd.f32 %v5262_v55, %v5116_v43  ;;  %v8102_v31 = vld [vmem:[%s11777_s9] ss:$0 sm:$0xff] }
 0x858   : > { %v5293_v1 = vpop.f32.mrf.mxu3 }
 0x859   : > { %v5345_v57 = vmax.f32 %v5331_v53, 0.0  ;;  %v5330_v50 = vadd.f32 %v11314_v27, %v5315_v15  ;;  %v5032_v21 = vpop.permute.xlu0 %5031  ;;  %v5306_v5 = vsel %vm4674_vm1, %v5293_v1, 0.0 }
 0x85a   : > { %v5045_v38 = vsel %vm2841_vm7, %v5030_v16, %v5032_v21  ;;  %v5034_v26 = vpop.permute.xlu1 %5033 }
 0x85b   : > { %v5344_v45 = vmax.f32 %v5330_v50, 0.0  ;;  %v5147_v47 = vadd.f32 %v11305_v41, %v5045_v38  ;;  %7639 = vmatmul.msk.f32.gmra.mxu2 %vm5384_vm0, %v5345_v57  ;;  %v5046_v32 = vsel %vm2841_vm7, %v5034_v26, %v5036_v17  ;;  %v5067_v20 = vsel %vm2841_vm7, 0.0, %v5034_v26 }
 0x85c   : > { %v5149_v34 = vadd.f32 %v11312_v12, %v5046_v32  ;;  %v5121_v4 = vadd.f32 %v11317_v29, %v5067_v20 }
 0x85d   : > { %v5318_v37 = vadd.f32 %v5306_v5, %v5147_v47  ;;  %5434 = vmatmul.f32.gmra.mxu0 %v5344_v45 }
 0x85e   : > { %v5265_v7 = vpop.f32.mrf.mxu1 }
 0x85f   : > { %v5333_v3 = vadd.f32 %v11314_v27, %v5318_v37  ;;  %v5317_v2 = vadd.f32 %v5265_v7, %v5119_v33 }
 0x860   : > { %v5295_v24 = vpop.f32.mrf.mxu3 }
 0x861   : > { %v5347_v52 = vmax.f32 %v5333_v3, 0.0  ;;  %v5332_v14 = vadd.f32 %v11314_v27, %v5317_v2  ;;  %v5307_v41 = vsel %vm4674_vm1, %v5295_v24, 0.0 }
 0x862   : > { %v5320_v9 = vadd.f32 %v5307_v41, %v5149_v34  ;;  %v5038_v12 = vpop.permute.xlu0 %5037 }
 0x863   : > { %v5346_v39 = vmax.f32 %v5332_v14, 0.0  ;;  %7640 = vmatmul.msk.f32.gmra.mxu2 %vm5384_vm0, %v5347_v52  ;;  %v5068_v56 = vsel %vm2841_vm7, 0.0, %v5038_v12 }
 0x864   : > { %v5335_v54 = vadd.f32 %v11314_v27, %v5320_v9  ;;  %v5124_v6 = vadd.f32 %v11328_v44, %v5068_v56 }
 0x865   : > { %5437 = vmatmul.f32.gmra.mxu0 %v5346_v39 }
 0x866   : > { %v5267_v28 = vpop.f32.mrf.mxu1  ;;  %v5349_v46 = vmax.f32 %v5335_v54, 0.0 }
 0x867   : > { %v5319_v36 = vadd.f32 %v5267_v28, %v5121_v4 }
 0x868   : > { %v5298_v13 = vpop.f32.mrf.mxu3 }
 0x869   : > { %v5334_v22 = vadd.f32 %v11314_v27, %v5319_v36  ;;  %v5040_v0 = vpop.permute.xlu1 %5039  ;;  %v5308_v62 = vsel %vm4674_vm1, %v5298_v13, 0.0  ;;  %vm6204_vm1 = vcmask 187392  }
 0x86a   : > { %v5047_v59 = vsel %vm2841_vm7, %v5038_v12, %v5040_v0  ;;  %v7958_v0 = vld [vmem:[%s11773_s5 + $0x10] sm:$0xff] }
 0x86b   : > { %v5348_v35 = vmax.f32 %v5334_v22, 0.0  ;;  %v5152_v60 = vadd.f32 %v11323_v58, %v5047_v59  ;;  %7641 = vmatmul.msk.f32.gmra.mxu2 %vm5384_vm0, %v5349_v46  ;;  %v7668_v59 = vld [vmem:[%s11773_s5 + $0x18] sm:$0xf] }
 0x86d   : > { %v5322_v29 = vadd.f32 %v5308_v62, %v5152_v60  ;;  %5440 = vmatmul.f32.gmra.mxu0 %v5348_v35  ;;  %v7959_v62 = vld [vmem:[%s11773_s5 + $0x18] sm:$0x10]  ;;  %v7968_v35 = vld [vmem:[%s11773_s5] sm:$0xff]  ;;  %v7720_v60 = vld [vmem:[%s11773_s5 + $0x8] sm:$0xf] }
 0x86e   : > { %v5270_v49 = vpop.f32.mrf.mxu1  ;;  %v7669_v56 = vor.u32 %v7959_v62, %v7668_v59 }
 0x86f   : > { %v5337_v8 = vadd.f32 %v11314_v27, %v5322_v29  ;;  %v5321_v48 = vadd.f32 %v5270_v49, %v5124_v6  ;;  %v7969_v29 = vld [vmem:[%s11773_s5 + $0x8] sm:$0x10] }
 0x870   : > { %v5300_v18 = vpop.f32.mrf.mxu3  ;;  %v7721_v6 = vor.u32 %v7969_v29, %v7720_v60 }
 0x871   : > { %v5351_v61 = vmax.f32 %v5337_v8, 0.0  ;;  %v5336_v40 = vadd.f32 %v11314_v27, %v5321_v48 }
 0x873   : > { %v5350_v51 = vmax.f32 %v5336_v40, 0.0  ;;  %7642 = vmatmul.msk.f32.gmra.mxu2 %vm5384_vm0, %v5351_v61 }
 0x875   : > { %5443 = vmatmul.f32.gmra.mxu0 %v5350_v51 }
 0x876   : > { %v5272_v10 = vpop.f32.mrf.mxu1 }
 0x8c2   : > { %v5426_v58 = vpop.f32.mrf.mxu0 }
 0x8c3   : > { %v5427_v41 = vadd.f32 %v8102_v31, %v5426_v58 }
 0x8c6   : > { %v5464_v25 = vpop.f32.mrf.mxu2 }
 0x8c7   : > { %v5465_v28 = vadd.f32 %v5464_v25, %v5427_v41  ;;  %v7967_v41 = vld [vmem:[%s11773_s5 + $0x58] sm:$0x10] }
 0x8c9   : > { %v5485_v12 = vpack.c.bf16 %v5465_v28, %v5465_v28 }
 0x8ca   : > { %v5429_v23 = vpop.f32.mrf.mxu0 }
 0x8cb   : > { %v5430_v24 = vadd.f32 %v8102_v31, %v5429_v23  ;;  %v5520_v46 = vunpack.c.l.b16 %v5485_v12 }
 0x8ce   : > { %v5467_v19 = vpop.f32.mrf.mxu2 }
 0x8cf   : > { %v5468_v39 = vadd.f32 %v5467_v19, %v5430_v24 }
 0x8d1   : > { %v5486_v36 = vpack.c.bf16 %v5468_v39, %v5468_v39  ;;  %v7971_v39 = vld [vmem:[%s11773_s5 + $0x68] sm:$0x10] }
 0x8d2   : > { %v5432_v16 = vpop.f32.mrf.mxu0 }
 0x8d3   : > { %v5433_v11 = vadd.f32 %v8102_v31, %v5432_v16  ;;  %v5521_v13 = vunpack.c.l.b16 %v5486_v36 }
 0x8d5   : > { %v5527_v22 = vpack.c.b16 %v5521_v13, %v5520_v46 }
 0x8d6   : > { %v5470_v44 = vpop.f32.mrf.mxu2 }
 0x8d7   : > { %v5471_v37 = vadd.f32 %v5470_v44, %v5433_v11  ;;  %v7960_v44 = vld [vmem:[%s11773_s5 + $0x20] sm:$0xff] }
 0x8d9   : > { %v5487_v2 = vpack.c.bf16 %v5471_v37, %v5471_v37 }
 0x8da   : > { %v5435_v42 = vpop.f32.mrf.mxu0 }
 0x8db   : > { %v5436_v1 = vadd.f32 %v8102_v31, %v5435_v42  ;;  %v5522_v9 = vunpack.c.l.b16 %v5487_v2 }
 0x8de   : > { %v5473_v63 = vpop.f32.mrf.mxu2 }
 0x8df   : > { %v5474_v5 = vadd.f32 %v5473_v63, %v5436_v1  ;;  %v7962_v63 = vld [vmem:[%s11773_s5 + $0x30] sm:$0xff]  ;;  %v7961_v1 = vld [vmem:[%s11773_s5 + $0x28] sm:$0x10] }
 0x8e1   : > { %v5488_v32 = vpack.c.bf16 %v5474_v5, %v5474_v5 }
 0x8e2   : > { %v5438_v30 = vpop.f32.mrf.mxu0 }
 0x8e3   : > { %v5439_v27 = vadd.f32 %v8102_v31, %v5438_v30  ;;  %v5523_v52 = vunpack.c.l.b16 %v5488_v32 }
 0x8e5   : > { %v5528_v54 = vpack.c.b16 %v5523_v52, %v5522_v9 }
 0x8e6   : > { %v5476_v43 = vpop.f32.mrf.mxu2 }
 0x8e7   : > { %v5477_v53 = vadd.f32 %v5476_v43, %v5439_v27 }
 0x8e9   : > { %v5489_v50 = vpack.c.bf16 %v5477_v53, %v5477_v53 }
 0x8ea   : > { %v5441_v55 = vpop.f32.mrf.mxu0 }
 0x8eb   : > { %v5442_v15 = vadd.f32 %v8102_v31, %v5441_v55  ;;  %v5524_v45 = vunpack.c.l.b16 %v5489_v50  ;;  %v7964_v55 = vld [vmem:[%s11773_s5 + $0x40] sm:$0xff]  ;;  %v7682_v50 = vld [vmem:[%s11773_s5 + $0x38] sm:$0xf] }
 0x8ee   : > { %v5479_v57 = vpop.f32.mrf.mxu2 }
 0x8ef   : > { %v5480_v21 = vadd.f32 %v5479_v57, %v5442_v15  ;;  %v7658_v15 = vld [vmem:[%s11773_s5 + $0x28] sm:$0xf] }
 0x8f0   : > { %v7659_v57 = vor.u32 %v7961_v1, %v7658_v15 }
 0x8f1   : > { %v5490_v38 = vpack.c.bf16 %v5480_v21, %v5480_v21  ;;  %v7963_v21 = vld [vmem:[%s11773_s5 + $0x38] sm:$0x10] }
 0x8f2   : > { %v5444_v26 = vpop.f32.mrf.mxu0 }
 0x8f3   : > { %v5525_v47 = vunpack.c.l.b16 %v5490_v38  ;;  %v5445_v17 = vadd.f32 %v8102_v31, %v5444_v26  ;;  %v7683_v38 = vor.u32 %v7963_v21, %v7682_v50 }
 0x8f5   : > { %v5529_v33 = vpack.c.b16 %v5525_v47, %v5524_v45  ;;  %v7696_v47 = vld [vmem:[%s11773_s5 + $0x48] sm:$0xf] }
 0x8f6   : > { %v5482_v7 = vpop.f32.mrf.mxu2 }
 0x8f7   : > { %v5483_v3 = vadd.f32 %v5482_v7, %v5445_v17  ;;  %5535 = vrot.lane.b32.xlu1 %v5529_v33, %s8357_s1  ;;  %v7965_v17 = vld [vmem:[%s11773_s5 + $0x48] sm:$0x10] }
 0x8f9   : > { %v5491_v34 = vpack.c.bf16 %v5483_v3, %v5483_v3  ;;  %v7966_v3 = vld [vmem:[%s11773_s5 + $0x50] sm:$0xff] }
 0x8fb   : > { %v5526_v14 = vunpack.c.l.b16 %v5491_v34  ;;  %v7970_v34 = vld [vmem:[%s11773_s5 + $0x60] sm:$0xff] }
 0x8fd   : > { %v5530_v20 = vpack.c.b16 %v5526_v14, %v5526_v14  ;;  %v7710_v14 = vld [vmem:[%s11773_s5 + $0x58] sm:$0xf] }
 0x8fe   : > { %v7711_v9 = vor.u32 %v7967_v41, %v7710_v14 }
 0x8ff   : > { %5633 = vrot.lane.b32.xlu0 %v5530_v20, %s8358_s4  ;;  %5537 = vrot.lane.b32.xlu2 %v5530_v20, %s8357_s1  ;;  %v5591_v4 = vsel %vm3430_vm11, %v5530_v20, 0 }
 0x900   : > { %5629 = vrot.lane.b32.xlu1 %v5528_v54, %s8358_s4  ;;  %5597 = vmatpush.bf16.msrb.mxu3 %v5591_v4 }
 0x904   : > { %5598 = vmatpush.bf16.msrb.mxu3 %v5529_v33 }
 0x907   : > { %5631 = vrot.lane.b32.xlu2 %v5529_v33, %s8358_s4  ;;  %5533 = vrot.lane.b32.xlu0 %v5528_v54, %s8357_s1 }
 0x908   : > { %5691 = vrot.lane.b32.xlu1 %v5530_v20, %s8359_s18  ;;  %5599 = vmatpush.bf16.msrb.mxu3 %v5528_v54 }
 0x90c   : > { %5600 = vmatpush.bf16.msrb.mxu3 %v5527_v22 }
 0x90f   : > { %5627 = vrot.lane.b32.xlu0 %v5527_v22, %s8358_s4  ;;  %5531 = vrot.lane.b32.xlu2 %v5527_v22, %s8357_s1 }
 0x910   : > { %5810 = vmatpush.bf16.msra.mxu3 %v5591_v4  ;;  %5687 = vrot.lane.b32.xlu1 %v5528_v54, %s8359_s18 }
 0x911   : > { %7670 = vmatmul.msk.bf16.vlgmr.msrb.gmra.mxu3 %vm5542_vm12, %v7958_v0 }
 0x914   : > { %5811 = vmatpush.bf16.msra.mxu3 %v5529_v33 }
 0x917   : > { %5685 = vrot.lane.b32.xlu0 %v5527_v22, %s8359_s18  ;;  %5689 = vrot.lane.b32.xlu2 %v5529_v33, %s8359_s18 }
 0x918   : > { %5812 = vmatpush.bf16.msra.mxu3 %v5528_v54  ;;  %5747 = vrot.lane.b32.xlu1 %v5529_v33, %s8360_s6 }
 0x91c   : > { %5813 = vmatpush.bf16.msra.mxu3 %v5527_v22 }
 0x91f   : > { %5749 = vrot.lane.b32.xlu0 %v5530_v20, %s8360_s6  ;;  %5870 = vrot.lane.b32.xlu2 %v5530_v20, %s8361_s27  ;;  %v7734_v20 = vld [vmem:[%s11773_s5 + $0x68] sm:$0xf] }
 0x920   : > { %5866 = vrot.lane.b32.xlu1 %v5528_v54, %s8361_s27 }
 0x921   : > { %7671 = vmatmul.msk.bf16.gmra.mxu3 %vm5542_vm12, %v7669_v56 }
 0x927   : > { %5745 = vrot.lane.b32.xlu0 %v5528_v54, %s8360_s6  ;;  %5868 = vrot.lane.b32.xlu2 %v5529_v33, %s8361_s27  ;;  %v7697_v33 = vor.u32 %v7965_v17, %v7696_v47  ;;  %v7735_v54 = vor.u32 %v7971_v39, %v7734_v20 }
 0x92f   : > { %5864 = vrot.lane.b32.xlu0 %v5527_v22, %s8361_s27  ;;  %5743 = vrot.lane.b32.xlu2 %v5527_v22, %s8360_s6  ;;  %s8374_s6 = smov 30  }
 0x931   : > { %7722 = vmatmul.msk.bf16.vlgmr.msra.gmra.mxu3 %vm5542_vm12, %v7968_v35 }
 0x941   : > { %7723 = vmatmul.msk.bf16.gmra.mxu3 %vm5542_vm12, %v7721_v6 }
 0x959   : > { %v5538_v49 = vpop.permute.xlu2 %5537 }
 0x95a   : > { %v5550_v8 = vsel %vm3430_vm11, %v5538_v49, 0 }
 0x95b   : > { %5556 = vmatpush.bf16.msrb.mxu1 %v5550_v8 }
 0x961   : > { %v5632_v48 = vpop.permute.xlu2 %5631 }
 0x969   : > { %v5536_v18 = vpop.permute.xlu1 %5535  ;;  %v5532_v61 = vpop.permute.xlu2 %5531 }
 0x96a   : > { %5557 = vmatpush.bf16.msrb.mxu1 %v5536_v18 }
 0x971   : > { %v5634_v40 = vpop.permute.xlu0 %5633  ;;  %v5690_v58 = vpop.permute.xlu2 %5689 }
 0x972   : > { %v5645_v51 = vsel %vm3430_vm11, %v5634_v40, 0  ;;  %v5630_v10 = vpop.permute.xlu1 %5629 }
 0x973   : > { %5651 = vmatpush.bf16.msra.mxu0 %v5645_v51 }
 0x977   : > { %5652 = vmatpush.bf16.msra.mxu0 %v5632_v48 }
 0x979   : > { %v5534_v25 = vpop.permute.xlu0 %5533  ;;  %v5871_v16 = vpop.permute.xlu2 %5870 }
 0x97a   : > { %v5692_v23 = vpop.permute.xlu1 %5691  ;;  %5558 = vmatpush.bf16.msrb.mxu1 %v5534_v25  ;;  %v5882_v30 = vsel %vm3430_vm11, %v5871_v16, 0 }
 0x97b   : > { %v5703_v19 = vsel %vm3430_vm11, %v5692_v23, 0  ;;  %5653 = vmatpush.bf16.msra.mxu0 %v5630_v10 }
 0x97c   : > { %5709 = vmatpush.bf16.msra.mxu2 %v5703_v19 }
 0x97e   : > { %5559 = vmatpush.bf16.msrb.mxu1 %v5532_v61 }
 0x980   : > { %5710 = vmatpush.bf16.msra.mxu2 %v5690_v58 }
 0x981   : > { %v5628_v42 = vpop.permute.xlu0 %5627  ;;  %7660 = vmatmul.msk.bf16.vlgmr.msrb.gmra.mxu1 %vm5542_vm12, %v7960_v44  ;;  %v5869_v43 = vpop.permute.xlu2 %5868 }
 0x982   : > { %v5688_v31 = vpop.permute.xlu1 %5687  ;;  %5654 = vmatpush.bf16.msra.mxu0 %v5628_v42 }
 0x984   : > { %5711 = vmatpush.bf16.msra.mxu2 %v5688_v31 }
 0x985   : > { %7684 = vmatmul.msk.bf16.vlgmr.msra.gmra.mxu0 %vm5542_vm12, %v7962_v63 }
 0x986   : > { %5888 = vmatpush.bf16.msrb.mxu0 %v5882_v30 }
 0x989   : > { %v5686_v27 = vpop.permute.xlu0 %5685  ;;  %v5744_v7 = vpop.permute.xlu2 %5743 }
 0x98a   : > { %5889 = vmatpush.bf16.msrb.mxu0 %v5869_v43  ;;  %v5748_v53 = vpop.permute.xlu1 %5747  ;;  %5712 = vmatpush.bf16.msra.mxu2 %v5686_v27 }
 0x98d   : > { %7698 = vmatmul.msk.bf16.vlgmr.msra.gmra.mxu2 %vm5542_vm12, %v7964_v55 }
 0x991   : > { %v5750_v11 = vpop.permute.xlu0 %5749  ;;  %7661 = vmatmul.msk.bf16.gmra.mxu1 %vm5542_vm12, %v7659_v57 }
 0x992   : > { %v5867_v5 = vpop.permute.xlu1 %5866  ;;  %v5761_v26 = vsel %vm3430_vm11, %v5750_v11, 0 }
 0x993   : > { %5890 = vmatpush.bf16.msrb.mxu0 %v5867_v5  ;;  %5767 = vmatpush.bf16.msra.mxu1 %v5761_v26 }
 0x994   : > { %v5602_v45 = vpop.f32.mrf.mxu3 }
 0x995   : > { %7685 = vmatmul.msk.bf16.gmra.mxu0 %vm5542_vm12, %v7683_v38 }
 0x997   : > { %5768 = vmatpush.bf16.msra.mxu1 %v5748_v53 }
 0x999   : > { %v5746_v37 = vpop.permute.xlu0 %5745 }
 0x99b   : > { %5769 = vmatpush.bf16.msra.mxu1 %v5746_v37 }
 0x99c   : > { %v11452_v32 = vpop.f32.mrf.mxu3 }
 0x99d   : > { %7699 = vmatmul.msk.bf16.gmra.mxu2 %vm5542_vm12, %v7697_v33 }
 0x99f   : > { %5770 = vmatpush.bf16.msra.mxu1 %v5744_v7  ;;  %v5912_v7 = vstv %s7643_s29 }
 0x9a1   : > { %v5865_v2 = vpop.permute.xlu0 %5864 }
 0x9a2   : > { %7712 = vmatmul.msk.bf16.vlgmr.msra.gmra.mxu1 %vm5542_vm12, %v7966_v3  ;;  %5891 = vmatpush.bf16.msrb.mxu0 %v5865_v2 }
 0x9a4   : > { %v5607_v24 = vpop.f32.mrf.mxu3 }
 0x9a5   : > { %7736 = vmatmul.msk.bf16.vlgmr.msrb.gmra.mxu0 %vm5542_vm12, %v7970_v34 }
 0x9ac   : > { %v5609_v52 = vpop.f32.mrf.mxu3 }
 0x9b2   : > { %7713 = vmatmul.msk.bf16.gmra.mxu1 %vm5542_vm12, %v7711_v9 }
 0x9b4   : > { %v5815_v4 = vpop.f32.mrf.mxu3 }
 0x9b5   : > { %5829 = vrot.lane.b32.xlu0 %v5815_v4, %s8362_s19  ;;  %7737 = vmatmul.msk.bf16.gmra.mxu0 %vm5542_vm12, %v7735_v54 }
 0x9bc   : > { %v5817_v28 = vpop.f32.mrf.mxu3 }
 0x9c4   : > { %v5820_v36 = vpop.f32.mrf.mxu3 }
 0x9c5   : > { %5833 = vrot.lane.b32.xlu1 %v5820_v36, %s8362_s19 }
 0x9cc   : > { %v5822_v12 = vpop.f32.mrf.mxu3 }
 0x9cd   : > { %5831 = vrot.lane.b32.xlu1 %v5817_v28, %s8362_s19  ;;  %5835 = vrot.lane.b32.xlu2 %v5822_v12, %s8362_s19 }
 0x9fe   : > { %v5561_v13 = vpop.f32.mrf.mxu1 }
 0x9ff   : > { %v5603_v61 = vadd.f32 %v5602_v45, %v5561_v13 }
 0xa02   : > { %v5656_v46 = vpop.f32.mrf.mxu0 }
 0xa03   : > { %v5666_v51 = vadd.f32 %v5656_v46, %v5603_v61  ;;  %v8363_v46 = vmov 65535   ;;  %v7975_v61 = vld [vmem:[#allocation13] sm:$0xff] }
 0xa06   : > { %v5563_v22 = vpop.f32.mrf.mxu1 }
 0xa07   : > { %v5605_v11 = vadd.f32 %v11452_v32, %v5563_v22  ;;  %v5965_v22 = vsel %vm3414_vm8, 4294967295, %v8363_v46 }
 0xa0a   : > { %v5658_v0 = vpop.f32.mrf.mxu0 }
 0xa0b   : > { %v5667_v45 = vadd.f32 %v5658_v0, %v5605_v11  ;;  %v6027_v11 = vld [vmem:[#allocation13 + $0x2c] sm:$0xf] }
 0xa0e   : > { %v5566_v59 = vpop.f32.mrf.mxu1 }
 0xa0f   : > { %v5608_v10 = vadd.f32 %v5607_v24, %v5566_v59 }
 0xa10   : > { %v5714_v56 = vpop.f32.mrf.mxu2 }
 0xa11   : > { %v5724_v25 = vadd.f32 %v5714_v56, %v5666_v51  ;;  %v5966_v56 = vsel %vm5964_vm14, %v5965_v22, 0 }
 0xa12   : > { %v5661_v62 = vpop.f32.mrf.mxu0 }
 0xa13   : > { %v5668_v23 = vadd.f32 %v5661_v62, %v5608_v10 }
 0xa16   : > { %v5568_v35 = vpop.f32.mrf.mxu1 }
 0xa17   : > { %v5610_v19 = vadd.f32 %v5609_v52, %v5568_v35 }
 0xa18   : > { %v5716_v29 = vpop.f32.mrf.mxu2 }
 0xa19   : > { %v5725_v2 = vadd.f32 %v5716_v29, %v5667_v45 }
 0xa1a   : > { %v5663_v60 = vpop.f32.mrf.mxu0 }
 0xa1b   : > { %v5669_v63 = vadd.f32 %v5663_v60, %v5610_v19  ;;  %v5929_v19 = vld [vmem:[#allocation13 + $0x14] sm:$0xf] }
 0xa1f   : > { %v5772_v6 = vpop.f32.mrf.mxu1 }
 0xa20   : > { %v5719_v48 = vpop.f32.mrf.mxu2  ;;  %v5782_v30 = vadd.f32 %v5772_v6, %v5724_v25 }
 0xa21   : > { %v5726_v31 = vadd.f32 %v5719_v48, %v5668_v23  ;;  %v7972_v23 = vld [vmem:[#allocation13 + $0xc] sm:$0xff] }
 0xa22   : > { %v5893_v49 = vpop.f32.mrf.mxu0 }
 0xa23   : > { %v5904_v1 = vsel %vm5903_vm13, %v5893_v49, 0.0 }
 0xa27   : > { %v5774_v8 = vpop.f32.mrf.mxu1  ;;  %v5830_v58 = vpop.permute.xlu0 %5829 }
 0xa28   : > { %v5841_v44 = vsel %vm2841_vm7, 0.0, %v5830_v58  ;;  %v5721_v42 = vpop.f32.mrf.mxu2  ;;  %v5836_v15 = vpop.permute.xlu2 %5835  ;;  %v5783_v14 = vadd.f32 %v5774_v8, %v5725_v2 }
 0xa29   : > { %v5845_v43 = vadd.f32 %v5841_v44, %v5782_v30  ;;  %v5727_v27 = vadd.f32 %v5721_v42, %v5669_v63  ;;  %v5844_v26 = vsel %vm2841_vm7, 0.0, %v5836_v15  ;;  %v7974_v15 = vld [vmem:[#allocation13 + $0x24] sm:$0xff] }
 0xa2a   : > { %v5895_v18 = vpop.f32.mrf.mxu0 }
 0xa2b   : > { %v5908_v47 = vadd.f32 %v5904_v1, %v5845_v43  ;;  %v5905_v28 = vsel %vm5903_vm13, %v5895_v18, 0.0  ;;  %v5933_v1 = vld [vmem:[#allocation13 + $0x20] sm:$0xf] }
 0xa2d   : > { %v5913_v52 = vadd.f32 %v5912_v7, %v5908_v47  ;;  %v7976_v47 = vld [vmem:[#allocation13 + $0x30] sm:$0xff] }
 0xa2f   : > { %v5777_v40 = vpop.f32.mrf.mxu1  ;;  %v5917_v36 = vmax.f32 %v5913_v52, 0.0 }
 0xa30   : > { %v5784_v55 = vadd.f32 %v5777_v40, %v5726_v31  ;;  %v6073_v40 = vld [vmem:[#allocation13 + $0x8] sm:$0xf] }
 0xa31   : > { %v5921_v35 = vpack.c.bf16 %v5917_v36, %v5917_v36  ;;  %v6079_v51 = vunpack.c.l.b16 %v6073_v40 }
 0xa32   : > { %v5898_v16 = vpop.f32.mrf.mxu0 }
 0xa33   : > { %v5906_v57 = vsel %vm5903_vm13, %v5898_v16, 0.0  ;;  %v5946_v8 = vunpack.c.l.b16 %v5921_v35  ;;  %v6081_v10 = vpack.c.b16 %v6079_v51, %v6079_v51  ;;  %v5993_v16 = vunpack.c.l.b16 %v5929_v19 }
 0xa35   : > { %v5995_v44 = vpack.c.b16 %v5993_v16, %v5993_v16 }
 0xa37   : > { %v5834_v53 = vpop.permute.xlu1 %5833  ;;  %v5779_v21 = vpop.f32.mrf.mxu1 }
 0xa38   : > { %v5843_v50 = vsel %vm2841_vm7, 0.0, %v5834_v53  ;;  %v5785_v5 = vadd.f32 %v5779_v21, %v5727_v27  ;;  %v7973_v27 = vld [vmem:[#allocation13 + $0x18] sm:$0xff] }
 0xa39   : > { %v5847_v38 = vadd.f32 %v5843_v50, %v5784_v55 }
 0xa3a   : > { %v5848_v37 = vadd.f32 %v5844_v26, %v5785_v5  ;;  %v5900_v33 = vpop.f32.mrf.mxu0 }
 0xa3b   : > { %v5910_v17 = vadd.f32 %v5906_v57, %v5847_v38  ;;  %v5907_v3 = vsel %vm5903_vm13, %v5900_v33, 0.0  ;;  %v5939_v57 = vunpack.c.l.b16 %v5933_v1  ;;  %v6033_v38 = vunpack.c.l.b16 %v6027_v11 }
 0xa3c   : > { %v5911_v24 = vadd.f32 %v5907_v3, %v5848_v37  ;;  %v6127_v37 = vld [vmem:[#allocation13 + $0x38] sm:$0xf]  ;;  %v6208_v1 = vsel %vm3430_vm11, 4294967295, %v8363_v46  ;;  %vm6343_vm13 = vcmask 850944  }
 0xa3d   : > { %v5915_v34 = vadd.f32 %v5912_v7, %v5910_v17  ;;  %v5941_v21 = vpack.c.b16 %v5939_v57, %v5939_v57  ;;  %v6035_v26 = vpack.c.b16 %v6033_v38, %v6033_v38  ;;  %v6133_v33 = vunpack.c.l.b16 %v6127_v37 }
 0xa3e   : > { %v5916_v9 = vadd.f32 %v5912_v7, %v5911_v24 }
 0xa3f   : > { %v5919_v41 = vmax.f32 %v5915_v34, 0.0  ;;  %v5832_v32 = vpop.permute.xlu1 %5831 }
 0xa40   : > { %v5842_v20 = vsel %vm2841_vm7, 0.0, %v5832_v32  ;;  %v5920_v54 = vmax.f32 %v5916_v9, 0.0 }
 0xa41   : > { %v5923_v39 = vpack.c.bf16 %v5919_v41, %v5919_v41  ;;  %v5846_v4 = vadd.f32 %v5842_v20, %v5783_v14 }
 0xa42   : > { %v5924_v12 = vpack.c.bf16 %v5920_v54, %v5920_v54 }
 0xa43   : > { %v5909_v13 = vadd.f32 %v5905_v28, %v5846_v4  ;;  %v5948_v0 = vunpack.c.l.b16 %v5923_v39 }
 0xa44   : > { %v5949_v59 = vunpack.c.l.b16 %v5924_v12 }
 0xa45   : > { %v5914_v62 = vadd.f32 %v5912_v7, %v5909_v13  ;;  %v6135_v7 = vpack.c.b16 %v6133_v33, %v6133_v33 }
 0xa46   : > { %v5951_v60 = vpack.c.b16 %v5949_v59, %v5948_v0 }
 0xa47   : > { %v5918_v29 = vmax.f32 %v5914_v62, 0.0 }
 0xa48   : > { %6038 = vrot.lane.b32.xlu1 %v5951_v60, %s8358_s4  ;;  %5954 = vrot.lane.b32.xlu2 %v5951_v60, %s8357_s1  ;;  %v6004_v49 = vand.u32 %v5966_v56, %v5951_v60 }
 0xa49   : > { %v5922_v6 = vpack.c.bf16 %v5918_v29, %v5918_v29 }
 0xa4a   : > { %6012 = vmatpush.bf16.msrb.mxu1 %v6004_v49  ;;  %6094 = vmatpush.bf16.msra.mxu0 %v6004_v49 }
 0xa4b   : > { %v5947_v48 = vunpack.c.l.b16 %v5922_v6 }
 0xa4d   : > { %v5950_v18 = vpack.c.b16 %v5947_v48, %v5946_v8 }
 0xa4f   : > { %5952 = vrot.lane.b32.xlu0 %v5950_v18, %s8357_s1  ;;  %6013 = vmatpush.bf16.msrb.mxu1 %v5950_v18 }
 0xa50   : > { %6095 = vmatpush.bf16.msra.mxu0 %v5950_v18  ;;  %6138 = vrot.lane.b32.xlu2 %v5951_v60, %s8359_s18 }
 0xa51   : > { %6136 = vrot.lane.b32.xlu1 %v5950_v18, %s8359_s18  ;;  %s8364_s18 = smov 26  }
 0xa52   : > { %7749 = vmatmul.msk.bf16.vlgmr.msrb.gmra.mxu1 %vm5957_vm15, %v7972_v23 }
 0xa53   : > { %7761 = vmatmul.msk.bf16.vlgmr.msra.gmra.mxu0 %vm5957_vm15, %v7975_v61 }
 0xa57   : > { %6036 = vrot.lane.b32.xlu0 %v5950_v18, %s8358_s4  ;;  %s7738_s4 = sld [smem:[#allocation9 + $0x4]] }
 0xa5d   : > { %v6174_v35 = vstv %s7738_s4 }
 0xa62   : > { %7750 = vmatmul.msk.bf16.gmra.mxu1 %vm5957_vm15, %v5995_v44 }
 0xa63   : > { %7762 = vmatmul.msk.bf16.gmra.mxu0 %vm5957_vm15, %v6081_v10 }
 0xaa2   : > { %v5955_v58 = vpop.permute.xlu2 %5954 }
 0xaa3   : > { %v5968_v25 = vand.u32 %v5966_v56, %v5955_v58 }
 0xaa5   : > { %5976 = vmatpush.bf16.msrb.mxu2 %v5968_v25 }
 0xaaa   : > { %v6139_v30 = vpop.permute.xlu2 %6138 }
 0xaab   : > { %v6148_v31 = vand.u32 %v6139_v30, %v5966_v56 }
 0xaba   : > { %v6039_v42 = vpop.permute.xlu1 %6038 }
 0xabb   : > { %v6048_v63 = vand.u32 %v6039_v42, %v5966_v56 }
 0xabd   : > { %6056 = vmatpush.bf16.msrb.mxu3 %v6048_v63 }
 0xac1   : > { %v5953_v43 = vpop.permute.xlu0 %5952 }
 0xac2   : > { %5977 = vmatpush.bf16.msrb.mxu2 %v5953_v43 }
 0xac3   : > { %v6137_v55 = vpop.permute.xlu1 %6136 }
 0xac5   : > { %7743 = vmatmul.msk.bf16.vlgmr.msrb.gmra.mxu2 %vm5957_vm15, %v7973_v27 }
 0xac6   : > { %6156 = vmatpush.bf16.msra.mxu2 %v6148_v31 }
 0xac9   : > { %v6037_v53 = vpop.permute.xlu0 %6036 }
 0xaca   : > { %6157 = vmatpush.bf16.msra.mxu2 %v6137_v55  ;;  %6057 = vmatpush.bf16.msrb.mxu3 %v6037_v53 }
 0xacd   : > { %7755 = vmatmul.msk.bf16.vlgmr.msrb.gmra.mxu3 %vm5957_vm15, %v7974_v15 }
 0xacf   : > { %v6015_v3 = vpop.f32.mrf.mxu1 }
 0xad0   : > { %v6097_v50 = vpop.f32.mrf.mxu0 }
 0xad1   : > { %6109 = vrot.lane.b32.xlu0 %v6097_v50, %s8362_s19 }
 0xad5   : > { %7744 = vmatmul.msk.bf16.gmra.mxu2 %vm5957_vm15, %v5941_v21  ;;  %v6209_v21 = vsel %vm3414_vm8, %v6208_v1, 0  ;;  %v6450_v1 = vld [vmem:[%s11778_s10 + $0xe0] sm:$0xff] }
 0xad7   : > { %v6017_v2 = vpop.f32.mrf.mxu1 }
 0xad8   : > { %v6099_v5 = vpop.f32.mrf.mxu0 }
 0xad9   : > { %6111 = vrot.lane.b32.xlu1 %v6099_v5, %s8362_s19  ;;  %v7772_v5 = vld [vmem:[#allocation15] sm:$0xf] }
 0xadd   : > { %7756 = vmatmul.msk.bf16.gmra.mxu3 %vm5957_vm15, %v6035_v26  ;;  %v7978_v26 = vld [vmem:[#allocation15] sm:$0x30] }
 0xadf   : > { %v6020_v34 = vpop.f32.mrf.mxu1 }
 0xae0   : > { %v6102_v45 = vpop.f32.mrf.mxu0 }
 0xae1   : > { %6113 = vrot.lane.b32.xlu2 %v6102_v45, %s8362_s19  ;;  %v7773_v45 = vor.u32 %v7978_v26, %v7772_v5 }
 0xae5   : > { %7767 = vmatmul.msk.bf16.vlgmr.msra.gmra.mxu2 %vm5957_vm15, %v7976_v47  ;;  %v7777_v47 = vld [vmem:[#allocation15 + $0x8] sm:$0xf] }
 0xae7   : > { %v6022_v24 = vpop.f32.mrf.mxu1 }
 0xae8   : > { %v6104_v17 = vpop.f32.mrf.mxu0 }
 0xae9   : > { %v7977_v17 = vld [vmem:[#allocation15 + $0x8] sm:$0x30] }
 0xaea   : > { %v7778_v46 = vor.u32 %v7977_v17, %v7777_v47  ;;  %v6448_v47 = vld [vmem:[%s11778_s10 + $0xd0] sm:$0xff]  ;;  %v6431_v17 = vld [vmem:[%s11778_s10 + $0x48] sm:$0xff] }
 0xaf5   : > { %7768 = vmatmul.msk.bf16.gmra.mxu2 %vm5957_vm15, %v6135_v7  ;;  %v7782_v7 = vld [vmem:[#allocation15 + $0x10] sm:$0xf] }
 0xb3b   : > { %v6114_v61 = vpop.permute.xlu2 %6113 }
 0xb3c   : > { %v6120_v25 = vsel %vm2841_vm7, 0.0, %v6114_v61 }
 0xb43   : > { %v6110_v4 = vpop.permute.xlu0 %6109 }
 0xb44   : > { %v6118_v36 = vsel %vm2841_vm7, 0.0, %v6110_v4  ;;  %v6301_v4 = vlaneseq }
 0xb46   : > { %vm6303_vm8 = vcmp.lt.s32.totalorder %v6301_v4, 26  ;;  %vm6314_vm11 = vcmp.lt.s32.totalorder %v6301_v4, 52  ;;  %vm6323_vm2 = vcmp.ge.s32.totalorder %v6301_v4, 52  ;;  %vm6324_vm3 = vcmp.lt.s32.totalorder %v6301_v4, 78 }
 0xb47   : > { %vm6325_vm5 = vmand %vm6323_vm2, %vm6324_vm3  ;;  %vm6333_vm6 = vcmp.ge.s32.totalorder %v6301_v4, 78  ;;  %vm6334_vm9 = vcmp.lt.s32.totalorder %v6301_v4, 104  ;;  %vm11557_vm0 = vcmp.ge.s32.totalorder %v6301_v4, 104  ;;  %vm11562_vm12 = vcmp.lt.s32.totalorder %v6301_v4, 130 }
 0xb48   : > { %v5979_v52 = vpop.f32.mrf.mxu2  ;;  %vm6335_vm10 = vmand %vm6333_vm6, %vm6334_vm9  ;;  %vm11671_vm3 = vcmp.ge.s32.totalorder %v6301_v4, 54  ;;  %vm11689_vm6 = vcmp.lt.s32.totalorder %v6301_v4, 106 }
 0xb49   : > { %v6016_v54 = vadd.f32 %v6015_v3, %v5979_v52  ;;  %v7979_v3 = vld [vmem:[#allocation15 + $0x10] sm:$0x30]  ;;  %vm6348_vm14 = vmand %vm11557_vm0, %vm11562_vm12  ;;  %vm6397_vm0 = vcmp.ge.s32.totalorder %v6301_v4, 106  ;;  %vm6398_vm12 = vcmp.lt.s32.totalorder %v6301_v4, 132 }
 0xb4b   : > { %v6112_v56 = vpop.permute.xlu1 %6111 }
 0xb4c   : > { %v6119_v29 = vsel %vm2841_vm7, 0.0, %v6112_v56 }
 0xb50   : > { %v5981_v14 = vpop.f32.mrf.mxu2  ;;  %v6059_v41 = vpop.f32.mrf.mxu3 }
 0xb51   : > { %v6068_v28 = vadd.f32 %v6059_v41, %v6016_v54  ;;  %v6018_v59 = vadd.f32 %v6017_v2, %v5981_v14 }
 0xb53   : > { %v6121_v13 = vadd.f32 %v6118_v36, %v6068_v28 }
 0xb58   : > { %v5984_v9 = vpop.f32.mrf.mxu2  ;;  %v6061_v32 = vpop.f32.mrf.mxu3 }
 0xb59   : > { %v6069_v60 = vadd.f32 %v6061_v32, %v6018_v59  ;;  %v6021_v18 = vadd.f32 %v6020_v34, %v5984_v9  ;;  %v7783_v34 = vor.u32 %v7979_v3, %v7782_v7  ;;  %v6430_v7 = vld [vmem:[%s11778_s10 + $0x40] sm:$0xff] }
 0xb5a   : > { %v6446_v3 = vld [vmem:[%s11778_s10 + $0xc0] sm:$0xff] }
 0xb5b   : > { %v6122_v8 = vadd.f32 %v6119_v29, %v6069_v60 }
 0xb60   : > { %v5986_v20 = vpop.f32.mrf.mxu2  ;;  %v6064_v39 = vpop.f32.mrf.mxu3 }
 0xb61   : > { %v6070_v10 = vadd.f32 %v6064_v39, %v6021_v18 }
 0xb63   : > { %v6123_v16 = vadd.f32 %v6120_v25, %v6070_v10 }
 0xb68   : > { %v6159_v12 = vpop.f32.mrf.mxu2  ;;  %v6066_v22 = vpop.f32.mrf.mxu3 }
 0xb69   : > { %v6168_v0 = vsel %vm5957_vm15, %v6159_v12, 0.0 }
 0xb6a   : > { %v6171_v62 = vadd.f32 %v6168_v0, %v6121_v13 }
 0xb6c   : > { %v6175_v6 = vadd.f32 %v6174_v35, %v6171_v62 }
 0xb6e   : > { %v6178_v40 = vmax.f32 %v6175_v6, 0.0 }
 0xb70   : > { %v6161_v49 = vpop.f32.mrf.mxu2  ;;  %v6181_v19 = vpack.c.bf16 %v6178_v40, %v6178_v40 }
 0xb71   : > { %v6169_v48 = vsel %vm5957_vm15, %v6161_v49, 0.0 }
 0xb72   : > { %v6172_v51 = vadd.f32 %v6169_v48, %v6122_v8  ;;  %v6198_v31 = vunpack.c.l.b16 %v6181_v19 }
 0xb74   : > { %v6176_v58 = vadd.f32 %v6174_v35, %v6172_v51 }
 0xb76   : > { %v6179_v23 = vmax.f32 %v6176_v58, 0.0 }
 0xb78   : > { %v6164_v44 = vpop.f32.mrf.mxu2  ;;  %v6182_v42 = vpack.c.bf16 %v6179_v23, %v6179_v23 }
 0xb79   : > { %v6170_v63 = vsel %vm5957_vm15, %v6164_v44, 0.0  ;;  %v6453_v44 = vld [vmem:[%s11778_s10 + $0xf8] sm:$0xff] }
 0xb7a   : > { %v6173_v30 = vadd.f32 %v6170_v63, %v6123_v16  ;;  %v6199_v43 = vunpack.c.l.b16 %v6182_v42  ;;  %v6437_v16 = vld [vmem:[%s11778_s10 + $0x78] sm:$0xff]  ;;  %v6436_v42 = vld [vmem:[%s11778_s10 + $0x70] sm:$0xff] }
 0xb7b   : > { %6471 = vmatpush.msrb.mxu2 %v6437_v16  ;;  %v6452_v63 = vld [vmem:[%s11778_s10 + $0xf0] sm:$0xff] }
 0xb7c   : > { %v6177_v27 = vadd.f32 %v6174_v35, %v6173_v30  ;;  %v6201_v55 = vpack.c.b16 %v6199_v43, %v6198_v31  ;;  %v6435_v30 = vld [vmem:[%s11778_s10 + $0x68] sm:$0xff] }
 0xb7d   : > { %v6451_v31 = vld [vmem:[%s11778_s10 + $0xe8] sm:$0xff]  ;;  %6472 = vmatpush.msrb.mxu2 %v6436_v42  ;;  %v6461_v42 = vld [vmem:[%s11779_s11] sm:$0x1] }
 0xb7e   : > { %v6180_v53 = vmax.f32 %v6177_v27, 0.0  ;;  %6267 = vrot.lane.b32.xlu0 %v6201_v55, %s8357_s1 }
 0xb7f   : > { %6473 = vmatpush.msrb.mxu2 %v6435_v30 }
 0xb80   : > { %v6183_v15 = vpack.c.bf16 %v6180_v53, %v6180_v53  ;;  %v6166_v57 = vpop.f32.mrf.mxu2 }
 0xb82   : > { %v6200_v50 = vunpack.c.l.b16 %v6183_v15  ;;  %v6434_v15 = vld [vmem:[%s11778_s10 + $0x60] sm:$0xff] }
 0xb83   : > { %6474 = vmatpush.msrb.mxu2 %v6434_v15 }
 0xb84   : > { %v6202_v11 = vpack.c.b16 %v6200_v50, %v6200_v50 }
 0xb86   : > { %v6211_v38 = vand.u32 %v6209_v21, %v6202_v11  ;;  %6269 = vrot.lane.b32.xlu2 %v6202_v11, %s8357_s1  ;;  %s11524_s1 = sld [smem:[#allocation9 + $0x5]]  ;;  %v6433_v11 = vld [vmem:[%s11778_s10 + $0x58] sm:$0xff] }
 0xb87   : > { %6475 = vmatpush.msrb.mxu2 %v6433_v11 }
 0xb88   : > { %6219 = vmatpush.bf16.msra.mxu1 %v6211_v38  ;;  %6251 = vmatpush.bf16.msra.mxu3 %v6211_v38  ;;  %v6449_v38 = vld [vmem:[%s11778_s10 + $0xd8] sm:$0xff] }
 0xb8c   : > { %6220 = vmatpush.bf16.msra.mxu1 %v6201_v55  ;;  %6252 = vmatpush.bf16.msra.mxu3 %v6201_v55  ;;  %v6296_v28 = vstv %s11524_s1  ;;  %s8288_s1 = scalar_lea.hbm %s11780_s12, 2 }
 0xb8f   : > { %7774 = vmatmul.msk.bf16.vlgmr.msra.gmra.mxu1 %vm6204_vm1, %v7773_v45  ;;  %7779 = vmatmul.msk.bf16.vlgmr.msra.gmra.mxu3 %vm6204_vm1, %v7778_v46  ;;  %v6432_v45 = vld [vmem:[%s11778_s10 + $0x50] sm:$0xff]  ;;  %v6447_v46 = vld [vmem:[%s11778_s10 + $0xc8] sm:$0xff] }
 0xb90   : > { %6491 = vmatpush.msrb.mxu1 %v6453_v44  ;;  %6476 = vmatpush.msrb.mxu2 %v6432_v45 }
 0xb92   : > { %6492 = vmatpush.msrb.mxu1 %v6452_v63  ;;  %6477 = vmatpush.msrb.mxu2 %v6431_v17 }
 0xb94   : > { %6493 = vmatpush.msrb.mxu1 %v6451_v31  ;;  %6478 = vmatpush.msrb.mxu2 %v6430_v7 }
 0xb96   : > { %6494 = vmatpush.msrb.mxu1 %v6450_v1 }
 0xb98   : > { %6495 = vmatpush.msrb.mxu1 %v6449_v38 }
 0xb9a   : > { %6496 = vmatpush.msrb.mxu1 %v6448_v47 }
 0xb9c   : > { %6497 = vmatpush.msrb.mxu1 %v6447_v46 }
 0xb9e   : > { %6498 = vmatpush.msrb.mxu1 %v6446_v3 }
 0xbe0   : > { %v6270_v37 = vpop.permute.xlu2 %6269 }
 0xbe1   : > { %v6276_v33 = vand.u32 %v6270_v37, %v6209_v21 }
 0xbe3   : > { %6284 = vmatpush.bf16.msrb.mxu0 %v6276_v33 }
 0xbf0   : > { %v6268_v2 = vpop.permute.xlu0 %6267 }
 0xbf1   : > { %6285 = vmatpush.bf16.msrb.mxu0 %v6268_v2  ;;  %v6429_v2 = vld [vmem:[%s11778_s10 + $0x38] sm:$0xff] }
 0xbf2   : > { %6479 = vmatpush.msrb.mxu2 %v6429_v2 }
 0xbf4   : > { %7784 = vmatmul.msk.bf16.vlgmr.msrb.gmra.mxu0 %vm6204_vm1, %v7783_v34  ;;  %vm11582_vm1 = vcmp.lt.s32.totalorder %v6301_v4, 28  ;;  %v6445_v34 = vld [vmem:[%s11778_s10 + $0xb8] sm:$0xff] }
 0xbf5   : > { %6499 = vmatpush.msrb.mxu1 %v6445_v34 }
 0xc0c   : > { %v6222_v24 = vpop.f32.mrf.mxu1 }
 0xc0d   : > { %6229 = vrot.lane.b32.xlu1 %v6222_v24, %s8362_s19  ;;  %v6460_v24 = vld [vmem:[%s11778_s10 + $0x130] sm:$0xff] }
 0xc0e   : > { %6520 = vmatpush.msrb.mxu3 %v6460_v24 }
 0xc12   : > { %v6254_v32 = vpop.f32.mrf.mxu3 }
 0xc14   : > { %v6224_v52 = vpop.f32.mrf.mxu1 }
 0xc15   : > { %6231 = vrot.lane.b32.xlu2 %v6224_v52, %s8362_s19  ;;  %s8365_s19 = smov 52   ;;  %v6428_v52 = vld [vmem:[%s11778_s10 + $0x30] sm:$0xff] }
 0xc16   : > { %6480 = vmatpush.msrb.mxu2 %v6428_v52 }
 0xc1a   : > { %v6256_v29 = vpop.f32.mrf.mxu3 }
 0xc6f   : > { %v6232_v62 = vpop.permute.xlu2 %6231 }
 0xc70   : > { %v6236_v60 = vsel %vm2841_vm7, 0.0, %v6232_v62 }
 0xc71   : > { %v6287_v41 = vpop.f32.mrf.mxu0  ;;  %v6257_v49 = vadd.f32 %v6256_v29, %v6236_v60  ;;  %v6455_v60 = vld [vmem:[%s11778_s10 + $0x108] sm:$0xff] }
 0xc72   : > { %v6292_v20 = vsel %vm5957_vm15, %v6287_v41, 0.0  ;;  %v6459_v41 = vld [vmem:[%s11778_s10 + $0x128] sm:$0xff] }
 0xc73   : > { %6521 = vmatpush.msrb.mxu3 %v6459_v41  ;;  %v6423_v29 = vld [vmem:[%s11778_s10 + $0x8] sm:$0xff] }
 0xc79   : > { %v6289_v35 = vpop.f32.mrf.mxu0 }
 0xc7a   : > { %v6293_v6 = vsel %vm5957_vm15, %v6289_v35, 0.0  ;;  %vm11577_vm15 = vcmp.ge.s32.totalorder %v6301_v4, 2  ;;  %v6440_v35 = vld [vmem:[%s11778_s10 + $0x90] sm:$0xff] }
 0xc7b   : > { %v6295_v8 = vadd.f32 %v6293_v6, %v6257_v49  ;;  %v6439_v6 = vld [vmem:[%s11778_s10 + $0x88] sm:$0xff]  ;;  %v6454_v49 = vld [vmem:[%s11778_s10 + $0x100] sm:$0xff] }
 0xc7d   : > { %v6298_v18 = vadd.f32 %v6296_v28, %v6295_v8 }
 0xc7f   : > { %v6230_v14 = vpop.permute.xlu1 %6229  ;;  %v6300_v61 = vmax.f32 %v6298_v18, 0.0  ;;  %v6438_v18 = vld [vmem:[%s11778_s10 + $0x80] sm:$0xff] }
 0xc80   : > { %v6235_v9 = vsel %vm2841_vm7, 0.0, %v6230_v14  ;;  %vm6313_vm7 = vcmp.ge.s32.totalorder %v6301_v4, 26  ;;  %v6444_v14 = vld [vmem:[%s11778_s10 + $0xb0] sm:$0xff] }
 0xc81   : > { %v6255_v39 = vadd.f32 %v6254_v32, %v6235_v9  ;;  %vm6315_vm4 = vmand %vm6313_vm7, %vm6314_vm11  ;;  %vm11598_vm7 = vcmp.lt.s32.totalorder %v6301_v4, 54  ;;  %v6427_v9 = vld [vmem:[%s11778_s10 + $0x28] sm:$0xff]  ;;  %6500 = vmatpush.msrb.mxu1 %v6444_v14 }
 0xc82   : > { %vm6358_vm11 = vmand %vm11577_vm15, %vm11582_vm1  ;;  %v6443_v32 = vld [vmem:[%s11778_s10 + $0xa8] sm:$0xff]  ;;  %6481 = vmatpush.msrb.mxu2 %v6427_v9  ;;  %vm6407_vm15 = vcmp.ge.s32.totalorder %v6301_v4, 4  ;;  %vm6408_vm1 = vcmp.lt.s32.totalorder %v6301_v4, 30 }
 0xc83   : > { %v6294_v54 = vadd.f32 %v6292_v20, %v6255_v39  ;;  %6501 = vmatpush.msrb.mxu1 %v6443_v32  ;;  %v6426_v20 = vld [vmem:[%s11778_s10 + $0x20] sm:$0xff] }
 0xc84   : > { %v6442_v39 = vld [vmem:[%s11778_s10 + $0xa0] sm:$0xff]  ;;  %6482 = vmatpush.msrb.mxu2 %v6426_v20 }
 0xc85   : > { %v6297_v36 = vadd.f32 %v6296_v28, %v6294_v54  ;;  %v6458_v54 = vld [vmem:[%s11778_s10 + $0x120] sm:$0xff]  ;;  %v6425_v28 = vld [vmem:[%s11778_s10 + $0x18] sm:$0xff]  ;;  %6502 = vmatpush.msrb.mxu1 %v6442_v39 }
 0xc86   : > { %6522 = vmatpush.msrb.mxu3 %v6458_v54  ;;  %6483 = vmatpush.msrb.mxu2 %v6425_v28 }
 0xc87   : > { %v6299_v12 = vmax.f32 %v6297_v36, 0.0  ;;  %v6441_v36 = vld [vmem:[%s11778_s10 + $0x98] sm:$0xff] }
 0xc88   : > { %6503 = vmatpush.msrb.mxu1 %v6441_v36 }
 0xc89   : > { %6307 = vst [vmem:[#allocation1] sm:$0xff] %v6299_v12 }
 0xc8a   : > { %6305 = vst.msk [vmem:[#allocation4] sm:$0x1] %vm6303_vm8, %v6299_v12  ;;  %vm11593_vm8 = vcmp.ge.s32.totalorder %v6301_v4, 28  ;;  %6504 = vmatpush.msrb.mxu1 %v6440_v35 }
 0xc8b   : > { %vm6368_vm2 = vmand %vm11593_vm8, %vm11598_vm7  ;;  %vm6417_vm7 = vcmp.ge.s32.totalorder %v6301_v4, 30 }
 0xc8c   : > { %6505 = vmatpush.msrb.mxu1 %v6439_v6  ;;  %vm6409_vm8 = vmand %vm6407_vm15, %vm6408_vm1 }
 0xc8e   : > { %6506 = vmatpush.msrb.mxu1 %v6438_v18 }
 0xc90   : > { %v6309_v13 = vld [vmem:[#allocation1 + $0x1] ss:$9 sm:$0xff] }
 0xc91   : > { %6317 = vst [vmem:[#allocation1] sm:$0xff] %v6299_v12  ;;  %6310 = vrot.lane.b32.xlu0 %v6309_v13, %s8364_s18 }
 0xc98   : > { %v6319_v22 = vld [vmem:[#allocation1 + $0x2] ss:$9 sm:$0xff] }
 0xc99   : > { %6327 = vst [vmem:[#allocation1] sm:$0xff] %v6299_v12  ;;  %6320 = vrot.lane.b32.xlu2 %v6319_v22, %s8365_s19 }
 0xca0   : > { %v6329_v0 = vld [vmem:[#allocation1 + $0x3] ss:$9 sm:$0xff] }
 0xca1   : > { %6337 = vst [vmem:[#allocation1] sm:$0xff] %v6299_v12  ;;  %6330 = vrot.lane.b32.xlu0 %v6329_v0, %s8366_s17  ;;  %v6456_v0 = vld [vmem:[%s11778_s10 + $0x110] sm:$0xff] }
 0xca8   : > { %v6339_v59 = vld [vmem:[#allocation1 + $0x4] ss:$9 sm:$0xff] }
 0xca9   : > { %6340 = vrot.lane.b32.xlu1 %v6339_v59, %s8367_s25  ;;  %6350 = vst [vmem:[#allocation1] sm:$0xff] %v6299_v12 }
 0xcb0   : > { %v6352_v56 = vld [vmem:[#allocation1 + $0x5] ss:$9 sm:$0xff] }
 0xcb1   : > { %6353 = vrot.lane.b32.xlu1 %v6352_v56, %s8368_s26  ;;  %6360 = vst [vmem:[#allocation1] sm:$0xff] %v6299_v12  ;;  %v6424_v56 = vld [vmem:[%s11778_s10 + $0x10] sm:$0xff] }
 0xcb2   : > { %6484 = vmatpush.msrb.mxu2 %v6424_v56 }
 0xcb4   : > { %6485 = vmatpush.msrb.mxu2 %v6423_v29 }
 0xcb8   : > { %v6362_v48 = vld [vmem:[#allocation1 + $0x6] ss:$9 sm:$0xff] }
 0xcb9   : > { %6370 = vst [vmem:[#allocation1] sm:$0xff] %v6299_v12  ;;  %6363 = vrot.lane.b32.xlu2 %v6362_v48, %s8369_s14  ;;  %v6457_v12 = vld [vmem:[%s11778_s10 + $0x118] sm:$0xff]  ;;  %v6422_v48 = vld [vmem:[%s11778_s10] sm:$0xff] }
 0xcba   : > { %6523 = vmatpush.msrb.mxu3 %v6457_v12  ;;  %6486 = vmatpush.msrb.mxu2 %v6422_v48 }
 0xcbc   : > { %6524 = vmatpush.msrb.mxu3 %v6456_v0 }
 0xcbe   : > { %6525 = vmatpush.msrb.mxu3 %v6455_v60 }
 0xcc0   : > { %v6372_v40 = vld [vmem:[#allocation1 + $0x7] ss:$9 sm:$0xff]  ;;  %6526 = vmatpush.msrb.mxu3 %v6454_v49 }
 0xcc1   : > { %6373 = vrot.lane.b32.xlu1 %v6372_v40, %s8370_s20  ;;  %6388 = vst [vmem:[#allocation1] sm:$0xff] %v6300_v61  ;;  %6381 = vrot.lane.b32.xlu2 %v6300_v61, %s8371_s16 }
 0xcc8   : > { %v6390_v51 = vld [vmem:[#allocation1 + $0x1] ss:$9 sm:$0xff] }
 0xcc9   : > { %6391 = vrot.lane.b32.xlu0 %v6390_v51, %s8372_s30  ;;  %6401 = vst [vmem:[#allocation1] sm:$0xff] %v6300_v61  ;;  %s6542_s30 = scalar_lea.hbm %s11780_s12, %s8464_s28 }
 0xcca   : > { %s6546_s27 = sshll.u32 %s6542_s30, 4  ;;  %s6547_s27 = int_to_ptr.hbm [resolvable:$true] %s6546_s27 }
 0xccb   : > { %s8282_s24 = sshra.s32 %s6547_s27, 4  ;;  %s8283_s24 = int_to_ptr.hbm [resolvable:$true] %s8282_s24 }
 0xccc   : > { %s8284_s29 = scalar_lea.hbm %s8283_s24, 1  ;;  %p8289_p13 = scmp.lt.s32.totalorder %s8283_s24, %s11780_s12 }
 0xccd   : > { %p8285_p1 = scmp.ne.s32.totalorder %s8283_s24, %s8284_s29  ;;  %p8290_p8 = scmp.lt.s32.totalorder %s8288_s1, %s8284_s29 }
 0xccf   : > { %p8286_p3 = pnand %p8285_p1, %p8526_p0  ;;  %p8291_p7 = por %p8290_p8, %p8289_p13 }
 0xcd0   : > { %v6403_v10 = vld [vmem:[#allocation1 + $0x2] ss:$9 sm:$0xff] }
 0xcd1   : > { %6404 = vrot.lane.b32.xlu0 %v6403_v10, %s8373_s15  ;;  %6411 = vst [vmem:[#allocation1] sm:$0xff] %v6300_v61  ;;  %s512_s15 = scalar_lea.vmem [#allocation16], %s8557_s23  ;;  %p8287_p5 = pneg %p8286_p3 }
 0xcd3   : > { %p8292_p9 = pnand %p8291_p7, %p8287_p5 }
 0xcd8   : > { %v6413_v58 = vld [vmem:[#allocation1 + $0x3] ss:$9 sm:$0xff] }
 0xcd9   : > { %6414 = vrot.lane.b32.xlu1 %v6413_v58, %s8374_s6  ;;  %s6544_s6 = sshll.u32 %s512_s15, 4  ;;  %s6545_s6 = int_to_ptr.vmem [resolvable:$true] %s6544_s6 }
 0xcf3   : > { %v6321_v23 = vpop.permute.xlu2 %6320 }
 0xd03   : > { %v6311_v25 = vpop.permute.xlu0 %6310 }
 0xd04   : > { %6316 = vst.msk [vmem:[#allocation4] sm:$0x1] %vm6315_vm4, %v6311_v25  ;;  %vm11676_vm4 = vcmp.lt.s32.totalorder %v6301_v4, 80 }
 0xd05   : > { %6326 = vst.msk [vmem:[#allocation4] sm:$0x1] %vm6325_vm5, %v6321_v23  ;;  %vm11684_vm5 = vcmp.ge.s32.totalorder %v6301_v4, 80  ;;  %vm6378_vm9 = vmand %vm11671_vm3, %vm11676_vm4  ;;  %vm6468_vm3 = vcmask 457728   ;;  %vm6531_vm4 = vcmask 65536  }
 0xd13   : > { %v6331_v19 = vpop.permute.xlu0 %6330  ;;  %v6364_v33 = vpop.permute.xlu2 %6363 }
 0xd14   : > { %6336 = vst.msk [vmem:[#allocation4] sm:$0x1] %vm6335_vm10, %v6331_v19  ;;  %vm6386_vm10 = vmand %vm11684_vm5, %vm11689_vm6 }
 0xd1b   : > { %v6341_v55 = vpop.permute.xlu1 %6340  ;;  %v6382_v61 = vpop.permute.xlu2 %6381 }
 0xd1c   : > { %v6342_v53 = vrot.slane %v6341_v55, 7 }
 0xd1e   : > { %v6344_v57 = vsel %vm6343_vm13, %v6342_v53, %v6341_v55  ;;  %vm6394_vm13 = vcmask 867328  }
 0xd1f   : > { %6349 = vst.msk [vmem:[#allocation4] sm:$0x3] %vm6348_vm14, %v6344_v57  ;;  %vm6399_vm14 = vmand %vm6397_vm0, %vm6398_vm12 }
 0xd23   : > { %v6354_v37 = vpop.permute.xlu1 %6353 }
 0xd24   : > { %6359 = vst.msk [vmem:[#allocation4 + $0x1] sm:$0x1] %vm6358_vm11, %v6354_v37  ;;  %vm6418_vm11 = vcmp.lt.s32.totalorder %v6301_v4, 56 }
 0xd25   : > { %6369 = vst.msk [vmem:[#allocation4 + $0x1] sm:$0x1] %vm6368_vm2, %v6364_v33  ;;  %vm6419_vm2 = vmand %vm6417_vm7, %vm6418_vm11 }
 0xd33   : > { %v6374_v8 = vpop.permute.xlu1 %6373 }
 0xd34   : > { %6379 = vst.msk [vmem:[#allocation4 + $0x1] sm:$0x1] %vm6378_vm9, %v6374_v8 }
 0xd35   : > { %6387 = vst.msk [vmem:[#allocation4 + $0x1] sm:$0x1] %vm6386_vm10, %v6382_v61 }
 0xd3b   : > { %v6392_v40 = vpop.permute.xlu0 %6391 }
 0xd3c   : > { %v6393_v51 = vrot.slane %v6392_v40, 7 }
 0xd3e   : > { %v6395_v10 = vsel %vm6394_vm13, %v6393_v51, %v6392_v40 }
 0xd3f   : > { %6400 = vst.msk [vmem:[#allocation4 + $0x1] sm:$0x3] %vm6399_vm14, %v6395_v10 }
 0xd43   : > { %v6405_v58 = vpop.permute.xlu0 %6404 }
 0xd44   : > { %6410 = vst.msk [vmem:[#allocation4 + $0x2] sm:$0x1] %vm6409_vm8, %v6405_v58 }
 0xd4b   : > { %v6415_v25 = vpop.permute.xlu1 %6414 }
 0xd4c   : > { %6420 = vst.msk [vmem:[#allocation4 + $0x2] sm:$0x1] %vm6419_vm2, %v6415_v25 }
 0xd53   : > { %v6421_v23 = vld [vmem:[#allocation4] sm:$0x7] }
 0xd54   : > { %v6463_v19 = vperm.slane %v6421_v23, 0  ;;  %v6465_v16 = vperm.slane %v6421_v23, 2  ;;  %v6464_v44 = vperm.slane %v6421_v23, 1 }
 0xd56   : > { %6487 = vmatmul.f32.vlgmr.msrb.gmra.mxu2 %v6463_v19  ;;  %6507 = vmatmul.f32.vlgmr.msrb.gmra.mxu1 %v6464_v44 }
 0xd57   : > { %7785 = vmatmul.msk.f32.vlgmr.msrb.gmra.mxu3 %vm6468_vm3, %v6465_v16 }
 0xdd3   : > { %v6508_v30 = vpop.f32.mrf.mxu1 }
 0xdd9   : > { %v6488_v4 = vpop.f32.mrf.mxu2 }
 0xdda   : > { %v6489_v63 = vadd.f32 %v6488_v4, %v6461_v42  ;;  %v6528_v43 = vpop.f32.mrf.mxu3 }
 0xddc   : > { %v6509_v31 = vadd.f32 %v6508_v30, %v6489_v63 }
 0xdde   : > { %v6529_v27 = vadd.f32 %v6528_v43, %v6509_v31 }
 0xde0   : > { %6532 = vst.msk [vmem:[%s512_s15] sm:$0x1] %vm6531_vm4, %v6529_v27 }
 0xde1   : > { %8295 = shalt.err (!%p8292_p9)
}
 0xde2   : > { %8005 = dma.vmem_to_hbm [thread:$0]  (%p8526_p0), %s6545_s6, 16, %s6547_s27, %s6534_s7  }
 0xde3 PF: > { %s11929_s23 = sld [smem:[#allocation23_spill]]  ;;  %s6558_s17 = sand.u32 1, %s8334_s21  }
 0xde4   : > { %s6559_s25 = scalar_lea.sflag [#allocation7], %s6558_s17 }
 0xde9   : > { %p11930_p10 = scmp.ge.s32.totalorder %s11929_s23, 2 }
 0xdeb   : > { %p8028_p11 = pnand %p11930_p10, %p8532_p6 }
 0xded   : > { %p8029_p12 = pneg %p8028_p11 }
 0xdef   : > { %8329 = dma.done.wait (%p8029_p12), %s6559_s25, 16  }
 0xdf0   : > { %8331 = vsyncadd (%p8029_p12), %s6559_s25, 4294967280  ;;  %s11931_s24 = sld [smem:[#allocation24_spill]]  ;;  %s11934_s21 = smov %s8338_s22 }
 0xdf1   : > { %s11932_s26 = sld [smem:[#allocation22_spill]] }
 0xdf2   : > { %s11933_s23 = sld [smem:[#allocation25_spill]] }
 0xdf6   : > { %p28_p2 = scmp.ge.s32.totalorder %s11931_s24, 4  }
 0xdf7   : > { %s11935_s22 = smov %s11932_s26 }
 0xdf8   :  { %30 = sbr.rel (!%p28_p2) target bundleno = 14 (0xe), region = 168 }
 0xdfd   :  { %6564 = vsyncpa [#allocation6], 1 }
 0xdfe   :  { %6566 = vsyncpa [#allocation6 + $0x1], 1 }
 0xdff   :  { %6567 = vsyncpa [#allocation11], 1 }
 0xe00   :  { %6568 = vsyncpa [#allocation14], 1 }
 0xe01   :  { %6569 = vsyncpa [#allocation7], 1 }
 0xe02   :  { %6571 = vsyncpa [#allocation7 + $0x1], 1 }
 0xe03   :  { %6572 = vsyncpa [#allocation8], 1 }
 0xe04   :  { %6574 = vsyncpa [#allocation8 + $0x1], 1 }

</bundles_post_ra>
